<compile_context>
chip_gen: v7x
topology: tpu7x:2x2x1
jax: 0.10.0
libtpu: 0.0.40
codegen_flags: <defaults>
</compile_context>

<pallas_src>
import functools

import jax
import jax.numpy as jnp
from jax.experimental import pallas as pl
from jax.experimental.pallas import tpu as pltpu

NC = 3
NDF = 64
LEAKY_SLOPE = 0.2
BN_EPS = 1e-5


# ---------------------------------------------------------------------------
# Tiling helpers
# ---------------------------------------------------------------------------
def _pick_tm(m):
    """Single grid step for small M; tile only genuinely large M."""
    if m <= 512:
        return m
    for t in (512, 256, 128, 64, 32, 16, 8):
        if m % t == 0:
            return t
    return m


def _pick_tk(k):
    """K-chunk the weight DMA only when the K dimension is large."""
    if k > 1024 and k % 1024 == 0:
        return 1024
    return k


# ---------------------------------------------------------------------------
# Pallas kernels
# ---------------------------------------------------------------------------
def _conv_matmul_kernel(a_ref, b_ref, o_ref, *rest, act, with_stats, nk):
    """(tm, tk) @ (tk, OC) with K-axis accumulation, fused act + BN stats."""
    if with_stats:
        stats_ref = rest[0]
        rest = rest[1:]
    else:
        stats_ref = None
    acc_ref = rest[0] if nk > 1 else None

    def finalize(y):
        if act == "leaky":
            y = jnp.where(y > 0, y, LEAKY_SLOPE * y)
        if with_stats:
            s = jnp.sum(y, axis=0, keepdims=True)        # (1, OC)
            sq = jnp.sum(y * y, axis=0, keepdims=True)   # (1, OC)
            stats_ref[...] = jnp.concatenate([s, sq], axis=0)[None]   # (1,2,OC)
        o_ref[...] = y.astype(o_ref.dtype)

    if nk == 1:
        finalize(jnp.dot(a_ref[...], b_ref[...],
                         preferred_element_type=jnp.float32))
    else:
        @pl.when(pl.program_id(1) == 0)
        def _():
            acc_ref[...] = jnp.zeros_like(acc_ref)

        acc_ref[...] += jnp.dot(a_ref[...], b_ref[...],
                                preferred_element_type=jnp.float32)

        @pl.when(pl.program_id(1) == nk - 1)
        def _():
            finalize(acc_ref[...])


def pallas_conv_matmul(a, b, act=None, with_stats=False, out_dtype=jnp.bfloat16):
    """a: (M, K) bf16 patches, b: (K, OC) pre-packed bf16 weights.

    Returns (M, OC) [, per-M-tile stats (T, 2, OC) = [col sum; col sumsq]].
    f32 MXU accumulation; K tiled with a VMEM accumulator when K is large.
    """
    M, K = a.shape
    Kb, OC = b.shape
    assert K == Kb, (K, Kb)
    a = a.astype(jnp.bfloat16)

    tm = _pick_tm(M)
    tk = _pick_tk(K)
    nm = M // tm
    nk = K // tk

    kernel = functools.partial(_conv_matmul_kernel, act=act,
                               with_stats=with_stats, nk=nk)

    in_specs = [
        pl.BlockSpec((tm, tk), lambda i, k: (i, k)),
        pl.BlockSpec((tk, OC), lambda i, k: (k, 0)),
    ]
    out_specs = [pl.BlockSpec((tm, OC), lambda i, k: (i, 0))]
    out_shape = [jax.ShapeDtypeStruct((M, OC), out_dtype)]
    if with_stats:
        out_specs.append(pl.BlockSpec((1, 2, OC), lambda i, k: (i, 0, 0)))
        out_shape.append(jax.ShapeDtypeStruct((nm, 2, OC), jnp.float32))

    scratch_shapes = []
    if nk > 1:
        scratch_shapes.append(pltpu.VMEM((tm, OC), jnp.float32))

    cost = pl.CostEstimate(
        flops=2 * M * K * OC,
        transcendentals=0,
        bytes_accessed=(M * K + K * OC) * 2 + M * OC * jnp.dtype(out_dtype).itemsize,
    )

    return pl.pallas_call(
        kernel,
        out_shape=tuple(out_shape) if with_stats else out_shape[0],
        grid=(nm, nk),
        in_specs=in_specs,
        out_specs=tuple(out_specs) if with_stats else out_specs[0],
        scratch_shapes=scratch_shapes,
        cost_estimate=cost,
        compiler_params=pltpu.CompilerParams(
            dimension_semantics=("parallel", "arbitrary"),
        ),
    )(a, b)


def _final_dot_kernel(a_ref, w_ref, o_ref, *, use_sigmoid):
    """OC=1 conv as multiply + lane reduce (no 128-wide zero-padded MXU pass)."""
    y = jnp.sum(a_ref[...].astype(jnp.float32) * w_ref[...].astype(jnp.float32),
                axis=-1, keepdims=True)                    # (M, 1)
    if use_sigmoid:
        e = jnp.exp(-jnp.abs(y))                           # EUP slot
        y = jnp.where(y >= 0, 1.0, e) / (1.0 + e)
    o_ref[...] = y


def pallas_final_dot(a, w_row, use_sigmoid):
    """a: (M, K) patches; w_row: (1, K) bf16.  Returns (M, 1) f32."""
    M, K = a.shape
    assert w_row.shape == (1, K)
    return pl.pallas_call(
        functools.partial(_final_dot_kernel, use_sigmoid=use_sigmoid),
        out_shape=jax.ShapeDtypeStruct((M, 1), jnp.float32),
        grid=(1,),
        in_specs=[pl.BlockSpec((M, K), lambda i: (0, 0)),
                  pl.BlockSpec((1, K), lambda i: (0, 0))],
        out_specs=pl.BlockSpec((M, 1), lambda i: (0, 0)),
    )(a.astype(jnp.bfloat16), w_row)


# ---------------------------------------------------------------------------
# XLA-side glue: im2col (NHWC, (kh,kw,c) order) with fused deferred BN+Leaky
# ---------------------------------------------------------------------------
def _im2col_nhwc(x, c_real, k, stride, pad, scale=None, shift=None):
    """x: (N, H, W, C_stored) -> patches (N*OH*OW, k*k*c_real).

    If scale/shift are given, applies the previous layer's deferred BatchNorm
    affine + LeakyReLU BEFORE the zero spatial pad (so padded borders stay
    exactly 0, matching PyTorch).  XLA fuses this elementwise work into the
    pad/slice ops — no extra Pallas launch or HBM round trip.
    """
    N, H, W, _ = x.shape
    x = x[..., :c_real]                      # drop lane-padding channels
    if scale is not None:
        y = x.astype(jnp.float32) * scale + shift
        x = jnp.where(y > 0, y, LEAKY_SLOPE * y).astype(jnp.bfloat16)
    if pad > 0:
        x = jnp.pad(x, ((0, 0), (pad, pad), (pad, pad), (0, 0)))
    OH = (H + 2 * pad - k) // stride + 1
    OW = (W + 2 * pad - k) // stride + 1
    cols = []
    for kh in range(k):
        for kw in range(k):
            cols.append(x[:, kh:kh + stride * OH:stride,
                          kw:kw + stride * OW:stride, :])
    patches = jnp.concatenate(cols, axis=-1)          # (N, OH, OW, k*k*c_real)
    return patches.reshape(N * OH * OW, k * k * c_real), OH, OW


def _bn_scale_shift(stats, gamma, beta, m_total):
    """Train-mode BatchNorm (biased batch variance) -> per-channel affine."""
    tot = jnp.sum(stats, axis=0)                      # (2, C), tiny reduction
    mean = tot[0] / m_total
    var = jnp.maximum(tot[1] / m_total - mean * mean, 0.0)
    scale = gamma * jax.lax.rsqrt(var + BN_EPS)
    shift = beta - mean * scale
    return scale, shift


# ---------------------------------------------------------------------------
# Parameters: DCGAN-style N(0, 0.02) conv init, pre-packed for the kernels
# ---------------------------------------------------------------------------
def _pack_conv_weight(w, oc_pad=None):
    """PyTorch (OC, IC, KH, KW) -> (KH*KW*IC, OC[pad]) bf16, (kh,kw,c) K order."""
    OC, IC, KH, KW = w.shape
    m = w.transpose(2, 3, 1, 0).reshape(KH * KW * IC, OC)
    if oc_pad is not None and oc_pad > OC:
        m = jnp.pad(m, ((0, 0), (0, oc_pad - OC)))
    return m.astype(jnp.bfloat16)


def init_params(key):
    ks = jax.random.split(key, 5)

    def conv_w(k, oc, ic):
        return 0.02 * jax.random.normal(k, (oc, ic, 4, 4), dtype=jnp.float32)

    w1 = conv_w(ks[0], NDF, NC)
    w2 = conv_w(ks[1], NDF * 2, NDF)
    w3 = conv_w(ks[2], NDF * 4, NDF * 2)
    w4 = conv_w(ks[3], NDF * 8, NDF * 4)
    w5 = conv_w(ks[4], 1, NDF * 8)

    return {
        # pre-packed bf16 matmul operands (done once, not per forward)
        "w1": _pack_conv_weight(w1, oc_pad=128),        # OC 64->128 lane-dense
        "w2": _pack_conv_weight(w2),                    # (1024, 128)
        "w3": _pack_conv_weight(w3),                    # (2048, 256)
        "w4": _pack_conv_weight(w4),                    # (4096, 512)
        "w5": _pack_conv_weight(w5).reshape(1, -1),     # (1, 8192), no OC pad
        # BatchNorm affine params (fresh nn.BatchNorm2d: weight=1, bias=0)
        "g2": jnp.ones((NDF * 2,), jnp.float32), "b2": jnp.zeros((NDF * 2,), jnp.float32),
        "g3": jnp.ones((NDF * 4,), jnp.float32), "b3": jnp.zeros((NDF * 4,), jnp.float32),
        "g4": jnp.ones((NDF * 8,), jnp.float32), "b4": jnp.zeros((NDF * 8,), jnp.float32),
    }


# ---------------------------------------------------------------------------
# Forward pass == _netD.forward   (all convs bias=False, BN in train mode)
# ---------------------------------------------------------------------------
def netD_forward(x_nchw, params, method="GAN"):
    # Single tiny boundary transpose NCHW -> NHWC; everything after stays NHWC.
    x = x_nchw.transpose(0, 2, 3, 1).astype(jnp.bfloat16)
    N = x.shape[0]

    # Conv(3->64, k4 s2 p1) + LeakyReLU(0.2)  (fused epilogue; K=48 unpadded)
    patches, OH, OW = _im2col_nhwc(x, NC, 4, 2, 1)
    y = pallas_conv_matmul(patches, params["w1"], act="leaky")       # (M, 128)
    x = y.reshape(N, OH, OW, -1)
    c_real = NDF
    scale = shift = None

    # Conv + BatchNorm(batch stats, fused in epilogue) + LeakyReLU, x3.
    # The BN affine + LeakyReLU of layer k is applied (as fused jnp) inside
    # layer k+1's im2col, before its zero spatial pad.
    for wk, gk, bk in (("w2", "g2", "b2"), ("w3", "g3", "b3"), ("w4", "g4", "b4")):
        patches, OH, OW = _im2col_nhwc(x, c_real, 4, 2, 1, scale, shift)
        y, stats = pallas_conv_matmul(patches, params[wk], with_stats=True)
        oc = params[gk].shape[0]
        x = y.reshape(N, OH, OW, oc)
        scale, shift = _bn_scale_shift(stats, params[gk], params[bk], y.shape[0])
        c_real = oc

    # Conv(512->1, k4 s1 p0) (+ Sigmoid for GAN); deferred BN4+Leaky applied here.
    patches, _, _ = _im2col_nhwc(x, c_real, 4, 1, 0, scale, shift)   # (N, 8192)
    out = pallas_final_dot(patches, params["w5"], use_sigmoid=(method == "GAN"))
    # == output.view(-1, 1).squeeze(1)
    return out[:, 0]


if __name__ == "__main__":
    key = jax.random.PRNGKey(0)
    k_x, k_p = jax.random.split(key)
    # DCGAN discriminator expects 64x64 inputs (4 stride-2 convs + final 4x4 valid conv)
    batch = 2
    x = jax.random.normal(k_x, (batch, NC, 64, 64), dtype=jnp.float32)
    params = init_params(k_p)

    fwd = jax.jit(functools.partial(netD_forward, method="GAN"))
    out = jax.block_until_ready(fwd(x, params))

    assert out.shape == (batch,), out.shape
    assert bool(jnp.all(jnp.isfinite(out)))
    print("KERNEL_OK")
</pallas_src>

<mosaic_0001>
module attributes {stable_mosaic.version = 11 : i64} {
  func.func @_conv_matmul_kernel(%arg0: i32, %arg1: i32, %arg2: memref<512x48xbf16, #tpu.memory_space<vmem>>, %arg3: memref<48x128xbf16, #tpu.memory_space<vmem>>, %arg4: memref<512x128xbf16, #tpu.memory_space<vmem>>) attributes {dimension_semantics = [#tpu.dimension_semantics<parallel>, #tpu.dimension_semantics<arbitrary>], iteration_bounds = array<i64: 4, 1>, scalar_prefetch = 0 : i64, scratch_operands = 0 : i64, tpu.core_type = #tpu.core_type<tc>, window_params = [{transform_indices = @transform_0, window_bounds = array<i64: 512, 48>}, {transform_indices = @transform_1, window_bounds = array<i64: 48, 128>}, {transform_indices = @transform_2, window_bounds = array<i64: 512, 128>}]} {
    %c0 = arith.constant 0 : index
    %c0_0 = arith.constant 0 : index
    %0 = vector.load %arg2[%c0, %c0_0] : memref<512x48xbf16, #tpu.memory_space<vmem>>, vector<512x48xbf16>
    %c0_1 = arith.constant 0 : index
    %c0_2 = arith.constant 0 : index
    %1 = vector.load %arg3[%c0_1, %c0_2] : memref<48x128xbf16, #tpu.memory_space<vmem>>, vector<48x128xbf16>
    %cst = arith.constant dense<0.000000e+00> : vector<512x128xf32>
    %2 = tpu.matmul %0, %1, %cst {dimension_numbers = #tpu.dot_dimension_numbers<[1], [0], [0], [1], [0, 0, 1, 1], [], []>} : vector<512x48xbf16>, vector<48x128xbf16>, vector<512x128xf32> -> vector<512x128xf32>
    %cst_3 = arith.constant 0.000000e+00 : f32
    %3 = vector.broadcast %cst_3 : f32 to vector<512x128xf32>
    %4 = arith.cmpf ogt, %2, %3 : vector<512x128xf32>
    %cst_4 = arith.constant 2.000000e-01 : f32
    %5 = vector.broadcast %cst_4 : f32 to vector<512x128xf32>
    %6 = arith.mulf %5, %2 : vector<512x128xf32>
    %7 = arith.select %4, %2, %6 : vector<512x128xi1>, vector<512x128xf32>
    %8 = arith.truncf %7 : vector<512x128xf32> to vector<512x128xbf16>
    %c0_5 = arith.constant 0 : index
    %c0_6 = arith.constant 0 : index
    %9 = vector.load %arg4[%c0_5, %c0_6] : memref<512x128xbf16, #tpu.memory_space<vmem>>, vector<512x128xbf16>
    tpu.vector_store %arg4[%c0_5, %c0_6], %8 {strides = array<i32>} : memref<512x128xbf16, #tpu.memory_space<vmem>>, vector<512x128xbf16>,
    return
  }
  func.func @transform_0(%arg0: i32, %arg1: i32) -> (i32, i32) {
    %c0_i32 = arith.constant 0 : i32
    return %arg0, %arg1 : i32, i32
  }
  func.func @transform_1(%arg0: i32, %arg1: i32) -> (i32, i32) {
    %c0_i32 = arith.constant 0 : i32
    %c0_i32_0 = arith.constant 0 : i32
    return %arg1, %c0_i32 : i32, i32
  }
  func.func @transform_2(%arg0: i32, %arg1: i32) -> (i32, i32) {
    %c0_i32 = arith.constant 0 : i32
    %c0_i32_0 = arith.constant 0 : i32
    return %arg0, %c0_i32 : i32, i32
  }
}

module attributes {stable_mosaic.version = 11 : i64} {
  func.func @_conv_matmul_kernel(%arg0: i32, %arg1: i32, %arg2: memref<512x1024xbf16, #tpu.memory_space<vmem>>, %arg3: memref<1024x128xbf16, #tpu.memory_space<vmem>>, %arg4: memref<512x128xbf16, #tpu.memory_space<vmem>>, %arg5: memref<1x2x128xf32, #tpu.memory_space<vmem>>) attributes {dimension_semantics = [#tpu.dimension_semantics<parallel>, #tpu.dimension_semantics<arbitrary>], iteration_bounds = array<i64: 1, 1>, scalar_prefetch = 0 : i64, scratch_operands = 0 : i64, tpu.core_type = #tpu.core_type<tc>, window_params = [{transform_indices = @transform_0, window_bounds = array<i64: 512, 1024>}, {transform_indices = @transform_1, window_bounds = array<i64: 1024, 128>}, {transform_indices = @transform_2, window_bounds = array<i64: 512, 128>}, {transform_indices = @transform_3, window_bounds = array<i64: 1, 2, 128>}]} {
    %c0 = arith.constant 0 : index
    %c0_0 = arith.constant 0 : index
    %0 = vector.load %arg2[%c0, %c0_0] : memref<512x1024xbf16, #tpu.memory_space<vmem>>, vector<512x1024xbf16>
    %c0_1 = arith.constant 0 : index
    %c0_2 = arith.constant 0 : index
    %1 = vector.load %arg3[%c0_1, %c0_2] : memref<1024x128xbf16, #tpu.memory_space<vmem>>, vector<1024x128xbf16>
    %cst = arith.constant dense<0.000000e+00> : vector<512x128xf32>
    %2 = tpu.matmul %0, %1, %cst {dimension_numbers = #tpu.dot_dimension_numbers<[1], [0], [0], [1], [0, 0, 1, 1], [], []>} : vector<512x1024xbf16>, vector<1024x128xbf16>, vector<512x128xf32> -> vector<512x128xf32>
    %cst_3 = arith.constant dense<0.000000e+00> : vector<128xf32>
    %3 = vector.multi_reduction <add>, %2, %cst_3 [0] : vector<512x128xf32> to vector<128xf32>
    %4 = vector.shape_cast %3 : vector<128xf32> to vector<1x128xf32>
    %5 = arith.mulf %2, %2 : vector<512x128xf32>
    %cst_4 = arith.constant dense<0.000000e+00> : vector<128xf32>
    %6 = vector.multi_reduction <add>, %5, %cst_4 [0] : vector<512x128xf32> to vector<128xf32>
    %7 = vector.shape_cast %6 : vector<128xf32> to vector<1x128xf32>
    %8 = tpu.concatenate %4, %7 in 0 : vector<1x128xf32>, vector<1x128xf32> -> vector<2x128xf32>
    %9 = vector.shape_cast %8 : vector<2x128xf32> to vector<1x2x128xf32>
    %c0_5 = arith.constant 0 : index
    %c0_6 = arith.constant 0 : index
    %c0_7 = arith.constant 0 : index
    %10 = vector.load %arg5[%c0_5, %c0_6, %c0_7] : memref<1x2x128xf32, #tpu.memory_space<vmem>>, vector<1x2x128xf32>
    tpu.vector_store %arg5[%c0_5, %c0_6, %c0_7], %9 {strides = array<i32>} : memref<1x2x128xf32, #tpu.memory_space<vmem>>, vector<1x2x128xf32>,
    %11 = arith.truncf %2 : vector<512x128xf32> to vector<512x128xbf16>
    %c0_8 = arith.constant 0 : index
    %c0_9 = arith.constant 0 : index
    %12 = vector.load %arg4[%c0_8, %c0_9] : memref<512x128xbf16, #tpu.memory_space<vmem>>, vector<512x128xbf16>
    tpu.vector_store %arg4[%c0_8, %c0_9], %11 {strides = array<i32>} : memref<512x128xbf16, #tpu.memory_space<vmem>>, vector<512x128xbf16>,
    return
  }
  func.func @transform_0(%arg0: i32, %arg1: i32) -> (i32, i32) {
    %c0_i32 = arith.constant 0 : i32
    return %arg0, %arg1 : i32, i32
  }
  func.func @transform_1(%arg0: i32, %arg1: i32) -> (i32, i32) {
    %c0_i32 = arith.constant 0 : i32
    %c0_i32_0 = arith.constant 0 : i32
    return %arg1, %c0_i32 : i32, i32
  }
  func.func @transform_2(%arg0: i32, %arg1: i32) -> (i32, i32) {
    %c0_i32 = arith.constant 0 : i32
    %c0_i32_0 = arith.constant 0 : i32
    return %arg0, %c0_i32 : i32, i32
  }
  func.func @transform_3(%arg0: i32, %arg1: i32) -> (i32, i32, i32) {
    %c0_i32 = arith.constant 0 : i32
    %c0_i32_0 = arith.constant 0 : i32
    %c0_i32_1 = arith.constant 0 : i32
    return %arg0, %c0_i32, %c0_i32_0 : i32, i32, i32
  }
}

module attributes {stable_mosaic.version = 11 : i64} {
  func.func @_conv_matmul_kernel(%arg0: i32, %arg1: i32, %arg2: memref<128x1024xbf16, #tpu.memory_space<vmem>>, %arg3: memref<1024x256xbf16, #tpu.memory_space<vmem>>, %arg4: memref<128x256xbf16, #tpu.memory_space<vmem>>, %arg5: memref<1x2x256xf32, #tpu.memory_space<vmem>>, %arg6: memref<128x256xf32, #tpu.memory_space<vmem>>) attributes {dimension_semantics = [#tpu.dimension_semantics<parallel>, #tpu.dimension_semantics<arbitrary>], iteration_bounds = array<i64: 1, 2>, scalar_prefetch = 0 : i64, scratch_operands = 1 : i64, tpu.core_type = #tpu.core_type<tc>, window_params = [{transform_indices = @transform_0, window_bounds = array<i64: 128, 1024>}, {transform_indices = @transform_1, window_bounds = array<i64: 1024, 256>}, {transform_indices = @transform_2, window_bounds = array<i64: 128, 256>}, {transform_indices = @transform_3, window_bounds = array<i64: 1, 2, 256>}]} {
    %c0_i32 = arith.constant 0 : i32
    %0 = arith.cmpi eq, %arg1, %c0_i32 : i32
    %1 = arith.extui %0 : i1 to i32
    %c0_i32_0 = arith.constant 0 : i32
    %2 = arith.cmpi ne, %1, %c0_i32_0 : i32
    scf.if %2 {
      %cst_9 = arith.constant 0.000000e+00 : f32
      %12 = vector.broadcast %cst_9 : f32 to vector<128x256xf32>
      %c0_10 = arith.constant 0 : index
      %c0_11 = arith.constant 0 : index
      %13 = vector.load %arg6[%c0_10, %c0_11] : memref<128x256xf32, #tpu.memory_space<vmem>>, vector<128x256xf32>
      tpu.vector_store %arg6[%c0_10, %c0_11], %12 {strides = array<i32>} : memref<128x256xf32, #tpu.memory_space<vmem>>, vector<128x256xf32>,
    } else {
    }
    %c0 = arith.constant 0 : index
    %c0_1 = arith.constant 0 : index
    %3 = vector.load %arg6[%c0, %c0_1] : memref<128x256xf32, #tpu.memory_space<vmem>>, vector<128x256xf32>
    %c0_2 = arith.constant 0 : index
    %c0_3 = arith.constant 0 : index
    %4 = vector.load %arg2[%c0_2, %c0_3] : memref<128x1024xbf16, #tpu.memory_space<vmem>>, vector<128x1024xbf16>
    %c0_4 = arith.constant 0 : index
    %c0_5 = arith.constant 0 : index
    %5 = vector.load %arg3[%c0_4, %c0_5] : memref<1024x256xbf16, #tpu.memory_space<vmem>>, vector<1024x256xbf16>
    %cst = arith.constant dense<0.000000e+00> : vector<128x256xf32>
    %6 = tpu.matmul %4, %5, %cst {dimension_numbers = #tpu.dot_dimension_numbers<[1], [0], [0], [1], [0, 0, 1, 1], [], []>} : vector<128x1024xbf16>, vector<1024x256xbf16>, vector<128x256xf32> -> vector<128x256xf32>
    %7 = arith.addf %3, %6 : vector<128x256xf32>
    %c0_6 = arith.constant 0 : index
    %c0_7 = arith.constant 0 : index
    %8 = vector.load %arg6[%c0_6, %c0_7] : memref<128x256xf32, #tpu.memory_space<vmem>>, vector<128x256xf32>
    tpu.vector_store %arg6[%c0_6, %c0_7], %7 {strides = array<i32>} : memref<128x256xf32, #tpu.memory_space<vmem>>, vector<128x256xf32>,
    %c1_i32 = arith.constant 1 : i32
    %9 = arith.cmpi eq, %arg1, %c1_i32 : i32
    %10 = arith.extui %9 : i1 to i32
    %c0_i32_8 = arith.constant 0 : i32
    %11 = arith.cmpi ne, %10, %c0_i32_8 : i32
    scf.if %11 {
      %c0_9 = arith.constant 0 : index
      %c0_10 = arith.constant 0 : index
      %12 = vector.load %arg6[%c0_9, %c0_10] : memref<128x256xf32, #tpu.memory_space<vmem>>, vector<128x256xf32>
      %cst_11 = arith.constant dense<0.000000e+00> : vector<256xf32>
      %13 = vector.multi_reduction <add>, %12, %cst_11 [0] : vector<128x256xf32> to vector<256xf32>
      %14 = vector.shape_cast %13 : vector<256xf32> to vector<1x256xf32>
      %15 = arith.mulf %12, %12 : vector<128x256xf32>
      %cst_12 = arith.constant dense<0.000000e+00> : vector<256xf32>
      %16 = vector.multi_reduction <add>, %15, %cst_12 [0] : vector<128x256xf32> to vector<256xf32>
      %17 = vector.shape_cast %16 : vector<256xf32> to vector<1x256xf32>
      %18 = tpu.concatenate %14, %17 in 0 : vector<1x256xf32>, vector<1x256xf32> -> vector<2x256xf32>
      %19 = vector.shape_cast %18 : vector<2x256xf32> to vector<1x2x256xf32>
      %c0_13 = arith.constant 0 : index
      %c0_14 = arith.constant 0 : index
      %c0_15 = arith.constant 0 : index
      %20 = vector.load %arg5[%c0_13, %c0_14, %c0_15] : memref<1x2x256xf32, #tpu.memory_space<vmem>>, vector<1x2x256xf32>
      tpu.vector_store %arg5[%c0_13, %c0_14, %c0_15], %19 {strides = array<i32>} : memref<1x2x256xf32, #tpu.memory_space<vmem>>, vector<1x2x256xf32>,
      %21 = arith.truncf %12 : vector<128x256xf32> to vector<128x256xbf16>
      %c0_16 = arith.constant 0 : index
      %c0_17 = arith.constant 0 : index
      %22 = vector.load %arg4[%c0_16, %c0_17] : memref<128x256xbf16, #tpu.memory_space<vmem>>, vector<128x256xbf16>
      tpu.vector_store %arg4[%c0_16, %c0_17], %21 {strides = array<i32>} : memref<128x256xbf16, #tpu.memory_space<vmem>>, vector<128x256xbf16>,
    } else {
    }
    return
  }
  func.func @transform_0(%arg0: i32, %arg1: i32) -> (i32, i32) {
    %c0_i32 = arith.constant 0 : i32
    return %arg0, %arg1 : i32, i32
  }
  func.func @transform_1(%arg0: i32, %arg1: i32) -> (i32, i32) {
    %c0_i32 = arith.constant 0 : i32
    %c0_i32_0 = arith.constant 0 : i32
    return %arg1, %c0_i32 : i32, i32
  }
  func.func @transform_2(%arg0: i32, %arg1: i32) -> (i32, i32) {
    %c0_i32 = arith.constant 0 : i32
    %c0_i32_0 = arith.constant 0 : i32
    return %arg0, %c0_i32 : i32, i32
  }
  func.func @transform_3(%arg0: i32, %arg1: i32) -> (i32, i32, i32) {
    %c0_i32 = arith.constant 0 : i32
    %c0_i32_0 = arith.constant 0 : i32
    %c0_i32_1 = arith.constant 0 : i32
    return %arg0, %c0_i32, %c0_i32_0 : i32, i32, i32
  }
}

module attributes {stable_mosaic.version = 11 : i64} {
  func.func @_conv_matmul_kernel(%arg0: i32, %arg1: i32, %arg2: memref<32x1024xbf16, #tpu.memory_space<vmem>>, %arg3: memref<1024x512xbf16, #tpu.memory_space<vmem>>, %arg4: memref<32x512xbf16, #tpu.memory_space<vmem>>, %arg5: memref<1x2x512xf32, #tpu.memory_space<vmem>>, %arg6: memref<32x512xf32, #tpu.memory_space<vmem>>) attributes {dimension_semantics = [#tpu.dimension_semantics<parallel>, #tpu.dimension_semantics<arbitrary>], iteration_bounds = array<i64: 1, 4>, scalar_prefetch = 0 : i64, scratch_operands = 1 : i64, tpu.core_type = #tpu.core_type<tc>, window_params = [{transform_indices = @transform_0, window_bounds = array<i64: 32, 1024>}, {transform_indices = @transform_1, window_bounds = array<i64: 1024, 512>}, {transform_indices = @transform_2, window_bounds = array<i64: 32, 512>}, {transform_indices = @transform_3, window_bounds = array<i64: 1, 2, 512>}]} {
    %c0_i32 = arith.constant 0 : i32
    %0 = arith.cmpi eq, %arg1, %c0_i32 : i32
    %1 = arith.extui %0 : i1 to i32
    %c0_i32_0 = arith.constant 0 : i32
    %2 = arith.cmpi ne, %1, %c0_i32_0 : i32
    scf.if %2 {
      %cst_9 = arith.constant 0.000000e+00 : f32
      %12 = vector.broadcast %cst_9 : f32 to vector<32x512xf32>
      %c0_10 = arith.constant 0 : index
      %c0_11 = arith.constant 0 : index
      %13 = vector.load %arg6[%c0_10, %c0_11] : memref<32x512xf32, #tpu.memory_space<vmem>>, vector<32x512xf32>
      tpu.vector_store %arg6[%c0_10, %c0_11], %12 {strides = array<i32>} : memref<32x512xf32, #tpu.memory_space<vmem>>, vector<32x512xf32>,
    } else {
    }
    %c0 = arith.constant 0 : index
    %c0_1 = arith.constant 0 : index
    %3 = vector.load %arg6[%c0, %c0_1] : memref<32x512xf32, #tpu.memory_space<vmem>>, vector<32x512xf32>
    %c0_2 = arith.constant 0 : index
    %c0_3 = arith.constant 0 : index
    %4 = vector.load %arg2[%c0_2, %c0_3] : memref<32x1024xbf16, #tpu.memory_space<vmem>>, vector<32x1024xbf16>
    %c0_4 = arith.constant 0 : index
    %c0_5 = arith.constant 0 : index
    %5 = vector.load %arg3[%c0_4, %c0_5] : memref<1024x512xbf16, #tpu.memory_space<vmem>>, vector<1024x512xbf16>
    %cst = arith.constant dense<0.000000e+00> : vector<32x512xf32>
    %6 = tpu.matmul %4, %5, %cst {dimension_numbers = #tpu.dot_dimension_numbers<[1], [0], [0], [1], [0, 0, 1, 1], [], []>} : vector<32x1024xbf16>, vector<1024x512xbf16>, vector<32x512xf32> -> vector<32x512xf32>
    %7 = arith.addf %3, %6 : vector<32x512xf32>
    %c0_6 = arith.constant 0 : index
    %c0_7 = arith.constant 0 : index
    %8 = vector.load %arg6[%c0_6, %c0_7] : memref<32x512xf32, #tpu.memory_space<vmem>>, vector<32x512xf32>
    tpu.vector_store %arg6[%c0_6, %c0_7], %7 {strides = array<i32>} : memref<32x512xf32, #tpu.memory_space<vmem>>, vector<32x512xf32>,
    %c3_i32 = arith.constant 3 : i32
    %9 = arith.cmpi eq, %arg1, %c3_i32 : i32
    %10 = arith.extui %9 : i1 to i32
    %c0_i32_8 = arith.constant 0 : i32
    %11 = arith.cmpi ne, %10, %c0_i32_8 : i32
    scf.if %11 {
      %c0_9 = arith.constant 0 : index
      %c0_10 = arith.constant 0 : index
      %12 = vector.load %arg6[%c0_9, %c0_10] : memref<32x512xf32, #tpu.memory_space<vmem>>, vector<32x512xf32>
      %cst_11 = arith.constant dense<0.000000e+00> : vector<512xf32>
      %13 = vector.multi_reduction <add>, %12, %cst_11 [0] : vector<32x512xf32> to vector<512xf32>
      %14 = vector.shape_cast %13 : vector<512xf32> to vector<1x512xf32>
      %15 = arith.mulf %12, %12 : vector<32x512xf32>
      %cst_12 = arith.constant dense<0.000000e+00> : vector<512xf32>
      %16 = vector.multi_reduction <add>, %15, %cst_12 [0] : vector<32x512xf32> to vector<512xf32>
      %17 = vector.shape_cast %16 : vector<512xf32> to vector<1x512xf32>
      %18 = tpu.concatenate %14, %17 in 0 : vector<1x512xf32>, vector<1x512xf32> -> vector<2x512xf32>
      %19 = vector.shape_cast %18 : vector<2x512xf32> to vector<1x2x512xf32>
      %c0_13 = arith.constant 0 : index
      %c0_14 = arith.constant 0 : index
      %c0_15 = arith.constant 0 : index
      %20 = vector.load %arg5[%c0_13, %c0_14, %c0_15] : memref<1x2x512xf32, #tpu.memory_space<vmem>>, vector<1x2x512xf32>
      tpu.vector_store %arg5[%c0_13, %c0_14, %c0_15], %19 {strides = array<i32>} : memref<1x2x512xf32, #tpu.memory_space<vmem>>, vector<1x2x512xf32>,
      %21 = arith.truncf %12 : vector<32x512xf32> to vector<32x512xbf16>
      %c0_16 = arith.constant 0 : index
      %c0_17 = arith.constant 0 : index
      %22 = vector.load %arg4[%c0_16, %c0_17] : memref<32x512xbf16, #tpu.memory_space<vmem>>, vector<32x512xbf16>
      tpu.vector_store %arg4[%c0_16, %c0_17], %21 {strides = array<i32>} : memref<32x512xbf16, #tpu.memory_space<vmem>>, vector<32x512xbf16>,
    } else {
    }
    return
  }
  func.func @transform_0(%arg0: i32, %arg1: i32) -> (i32, i32) {
    %c0_i32 = arith.constant 0 : i32
    return %arg0, %arg1 : i32, i32
  }
  func.func @transform_1(%arg0: i32, %arg1: i32) -> (i32, i32) {
    %c0_i32 = arith.constant 0 : i32
    %c0_i32_0 = arith.constant 0 : i32
    return %arg1, %c0_i32 : i32, i32
  }
  func.func @transform_2(%arg0: i32, %arg1: i32) -> (i32, i32) {
    %c0_i32 = arith.constant 0 : i32
    %c0_i32_0 = arith.constant 0 : i32
    return %arg0, %c0_i32 : i32, i32
  }
  func.func @transform_3(%arg0: i32, %arg1: i32) -> (i32, i32, i32) {
    %c0_i32 = arith.constant 0 : i32
    %c0_i32_0 = arith.constant 0 : i32
    %c0_i32_1 = arith.constant 0 : i32
    return %arg0, %c0_i32, %c0_i32_0 : i32, i32, i32
  }
}

module attributes {stable_mosaic.version = 11 : i64} {
  func.func @_final_dot_kernel(%arg0: i32, %arg1: memref<2x8192xbf16, #tpu.memory_space<vmem>>, %arg2: memref<1x8192xbf16, #tpu.memory_space<vmem>>, %arg3: memref<2x1xf32, #tpu.memory_space<vmem>>) attributes {dimension_semantics = [#tpu.dimension_semantics<arbitrary>], iteration_bounds = array<i64: 1>, scalar_prefetch = 0 : i64, scratch_operands = 0 : i64, tpu.core_type = #tpu.core_type<tc>, window_params = [{pipeline_mode = #tpu.pipeline_mode<synchronous>, transform_indices = @transform_0, window_bounds = array<i64: 2, 8192>}, {pipeline_mode = #tpu.pipeline_mode<synchronous>, transform_indices = @transform_1, window_bounds = array<i64: 1, 8192>}, {pipeline_mode = #tpu.pipeline_mode<synchronous>, transform_indices = @transform_2, window_bounds = array<i64: 2, 1>}]} {
    %c0 = arith.constant 0 : index
    %c0_0 = arith.constant 0 : index
    %0 = vector.load %arg1[%c0, %c0_0] : memref<2x8192xbf16, #tpu.memory_space<vmem>>, vector<2x8192xbf16>
    %1 = arith.extf %0 : vector<2x8192xbf16> to vector<2x8192xf32>
    %c0_1 = arith.constant 0 : index
    %c0_2 = arith.constant 0 : index
    %2 = vector.load %arg2[%c0_1, %c0_2] : memref<1x8192xbf16, #tpu.memory_space<vmem>>, vector<1x8192xbf16>
    %3 = arith.extf %2 : vector<1x8192xbf16> to vector<1x8192xf32>
    %4 = vector.broadcast %3 : vector<1x8192xf32> to vector<2x8192xf32>
    %5 = arith.mulf %1, %4 : vector<2x8192xf32>
    %cst = arith.constant dense<0.000000e+00> : vector<2xf32>
    %6 = vector.multi_reduction <add>, %5, %cst [1] : vector<2x8192xf32> to vector<2xf32>
    %7 = vector.shape_cast %6 : vector<2xf32> to vector<2x1xf32>
    %8 = math.absf %7 : vector<2x1xf32>
    %cst_3 = arith.constant 0.000000e+00 : f32
    %9 = vector.broadcast %cst_3 : f32 to vector<2x1xf32>
    %10 = arith.subf %9, %8 : vector<2x1xf32>
    %11 = math.exp %10 : vector<2x1xf32>
    %cst_4 = arith.constant 0.000000e+00 : f32
    %12 = vector.broadcast %cst_4 : f32 to vector<2x1xf32>
    %13 = arith.cmpf oge, %7, %12 : vector<2x1xf32>
    %cst_5 = arith.constant 1.000000e+00 : f32
    %14 = vector.broadcast %cst_5 : f32 to vector<2x1xf32>
    %15 = arith.select %13, %14, %11 : vector<2x1xi1>, vector<2x1xf32>
    %cst_6 = arith.constant 1.000000e+00 : f32
    %16 = vector.broadcast %cst_6 : f32 to vector<2x1xf32>
    %17 = arith.addf %16, %11 : vector<2x1xf32>
    %18 = arith.divf %15, %17 : vector<2x1xf32>
    %c0_7 = arith.constant 0 : index
    %c0_8 = arith.constant 0 : index
    %19 = vector.load %arg3[%c0_7, %c0_8] : memref<2x1xf32, #tpu.memory_space<vmem>>, vector<2x1xf32>
    tpu.vector_store %arg3[%c0_7, %c0_8], %18 {strides = array<i32>} : memref<2x1xf32, #tpu.memory_space<vmem>>, vector<2x1xf32>,
    return
  }
  func.func @transform_0(%arg0: i32) -> (i32, i32) {
    %c0_i32 = arith.constant 0 : i32
    %c0_i32_0 = arith.constant 0 : i32
    %c0_i32_1 = arith.constant 0 : i32
    return %c0_i32, %c0_i32_0 : i32, i32
  }
  func.func @transform_1(%arg0: i32) -> (i32, i32) {
    %c0_i32 = arith.constant 0 : i32
    %c0_i32_0 = arith.constant 0 : i32
    %c0_i32_1 = arith.constant 0 : i32
    return %c0_i32, %c0_i32_0 : i32, i32
  }
  func.func @transform_2(%arg0: i32) -> (i32, i32) {
    %c0_i32 = arith.constant 0 : i32
    %c0_i32_0 = arith.constant 0 : i32
    %c0_i32_1 = arith.constant 0 : i32
    return %c0_i32, %c0_i32_0 : i32, i32
  }
}

</mosaic_0001>

<bundles_post_ra>
// kernel: netD_forward.5
= control target key start
LH: loop header
LB: loop body
LE: loop exit
PB: predicated region body
PF: predicated region fallthrough
CT: control target
= control target key end

     0   :  { %s2029_s9 = smov 0   ;;  %s2031_s10 = smov 0   ;;  %s2185_s0 = inlined_call_operand.vmem [shape: bf16[2048,48], index: 0, kind: input, shape index: {}]   ;;  %s2186_s1 = inlined_call_operand.vmem [shape: bf16[48,128], index: 1, kind: input, shape index: {}]   ;;  %s2187_s2 = inlined_call_operand.vmem [shape: bf16[2048,128], index: 2, kind: output, shape index: {}]  }
   0x1   :  { %s2033_s11 = smov 0  }
   0x2 LB: > { %s24_s12 = sadd.s32 1, %s2008_s10  ;;  %p1427_p0 = scmp.ge.s32.totalorder %s2012_s11, 1  ;;  %s2012_s11 = sphi %s2033_s11, %s12_s11   ;;  %s2008_s10 = sphi %s2031_s10, %s2189_s10   ;;  %s2004_s9 = sphi %s2029_s9, %s2188_s9  }
   0x3   : > { %p26_p1 = scmp.ge.s32.totalorder %s24_s12, 4  ;;  %p141_p2 = scmp.lt.s32.totalorder %s2012_s11, 5 }
   0x5   : > { %s2191_s12 = smov (%p26_p1, %s24_s12), 0  ;;  %p142_p3 = pnand %p1427_p0, %p141_p2 }
   0x6   : > { %v1955_v0 = vld [vmem:[%s2186_s1] sm:$0xff] (!%p142_p3)   ;;  %s1428_s15 = sshll.u32 (!%p142_p3), %s2004_s9, 6  ;;  %v1956_v1 = vld [vmem:[%s2186_s1 + $0x8] sm:$0xff] (!%p142_p3)   ;;  %v1957_v2 = vld [vmem:[%s2186_s1 + $0x10] sm:$0xff] (!%p142_p3)   ;;  %vm441_vm0 = vcmask (!%p142_p3), 392192  }
   0x7   : > { %145 = sbr.rel (%p142_p3) target bundleno = 298 (0x12a), region = 28  ;;  %p172_p4 = scmp.lt.s32.totalorder (!%p142_p3), %s1428_s15, 255  ;;  %1855 = vmatprep.subr.bf16.mxu0 (!%p142_p3), %v1955_v0  ;;  %1925 = vmatprep.subr.bf16.mxu1 (!%p142_p3), %v1955_v0 }
   0x8   : > { %1856 = vmatpush3.bf16.msra.mxu0 (!%p142_p3), %v1955_v0  ;;  %1928 = vmatpush3.bf16.msra.mxu1 (!%p142_p3), %v1955_v0 }
   0x9   : > { %1857 = vmatprep.subr.bf16.mxu0 (!%p142_p3), %v1956_v1  ;;  %1926 = vmatprep.subr.bf16.mxu1 (!%p142_p3), %v1956_v1 }
   0xc   : > { %1858 = vmatpush3.bf16.msra.mxu0 (!%p142_p3), %v1956_v1  ;;  %1929 = vmatpush3.bf16.msra.mxu1 (!%p142_p3), %v1956_v1 }
   0xd   : > { %1859 = vmatprep.subr.bf16.mxu0 (!%p142_p3), %v1957_v2  ;;  %1927 = vmatprep.subr.bf16.mxu1 (!%p142_p3), %v1957_v2 }
   0xe   : > { %s2193_s15 = smov (!%p172_p4, %s1428_s15), 255 }
   0xf   : > { %s1429_s20 = sshll.u32 %s2193_s15, 2 }
  0x10   : > { %s2064_s23 = scalar_lea.vmem %s2185_s0, %s1429_s20  ;;  %1860 = vmatpush3.bf16.msra.mxu0 %v1957_v2  ;;  %1930 = vmatpush3.bf16.msra.mxu1 %v1957_v2  ;;  %s2135_s26 = scalar_lea.vmem %s2187_s2, %s1429_s20 }
  0x11   : > { %v1958_v3 = vld [vmem:[%s2064_s23] sm:$0xff]   ;;  %v1960_v5 = vld [vmem:[%s2064_s23 + $0x8] sm:$0xff]   ;;  %v1962_v7 = vld [vmem:[%s2064_s23 + $0x10] sm:$0xff]  }
  0x12   : > { %v1959_v4 = vld [vmem:[%s2064_s23 + $0x80] sm:$0xff]   ;;  %1861 = vmatprep.mubr.msk.bf16.mxu0 %vm441_vm0, %v1958_v3  ;;  %v1961_v6 = vld [vmem:[%s2064_s23 + $0x88] sm:$0xff]   ;;  %v1963_v8 = vld [vmem:[%s2064_s23 + $0x90] sm:$0xff]  }
  0x13   : > { %1893 = vmatprep.mubr.msk.bf16.mxu1 %vm441_vm0, %v1959_v4  ;;  %1862 = vmatmul.mubr.msk.bf16.vlgmr.msra.gmra.mrb[0].mxu0 %vm441_vm0, %v1960_v5  ;;  %v1964_v9 = vld [vmem:[%s2064_s23 + $0x18] sm:$0xff]   ;;  %v1966_v11 = vld [vmem:[%s2064_s23 + $0x20] sm:$0xff]   ;;  %v1968_v13 = vld [vmem:[%s2064_s23 + $0x28] sm:$0xff]  }
  0x14   : > { %1894 = vmatmul.mubr.msk.bf16.vlgmr.msra.gmra.mrb[0].mxu1 %vm441_vm0, %v1961_v6  ;;  %1865 = vmatprep.mubr.msk.bf16.mxu0 %vm441_vm0, %v1962_v7  ;;  %v1965_v10 = vld [vmem:[%s2064_s23 + $0x98] sm:$0xff]   ;;  %v1967_v12 = vld [vmem:[%s2064_s23 + $0xa0] sm:$0xff]   ;;  %v1969_v14 = vld [vmem:[%s2064_s23 + $0xa8] sm:$0xff]  }
  0x15   : > { %1897 = vmatprep.mubr.msk.bf16.mxu1 %vm441_vm0, %v1963_v8  ;;  %v1970_v15 = vld [vmem:[%s2064_s23 + $0x30] sm:$0xff]   ;;  %v1972_v17 = vld [vmem:[%s2064_s23 + $0x38] sm:$0xff]   ;;  %v1974_v19 = vld [vmem:[%s2064_s23 + $0x40] sm:$0xff]  }
  0x16   : > { %v1971_v16 = vld [vmem:[%s2064_s23 + $0xb0] sm:$0xff]   ;;  %v1973_v18 = vld [vmem:[%s2064_s23 + $0xb8] sm:$0xff]   ;;  %v1975_v20 = vld [vmem:[%s2064_s23 + $0xc0] sm:$0xff]  }
  0x17   : > { %v1976_v21 = vld [vmem:[%s2064_s23 + $0x48] sm:$0xff]   ;;  %v1978_v23 = vld [vmem:[%s2064_s23 + $0x50] sm:$0xff]   ;;  %v1980_v25 = vld [vmem:[%s2064_s23 + $0x58] sm:$0xff]  }
  0x18   : > { %v1977_v22 = vld [vmem:[%s2064_s23 + $0xc8] sm:$0xff]   ;;  %v1979_v24 = vld [vmem:[%s2064_s23 + $0xd0] sm:$0xff]   ;;  %v1981_v26 = vld [vmem:[%s2064_s23 + $0xd8] sm:$0xff]  }
  0x19   : > { %v1982_v27 = vld [vmem:[%s2064_s23 + $0x60] sm:$0xff]   ;;  %v1984_v29 = vld [vmem:[%s2064_s23 + $0x68] sm:$0xff]   ;;  %v1986_v31 = vld [vmem:[%s2064_s23 + $0x70] sm:$0xff]  }
  0x1a   : > { %v1983_v28 = vld [vmem:[%s2064_s23 + $0xe0] sm:$0xff]   ;;  %v1985_v30 = vld [vmem:[%s2064_s23 + $0xe8] sm:$0xff]   ;;  %v1987_v32 = vld [vmem:[%s2064_s23 + $0xf0] sm:$0xff]  }
  0x1b   : > { %1866 = vmatmul.mubr.msk.bf16.gmra.mrb[4].mxu0 %vm441_vm0, %v1964_v9  ;;  %v1988_v33 = vld [vmem:[%s2064_s23 + $0x78] sm:$0xff]  }
  0x1c   : > { %1898 = vmatmul.mubr.msk.bf16.gmra.mrb[4].mxu1 %vm441_vm0, %v1965_v10  ;;  %1869 = vmatprep.mubr.msk.bf16.mxu0 %vm441_vm0, %v1966_v11  ;;  %v1989_v34 = vld [vmem:[%s2064_s23 + $0xf8] sm:$0xff]  }
  0x1d   : > { %1901 = vmatprep.mubr.msk.bf16.mxu1 %vm441_vm0, %v1967_v12 }
  0x23   : > { %1870 = vmatmul.mubr.msk.bf16.gmra.mrb[8].mxu0 %vm441_vm0, %v1968_v13 }
  0x24   : > { %1902 = vmatmul.mubr.msk.bf16.gmra.mrb[8].mxu1 %vm441_vm0, %v1969_v14  ;;  %1873 = vmatprep.mubr.msk.bf16.mxu0 %vm441_vm0, %v1970_v15 }
  0x25   : > { %1905 = vmatprep.mubr.msk.bf16.mxu1 %vm441_vm0, %v1971_v16 }
  0x2b   : > { %1874 = vmatmul.mubr.msk.bf16.gmra.mrb[12].mxu0 %vm441_vm0, %v1972_v17 }
  0x2c   : > { %1906 = vmatmul.mubr.msk.bf16.gmra.mrb[12].mxu1 %vm441_vm0, %v1973_v18  ;;  %1877 = vmatprep.mubr.msk.bf16.mxu0 %vm441_vm0, %v1974_v19 }
  0x2d   : > { %1909 = vmatprep.mubr.msk.bf16.mxu1 %vm441_vm0, %v1975_v20 }
  0x33   : > { %1878 = vmatmul.mubr.msk.bf16.gmra.mrb[16].mxu0 %vm441_vm0, %v1976_v21 }
  0x34   : > { %1910 = vmatmul.mubr.msk.bf16.gmra.mrb[16].mxu1 %vm441_vm0, %v1977_v22  ;;  %1881 = vmatprep.mubr.msk.bf16.mxu0 %vm441_vm0, %v1978_v23 }
  0x35   : > { %1913 = vmatprep.mubr.msk.bf16.mxu1 %vm441_vm0, %v1979_v24 }
  0x3b   : > { %1882 = vmatmul.mubr.msk.bf16.gmra.mrb[20].mxu0 %vm441_vm0, %v1980_v25 }
  0x3c   : > { %1914 = vmatmul.mubr.msk.bf16.gmra.mrb[20].mxu1 %vm441_vm0, %v1981_v26  ;;  %1885 = vmatprep.mubr.msk.bf16.mxu0 %vm441_vm0, %v1982_v27 }
  0x3d   : > { %1917 = vmatprep.mubr.msk.bf16.mxu1 %vm441_vm0, %v1983_v28 }
  0x43   : > { %1886 = vmatmul.mubr.msk.bf16.gmra.mrb[24].mxu0 %vm441_vm0, %v1984_v29 }
  0x44   : > { %1918 = vmatmul.mubr.msk.bf16.gmra.mrb[24].mxu1 %vm441_vm0, %v1985_v30  ;;  %1889 = vmatprep.mubr.msk.bf16.mxu0 %vm441_vm0, %v1986_v31 }
  0x45   : > { %1921 = vmatprep.mubr.msk.bf16.mxu1 %vm441_vm0, %v1987_v32 }
  0x4b   : > { %1890 = vmatmul.mubr.msk.bf16.gmra.mrb[28].mxu0 %vm441_vm0, %v1988_v33 }
  0x4c   : > { %1922 = vmatmul.mubr.msk.bf16.gmra.mrb[28].mxu1 %vm441_vm0, %v1989_v34 }
  0xe6   : > { %v1863_v35 = vpop.f32.mrb[0].mxu0 }
  0xe7   : > { %v1895_v36 = vpop.f32.mrb[0].mxu1  ;;  %vm829_vm1 = vcmp.gt.f32.partialorder %v1863_v35, 0.0  ;;  %v893_v37 = vmul.f32 0.2, %v1863_v35  ;;  %v572_v39 = vpop.f32.mrb[1].mxu0 }
  0xe8   : > { %v925_v38 = vmul.f32 0.2, %v1895_v36  ;;  %vm861_vm2 = vcmp.gt.f32.partialorder %v1895_v36, 0.0  ;;  %v700_v40 = vpop.f32.mrb[1].mxu1  ;;  %v891_v41 = vmul.f32 0.2, %v572_v39 }
  0xe9   : > { %v1864_v42 = vpop.f32.mrb[2].mxu0  ;;  %v1896_v43 = vpop.f32.mrb[2].mxu1  ;;  %v957_v44 = vsel %vm829_vm1, %v1863_v35, %v893_v37  ;;  %v923_v45 = vmul.f32 0.2, %v700_v40  ;;  %vm827_vm4 = vcmp.gt.f32.partialorder %v572_v39, 0.0  ;;  %vm859_vm6 = vcmp.gt.f32.partialorder %v700_v40, 0.0 }
  0xea   : > { %vm830_vm3 = vcmp.gt.f32.partialorder %v1864_v42, 0.0  ;;  %v894_v46 = vmul.f32 0.2, %v1864_v42  ;;  %v989_v47 = vsel %vm861_vm2, %v1895_v36, %v925_v38  ;;  %vm862_vm5 = vcmp.gt.f32.partialorder %v1896_v43, 0.0  ;;  %v575_v49 = vpop.f32.mrb[3].mxu0  ;;  %v703_v50 = vpop.f32.mrb[3].mxu1 }
  0xeb   : > { %v926_v48 = vmul.f32 0.2, %v1896_v43  ;;  %vm828_vm7 = vcmp.gt.f32.partialorder %v575_v49, 0.0  ;;  %v892_v52 = vmul.f32 0.2, %v575_v49  ;;  %vm860_vm8 = vcmp.gt.f32.partialorder %v703_v50, 0.0 }
  0xec   : > { %v958_v51 = vsel %vm830_vm3, %v1864_v42, %v894_v46  ;;  %v924_v55 = vmul.f32 0.2, %v703_v50  ;;  %v955_v56 = vsel %vm827_vm4, %v572_v39, %v891_v41  ;;  %v987_v61 = vsel %vm859_vm6, %v700_v40, %v923_v45 }
  0xed   : > { %v1637_v53 = vpack.c.bf16 %v958_v51, %v957_v44  ;;  %v990_v54 = vsel %vm862_vm5, %v1896_v43, %v926_v48  ;;  %v956_v58 = vsel %vm828_vm7, %v575_v49, %v892_v52 }
  0xee   : > { %v1717_v57 = vpack.c.bf16 %v990_v54, %v989_v47  ;;  %v1867_v59 = vpop.f32.mrb[4].mxu0  ;;  %v1632_v62 = vpack.c.bf16 %v956_v58, %v955_v56  ;;  %v988_v63 = vsel %vm860_vm8, %v703_v50, %v924_v55 }
  0xef   : > { %v1899_v60 = vpop.f32.mrb[4].mxu1  ;;  %1789 = vst [vmem:[%s2135_s26 + $0x8] sm:$0xff] %v1637_v53   ;;  %v897_v0 = vmul.f32 0.2, %v1867_v59  ;;  %v588_v1 = vpop.f32.mrb[5].mxu0  ;;  %v1712_v3 = vpack.c.bf16 %v988_v63, %v987_v61  ;;  %vm833_vm9 = vcmp.gt.f32.partialorder %v1867_v59, 0.0 }
  0xf0   : > { %v716_v2 = vpop.f32.mrb[5].mxu1  ;;  %1805 = vst [vmem:[%s2135_s26 + $0x88] sm:$0xff] %v1717_v57   ;;  %v929_v4 = vmul.f32 0.2, %v1899_v60  ;;  %v1868_v5 = vpop.f32.mrb[6].mxu0  ;;  %1633 = vst [vmem:[%s2135_s26] sm:$0xff] %v1632_v62   ;;  %vm865_vm10 = vcmp.gt.f32.partialorder %v1899_v60, 0.0 }
  0xf1   : > { %v1900_v6 = vpop.f32.mrb[6].mxu1  ;;  %v895_v7 = vmul.f32 0.2, %v588_v1  ;;  %v927_v8 = vmul.f32 0.2, %v716_v2  ;;  %v591_v9 = vpop.f32.mrb[7].mxu0  ;;  %v961_v12 = vsel %vm833_vm9, %v1867_v59, %v897_v0 }
  0xf2   : > { %1804 = vst [vmem:[%s2135_s26 + $0x80] sm:$0xff] %v1712_v3   ;;  %vm831_vm11 = vcmp.gt.f32.partialorder %v588_v1, 0.0  ;;  %vm834_vm12 = vcmp.gt.f32.partialorder %v1868_v5, 0.0  ;;  %v898_v10 = vmul.f32 0.2, %v1868_v5  ;;  %vm866_vm13 = vcmp.gt.f32.partialorder %v1900_v6, 0.0 }
  0xf3   : > { %v719_v11 = vpop.f32.mrb[7].mxu1  ;;  %vm863_vm14 = vcmp.gt.f32.partialorder %v716_v2, 0.0  ;;  %v930_v13 = vmul.f32 0.2, %v1900_v6  ;;  %vm832_vm15 = vcmp.gt.f32.partialorder %v591_v9, 0.0  ;;  %v993_v17 = vsel %vm865_vm10, %v1899_v60, %v929_v4 }
  0xf4   : > { %v962_v14 = vsel %vm834_vm12, %v1868_v5, %v898_v10  ;;  %v896_v15 = vmul.f32 0.2, %v591_v9  ;;  %vm864_vm0 = vcmp.gt.f32.partialorder %v719_v11, 0.0  ;;  %v928_v16 = vmul.f32 0.2, %v719_v11 }
  0xf5   : > { %v959_v18 = vsel %vm831_vm11, %v588_v1, %v895_v7  ;;  %v1647_v19 = vpack.c.bf16 %v962_v14, %v961_v12  ;;  %v994_v20 = vsel %vm866_vm13, %v1900_v6, %v930_v13  ;;  %v991_v21 = vsel %vm863_vm14, %v716_v2, %v927_v8 }
  0xf6   : > { %v1727_v22 = vpack.c.bf16 %v994_v20, %v993_v17  ;;  %v960_v23 = vsel %vm832_vm15, %v591_v9, %v896_v15  ;;  %v992_v24 = vsel %vm864_vm0, %v719_v11, %v928_v16  ;;  %v1871_v25 = vpop.f32.mrb[8].mxu0 }
  0xf7   : > { %v1903_v26 = vpop.f32.mrb[8].mxu1  ;;  %1791 = vst [vmem:[%s2135_s26 + $0x18] sm:$0xff] %v1647_v19   ;;  %v1642_v27 = vpack.c.bf16 %v960_v23, %v959_v18  ;;  %v1722_v28 = vpack.c.bf16 %v992_v24, %v991_v21  ;;  %vm837_vm1 = vcmp.gt.f32.partialorder %v1871_v25, 0.0  ;;  %v901_v29 = vmul.f32 0.2, %v1871_v25  ;;  %v604_v30 = vpop.f32.mrb[9].mxu0 }
  0xf8   : > { %v732_v31 = vpop.f32.mrb[9].mxu1  ;;  %1807 = vst [vmem:[%s2135_s26 + $0x98] sm:$0xff] %v1727_v22   ;;  %vm869_vm2 = vcmp.gt.f32.partialorder %v1903_v26, 0.0  ;;  %v933_v32 = vmul.f32 0.2, %v1903_v26  ;;  %v1872_v35 = vpop.f32.mrb[10].mxu0 }
  0xf9   : > { %1790 = vst [vmem:[%s2135_s26 + $0x10] sm:$0xff] %v1642_v27   ;;  %1806 = vst [vmem:[%s2135_s26 + $0x90] sm:$0xff] %v1722_v28   ;;  %v899_v33 = vmul.f32 0.2, %v604_v30  ;;  %v931_v34 = vmul.f32 0.2, %v732_v31  ;;  %v965_v37 = vsel %vm837_vm1, %v1871_v25, %v901_v29 }
  0xfa   : > { %v1904_v36 = vpop.f32.mrb[10].mxu1  ;;  %vm835_vm3 = vcmp.gt.f32.partialorder %v604_v30, 0.0  ;;  %vm838_vm4 = vcmp.gt.f32.partialorder %v1872_v35, 0.0  ;;  %v902_v38 = vmul.f32 0.2, %v1872_v35  ;;  %v607_v39 = vpop.f32.mrb[11].mxu0  ;;  %v997_v45 = vsel %vm869_vm2, %v1903_v26, %v933_v32 }
  0xfb   : > { %v735_v40 = vpop.f32.mrb[11].mxu1  ;;  %vm867_vm5 = vcmp.gt.f32.partialorder %v732_v31, 0.0  ;;  %vm870_vm6 = vcmp.gt.f32.partialorder %v1904_v36, 0.0  ;;  %v934_v41 = vmul.f32 0.2, %v1904_v36  ;;  %vm836_vm7 = vcmp.gt.f32.partialorder %v607_v39, 0.0 }
  0xfc   : > { %v966_v42 = vsel %vm838_vm4, %v1872_v35, %v902_v38  ;;  %v900_v43 = vmul.f32 0.2, %v607_v39  ;;  %vm868_vm8 = vcmp.gt.f32.partialorder %v735_v40, 0.0  ;;  %v932_v44 = vmul.f32 0.2, %v735_v40 }
  0xfd   : > { %v963_v46 = vsel %vm835_vm3, %v604_v30, %v899_v33  ;;  %v1657_v47 = vpack.c.bf16 %v966_v42, %v965_v37  ;;  %v998_v48 = vsel %vm870_vm6, %v1904_v36, %v934_v41  ;;  %v995_v49 = vsel %vm867_vm5, %v732_v31, %v931_v34 }
  0xfe   : > { %v1737_v50 = vpack.c.bf16 %v998_v48, %v997_v45  ;;  %v964_v51 = vsel %vm836_vm7, %v607_v39, %v900_v43  ;;  %v996_v52 = vsel %vm868_vm8, %v735_v40, %v932_v44  ;;  %v1875_v53 = vpop.f32.mrb[12].mxu0 }
  0xff   : > { %v1907_v54 = vpop.f32.mrb[12].mxu1  ;;  %1793 = vst [vmem:[%s2135_s26 + $0x28] sm:$0xff] %v1657_v47   ;;  %v1652_v55 = vpack.c.bf16 %v964_v51, %v963_v46  ;;  %v1732_v56 = vpack.c.bf16 %v996_v52, %v995_v49  ;;  %vm841_vm9 = vcmp.gt.f32.partialorder %v1875_v53, 0.0  ;;  %v905_v57 = vmul.f32 0.2, %v1875_v53  ;;  %v620_v58 = vpop.f32.mrb[13].mxu0 }
 0x100   : > { %v748_v59 = vpop.f32.mrb[13].mxu1  ;;  %1809 = vst [vmem:[%s2135_s26 + $0xa8] sm:$0xff] %v1737_v50   ;;  %vm873_vm10 = vcmp.gt.f32.partialorder %v1907_v54, 0.0  ;;  %v937_v60 = vmul.f32 0.2, %v1907_v54  ;;  %v1876_v63 = vpop.f32.mrb[14].mxu0 }
 0x101   : > { %1792 = vst [vmem:[%s2135_s26 + $0x20] sm:$0xff] %v1652_v55   ;;  %1808 = vst [vmem:[%s2135_s26 + $0xa0] sm:$0xff] %v1732_v56   ;;  %v903_v61 = vmul.f32 0.2, %v620_v58  ;;  %v935_v62 = vmul.f32 0.2, %v748_v59  ;;  %v969_v1 = vsel %vm841_vm9, %v1875_v53, %v905_v57 }
 0x102   : > { %v1908_v0 = vpop.f32.mrb[14].mxu1  ;;  %vm839_vm11 = vcmp.gt.f32.partialorder %v620_v58, 0.0  ;;  %vm842_vm12 = vcmp.gt.f32.partialorder %v1876_v63, 0.0  ;;  %v906_v2 = vmul.f32 0.2, %v1876_v63  ;;  %v623_v3 = vpop.f32.mrb[15].mxu0  ;;  %v1001_v9 = vsel %vm873_vm10, %v1907_v54, %v937_v60 }
 0x103   : > { %v751_v4 = vpop.f32.mrb[15].mxu1  ;;  %vm871_vm13 = vcmp.gt.f32.partialorder %v748_v59, 0.0  ;;  %vm874_vm14 = vcmp.gt.f32.partialorder %v1908_v0, 0.0  ;;  %v938_v5 = vmul.f32 0.2, %v1908_v0  ;;  %vm840_vm15 = vcmp.gt.f32.partialorder %v623_v3, 0.0 }
 0x104   : > { %v970_v6 = vsel %vm842_vm12, %v1876_v63, %v906_v2  ;;  %v904_v7 = vmul.f32 0.2, %v623_v3  ;;  %vm872_vm0 = vcmp.gt.f32.partialorder %v751_v4, 0.0  ;;  %v936_v8 = vmul.f32 0.2, %v751_v4 }
 0x105   : > { %v967_v10 = vsel %vm839_vm11, %v620_v58, %v903_v61  ;;  %v1667_v11 = vpack.c.bf16 %v970_v6, %v969_v1  ;;  %v1002_v12 = vsel %vm874_vm14, %v1908_v0, %v938_v5  ;;  %v999_v13 = vsel %vm871_vm13, %v748_v59, %v935_v62 }
 0x106   : > { %v1747_v14 = vpack.c.bf16 %v1002_v12, %v1001_v9  ;;  %v968_v15 = vsel %vm840_vm15, %v623_v3, %v904_v7  ;;  %v1000_v16 = vsel %vm872_vm0, %v751_v4, %v936_v8  ;;  %v1879_v17 = vpop.f32.mrb[16].mxu0 }
 0x107   : > { %v1911_v18 = vpop.f32.mrb[16].mxu1  ;;  %1795 = vst [vmem:[%s2135_s26 + $0x38] sm:$0xff] %v1667_v11   ;;  %v1662_v19 = vpack.c.bf16 %v968_v15, %v967_v10  ;;  %v1742_v20 = vpack.c.bf16 %v1000_v16, %v999_v13  ;;  %vm845_vm1 = vcmp.gt.f32.partialorder %v1879_v17, 0.0  ;;  %v909_v21 = vmul.f32 0.2, %v1879_v17  ;;  %v636_v22 = vpop.f32.mrb[17].mxu0 }
 0x108   : > { %v764_v23 = vpop.f32.mrb[17].mxu1  ;;  %1811 = vst [vmem:[%s2135_s26 + $0xb8] sm:$0xff] %v1747_v14   ;;  %vm877_vm2 = vcmp.gt.f32.partialorder %v1911_v18, 0.0  ;;  %v941_v24 = vmul.f32 0.2, %v1911_v18  ;;  %v1880_v27 = vpop.f32.mrb[18].mxu0 }
 0x109   : > { %1794 = vst [vmem:[%s2135_s26 + $0x30] sm:$0xff] %v1662_v19   ;;  %1810 = vst [vmem:[%s2135_s26 + $0xb0] sm:$0xff] %v1742_v20   ;;  %v907_v25 = vmul.f32 0.2, %v636_v22  ;;  %v939_v26 = vmul.f32 0.2, %v764_v23  ;;  %v973_v29 = vsel %vm845_vm1, %v1879_v17, %v909_v21 }
 0x10a   : > { %v1912_v28 = vpop.f32.mrb[18].mxu1  ;;  %vm843_vm3 = vcmp.gt.f32.partialorder %v636_v22, 0.0  ;;  %vm846_vm4 = vcmp.gt.f32.partialorder %v1880_v27, 0.0  ;;  %v910_v30 = vmul.f32 0.2, %v1880_v27  ;;  %v639_v31 = vpop.f32.mrb[19].mxu0  ;;  %v1005_v37 = vsel %vm877_vm2, %v1911_v18, %v941_v24 }
 0x10b   : > { %v767_v32 = vpop.f32.mrb[19].mxu1  ;;  %vm875_vm5 = vcmp.gt.f32.partialorder %v764_v23, 0.0  ;;  %vm878_vm6 = vcmp.gt.f32.partialorder %v1912_v28, 0.0  ;;  %v942_v33 = vmul.f32 0.2, %v1912_v28  ;;  %vm844_vm7 = vcmp.gt.f32.partialorder %v639_v31, 0.0 }
 0x10c   : > { %v974_v34 = vsel %vm846_vm4, %v1880_v27, %v910_v30  ;;  %v908_v35 = vmul.f32 0.2, %v639_v31  ;;  %vm876_vm8 = vcmp.gt.f32.partialorder %v767_v32, 0.0  ;;  %v940_v36 = vmul.f32 0.2, %v767_v32 }
 0x10d   : > { %v971_v38 = vsel %vm843_vm3, %v636_v22, %v907_v25  ;;  %v1677_v39 = vpack.c.bf16 %v974_v34, %v973_v29  ;;  %v1006_v40 = vsel %vm878_vm6, %v1912_v28, %v942_v33  ;;  %v1003_v41 = vsel %vm875_vm5, %v764_v23, %v939_v26 }
 0x10e   : > { %v1757_v42 = vpack.c.bf16 %v1006_v40, %v1005_v37  ;;  %v972_v43 = vsel %vm844_vm7, %v639_v31, %v908_v35  ;;  %v1004_v44 = vsel %vm876_vm8, %v767_v32, %v940_v36  ;;  %v1883_v45 = vpop.f32.mrb[20].mxu0 }
 0x10f   : > { %v1915_v46 = vpop.f32.mrb[20].mxu1  ;;  %1797 = vst [vmem:[%s2135_s26 + $0x48] sm:$0xff] %v1677_v39   ;;  %v1672_v47 = vpack.c.bf16 %v972_v43, %v971_v38  ;;  %v1752_v48 = vpack.c.bf16 %v1004_v44, %v1003_v41  ;;  %vm849_vm9 = vcmp.gt.f32.partialorder %v1883_v45, 0.0  ;;  %v913_v49 = vmul.f32 0.2, %v1883_v45  ;;  %v652_v50 = vpop.f32.mrb[21].mxu0 }
 0x110   : > { %v780_v51 = vpop.f32.mrb[21].mxu1  ;;  %1813 = vst [vmem:[%s2135_s26 + $0xc8] sm:$0xff] %v1757_v42   ;;  %vm881_vm10 = vcmp.gt.f32.partialorder %v1915_v46, 0.0  ;;  %v945_v52 = vmul.f32 0.2, %v1915_v46  ;;  %v1884_v55 = vpop.f32.mrb[22].mxu0 }
 0x111   : > { %1796 = vst [vmem:[%s2135_s26 + $0x40] sm:$0xff] %v1672_v47   ;;  %1812 = vst [vmem:[%s2135_s26 + $0xc0] sm:$0xff] %v1752_v48   ;;  %v911_v53 = vmul.f32 0.2, %v652_v50  ;;  %v943_v54 = vmul.f32 0.2, %v780_v51  ;;  %v977_v57 = vsel %vm849_vm9, %v1883_v45, %v913_v49 }
 0x112   : > { %v1916_v56 = vpop.f32.mrb[22].mxu1  ;;  %vm847_vm11 = vcmp.gt.f32.partialorder %v652_v50, 0.0  ;;  %vm850_vm12 = vcmp.gt.f32.partialorder %v1884_v55, 0.0  ;;  %v914_v58 = vmul.f32 0.2, %v1884_v55  ;;  %v655_v59 = vpop.f32.mrb[23].mxu0  ;;  %v1009_v1 = vsel %vm881_vm10, %v1915_v46, %v945_v52 }
 0x113   : > { %v783_v60 = vpop.f32.mrb[23].mxu1  ;;  %vm879_vm13 = vcmp.gt.f32.partialorder %v780_v51, 0.0  ;;  %vm882_vm14 = vcmp.gt.f32.partialorder %v1916_v56, 0.0  ;;  %v946_v61 = vmul.f32 0.2, %v1916_v56  ;;  %vm848_vm15 = vcmp.gt.f32.partialorder %v655_v59, 0.0 }
 0x114   : > { %v978_v62 = vsel %vm850_vm12, %v1884_v55, %v914_v58  ;;  %v912_v63 = vmul.f32 0.2, %v655_v59  ;;  %vm880_vm0 = vcmp.gt.f32.partialorder %v783_v60, 0.0  ;;  %v944_v0 = vmul.f32 0.2, %v783_v60 }
 0x115   : > { %v975_v2 = vsel %vm847_vm11, %v652_v50, %v911_v53  ;;  %v1687_v3 = vpack.c.bf16 %v978_v62, %v977_v57  ;;  %v1010_v4 = vsel %vm882_vm14, %v1916_v56, %v946_v61  ;;  %v1007_v5 = vsel %vm879_vm13, %v780_v51, %v943_v54 }
 0x116   : > { %v1767_v6 = vpack.c.bf16 %v1010_v4, %v1009_v1  ;;  %v976_v7 = vsel %vm848_vm15, %v655_v59, %v912_v63  ;;  %v1008_v8 = vsel %vm880_vm0, %v783_v60, %v944_v0  ;;  %v1887_v9 = vpop.f32.mrb[24].mxu0 }
 0x117   : > { %v1919_v10 = vpop.f32.mrb[24].mxu1  ;;  %1799 = vst [vmem:[%s2135_s26 + $0x58] sm:$0xff] %v1687_v3   ;;  %v1682_v11 = vpack.c.bf16 %v976_v7, %v975_v2  ;;  %v1762_v12 = vpack.c.bf16 %v1008_v8, %v1007_v5  ;;  %vm853_vm1 = vcmp.gt.f32.partialorder %v1887_v9, 0.0  ;;  %v917_v13 = vmul.f32 0.2, %v1887_v9  ;;  %v668_v14 = vpop.f32.mrb[25].mxu0 }
 0x118   : > { %v796_v15 = vpop.f32.mrb[25].mxu1  ;;  %1815 = vst [vmem:[%s2135_s26 + $0xd8] sm:$0xff] %v1767_v6   ;;  %vm885_vm2 = vcmp.gt.f32.partialorder %v1919_v10, 0.0  ;;  %v949_v16 = vmul.f32 0.2, %v1919_v10  ;;  %v1888_v19 = vpop.f32.mrb[26].mxu0 }
 0x119   : > { %1798 = vst [vmem:[%s2135_s26 + $0x50] sm:$0xff] %v1682_v11   ;;  %1814 = vst [vmem:[%s2135_s26 + $0xd0] sm:$0xff] %v1762_v12   ;;  %v915_v17 = vmul.f32 0.2, %v668_v14  ;;  %v947_v18 = vmul.f32 0.2, %v796_v15  ;;  %v981_v21 = vsel %vm853_vm1, %v1887_v9, %v917_v13 }
 0x11a   : > { %v1920_v20 = vpop.f32.mrb[26].mxu1  ;;  %vm851_vm3 = vcmp.gt.f32.partialorder %v668_v14, 0.0  ;;  %vm854_vm4 = vcmp.gt.f32.partialorder %v1888_v19, 0.0  ;;  %v918_v22 = vmul.f32 0.2, %v1888_v19  ;;  %v671_v23 = vpop.f32.mrb[27].mxu0  ;;  %v1013_v29 = vsel %vm885_vm2, %v1919_v10, %v949_v16 }
 0x11b   : > { %v799_v24 = vpop.f32.mrb[27].mxu1  ;;  %vm883_vm5 = vcmp.gt.f32.partialorder %v796_v15, 0.0  ;;  %vm886_vm6 = vcmp.gt.f32.partialorder %v1920_v20, 0.0  ;;  %v950_v25 = vmul.f32 0.2, %v1920_v20  ;;  %vm852_vm7 = vcmp.gt.f32.partialorder %v671_v23, 0.0 }
 0x11c   : > { %v982_v26 = vsel %vm854_vm4, %v1888_v19, %v918_v22  ;;  %v916_v27 = vmul.f32 0.2, %v671_v23  ;;  %vm884_vm8 = vcmp.gt.f32.partialorder %v799_v24, 0.0  ;;  %v948_v28 = vmul.f32 0.2, %v799_v24 }
 0x11d   : > { %v979_v30 = vsel %vm851_vm3, %v668_v14, %v915_v17  ;;  %v1697_v31 = vpack.c.bf16 %v982_v26, %v981_v21  ;;  %v1014_v32 = vsel %vm886_vm6, %v1920_v20, %v950_v25  ;;  %v1011_v33 = vsel %vm883_vm5, %v796_v15, %v947_v18 }
 0x11e   : > { %v1777_v34 = vpack.c.bf16 %v1014_v32, %v1013_v29  ;;  %v980_v35 = vsel %vm852_vm7, %v671_v23, %v916_v27  ;;  %v1012_v36 = vsel %vm884_vm8, %v799_v24, %v948_v28  ;;  %v1891_v37 = vpop.f32.mrb[28].mxu0 }
 0x11f   : > { %v1923_v38 = vpop.f32.mrb[28].mxu1  ;;  %1801 = vst [vmem:[%s2135_s26 + $0x68] sm:$0xff] %v1697_v31   ;;  %v1692_v39 = vpack.c.bf16 %v980_v35, %v979_v30  ;;  %v1772_v40 = vpack.c.bf16 %v1012_v36, %v1011_v33  ;;  %vm857_vm9 = vcmp.gt.f32.partialorder %v1891_v37, 0.0  ;;  %v921_v41 = vmul.f32 0.2, %v1891_v37  ;;  %v684_v42 = vpop.f32.mrb[29].mxu0 }
 0x120   : > { %v812_v43 = vpop.f32.mrb[29].mxu1  ;;  %1817 = vst [vmem:[%s2135_s26 + $0xe8] sm:$0xff] %v1777_v34   ;;  %vm889_vm10 = vcmp.gt.f32.partialorder %v1923_v38, 0.0  ;;  %v953_v44 = vmul.f32 0.2, %v1923_v38  ;;  %v1892_v47 = vpop.f32.mrb[30].mxu0 }
 0x121   : > { %1800 = vst [vmem:[%s2135_s26 + $0x60] sm:$0xff] %v1692_v39   ;;  %1816 = vst [vmem:[%s2135_s26 + $0xe0] sm:$0xff] %v1772_v40   ;;  %v919_v45 = vmul.f32 0.2, %v684_v42  ;;  %v951_v46 = vmul.f32 0.2, %v812_v43  ;;  %v985_v49 = vsel %vm857_vm9, %v1891_v37, %v921_v41 }
 0x122   : > { %v1924_v48 = vpop.f32.mrb[30].mxu1  ;;  %vm855_vm11 = vcmp.gt.f32.partialorder %v684_v42, 0.0  ;;  %vm858_vm12 = vcmp.gt.f32.partialorder %v1892_v47, 0.0  ;;  %v922_v50 = vmul.f32 0.2, %v1892_v47  ;;  %v687_v51 = vpop.f32.mrb[31].mxu0  ;;  %v1017_v57 = vsel %vm889_vm10, %v1923_v38, %v953_v44 }
 0x123   : > { %v815_v52 = vpop.f32.mrb[31].mxu1  ;;  %vm887_vm13 = vcmp.gt.f32.partialorder %v812_v43, 0.0  ;;  %vm890_vm14 = vcmp.gt.f32.partialorder %v1924_v48, 0.0  ;;  %v954_v53 = vmul.f32 0.2, %v1924_v48  ;;  %vm856_vm15 = vcmp.gt.f32.partialorder %v687_v51, 0.0 }
 0x124   : > { %v986_v54 = vsel %vm858_vm12, %v1892_v47, %v922_v50  ;;  %v920_v55 = vmul.f32 0.2, %v687_v51  ;;  %vm888_vm0 = vcmp.gt.f32.partialorder %v815_v52, 0.0  ;;  %v952_v56 = vmul.f32 0.2, %v815_v52 }
 0x125   : > { %v983_v58 = vsel %vm855_vm11, %v684_v42, %v919_v45  ;;  %v1707_v59 = vpack.c.bf16 %v986_v54, %v985_v49  ;;  %v1018_v60 = vsel %vm890_vm14, %v1924_v48, %v954_v53  ;;  %v1015_v61 = vsel %vm887_vm13, %v812_v43, %v951_v46 }
 0x126   : > { %v1787_v62 = vpack.c.bf16 %v1018_v60, %v1017_v57  ;;  %v984_v63 = vsel %vm856_vm15, %v687_v51, %v920_v55  ;;  %v1016_v0 = vsel %vm888_vm0, %v815_v52, %v952_v56 }
 0x127   : > { %1803 = vst [vmem:[%s2135_s26 + $0x78] sm:$0xff] %v1707_v59   ;;  %v1702_v1 = vpack.c.bf16 %v984_v63, %v983_v58  ;;  %v1782_v2 = vpack.c.bf16 %v1016_v0, %v1015_v61 }
 0x128   : > { %1819 = vst [vmem:[%s2135_s26 + $0xf8] sm:$0xff] %v1787_v62  }
 0x129   : > { %1802 = vst [vmem:[%s2135_s26 + $0x70] sm:$0xff] %v1702_v1   ;;  %1818 = vst [vmem:[%s2135_s26 + $0xf0] sm:$0xff] %v1782_v2  }
 0x12a PF: > { %s12_s11 = sadd.s32 1, %s2012_s11   ;;  %s2188_s9 = smov %s2008_s10 }
 0x12b   : > { %p9_p5 = scmp.ge.s32.totalorder %s12_s11, 6   ;;  %s2189_s10 = smov %s2191_s12 }
 0x12d   :  { %11 = sbr.rel (!%p9_p5) target bundleno = 2 (0x2), region = 61 }

// kernel: netD_forward.6
= control target key start
LH: loop header
LB: loop body
LE: loop exit
PB: predicated region body
PF: predicated region fallthrough
CT: control target
= control target key end

     0   :  { %v4775_v0 = vmov 0   ;;  %vm3420_vm0 = vcmask 1040384   ;;  %s5935_s1 = inlined_call_operand.vmem [shape: bf16[1024,128], index: 1, kind: input, shape index: {}]   ;;  %s5936_s0 = inlined_call_operand.vmem [shape: bf16[512,1024], index: 0, kind: input, shape index: {}]   ;;  %s5937_s2 = inlined_call_operand.vmem [shape: bf16[512,128], index: 2, kind: output, shape index: {0}]   ;;  %s5938_s3 = inlined_call_operand.vmem [shape: f32[1,2,128], index: 3, kind: output, shape index: {1}]  }
   0x1   :  { %2062 = vmatprep.subr.bf16.mxu1 %v4775_v0  ;;  %2640 = vmatprep.subr.bf16.mxu0 %v4775_v0  ;;  %v4711_v1 = vld [vmem:[%s5935_s1] sm:$0xff]   ;;  %v4713_v3 = vld [vmem:[%s5935_s1 + $0x8] sm:$0xff]   ;;  %v4715_v5 = vld [vmem:[%s5935_s1 + $0x10] sm:$0xff]  }
   0x2   :  { %v4712_v2 = vld [vmem:[%s5935_s1 + $0x100] sm:$0xff]   ;;  %2063 = vmatpush1.bf16.msra.mxu1 %v4711_v1  ;;  %v4714_v4 = vld [vmem:[%s5935_s1 + $0x108] sm:$0xff]   ;;  %v4716_v6 = vld [vmem:[%s5935_s1 + $0x110] sm:$0xff]  }
   0x3   :  { %2641 = vmatpush1.bf16.msra.mxu0 %v4712_v2  ;;  %2064 = vmatprep.subr.bf16.mxu1 %v4775_v0  ;;  %v4717_v7 = vld [vmem:[%s5935_s1 + $0x18] sm:$0xff]   ;;  %v4719_v9 = vld [vmem:[%s5935_s1 + $0x20] sm:$0xff]   ;;  %v4721_v11 = vld [vmem:[%s5935_s1 + $0x28] sm:$0xff]  }
   0x4   :  { %2642 = vmatprep.subr.bf16.mxu0 %v4775_v0  ;;  %v4718_v8 = vld [vmem:[%s5935_s1 + $0x118] sm:$0xff]   ;;  %v4720_v10 = vld [vmem:[%s5935_s1 + $0x120] sm:$0xff]   ;;  %v4722_v12 = vld [vmem:[%s5935_s1 + $0x128] sm:$0xff]  }
   0x5   :  { %v4723_v13 = vld [vmem:[%s5935_s1 + $0x30] sm:$0xff]   ;;  %v4725_v15 = vld [vmem:[%s5935_s1 + $0x38] sm:$0xff]   ;;  %v4727_v17 = vld [vmem:[%s5935_s1 + $0x40] sm:$0xff]  }
   0x6   :  { %2065 = vmatpush1.bf16.msra.mxu1 %v4713_v3  ;;  %v4724_v14 = vld [vmem:[%s5935_s1 + $0x130] sm:$0xff]   ;;  %v4726_v16 = vld [vmem:[%s5935_s1 + $0x138] sm:$0xff]   ;;  %v4728_v18 = vld [vmem:[%s5935_s1 + $0x140] sm:$0xff]  }
   0x7   :  { %2643 = vmatpush1.bf16.msra.mxu0 %v4714_v4  ;;  %2066 = vmatprep.subr.bf16.mxu1 %v4775_v0  ;;  %v4871_v19 = vld [vmem:[%s5936_s0] sm:$0xff]  ;;  %v4881_v21 = vld [vmem:[%s5936_s0 + $0x10] sm:$0xff]  ;;  %v4729_v24 = vld [vmem:[%s5935_s1 + $0x48] sm:$0xff]  }
   0x8   :  { %2644 = vmatprep.subr.bf16.mxu0 %v4775_v0  ;;  %v4876_v20 = vld [vmem:[%s5936_s0 + $0x20] sm:$0xff]  ;;  %v4888_v23 = vld [vmem:[%s5936_s0 + $0x30] sm:$0xff]  ;;  %v4730_v26 = vld [vmem:[%s5935_s1 + $0x148] sm:$0xff]  }
   0x9   :  { %v3752_v22 = vcombine.high %v4871_v19, %v4876_v20  ;;  %v3756_v25 = vcombine.high %v4881_v21, %v4888_v23  ;;  %v4731_v27 = vld [vmem:[%s5935_s1 + $0x50] sm:$0xff]   ;;  %v4733_v29 = vld [vmem:[%s5935_s1 + $0x58] sm:$0xff]   ;;  %v4735_v31 = vld [vmem:[%s5935_s1 + $0x60] sm:$0xff]   ;;  %v3751_v42 = vcombine.low %v4871_v19, %v4876_v20  ;;  %v3755_v44 = vcombine.low %v4881_v21, %v4888_v23 }
   0xa   :  { %2067 = vmatpush1.bf16.msra.mxu1 %v4715_v5  ;;  %v4732_v28 = vld [vmem:[%s5935_s1 + $0x150] sm:$0xff]   ;;  %v4734_v30 = vld [vmem:[%s5935_s1 + $0x158] sm:$0xff]   ;;  %v4736_v32 = vld [vmem:[%s5935_s1 + $0x160] sm:$0xff]  }
   0xb   :  { %2645 = vmatpush1.bf16.msra.mxu0 %v4716_v6  ;;  %2068 = vmatprep.subr.bf16.mxu1 %v4775_v0  ;;  %v4737_v33 = vld [vmem:[%s5935_s1 + $0x68] sm:$0xff]   ;;  %v4739_v35 = vld [vmem:[%s5935_s1 + $0x70] sm:$0xff]   ;;  %v4741_v37 = vld [vmem:[%s5935_s1 + $0x78] sm:$0xff]  }
   0xc   :  { %2646 = vmatprep.subr.bf16.mxu0 %v4775_v0  ;;  %2094 = vmatprep.mubr.bf16.mxu1 %v3752_v22  ;;  %v4738_v34 = vld [vmem:[%s5935_s1 + $0x168] sm:$0xff]   ;;  %v4740_v36 = vld [vmem:[%s5935_s1 + $0x170] sm:$0xff]   ;;  %v4742_v38 = vld [vmem:[%s5935_s1 + $0x178] sm:$0xff]  }
   0xd   :  { %2672 = vmatprep.mubr.bf16.mxu0 %v3756_v25  ;;  %v22_v39 = vld [vmem:[%s5936_s0 + $0x40] sm:$0xff]  ;;  %v24_v41 = vld [vmem:[%s5936_s0 + $0x50] sm:$0xff]  ;;  %v4745_v51 = vld [vmem:[%s5935_s1 + $0x88] sm:$0xff]  }
   0xe   :  { %2069 = vmatpush1.bf16.msra.mxu1 %v4717_v7  ;;  %v26_v40 = vld [vmem:[%s5936_s0 + $0x60] sm:$0xff]  ;;  %v28_v43 = vld [vmem:[%s5936_s0 + $0x70] sm:$0xff]  ;;  %v4746_v52 = vld [vmem:[%s5935_s1 + $0x188] sm:$0xff]  }
   0xf   :  { %2647 = vmatpush1.bf16.msra.mxu0 %v4718_v8  ;;  %2070 = vmatprep.subr.bf16.mxu1 %v4775_v0  ;;  %v4743_v45 = vld [vmem:[%s5935_s1 + $0x80] sm:$0xff]   ;;  %v3760_v47 = vcombine.high %v22_v39, %v26_v40  ;;  %v3764_v48 = vcombine.high %v24_v41, %v28_v43  ;;  %v32_v53 = vld [vmem:[%s5936_s0 + $0x90] sm:$0xff]  ;;  %v3759_v55 = vcombine.low %v22_v39, %v26_v40  ;;  %v4749_v2 = vld [vmem:[%s5935_s1 + $0x98] sm:$0xff]  }
  0x10   :  { %2648 = vmatprep.subr.bf16.mxu0 %v4775_v0  ;;  %v4744_v46 = vld [vmem:[%s5935_s1 + $0x180] sm:$0xff]   ;;  %v36_v54 = vld [vmem:[%s5936_s0 + $0xb0] sm:$0xff]  ;;  %v3763_v56 = vcombine.low %v24_v41, %v28_v43  ;;  %v4750_v3 = vld [vmem:[%s5935_s1 + $0x198] sm:$0xff]  }
  0x11   :  { %v30_v49 = vld [vmem:[%s5936_s0 + $0x80] sm:$0xff]  ;;  %v3772_v58 = vcombine.high %v32_v53, %v36_v54  ;;  %v4747_v59 = vld [vmem:[%s5935_s1 + $0x90] sm:$0xff]   ;;  %v3771_v6 = vcombine.low %v32_v53, %v36_v54  ;;  %v4762_v39 = vld [vmem:[%s5935_s1 + $0x1c8] sm:$0xff]  }
  0x12   :  { %2071 = vmatpush1.bf16.msra.mxu1 %v4719_v9  ;;  %v34_v50 = vld [vmem:[%s5936_s0 + $0xa0] sm:$0xff]  ;;  %v4748_v60 = vld [vmem:[%s5935_s1 + $0x190] sm:$0xff]   ;;  %v4765_v54 = vld [vmem:[%s5935_s1 + $0xd8] sm:$0xff]  }
  0x13   :  { %2649 = vmatpush1.bf16.msra.mxu0 %v4720_v10  ;;  %2072 = vmatprep.subr.bf16.mxu1 %v4775_v0  ;;  %v3768_v57 = vcombine.high %v30_v49, %v34_v50  ;;  %v38_v61 = vld [vmem:[%s5936_s0 + $0xc0] sm:$0xff]  ;;  %v40_v63 = vld [vmem:[%s5936_s0 + $0xd0] sm:$0xff]  ;;  %v3767_v4 = vcombine.low %v30_v49, %v34_v50 }
  0x14   :  { %2650 = vmatprep.subr.bf16.mxu0 %v4775_v0  ;;  %v42_v62 = vld [vmem:[%s5936_s0 + $0xe0] sm:$0xff]  ;;  %v44_v1 = vld [vmem:[%s5936_s0 + $0xf0] sm:$0xff] }
  0x15   :  { %v4751_v5 = vld [vmem:[%s5935_s1 + $0xa0] sm:$0xff]   ;;  %v3776_v7 = vcombine.high %v38_v61, %v42_v62  ;;  %v3780_v9 = vcombine.high %v40_v63, %v44_v1  ;;  %v4755_v20 = vld [vmem:[%s5935_s1 + $0xb0] sm:$0xff]  }
  0x16   :  { %2073 = vmatpush1.bf16.msra.mxu1 %v4721_v11  ;;  %v4752_v8 = vld [vmem:[%s5935_s1 + $0x1a0] sm:$0xff]   ;;  %v4756_v21 = vld [vmem:[%s5935_s1 + $0x1b0] sm:$0xff]  }
  0x17   :  { %2651 = vmatpush1.bf16.msra.mxu0 %v4722_v12  ;;  %2074 = vmatprep.subr.bf16.mxu1 %v4775_v0  ;;  %v46_v10 = vld [vmem:[%s5936_s0 + $0x100] sm:$0xff]  ;;  %v48_v12 = vld [vmem:[%s5936_s0 + $0x110] sm:$0xff] }
  0x18   :  { %2652 = vmatprep.subr.bf16.mxu0 %v4775_v0  ;;  %v50_v11 = vld [vmem:[%s5936_s0 + $0x120] sm:$0xff]  ;;  %v56_v25 = vld [vmem:[%s5936_s0 + $0x150] sm:$0xff] }
  0x19   :  { %v54_v22 = vld [vmem:[%s5936_s0 + $0x140] sm:$0xff]  ;;  %v76_v49 = vld [vmem:[%s5936_s0 + $0x1f0] sm:$0xff] }
  0x1a   :  { %2075 = vmatpush1.bf16.msra.mxu1 %v4723_v13  ;;  %v52_v13 = vld [vmem:[%s5936_s0 + $0x130] sm:$0xff]  ;;  %v58_v23 = vld [vmem:[%s5936_s0 + $0x160] sm:$0xff] }
  0x1b   :  { %2653 = vmatpush1.bf16.msra.mxu0 %v4724_v14  ;;  %2076 = vmatprep.subr.bf16.mxu1 %v4775_v0  ;;  %v4753_v14 = vld [vmem:[%s5935_s1 + $0xa8] sm:$0xff]   ;;  %v3788_v19 = vcombine.high %v48_v12, %v52_v13  ;;  %v3791_v40 = vcombine.low %v54_v22, %v58_v23 }
  0x1c   :  { %2654 = vmatprep.subr.bf16.mxu0 %v4775_v0 }
  0x1e   :  { %2077 = vmatpush1.bf16.msra.mxu1 %v4725_v15  ;;  %v4754_v15 = vld [vmem:[%s5935_s1 + $0x1a8] sm:$0xff]  }
  0x1f   :  { %2655 = vmatpush1.bf16.msra.mxu0 %v4726_v16  ;;  %2078 = vmatprep.subr.bf16.mxu1 %v4775_v0  ;;  %v3775_v16 = vcombine.low %v38_v61, %v42_v62 }
  0x20   :  { %2656 = vmatprep.subr.bf16.mxu0 %v4775_v0 }
  0x22   :  { %2079 = vmatpush1.bf16.msra.mxu1 %v4727_v17  ;;  %v3779_v17 = vcombine.low %v40_v63, %v44_v1  ;;  %v86_v1 = vld [vmem:[%s5936_s0 + $0x240] sm:$0xff] }
  0x23   :  { %2657 = vmatpush1.bf16.msra.mxu0 %v4728_v18  ;;  %2080 = vmatprep.subr.bf16.mxu1 %v4775_v0  ;;  %v3784_v18 = vcombine.high %v46_v10, %v50_v11 }
  0x24   :  { %2658 = vmatprep.subr.bf16.mxu0 %v4775_v0 }
  0x26   :  { %2081 = vmatpush1.bf16.msra.mxu1 %v4729_v24  ;;  %v4757_v24 = vld [vmem:[%s5935_s1 + $0xb8] sm:$0xff]  }
  0x27   :  { %2659 = vmatpush1.bf16.msra.mxu0 %v4730_v26  ;;  %2082 = vmatprep.subr.bf16.mxu1 %v4775_v0  ;;  %v60_v26 = vld [vmem:[%s5936_s0 + $0x170] sm:$0xff] }
  0x28   :  { %2660 = vmatprep.subr.bf16.mxu0 %v4775_v0  ;;  %v3795_v41 = vcombine.low %v56_v25, %v60_v26 }
  0x2a   :  { %2083 = vmatpush1.bf16.msra.mxu1 %v4731_v27  ;;  %v4758_v27 = vld [vmem:[%s5935_s1 + $0x1b8] sm:$0xff]  }
  0x2b   :  { %2661 = vmatpush1.bf16.msra.mxu0 %v4732_v28  ;;  %2084 = vmatprep.subr.bf16.mxu1 %v4775_v0  ;;  %v3783_v28 = vcombine.low %v46_v10, %v50_v11  ;;  %v4768_v10 = vld [vmem:[%s5935_s1 + $0x1e0] sm:$0xff]  }
  0x2c   :  { %2662 = vmatprep.subr.bf16.mxu0 %v4775_v0  ;;  %v94_v11 = vld [vmem:[%s5936_s0 + $0x280] sm:$0xff] }
  0x2e   :  { %2085 = vmatpush1.bf16.msra.mxu1 %v4733_v29  ;;  %v3787_v29 = vcombine.low %v48_v12, %v52_v13  ;;  %v98_v12 = vld [vmem:[%s5936_s0 + $0x2a0] sm:$0xff]  ;;  %v96_v13 = vld [vmem:[%s5936_s0 + $0x290] sm:$0xff] }
  0x2f   :  { %2663 = vmatpush1.bf16.msra.mxu0 %v4734_v30  ;;  %2086 = vmatprep.subr.bf16.mxu1 %v4775_v0  ;;  %v3792_v30 = vcombine.high %v54_v22, %v58_v23  ;;  %v108_v22 = vld [vmem:[%s5936_s0 + $0x2f0] sm:$0xff]  ;;  %v3831_v23 = vcombine.low %v94_v11, %v98_v12 }
  0x30   :  { %2664 = vmatprep.subr.bf16.mxu0 %v4775_v0 }
  0x32   :  { %2087 = vmatpush1.bf16.msra.mxu1 %v4735_v31  ;;  %v3796_v31 = vcombine.high %v56_v25, %v60_v26 }
  0x33   :  { %2665 = vmatpush1.bf16.msra.mxu0 %v4736_v32  ;;  %2088 = vmatprep.subr.bf16.mxu1 %v4775_v0  ;;  %v4759_v32 = vld [vmem:[%s5935_s1 + $0xc0] sm:$0xff]  }
  0x34   :  { %2666 = vmatprep.subr.bf16.mxu0 %v4775_v0 }
  0x36   :  { %2089 = vmatpush1.bf16.msra.mxu1 %v4737_v33  ;;  %v4760_v33 = vld [vmem:[%s5935_s1 + $0x1c0] sm:$0xff]  }
  0x37   :  { %2667 = vmatpush1.bf16.msra.mxu0 %v4738_v34  ;;  %2090 = vmatprep.subr.bf16.mxu1 %v4775_v0  ;;  %v62_v34 = vld [vmem:[%s5936_s0 + $0x180] sm:$0xff] }
  0x38   :  { %2668 = vmatprep.subr.bf16.mxu0 %v4775_v0 }
  0x3a   :  { %2091 = vmatpush1.bf16.msra.mxu1 %v4739_v35  ;;  %v66_v35 = vld [vmem:[%s5936_s0 + $0x1a0] sm:$0xff] }
  0x3b   :  { %2669 = vmatpush1.bf16.msra.mxu0 %v4740_v36  ;;  %2092 = vmatprep.subr.bf16.mxu1 %v4775_v0  ;;  %v4761_v36 = vld [vmem:[%s5935_s1 + $0xc8] sm:$0xff]   ;;  %v3799_v50 = vcombine.low %v62_v34, %v66_v35 }
  0x3c   :  { %2670 = vmatprep.subr.bf16.mxu0 %v4775_v0 }
  0x3e   :  { %2093 = vmatpush1.bf16.msra.mxu1 %v4741_v37  ;;  %v64_v37 = vld [vmem:[%s5936_s0 + $0x190] sm:$0xff] }
  0x3f   :  { %2671 = vmatpush1.bf16.msra.mxu0 %v4742_v38  ;;  %2351 = vmatprep.subr.bf16.mxu1 %v4775_v0  ;;  %v68_v38 = vld [vmem:[%s5936_s0 + $0x1b0] sm:$0xff] }
  0x40   :  { %2929 = vmatprep.subr.bf16.mxu0 %v4775_v0  ;;  %v3804_v43 = vcombine.high %v64_v37, %v68_v38 }
  0x41   :  { %2095 = vmatmul.mubr.bf16.vlgmr.msra.gmra.mrb[0].mxu1 %v3751_v42  ;;  %v3800_v42 = vcombine.high %v62_v34, %v66_v35 }
  0x42   :  { %2673 = vmatmul.mubr.bf16.vlgmr.msra.gmra.mrb[0].mxu0 %v3755_v44  ;;  %2352 = vmatpush1.bf16.msra.mxu1 %v4743_v45  ;;  %v4763_v44 = vld [vmem:[%s5935_s1 + $0xd0] sm:$0xff]  }
  0x43   :  { %2930 = vmatpush1.bf16.msra.mxu0 %v4744_v46  ;;  %2102 = vmatprep.mubr.bf16.mxu1 %v3760_v47  ;;  %v4764_v45 = vld [vmem:[%s5935_s1 + $0x1d0] sm:$0xff]   ;;  %v70_v46 = vld [vmem:[%s5936_s0 + $0x1c0] sm:$0xff] }
  0x44   :  { %2680 = vmatprep.mubr.bf16.mxu0 %v3764_v48  ;;  %2353 = vmatprep.subr.bf16.mxu1 %v4775_v0  ;;  %v74_v47 = vld [vmem:[%s5936_s0 + $0x1e0] sm:$0xff]  ;;  %v72_v48 = vld [vmem:[%s5936_s0 + $0x1d0] sm:$0xff] }
  0x45   :  { %2931 = vmatprep.subr.bf16.mxu0 %v4775_v0  ;;  %v3812_v53 = vcombine.high %v72_v48, %v76_v49  ;;  %v3811_v61 = vcombine.low %v72_v48, %v76_v49  ;;  %v130_v48 = vld [vmem:[%s5936_s0 + $0x3a0] sm:$0xff]  ;;  %v128_v49 = vld [vmem:[%s5936_s0 + $0x390] sm:$0xff] }
  0x46   :  { %2354 = vmatpush1.bf16.msra.mxu1 %v4745_v51  ;;  %v3803_v51 = vcombine.low %v64_v37, %v68_v38  ;;  %v118_v37 = vld [vmem:[%s5936_s0 + $0x340] sm:$0xff] }
  0x47   :  { %2932 = vmatpush1.bf16.msra.mxu0 %v4746_v52  ;;  %2355 = vmatprep.subr.bf16.mxu1 %v4775_v0  ;;  %v3808_v52 = vcombine.high %v70_v46, %v74_v47  ;;  %v122_v38 = vld [vmem:[%s5936_s0 + $0x360] sm:$0xff] }
  0x48   :  { %2933 = vmatprep.subr.bf16.mxu0 %v4775_v0 }
  0x49   :  { %2103 = vmatmul.mubr.bf16.gmra.mrb[4].mxu1 %v3759_v55  ;;  %v4766_v55 = vld [vmem:[%s5935_s1 + $0x1d8] sm:$0xff]  }
  0x4a   :  { %2681 = vmatmul.mubr.bf16.gmra.mrb[4].mxu0 %v3763_v56  ;;  %2110 = vmatprep.mubr.bf16.mxu1 %v3768_v57  ;;  %v78_v56 = vld [vmem:[%s5936_s0 + $0x200] sm:$0xff] }
  0x4b   :  { %2688 = vmatprep.mubr.bf16.mxu0 %v3772_v58  ;;  %2356 = vmatpush1.bf16.msra.mxu1 %v4747_v59  ;;  %v82_v57 = vld [vmem:[%s5936_s0 + $0x220] sm:$0xff]  ;;  %v80_v58 = vld [vmem:[%s5936_s0 + $0x210] sm:$0xff] }
  0x4c   :  { %2934 = vmatpush1.bf16.msra.mxu0 %v4748_v60  ;;  %2357 = vmatprep.subr.bf16.mxu1 %v4775_v0  ;;  %v84_v59 = vld [vmem:[%s5936_s0 + $0x230] sm:$0xff]  ;;  %v3807_v60 = vcombine.low %v70_v46, %v74_v47  ;;  %v3816_v62 = vcombine.high %v78_v56, %v82_v57  ;;  %v126_v47 = vld [vmem:[%s5936_s0 + $0x380] sm:$0xff] }
  0x4d   :  { %2935 = vmatprep.subr.bf16.mxu0 %v4775_v0  ;;  %v3820_v63 = vcombine.high %v80_v58, %v84_v59  ;;  %v4772_v46 = vld [vmem:[%s5935_s1 + $0x1f0] sm:$0xff]  }
  0x4f   :  { %2358 = vmatpush1.bf16.msra.mxu1 %v4749_v2  ;;  %v90_v2 = vld [vmem:[%s5936_s0 + $0x260] sm:$0xff] }
  0x50   :  { %2936 = vmatpush1.bf16.msra.mxu0 %v4750_v3  ;;  %2359 = vmatprep.subr.bf16.mxu1 %v4775_v0  ;;  %v88_v3 = vld [vmem:[%s5936_s0 + $0x250] sm:$0xff] }
  0x51   :  { %2111 = vmatmul.mubr.bf16.gmra.mrb[8].mxu1 %v3767_v4  ;;  %2937 = vmatprep.subr.bf16.mxu0 %v4775_v0  ;;  %v92_v4 = vld [vmem:[%s5936_s0 + $0x270] sm:$0xff] }
  0x52   :  { %2689 = vmatmul.mubr.bf16.gmra.mrb[8].mxu0 %v3771_v6  ;;  %2118 = vmatprep.mubr.bf16.mxu1 %v3776_v7  ;;  %v3819_v6 = vcombine.low %v80_v58, %v84_v59  ;;  %v3824_v7 = vcombine.high %v86_v1, %v90_v2  ;;  %v3863_v58 = vcombine.low %v126_v47, %v130_v48 }
  0x53   :  { %2696 = vmatprep.mubr.bf16.mxu0 %v3780_v9  ;;  %2360 = vmatpush1.bf16.msra.mxu1 %v4751_v5  ;;  %v3815_v5 = vcombine.low %v78_v56, %v82_v57  ;;  %v4767_v9 = vld [vmem:[%s5935_s1 + $0xe0] sm:$0xff]   ;;  %v136_v57 = vld [vmem:[%s5936_s0 + $0x3d0] sm:$0xff] }
  0x54   :  { %2938 = vmatpush1.bf16.msra.mxu0 %v4752_v8  ;;  %2361 = vmatprep.subr.bf16.mxu1 %v4775_v0  ;;  %v3828_v8 = vcombine.high %v88_v3, %v92_v4  ;;  %v138_v56 = vld [vmem:[%s5936_s0 + $0x3e0] sm:$0xff] }
  0x55   :  { %2939 = vmatprep.subr.bf16.mxu0 %v4775_v0 }
  0x57   :  { %2362 = vmatpush1.bf16.msra.mxu1 %v4753_v14  ;;  %v100_v14 = vld [vmem:[%s5936_s0 + $0x2b0] sm:$0xff] }
  0x58   :  { %2940 = vmatpush1.bf16.msra.mxu0 %v4754_v15  ;;  %2363 = vmatprep.subr.bf16.mxu1 %v4775_v0  ;;  %v3823_v15 = vcombine.low %v86_v1, %v90_v2  ;;  %v142_v1 = vld [vmem:[%s5936_s0 + $0x400] sm:$0xff] }
  0x59   :  { %2119 = vmatmul.mubr.bf16.gmra.mrb[12].mxu1 %v3775_v16  ;;  %2941 = vmatprep.subr.bf16.mxu0 %v4775_v0  ;;  %v3827_v16 = vcombine.low %v88_v3, %v92_v4  ;;  %v146_v2 = vld [vmem:[%s5936_s0 + $0x420] sm:$0xff]  ;;  %v144_v3 = vld [vmem:[%s5936_s0 + $0x410] sm:$0xff] }
  0x5a   :  { %2697 = vmatmul.mubr.bf16.gmra.mrb[12].mxu0 %v3779_v17  ;;  %2126 = vmatprep.mubr.bf16.mxu1 %v3784_v18  ;;  %v3832_v17 = vcombine.high %v94_v11, %v98_v12  ;;  %v3836_v18 = vcombine.high %v96_v13, %v100_v14  ;;  %v148_v4 = vld [vmem:[%s5936_s0 + $0x430] sm:$0xff] }
  0x5b   :  { %2704 = vmatprep.mubr.bf16.mxu0 %v3788_v19  ;;  %2364 = vmatpush1.bf16.msra.mxu1 %v4755_v20  ;;  %v102_v19 = vld [vmem:[%s5936_s0 + $0x2c0] sm:$0xff]  ;;  %v152_v11 = vld [vmem:[%s5936_s0 + $0x450] sm:$0xff] }
  0x5c   :  { %2942 = vmatpush1.bf16.msra.mxu0 %v4756_v21  ;;  %2365 = vmatprep.subr.bf16.mxu1 %v4775_v0  ;;  %v106_v20 = vld [vmem:[%s5936_s0 + $0x2e0] sm:$0xff]  ;;  %v104_v21 = vld [vmem:[%s5936_s0 + $0x2d0] sm:$0xff] }
  0x5d   :  { %2943 = vmatprep.subr.bf16.mxu0 %v4775_v0  ;;  %v3840_v25 = vcombine.high %v102_v19, %v106_v20  ;;  %v3844_v26 = vcombine.high %v104_v21, %v108_v22  ;;  %v3843_v34 = vcombine.low %v104_v21, %v108_v22  ;;  %v156_v12 = vld [vmem:[%s5936_s0 + $0x470] sm:$0xff] }
  0x5e   :  { %v3891_v22 = vcombine.low %v152_v11, %v156_v12 }
  0x5f   :  { %2366 = vmatpush1.bf16.msra.mxu1 %v4757_v24  ;;  %v3835_v24 = vcombine.low %v96_v13, %v100_v14  ;;  %v3879_v13 = vcombine.low %v142_v1, %v146_v2  ;;  %v3883_v14 = vcombine.low %v144_v3, %v148_v4 }
  0x60   :  { %2944 = vmatpush1.bf16.msra.mxu0 %v4758_v27  ;;  %2367 = vmatprep.subr.bf16.mxu1 %v4775_v0  ;;  %v4769_v27 = vld [vmem:[%s5935_s1 + $0xe8] sm:$0xff]  }
  0x61   :  { %2127 = vmatmul.mubr.bf16.gmra.mrb[16].mxu1 %v3783_v28  ;;  %2945 = vmatprep.subr.bf16.mxu0 %v4775_v0  ;;  %v4770_v28 = vld [vmem:[%s5935_s1 + $0x1e8] sm:$0xff]  }
  0x62   :  { %2705 = vmatmul.mubr.bf16.gmra.mrb[16].mxu0 %v3787_v29  ;;  %2134 = vmatprep.mubr.bf16.mxu1 %v3792_v30  ;;  %v110_v29 = vld [vmem:[%s5936_s0 + $0x300] sm:$0xff] }
  0x63   :  { %2712 = vmatprep.mubr.bf16.mxu0 %v3796_v31  ;;  %2368 = vmatpush1.bf16.msra.mxu1 %v4759_v32  ;;  %v114_v30 = vld [vmem:[%s5936_s0 + $0x320] sm:$0xff]  ;;  %v112_v31 = vld [vmem:[%s5936_s0 + $0x310] sm:$0xff] }
  0x64   :  { %2946 = vmatpush1.bf16.msra.mxu0 %v4760_v33  ;;  %2369 = vmatprep.subr.bf16.mxu1 %v4775_v0  ;;  %v116_v32 = vld [vmem:[%s5936_s0 + $0x330] sm:$0xff]  ;;  %v3839_v33 = vcombine.low %v102_v19, %v106_v20  ;;  %v3848_v35 = vcombine.high %v110_v29, %v114_v30 }
  0x65   :  { %2947 = vmatprep.subr.bf16.mxu0 %v4775_v0  ;;  %v160_v19 = vld [vmem:[%s5936_s0 + $0x490] sm:$0xff] }
  0x66   :  { %v164_v20 = vld [vmem:[%s5936_s0 + $0x4b0] sm:$0xff] }
  0x67   :  { %2370 = vmatpush1.bf16.msra.mxu1 %v4761_v36  ;;  %v3852_v36 = vcombine.high %v112_v31, %v116_v32 }
  0x68   :  { %2948 = vmatpush1.bf16.msra.mxu0 %v4762_v39  ;;  %2371 = vmatprep.subr.bf16.mxu1 %v4775_v0  ;;  %v120_v39 = vld [vmem:[%s5936_s0 + $0x350] sm:$0xff] }
  0x69   :  { %2135 = vmatmul.mubr.bf16.gmra.mrb[20].mxu1 %v3791_v40  ;;  %2949 = vmatprep.subr.bf16.mxu0 %v4775_v0  ;;  %v124_v40 = vld [vmem:[%s5936_s0 + $0x370] sm:$0xff] }
  0x6a   :  { %2713 = vmatmul.mubr.bf16.gmra.mrb[20].mxu0 %v3795_v41  ;;  %2142 = vmatprep.mubr.bf16.mxu1 %v3800_v42  ;;  %v3847_v41 = vcombine.low %v110_v29, %v114_v30  ;;  %v3851_v42 = vcombine.low %v112_v31, %v116_v32  ;;  %v3899_v30 = vcombine.low %v160_v19, %v164_v20 }
  0x6b   :  { %2720 = vmatprep.mubr.bf16.mxu0 %v3804_v43  ;;  %2372 = vmatpush1.bf16.msra.mxu1 %v4763_v44  ;;  %v3856_v43 = vcombine.high %v118_v37, %v122_v38  ;;  %v3860_v44 = vcombine.high %v120_v39, %v124_v40 }
  0x6c   :  { %2950 = vmatpush1.bf16.msra.mxu0 %v4764_v45  ;;  %2373 = vmatprep.subr.bf16.mxu1 %v4775_v0  ;;  %v4771_v45 = vld [vmem:[%s5935_s1 + $0xf0] sm:$0xff]  }
  0x6d   :  { %2951 = vmatprep.subr.bf16.mxu0 %v4775_v0 }
  0x6f   :  { %2374 = vmatpush1.bf16.msra.mxu1 %v4765_v54 }
  0x70   :  { %2952 = vmatpush1.bf16.msra.mxu0 %v4766_v55  ;;  %2375 = vmatprep.subr.bf16.mxu1 %v4775_v0  ;;  %v134_v55 = vld [vmem:[%s5936_s0 + $0x3c0] sm:$0xff] }
  0x71   :  { %2143 = vmatmul.mubr.bf16.gmra.mrb[24].mxu1 %v3799_v50  ;;  %2953 = vmatprep.subr.bf16.mxu0 %v4775_v0  ;;  %v132_v50 = vld [vmem:[%s5936_s0 + $0x3b0] sm:$0xff] }
  0x72   :  { %2721 = vmatmul.mubr.bf16.gmra.mrb[24].mxu0 %v3803_v51  ;;  %2150 = vmatprep.mubr.bf16.mxu1 %v3808_v52  ;;  %v3855_v51 = vcombine.low %v118_v37, %v122_v38  ;;  %v3859_v52 = vcombine.low %v120_v39, %v124_v40  ;;  %v3868_v54 = vcombine.high %v128_v49, %v132_v50 }
  0x73   :  { %2728 = vmatprep.mubr.bf16.mxu0 %v3812_v53  ;;  %2376 = vmatpush1.bf16.msra.mxu1 %v4767_v9  ;;  %v3864_v53 = vcombine.high %v126_v47, %v130_v48  ;;  %v3867_v59 = vcombine.low %v128_v49, %v132_v50  ;;  %v150_v9 = vld [vmem:[%s5936_s0 + $0x440] sm:$0xff] }
  0x74   :  { %2954 = vmatpush1.bf16.msra.mxu0 %v4768_v10  ;;  %2377 = vmatprep.subr.bf16.mxu1 %v4775_v0  ;;  %v154_v10 = vld [vmem:[%s5936_s0 + $0x460] sm:$0xff] }
  0x75   :  { %2955 = vmatprep.subr.bf16.mxu0 %v4775_v0  ;;  %v3887_v21 = vcombine.low %v150_v9, %v154_v10  ;;  %v190_v49 = vld [vmem:[%s5936_s0 + $0x580] sm:$0xff] }
  0x76   :  { %v194_v50 = vld [vmem:[%s5936_s0 + $0x5a0] sm:$0xff] }
  0x77   :  { %2378 = vmatpush1.bf16.msra.mxu1 %v4769_v27  ;;  %v168_v27 = vld [vmem:[%s5936_s0 + $0x4d0] sm:$0xff] }
  0x78   :  { %2956 = vmatpush1.bf16.msra.mxu0 %v4770_v28  ;;  %2379 = vmatprep.subr.bf16.mxu1 %v4775_v0  ;;  %v172_v28 = vld [vmem:[%s5936_s0 + $0x4f0] sm:$0xff] }
  0x79   :  { %2151 = vmatmul.mubr.bf16.gmra.mrb[28].mxu1 %v3807_v60  ;;  %2957 = vmatprep.subr.bf16.mxu0 %v4775_v0  ;;  %v3872_v60 = vcombine.high %v134_v55, %v138_v56  ;;  %v3908_v32 = vcombine.high %v168_v27, %v172_v28  ;;  %v3907_v38 = vcombine.low %v168_v27, %v172_v28  ;;  %v232_v27 = vld [vmem:[%s5936_s0 + $0x6d0] sm:$0xff] }
  0x7a   :  { %2729 = vmatmul.mubr.bf16.gmra.mrb[28].mxu0 %v3811_v61  ;;  %2158 = vmatprep.mubr.bf16.mxu1 %v3816_v62  ;;  %v4773_v62 = vld [vmem:[%s5935_s1 + $0xf8] sm:$0xff]   ;;  %v236_v28 = vld [vmem:[%s5936_s0 + $0x6f0] sm:$0xff] }
  0x7b   :  { %2736 = vmatprep.mubr.bf16.mxu0 %v3820_v63  ;;  %2380 = vmatpush1.bf16.msra.mxu1 %v4771_v45  ;;  %v4774_v63 = vld [vmem:[%s5935_s1 + $0x1f8] sm:$0xff]  }
  0x7c   :  { %2958 = vmatpush1.bf16.msra.mxu0 %v4772_v46  ;;  %2381 = vmatprep.subr.bf16.mxu1 %v4775_v0 }
  0x7d   :  { %2959 = vmatprep.subr.bf16.mxu0 %v4775_v0  ;;  %v140_v0 = vld [vmem:[%s5936_s0 + $0x3f0] sm:$0xff] }
  0x7e   :  { %v3876_v61 = vcombine.high %v136_v57, %v140_v0 }
  0x7f   :  { %2382 = vmatpush1.bf16.msra.mxu1 %v4773_v62 }
  0x80   :  { %2960 = vmatpush1.bf16.msra.mxu0 %v4774_v63 }
  0x81   :  { %2159 = vmatmul.mubr.bf16.gmra.mrb[32].mxu1 %v3815_v5  ;;  %v3871_v5 = vcombine.low %v134_v55, %v138_v56  ;;  %v3928_v55 = vcombine.high %v190_v49, %v194_v50 }
  0x82   :  { %2737 = vmatmul.mubr.bf16.gmra.mrb[32].mxu0 %v3819_v6  ;;  %2166 = vmatprep.mubr.bf16.mxu1 %v3824_v7  ;;  %v3875_v6 = vcombine.low %v136_v57, %v140_v0  ;;  %v3880_v7 = vcombine.high %v142_v1, %v146_v2  ;;  %v198_v57 = vld [vmem:[%s5936_s0 + $0x5c0] sm:$0xff] }
  0x83   :  { %2744 = vmatprep.mubr.bf16.mxu0 %v3828_v8  ;;  %v3884_v8 = vcombine.high %v144_v3, %v148_v4  ;;  %v202_v0 = vld [vmem:[%s5936_s0 + $0x5e0] sm:$0xff]  ;;  %v208_v3 = vld [vmem:[%s5936_s0 + $0x610] sm:$0xff] }
  0x84   :  { %v3936_v62 = vcombine.high %v198_v57, %v202_v0  ;;  %v206_v1 = vld [vmem:[%s5936_s0 + $0x600] sm:$0xff]  ;;  %v212_v4 = vld [vmem:[%s5936_s0 + $0x630] sm:$0xff] }
  0x85   :  { %v210_v2 = vld [vmem:[%s5936_s0 + $0x620] sm:$0xff] }
  0x89   :  { %2167 = vmatmul.mubr.bf16.gmra.mrb[36].mxu1 %v3823_v15  ;;  %v3888_v15 = vcombine.high %v150_v9, %v154_v10  ;;  %v214_v9 = vld [vmem:[%s5936_s0 + $0x640] sm:$0xff] }
  0x8a   :  { %2745 = vmatmul.mubr.bf16.gmra.mrb[36].mxu0 %v3827_v16  ;;  %2174 = vmatprep.mubr.bf16.mxu1 %v3832_v17  ;;  %v3892_v16 = vcombine.high %v152_v11, %v156_v12  ;;  %v158_v17 = vld [vmem:[%s5936_s0 + $0x480] sm:$0xff]  ;;  %v216_v11 = vld [vmem:[%s5936_s0 + $0x650] sm:$0xff] }
  0x8b   :  { %2752 = vmatprep.mubr.bf16.mxu0 %v3836_v18  ;;  %v162_v18 = vld [vmem:[%s5936_s0 + $0x4a0] sm:$0xff]  ;;  %v220_v12 = vld [vmem:[%s5936_s0 + $0x670] sm:$0xff] }
  0x8c   :  { %v3895_v29 = vcombine.low %v158_v17, %v162_v18  ;;  %v218_v10 = vld [vmem:[%s5936_s0 + $0x660] sm:$0xff] }
  0x91   :  { %2175 = vmatmul.mubr.bf16.gmra.mrb[40].mxu1 %v3831_v23  ;;  %v3896_v23 = vcombine.high %v158_v17, %v162_v18  ;;  %v222_v17 = vld [vmem:[%s5936_s0 + $0x680] sm:$0xff] }
  0x92   :  { %2753 = vmatmul.mubr.bf16.gmra.mrb[40].mxu0 %v3835_v24  ;;  %2182 = vmatprep.mubr.bf16.mxu1 %v3840_v25  ;;  %v3900_v24 = vcombine.high %v160_v19, %v164_v20  ;;  %v166_v25 = vld [vmem:[%s5936_s0 + $0x4c0] sm:$0xff]  ;;  %v224_v19 = vld [vmem:[%s5936_s0 + $0x690] sm:$0xff] }
  0x93   :  { %2760 = vmatprep.mubr.bf16.mxu0 %v3844_v26  ;;  %v170_v26 = vld [vmem:[%s5936_s0 + $0x4e0] sm:$0xff]  ;;  %v228_v20 = vld [vmem:[%s5936_s0 + $0x6b0] sm:$0xff] }
  0x94   :  { %v3904_v31 = vcombine.high %v166_v25, %v170_v26  ;;  %v3903_v37 = vcombine.low %v166_v25, %v170_v26  ;;  %v226_v18 = vld [vmem:[%s5936_s0 + $0x6a0] sm:$0xff] }
  0x95   :  { %v230_v25 = vld [vmem:[%s5936_s0 + $0x6c0] sm:$0xff] }
  0x96   :  { %v234_v26 = vld [vmem:[%s5936_s0 + $0x6e0] sm:$0xff] }
  0x99   :  { %2183 = vmatmul.mubr.bf16.gmra.mrb[44].mxu1 %v3839_v33  ;;  %v174_v33 = vld [vmem:[%s5936_s0 + $0x500] sm:$0xff] }
  0x9a   :  { %2761 = vmatmul.mubr.bf16.gmra.mrb[44].mxu0 %v3843_v34  ;;  %2190 = vmatprep.mubr.bf16.mxu1 %v3848_v35  ;;  %v178_v34 = vld [vmem:[%s5936_s0 + $0x520] sm:$0xff]  ;;  %v176_v35 = vld [vmem:[%s5936_s0 + $0x510] sm:$0xff] }
  0x9b   :  { %2768 = vmatprep.mubr.bf16.mxu0 %v3852_v36  ;;  %v180_v36 = vld [vmem:[%s5936_s0 + $0x530] sm:$0xff]  ;;  %v3912_v39 = vcombine.high %v174_v33, %v178_v34  ;;  %v3911_v45 = vcombine.low %v174_v33, %v178_v34  ;;  %v238_v33 = vld [vmem:[%s5936_s0 + $0x700] sm:$0xff] }
  0x9c   :  { %v3916_v40 = vcombine.high %v176_v35, %v180_v36  ;;  %v3915_v46 = vcombine.low %v176_v35, %v180_v36  ;;  %v242_v34 = vld [vmem:[%s5936_s0 + $0x720] sm:$0xff]  ;;  %v240_v35 = vld [vmem:[%s5936_s0 + $0x710] sm:$0xff] }
  0x9d   :  { %v244_v36 = vld [vmem:[%s5936_s0 + $0x730] sm:$0xff] }
  0xa1   :  { %2191 = vmatmul.mubr.bf16.gmra.mrb[48].mxu1 %v3847_v41  ;;  %v182_v41 = vld [vmem:[%s5936_s0 + $0x540] sm:$0xff] }
  0xa2   :  { %2769 = vmatmul.mubr.bf16.gmra.mrb[48].mxu0 %v3851_v42  ;;  %2198 = vmatprep.mubr.bf16.mxu1 %v3856_v43  ;;  %v186_v42 = vld [vmem:[%s5936_s0 + $0x560] sm:$0xff]  ;;  %v184_v43 = vld [vmem:[%s5936_s0 + $0x550] sm:$0xff] }
  0xa3   :  { %2776 = vmatprep.mubr.bf16.mxu0 %v3860_v44  ;;  %v188_v44 = vld [vmem:[%s5936_s0 + $0x570] sm:$0xff]  ;;  %v3920_v47 = vcombine.high %v182_v41, %v186_v42 }
  0xa4   :  { %v3924_v48 = vcombine.high %v184_v43, %v188_v44 }
  0xa9   :  { %2199 = vmatmul.mubr.bf16.gmra.mrb[52].mxu1 %v3855_v51  ;;  %v192_v51 = vld [vmem:[%s5936_s0 + $0x590] sm:$0xff] }
  0xaa   :  { %2777 = vmatmul.mubr.bf16.gmra.mrb[52].mxu0 %v3859_v52  ;;  %2206 = vmatprep.mubr.bf16.mxu1 %v3864_v53  ;;  %v196_v52 = vld [vmem:[%s5936_s0 + $0x5b0] sm:$0xff]  ;;  %v3919_v53 = vcombine.low %v182_v41, %v186_v42  ;;  %v246_v41 = vld [vmem:[%s5936_s0 + $0x740] sm:$0xff] }
  0xab   :  { %2784 = vmatprep.mubr.bf16.mxu0 %v3868_v54  ;;  %v3923_v54 = vcombine.low %v184_v43, %v188_v44  ;;  %v3932_v56 = vcombine.high %v192_v51, %v196_v52  ;;  %v250_v42 = vld [vmem:[%s5936_s0 + $0x760] sm:$0xff]  ;;  %v248_v43 = vld [vmem:[%s5936_s0 + $0x750] sm:$0xff] }
  0xac   :  { %v252_v44 = vld [vmem:[%s5936_s0 + $0x770] sm:$0xff] }
  0xb1   :  { %2207 = vmatmul.mubr.bf16.gmra.mrb[56].mxu1 %v3863_v58  ;;  %v200_v58 = vld [vmem:[%s5936_s0 + $0x5d0] sm:$0xff] }
  0xb2   :  { %2785 = vmatmul.mubr.bf16.gmra.mrb[56].mxu0 %v3867_v59  ;;  %2214 = vmatprep.mubr.bf16.mxu1 %v3872_v60  ;;  %v204_v59 = vld [vmem:[%s5936_s0 + $0x5f0] sm:$0xff]  ;;  %v3927_v60 = vcombine.low %v190_v49, %v194_v50  ;;  %v254_v49 = vld [vmem:[%s5936_s0 + $0x780] sm:$0xff] }
  0xb3   :  { %2792 = vmatprep.mubr.bf16.mxu0 %v3876_v61  ;;  %v3931_v61 = vcombine.low %v192_v51, %v196_v52  ;;  %v3940_v63 = vcombine.high %v200_v58, %v204_v59  ;;  %v258_v50 = vld [vmem:[%s5936_s0 + $0x7a0] sm:$0xff]  ;;  %v256_v51 = vld [vmem:[%s5936_s0 + $0x790] sm:$0xff] }
  0xb4   :  { %v260_v52 = vld [vmem:[%s5936_s0 + $0x7b0] sm:$0xff] }
  0xb9   :  { %2215 = vmatmul.mubr.bf16.gmra.mrb[60].mxu1 %v3871_v5  ;;  %v3935_v5 = vcombine.low %v198_v57, %v202_v0  ;;  %v262_v57 = vld [vmem:[%s5936_s0 + $0x7c0] sm:$0xff] }
  0xba   :  { %2793 = vmatmul.mubr.bf16.gmra.mrb[60].mxu0 %v3875_v6  ;;  %2222 = vmatprep.mubr.bf16.mxu1 %v3880_v7  ;;  %v3939_v6 = vcombine.low %v200_v58, %v204_v59  ;;  %v3944_v7 = vcombine.high %v206_v1, %v210_v2  ;;  %v266_v0 = vld [vmem:[%s5936_s0 + $0x7e0] sm:$0xff]  ;;  %v264_v58 = vld [vmem:[%s5936_s0 + $0x7d0] sm:$0xff] }
  0xbb   :  { %2800 = vmatprep.mubr.bf16.mxu0 %v3884_v8  ;;  %v3948_v8 = vcombine.high %v208_v3, %v212_v4  ;;  %v268_v59 = vld [vmem:[%s5936_s0 + $0x7f0] sm:$0xff] }
  0xc1   :  { %2223 = vmatmul.mubr.bf16.gmra.mrb[64].mxu1 %v3879_v13  ;;  %v3943_v13 = vcombine.low %v206_v1, %v210_v2  ;;  %v15_v1 = vld [vmem:[%s5936_s0 + $0x8] sm:$0xff] }
  0xc2   :  { %2801 = vmatmul.mubr.bf16.gmra.mrb[64].mxu0 %v3883_v14  ;;  %2230 = vmatprep.mubr.bf16.mxu1 %v3888_v15  ;;  %v3947_v14 = vcombine.low %v208_v3, %v212_v4  ;;  %v3952_v15 = vcombine.high %v214_v9, %v218_v10  ;;  %v19_v2 = vld [vmem:[%s5936_s0 + $0x28] sm:$0xff]  ;;  %v17_v3 = vld [vmem:[%s5936_s0 + $0x18] sm:$0xff] }
  0xc3   :  { %2808 = vmatprep.mubr.bf16.mxu0 %v3892_v16  ;;  %v3956_v16 = vcombine.high %v216_v11, %v220_v12  ;;  %v21_v4 = vld [vmem:[%s5936_s0 + $0x38] sm:$0xff] }
  0xc9   :  { %2231 = vmatmul.mubr.bf16.gmra.mrb[68].mxu1 %v3887_v21  ;;  %v3951_v21 = vcombine.low %v214_v9, %v218_v10  ;;  %v23_v9 = vld [vmem:[%s5936_s0 + $0x48] sm:$0xff] }
  0xca   :  { %2809 = vmatmul.mubr.bf16.gmra.mrb[68].mxu0 %v3891_v22  ;;  %2238 = vmatprep.mubr.bf16.mxu1 %v3896_v23  ;;  %v3955_v22 = vcombine.low %v216_v11, %v220_v12  ;;  %v3960_v23 = vcombine.high %v222_v17, %v226_v18  ;;  %v27_v10 = vld [vmem:[%s5936_s0 + $0x68] sm:$0xff]  ;;  %v25_v11 = vld [vmem:[%s5936_s0 + $0x58] sm:$0xff] }
  0xcb   :  { %2816 = vmatprep.mubr.bf16.mxu0 %v3900_v24  ;;  %v3964_v24 = vcombine.high %v224_v19, %v228_v20  ;;  %v29_v12 = vld [vmem:[%s5936_s0 + $0x78] sm:$0xff] }
  0xd1   :  { %2239 = vmatmul.mubr.bf16.gmra.mrb[72].mxu1 %v3895_v29  ;;  %v3959_v29 = vcombine.low %v222_v17, %v226_v18  ;;  %v31_v17 = vld [vmem:[%s5936_s0 + $0x88] sm:$0xff] }
  0xd2   :  { %2817 = vmatmul.mubr.bf16.gmra.mrb[72].mxu0 %v3899_v30  ;;  %2246 = vmatprep.mubr.bf16.mxu1 %v3904_v31  ;;  %v3963_v30 = vcombine.low %v224_v19, %v228_v20  ;;  %v3968_v31 = vcombine.high %v230_v25, %v234_v26  ;;  %v35_v18 = vld [vmem:[%s5936_s0 + $0xa8] sm:$0xff]  ;;  %v33_v19 = vld [vmem:[%s5936_s0 + $0x98] sm:$0xff] }
  0xd3   :  { %2824 = vmatprep.mubr.bf16.mxu0 %v3908_v32  ;;  %v3972_v32 = vcombine.high %v232_v27, %v236_v28  ;;  %v37_v20 = vld [vmem:[%s5936_s0 + $0xb8] sm:$0xff] }
  0xd9   :  { %2247 = vmatmul.mubr.bf16.gmra.mrb[76].mxu1 %v3903_v37  ;;  %v3967_v37 = vcombine.low %v230_v25, %v234_v26  ;;  %v39_v25 = vld [vmem:[%s5936_s0 + $0xc8] sm:$0xff] }
  0xda   :  { %2825 = vmatmul.mubr.bf16.gmra.mrb[76].mxu0 %v3907_v38  ;;  %2254 = vmatprep.mubr.bf16.mxu1 %v3912_v39  ;;  %v3971_v38 = vcombine.low %v232_v27, %v236_v28  ;;  %v3976_v39 = vcombine.high %v238_v33, %v242_v34  ;;  %v43_v26 = vld [vmem:[%s5936_s0 + $0xe8] sm:$0xff]  ;;  %v41_v27 = vld [vmem:[%s5936_s0 + $0xd8] sm:$0xff] }
  0xdb   :  { %2832 = vmatprep.mubr.bf16.mxu0 %v3916_v40  ;;  %v3980_v40 = vcombine.high %v240_v35, %v244_v36  ;;  %v45_v28 = vld [vmem:[%s5936_s0 + $0xf8] sm:$0xff] }
  0xe1   :  { %2255 = vmatmul.mubr.bf16.gmra.mrb[80].mxu1 %v3911_v45  ;;  %v3975_v45 = vcombine.low %v238_v33, %v242_v34  ;;  %v47_v33 = vld [vmem:[%s5936_s0 + $0x108] sm:$0xff] }
  0xe2   :  { %2833 = vmatmul.mubr.bf16.gmra.mrb[80].mxu0 %v3915_v46  ;;  %2262 = vmatprep.mubr.bf16.mxu1 %v3920_v47  ;;  %v3979_v46 = vcombine.low %v240_v35, %v244_v36  ;;  %v3984_v47 = vcombine.high %v246_v41, %v250_v42  ;;  %v51_v34 = vld [vmem:[%s5936_s0 + $0x128] sm:$0xff]  ;;  %v49_v35 = vld [vmem:[%s5936_s0 + $0x118] sm:$0xff] }
  0xe3   :  { %2840 = vmatprep.mubr.bf16.mxu0 %v3924_v48  ;;  %v3988_v48 = vcombine.high %v248_v43, %v252_v44  ;;  %v53_v36 = vld [vmem:[%s5936_s0 + $0x138] sm:$0xff] }
  0xe9   :  { %2263 = vmatmul.mubr.bf16.gmra.mrb[84].mxu1 %v3919_v53  ;;  %v3983_v53 = vcombine.low %v246_v41, %v250_v42  ;;  %v55_v41 = vld [vmem:[%s5936_s0 + $0x148] sm:$0xff] }
  0xea   :  { %2841 = vmatmul.mubr.bf16.gmra.mrb[84].mxu0 %v3923_v54  ;;  %2270 = vmatprep.mubr.bf16.mxu1 %v3928_v55  ;;  %v3987_v54 = vcombine.low %v248_v43, %v252_v44  ;;  %v3992_v55 = vcombine.high %v254_v49, %v258_v50  ;;  %v59_v42 = vld [vmem:[%s5936_s0 + $0x168] sm:$0xff]  ;;  %v57_v43 = vld [vmem:[%s5936_s0 + $0x158] sm:$0xff] }
  0xeb   :  { %2848 = vmatprep.mubr.bf16.mxu0 %v3932_v56  ;;  %v3996_v56 = vcombine.high %v256_v51, %v260_v52  ;;  %v61_v44 = vld [vmem:[%s5936_s0 + $0x178] sm:$0xff] }
  0xf1   :  { %2271 = vmatmul.mubr.bf16.gmra.mrb[88].mxu1 %v3927_v60  ;;  %v3991_v60 = vcombine.low %v254_v49, %v258_v50  ;;  %v63_v49 = vld [vmem:[%s5936_s0 + $0x188] sm:$0xff] }
  0xf2   :  { %2849 = vmatmul.mubr.bf16.gmra.mrb[88].mxu0 %v3931_v61  ;;  %2278 = vmatprep.mubr.bf16.mxu1 %v3936_v62  ;;  %v3995_v61 = vcombine.low %v256_v51, %v260_v52  ;;  %v4000_v62 = vcombine.high %v262_v57, %v266_v0  ;;  %v67_v50 = vld [vmem:[%s5936_s0 + $0x1a8] sm:$0xff]  ;;  %v65_v51 = vld [vmem:[%s5936_s0 + $0x198] sm:$0xff] }
  0xf3   :  { %2856 = vmatprep.mubr.bf16.mxu0 %v3940_v63  ;;  %v4004_v63 = vcombine.high %v264_v58, %v268_v59  ;;  %v69_v52 = vld [vmem:[%s5936_s0 + $0x1b8] sm:$0xff] }
  0xf9   :  { %2279 = vmatmul.mubr.bf16.gmra.mrb[92].mxu1 %v3935_v5  ;;  %v3999_v5 = vcombine.low %v262_v57, %v266_v0  ;;  %v71_v57 = vld [vmem:[%s5936_s0 + $0x1c8] sm:$0xff] }
  0xfa   :  { %2857 = vmatmul.mubr.bf16.gmra.mrb[92].mxu0 %v3939_v6  ;;  %2286 = vmatprep.mubr.bf16.mxu1 %v3944_v7  ;;  %v4003_v6 = vcombine.low %v264_v58, %v268_v59  ;;  %v3754_v7 = vcombine.high %v15_v1, %v19_v2  ;;  %v75_v0 = vld [vmem:[%s5936_s0 + $0x1e8] sm:$0xff]  ;;  %v73_v58 = vld [vmem:[%s5936_s0 + $0x1d8] sm:$0xff] }
  0xfb   :  { %2864 = vmatprep.mubr.bf16.mxu0 %v3948_v8  ;;  %v3758_v8 = vcombine.high %v17_v3, %v21_v4  ;;  %v77_v59 = vld [vmem:[%s5936_s0 + $0x1f8] sm:$0xff] }
 0x101   :  { %2287 = vmatmul.mubr.bf16.gmra.mrb[96].mxu1 %v3943_v13  ;;  %v3753_v13 = vcombine.low %v15_v1, %v19_v2  ;;  %v79_v1 = vld [vmem:[%s5936_s0 + $0x208] sm:$0xff] }
 0x102   :  { %2865 = vmatmul.mubr.bf16.gmra.mrb[96].mxu0 %v3947_v14  ;;  %2294 = vmatprep.mubr.bf16.mxu1 %v3952_v15  ;;  %v3757_v14 = vcombine.low %v17_v3, %v21_v4  ;;  %v3762_v15 = vcombine.high %v23_v9, %v27_v10  ;;  %v83_v2 = vld [vmem:[%s5936_s0 + $0x228] sm:$0xff]  ;;  %v81_v3 = vld [vmem:[%s5936_s0 + $0x218] sm:$0xff] }
 0x103   :  { %2872 = vmatprep.mubr.bf16.mxu0 %v3956_v16  ;;  %v3766_v16 = vcombine.high %v25_v11, %v29_v12  ;;  %v85_v4 = vld [vmem:[%s5936_s0 + $0x238] sm:$0xff] }
 0x109   :  { %2295 = vmatmul.mubr.bf16.gmra.mrb[100].mxu1 %v3951_v21  ;;  %v3761_v21 = vcombine.low %v23_v9, %v27_v10  ;;  %v87_v9 = vld [vmem:[%s5936_s0 + $0x248] sm:$0xff] }
 0x10a   :  { %2873 = vmatmul.mubr.bf16.gmra.mrb[100].mxu0 %v3955_v22  ;;  %2302 = vmatprep.mubr.bf16.mxu1 %v3960_v23  ;;  %v3765_v22 = vcombine.low %v25_v11, %v29_v12  ;;  %v3770_v23 = vcombine.high %v31_v17, %v35_v18  ;;  %v91_v10 = vld [vmem:[%s5936_s0 + $0x268] sm:$0xff]  ;;  %v89_v11 = vld [vmem:[%s5936_s0 + $0x258] sm:$0xff] }
 0x10b   :  { %2880 = vmatprep.mubr.bf16.mxu0 %v3964_v24  ;;  %v3774_v24 = vcombine.high %v33_v19, %v37_v20  ;;  %v93_v12 = vld [vmem:[%s5936_s0 + $0x278] sm:$0xff] }
 0x111   :  { %2303 = vmatmul.mubr.bf16.gmra.mrb[104].mxu1 %v3959_v29  ;;  %v3769_v29 = vcombine.low %v31_v17, %v35_v18  ;;  %v95_v17 = vld [vmem:[%s5936_s0 + $0x288] sm:$0xff] }
 0x112   :  { %2881 = vmatmul.mubr.bf16.gmra.mrb[104].mxu0 %v3963_v30  ;;  %2310 = vmatprep.mubr.bf16.mxu1 %v3968_v31  ;;  %v3773_v30 = vcombine.low %v33_v19, %v37_v20  ;;  %v3778_v31 = vcombine.high %v39_v25, %v43_v26  ;;  %v99_v18 = vld [vmem:[%s5936_s0 + $0x2a8] sm:$0xff]  ;;  %v97_v19 = vld [vmem:[%s5936_s0 + $0x298] sm:$0xff] }
 0x113   :  { %2888 = vmatprep.mubr.bf16.mxu0 %v3972_v32  ;;  %v3782_v32 = vcombine.high %v41_v27, %v45_v28  ;;  %v101_v20 = vld [vmem:[%s5936_s0 + $0x2b8] sm:$0xff] }
 0x119   :  { %2311 = vmatmul.mubr.bf16.gmra.mrb[108].mxu1 %v3967_v37  ;;  %v3777_v37 = vcombine.low %v39_v25, %v43_v26  ;;  %v103_v25 = vld [vmem:[%s5936_s0 + $0x2c8] sm:$0xff] }
 0x11a   :  { %2889 = vmatmul.mubr.bf16.gmra.mrb[108].mxu0 %v3971_v38  ;;  %2318 = vmatprep.mubr.bf16.mxu1 %v3976_v39  ;;  %v3781_v38 = vcombine.low %v41_v27, %v45_v28  ;;  %v3786_v39 = vcombine.high %v47_v33, %v51_v34  ;;  %v107_v26 = vld [vmem:[%s5936_s0 + $0x2e8] sm:$0xff]  ;;  %v105_v27 = vld [vmem:[%s5936_s0 + $0x2d8] sm:$0xff] }
 0x11b   :  { %2896 = vmatprep.mubr.bf16.mxu0 %v3980_v40  ;;  %v3790_v40 = vcombine.high %v49_v35, %v53_v36  ;;  %v109_v28 = vld [vmem:[%s5936_s0 + $0x2f8] sm:$0xff] }
 0x121   :  { %2319 = vmatmul.mubr.bf16.gmra.mrb[112].mxu1 %v3975_v45  ;;  %v3785_v45 = vcombine.low %v47_v33, %v51_v34  ;;  %v111_v33 = vld [vmem:[%s5936_s0 + $0x308] sm:$0xff] }
 0x122   :  { %2897 = vmatmul.mubr.bf16.gmra.mrb[112].mxu0 %v3979_v46  ;;  %2326 = vmatprep.mubr.bf16.mxu1 %v3984_v47  ;;  %v3789_v46 = vcombine.low %v49_v35, %v53_v36  ;;  %v3794_v47 = vcombine.high %v55_v41, %v59_v42  ;;  %v115_v34 = vld [vmem:[%s5936_s0 + $0x328] sm:$0xff]  ;;  %v113_v35 = vld [vmem:[%s5936_s0 + $0x318] sm:$0xff] }
 0x123   :  { %2904 = vmatprep.mubr.bf16.mxu0 %v3988_v48  ;;  %v3798_v48 = vcombine.high %v57_v43, %v61_v44  ;;  %v117_v36 = vld [vmem:[%s5936_s0 + $0x338] sm:$0xff] }
 0x129   :  { %2327 = vmatmul.mubr.bf16.gmra.mrb[116].mxu1 %v3983_v53  ;;  %v3793_v53 = vcombine.low %v55_v41, %v59_v42  ;;  %v119_v41 = vld [vmem:[%s5936_s0 + $0x348] sm:$0xff] }
 0x12a   :  { %2905 = vmatmul.mubr.bf16.gmra.mrb[116].mxu0 %v3987_v54  ;;  %2334 = vmatprep.mubr.bf16.mxu1 %v3992_v55  ;;  %v3797_v54 = vcombine.low %v57_v43, %v61_v44  ;;  %v3802_v55 = vcombine.high %v63_v49, %v67_v50  ;;  %v123_v42 = vld [vmem:[%s5936_s0 + $0x368] sm:$0xff]  ;;  %v121_v43 = vld [vmem:[%s5936_s0 + $0x358] sm:$0xff] }
 0x12b   :  { %2912 = vmatprep.mubr.bf16.mxu0 %v3996_v56  ;;  %v3806_v56 = vcombine.high %v65_v51, %v69_v52  ;;  %v125_v44 = vld [vmem:[%s5936_s0 + $0x378] sm:$0xff] }
 0x131   :  { %2335 = vmatmul.mubr.bf16.gmra.mrb[120].mxu1 %v3991_v60  ;;  %v3801_v60 = vcombine.low %v63_v49, %v67_v50  ;;  %v127_v49 = vld [vmem:[%s5936_s0 + $0x388] sm:$0xff] }
 0x132   :  { %2913 = vmatmul.mubr.bf16.gmra.mrb[120].mxu0 %v3995_v61  ;;  %2342 = vmatprep.mubr.bf16.mxu1 %v4000_v62  ;;  %v3805_v61 = vcombine.low %v65_v51, %v69_v52  ;;  %v3810_v62 = vcombine.high %v71_v57, %v75_v0  ;;  %v131_v50 = vld [vmem:[%s5936_s0 + $0x3a8] sm:$0xff]  ;;  %v129_v51 = vld [vmem:[%s5936_s0 + $0x398] sm:$0xff] }
 0x133   :  { %2920 = vmatprep.mubr.bf16.mxu0 %v4004_v63  ;;  %v3814_v63 = vcombine.high %v73_v58, %v77_v59  ;;  %v133_v52 = vld [vmem:[%s5936_s0 + $0x3b8] sm:$0xff] }
 0x139   :  { %2343 = vmatmul.mubr.bf16.gmra.mrb[124].mxu1 %v3999_v5  ;;  %v3809_v5 = vcombine.low %v71_v57, %v75_v0  ;;  %v135_v57 = vld [vmem:[%s5936_s0 + $0x3c8] sm:$0xff] }
 0x13a   :  { %2921 = vmatmul.mubr.bf16.gmra.mrb[124].mxu0 %v4003_v6  ;;  %2383 = vmatprep.mubr.bf16.mxu1 %v3754_v7  ;;  %v3813_v6 = vcombine.low %v73_v58, %v77_v59  ;;  %v3818_v7 = vcombine.high %v79_v1, %v83_v2  ;;  %v139_v0 = vld [vmem:[%s5936_s0 + $0x3e8] sm:$0xff]  ;;  %v137_v58 = vld [vmem:[%s5936_s0 + $0x3d8] sm:$0xff] }
 0x13b   :  { %2961 = vmatprep.mubr.bf16.mxu0 %v3758_v8  ;;  %v3822_v8 = vcombine.high %v81_v3, %v85_v4  ;;  %v141_v59 = vld [vmem:[%s5936_s0 + $0x3f8] sm:$0xff] }
 0x141   :  { %2384 = vmatmul.mubr.bf16.vlgmr.msra.gmra.mrb[0].mxu1 %v3753_v13  ;;  %v3817_v13 = vcombine.low %v79_v1, %v83_v2  ;;  %v143_v1 = vld [vmem:[%s5936_s0 + $0x408] sm:$0xff] }
 0x142   :  { %2962 = vmatmul.mubr.bf16.vlgmr.msra.gmra.mrb[0].mxu0 %v3757_v14  ;;  %2391 = vmatprep.mubr.bf16.mxu1 %v3762_v15  ;;  %v3821_v14 = vcombine.low %v81_v3, %v85_v4  ;;  %v3826_v15 = vcombine.high %v87_v9, %v91_v10  ;;  %v147_v2 = vld [vmem:[%s5936_s0 + $0x428] sm:$0xff]  ;;  %v145_v3 = vld [vmem:[%s5936_s0 + $0x418] sm:$0xff] }
 0x143   :  { %2969 = vmatprep.mubr.bf16.mxu0 %v3766_v16  ;;  %v3830_v16 = vcombine.high %v89_v11, %v93_v12  ;;  %v149_v4 = vld [vmem:[%s5936_s0 + $0x438] sm:$0xff] }
 0x149   :  { %2392 = vmatmul.mubr.bf16.gmra.mrb[4].mxu1 %v3761_v21  ;;  %v3825_v21 = vcombine.low %v87_v9, %v91_v10  ;;  %v151_v9 = vld [vmem:[%s5936_s0 + $0x448] sm:$0xff] }
 0x14a   :  { %2970 = vmatmul.mubr.bf16.gmra.mrb[4].mxu0 %v3765_v22  ;;  %2399 = vmatprep.mubr.bf16.mxu1 %v3770_v23  ;;  %v3829_v22 = vcombine.low %v89_v11, %v93_v12  ;;  %v3834_v23 = vcombine.high %v95_v17, %v99_v18  ;;  %v155_v10 = vld [vmem:[%s5936_s0 + $0x468] sm:$0xff]  ;;  %v153_v11 = vld [vmem:[%s5936_s0 + $0x458] sm:$0xff] }
 0x14b   :  { %2977 = vmatprep.mubr.bf16.mxu0 %v3774_v24  ;;  %v3838_v24 = vcombine.high %v97_v19, %v101_v20  ;;  %v157_v12 = vld [vmem:[%s5936_s0 + $0x478] sm:$0xff] }
 0x151   :  { %2400 = vmatmul.mubr.bf16.gmra.mrb[8].mxu1 %v3769_v29  ;;  %v3833_v29 = vcombine.low %v95_v17, %v99_v18  ;;  %v159_v17 = vld [vmem:[%s5936_s0 + $0x488] sm:$0xff] }
 0x152   :  { %2978 = vmatmul.mubr.bf16.gmra.mrb[8].mxu0 %v3773_v30  ;;  %2407 = vmatprep.mubr.bf16.mxu1 %v3778_v31  ;;  %v3837_v30 = vcombine.low %v97_v19, %v101_v20  ;;  %v3842_v31 = vcombine.high %v103_v25, %v107_v26  ;;  %v163_v18 = vld [vmem:[%s5936_s0 + $0x4a8] sm:$0xff]  ;;  %v161_v19 = vld [vmem:[%s5936_s0 + $0x498] sm:$0xff] }
 0x153   :  { %2985 = vmatprep.mubr.bf16.mxu0 %v3782_v32  ;;  %v3846_v32 = vcombine.high %v105_v27, %v109_v28  ;;  %v165_v20 = vld [vmem:[%s5936_s0 + $0x4b8] sm:$0xff] }
 0x159   :  { %2408 = vmatmul.mubr.bf16.gmra.mrb[12].mxu1 %v3777_v37  ;;  %v3841_v37 = vcombine.low %v103_v25, %v107_v26  ;;  %v167_v25 = vld [vmem:[%s5936_s0 + $0x4c8] sm:$0xff] }
 0x15a   :  { %2986 = vmatmul.mubr.bf16.gmra.mrb[12].mxu0 %v3781_v38  ;;  %2415 = vmatprep.mubr.bf16.mxu1 %v3786_v39  ;;  %v3845_v38 = vcombine.low %v105_v27, %v109_v28  ;;  %v3850_v39 = vcombine.high %v111_v33, %v115_v34  ;;  %v171_v26 = vld [vmem:[%s5936_s0 + $0x4e8] sm:$0xff]  ;;  %v169_v27 = vld [vmem:[%s5936_s0 + $0x4d8] sm:$0xff] }
 0x15b   :  { %2993 = vmatprep.mubr.bf16.mxu0 %v3790_v40  ;;  %v3854_v40 = vcombine.high %v113_v35, %v117_v36  ;;  %v173_v28 = vld [vmem:[%s5936_s0 + $0x4f8] sm:$0xff] }
 0x161   :  { %2416 = vmatmul.mubr.bf16.gmra.mrb[16].mxu1 %v3785_v45  ;;  %v3849_v45 = vcombine.low %v111_v33, %v115_v34  ;;  %v175_v33 = vld [vmem:[%s5936_s0 + $0x508] sm:$0xff] }
 0x162   :  { %2994 = vmatmul.mubr.bf16.gmra.mrb[16].mxu0 %v3789_v46  ;;  %2423 = vmatprep.mubr.bf16.mxu1 %v3794_v47  ;;  %v3853_v46 = vcombine.low %v113_v35, %v117_v36  ;;  %v3858_v47 = vcombine.high %v119_v41, %v123_v42  ;;  %v179_v34 = vld [vmem:[%s5936_s0 + $0x528] sm:$0xff]  ;;  %v177_v35 = vld [vmem:[%s5936_s0 + $0x518] sm:$0xff] }
 0x163   :  { %3001 = vmatprep.mubr.bf16.mxu0 %v3798_v48  ;;  %v3862_v48 = vcombine.high %v121_v43, %v125_v44  ;;  %v181_v36 = vld [vmem:[%s5936_s0 + $0x538] sm:$0xff] }
 0x169   :  { %2424 = vmatmul.mubr.bf16.gmra.mrb[20].mxu1 %v3793_v53  ;;  %v3857_v53 = vcombine.low %v119_v41, %v123_v42  ;;  %v183_v41 = vld [vmem:[%s5936_s0 + $0x548] sm:$0xff] }
 0x16a   :  { %3002 = vmatmul.mubr.bf16.gmra.mrb[20].mxu0 %v3797_v54  ;;  %2431 = vmatprep.mubr.bf16.mxu1 %v3802_v55  ;;  %v3861_v54 = vcombine.low %v121_v43, %v125_v44  ;;  %v3866_v55 = vcombine.high %v127_v49, %v131_v50  ;;  %v187_v42 = vld [vmem:[%s5936_s0 + $0x568] sm:$0xff]  ;;  %v185_v43 = vld [vmem:[%s5936_s0 + $0x558] sm:$0xff] }
 0x16b   :  { %3009 = vmatprep.mubr.bf16.mxu0 %v3806_v56  ;;  %v3870_v56 = vcombine.high %v129_v51, %v133_v52  ;;  %v189_v44 = vld [vmem:[%s5936_s0 + $0x578] sm:$0xff] }
 0x171   :  { %2432 = vmatmul.mubr.bf16.gmra.mrb[24].mxu1 %v3801_v60  ;;  %v3865_v60 = vcombine.low %v127_v49, %v131_v50  ;;  %v191_v49 = vld [vmem:[%s5936_s0 + $0x588] sm:$0xff] }
 0x172   :  { %3010 = vmatmul.mubr.bf16.gmra.mrb[24].mxu0 %v3805_v61  ;;  %2439 = vmatprep.mubr.bf16.mxu1 %v3810_v62  ;;  %v3869_v61 = vcombine.low %v129_v51, %v133_v52  ;;  %v3874_v62 = vcombine.high %v135_v57, %v139_v0  ;;  %v195_v50 = vld [vmem:[%s5936_s0 + $0x5a8] sm:$0xff]  ;;  %v193_v51 = vld [vmem:[%s5936_s0 + $0x598] sm:$0xff] }
 0x173   :  { %3017 = vmatprep.mubr.bf16.mxu0 %v3814_v63  ;;  %v3878_v63 = vcombine.high %v137_v58, %v141_v59  ;;  %v197_v52 = vld [vmem:[%s5936_s0 + $0x5b8] sm:$0xff] }
 0x179   :  { %2440 = vmatmul.mubr.bf16.gmra.mrb[28].mxu1 %v3809_v5  ;;  %v3873_v5 = vcombine.low %v135_v57, %v139_v0  ;;  %v199_v57 = vld [vmem:[%s5936_s0 + $0x5c8] sm:$0xff] }
 0x17a   :  { %3018 = vmatmul.mubr.bf16.gmra.mrb[28].mxu0 %v3813_v6  ;;  %2447 = vmatprep.mubr.bf16.mxu1 %v3818_v7  ;;  %v3877_v6 = vcombine.low %v137_v58, %v141_v59  ;;  %v3882_v7 = vcombine.high %v143_v1, %v147_v2  ;;  %v203_v0 = vld [vmem:[%s5936_s0 + $0x5e8] sm:$0xff]  ;;  %v201_v58 = vld [vmem:[%s5936_s0 + $0x5d8] sm:$0xff] }
 0x17b   :  { %3025 = vmatprep.mubr.bf16.mxu0 %v3822_v8  ;;  %v3886_v8 = vcombine.high %v145_v3, %v149_v4  ;;  %v205_v59 = vld [vmem:[%s5936_s0 + $0x5f8] sm:$0xff] }
 0x181   :  { %2448 = vmatmul.mubr.bf16.gmra.mrb[32].mxu1 %v3817_v13  ;;  %v3881_v13 = vcombine.low %v143_v1, %v147_v2  ;;  %v207_v1 = vld [vmem:[%s5936_s0 + $0x608] sm:$0xff] }
 0x182   :  { %3026 = vmatmul.mubr.bf16.gmra.mrb[32].mxu0 %v3821_v14  ;;  %2455 = vmatprep.mubr.bf16.mxu1 %v3826_v15  ;;  %v3885_v14 = vcombine.low %v145_v3, %v149_v4  ;;  %v3890_v15 = vcombine.high %v151_v9, %v155_v10  ;;  %v211_v2 = vld [vmem:[%s5936_s0 + $0x628] sm:$0xff]  ;;  %v209_v3 = vld [vmem:[%s5936_s0 + $0x618] sm:$0xff] }
 0x183   :  { %3033 = vmatprep.mubr.bf16.mxu0 %v3830_v16  ;;  %v3894_v16 = vcombine.high %v153_v11, %v157_v12  ;;  %v213_v4 = vld [vmem:[%s5936_s0 + $0x638] sm:$0xff] }
 0x189   :  { %2456 = vmatmul.mubr.bf16.gmra.mrb[36].mxu1 %v3825_v21  ;;  %v3889_v21 = vcombine.low %v151_v9, %v155_v10  ;;  %v215_v9 = vld [vmem:[%s5936_s0 + $0x648] sm:$0xff] }
 0x18a   :  { %3034 = vmatmul.mubr.bf16.gmra.mrb[36].mxu0 %v3829_v22  ;;  %2463 = vmatprep.mubr.bf16.mxu1 %v3834_v23  ;;  %v3893_v22 = vcombine.low %v153_v11, %v157_v12  ;;  %v3898_v23 = vcombine.high %v159_v17, %v163_v18  ;;  %v219_v10 = vld [vmem:[%s5936_s0 + $0x668] sm:$0xff]  ;;  %v217_v11 = vld [vmem:[%s5936_s0 + $0x658] sm:$0xff] }
 0x18b   :  { %3041 = vmatprep.mubr.bf16.mxu0 %v3838_v24  ;;  %v3902_v24 = vcombine.high %v161_v19, %v165_v20  ;;  %v221_v12 = vld [vmem:[%s5936_s0 + $0x678] sm:$0xff] }
 0x191   :  { %2464 = vmatmul.mubr.bf16.gmra.mrb[40].mxu1 %v3833_v29  ;;  %v3897_v29 = vcombine.low %v159_v17, %v163_v18  ;;  %v223_v17 = vld [vmem:[%s5936_s0 + $0x688] sm:$0xff] }
 0x192   :  { %3042 = vmatmul.mubr.bf16.gmra.mrb[40].mxu0 %v3837_v30  ;;  %2471 = vmatprep.mubr.bf16.mxu1 %v3842_v31  ;;  %v3901_v30 = vcombine.low %v161_v19, %v165_v20  ;;  %v3906_v31 = vcombine.high %v167_v25, %v171_v26  ;;  %v227_v18 = vld [vmem:[%s5936_s0 + $0x6a8] sm:$0xff]  ;;  %v225_v19 = vld [vmem:[%s5936_s0 + $0x698] sm:$0xff] }
 0x193   :  { %3049 = vmatprep.mubr.bf16.mxu0 %v3846_v32  ;;  %v3910_v32 = vcombine.high %v169_v27, %v173_v28  ;;  %v229_v20 = vld [vmem:[%s5936_s0 + $0x6b8] sm:$0xff] }
 0x199   :  { %2472 = vmatmul.mubr.bf16.gmra.mrb[44].mxu1 %v3841_v37  ;;  %v3905_v37 = vcombine.low %v167_v25, %v171_v26  ;;  %v231_v25 = vld [vmem:[%s5936_s0 + $0x6c8] sm:$0xff] }
 0x19a   :  { %3050 = vmatmul.mubr.bf16.gmra.mrb[44].mxu0 %v3845_v38  ;;  %2479 = vmatprep.mubr.bf16.mxu1 %v3850_v39  ;;  %v3909_v38 = vcombine.low %v169_v27, %v173_v28  ;;  %v3914_v39 = vcombine.high %v175_v33, %v179_v34  ;;  %v235_v26 = vld [vmem:[%s5936_s0 + $0x6e8] sm:$0xff]  ;;  %v233_v27 = vld [vmem:[%s5936_s0 + $0x6d8] sm:$0xff] }
 0x19b   :  { %3057 = vmatprep.mubr.bf16.mxu0 %v3854_v40  ;;  %v3918_v40 = vcombine.high %v177_v35, %v181_v36  ;;  %v237_v28 = vld [vmem:[%s5936_s0 + $0x6f8] sm:$0xff] }
 0x1a1   :  { %2480 = vmatmul.mubr.bf16.gmra.mrb[48].mxu1 %v3849_v45  ;;  %v3913_v45 = vcombine.low %v175_v33, %v179_v34  ;;  %v239_v33 = vld [vmem:[%s5936_s0 + $0x708] sm:$0xff] }
 0x1a2   :  { %3058 = vmatmul.mubr.bf16.gmra.mrb[48].mxu0 %v3853_v46  ;;  %2487 = vmatprep.mubr.bf16.mxu1 %v3858_v47  ;;  %v3917_v46 = vcombine.low %v177_v35, %v181_v36  ;;  %v3922_v47 = vcombine.high %v183_v41, %v187_v42  ;;  %v243_v34 = vld [vmem:[%s5936_s0 + $0x728] sm:$0xff]  ;;  %v241_v36 = vld [vmem:[%s5936_s0 + $0x718] sm:$0xff] }
 0x1a3   :  { %3065 = vmatprep.mubr.bf16.mxu0 %v3862_v48  ;;  %v3926_v48 = vcombine.high %v185_v43, %v189_v44 }
 0x1a9   :  { %2488 = vmatmul.mubr.bf16.gmra.mrb[52].mxu1 %v3857_v53  ;;  %v3921_v53 = vcombine.low %v183_v41, %v187_v42 }
 0x1aa   :  { %3066 = vmatmul.mubr.bf16.gmra.mrb[52].mxu0 %v3861_v54  ;;  %2495 = vmatprep.mubr.bf16.mxu1 %v3866_v55  ;;  %v3925_v54 = vcombine.low %v185_v43, %v189_v44  ;;  %v3930_v55 = vcombine.high %v191_v49, %v195_v50  ;;  %v3973_v44 = vcombine.low %v233_v27, %v237_v28 }
 0x1ab   :  { %3073 = vmatprep.mubr.bf16.mxu0 %v3870_v56  ;;  %v3934_v56 = vcombine.high %v193_v51, %v197_v52 }
 0x1b1   :  { %2496 = vmatmul.mubr.bf16.gmra.mrb[56].mxu1 %v3865_v60  ;;  %v3929_v60 = vcombine.low %v191_v49, %v195_v50 }
 0x1b2   :  { %3074 = vmatmul.mubr.bf16.gmra.mrb[56].mxu0 %v3869_v61  ;;  %2503 = vmatprep.mubr.bf16.mxu1 %v3874_v62  ;;  %v3933_v61 = vcombine.low %v193_v51, %v197_v52  ;;  %v3938_v62 = vcombine.high %v199_v57, %v203_v0 }
 0x1b3   :  { %3081 = vmatprep.mubr.bf16.mxu0 %v3878_v63  ;;  %v3942_v63 = vcombine.high %v201_v58, %v205_v59 }
 0x1b9   :  { %2504 = vmatmul.mubr.bf16.gmra.mrb[60].mxu1 %v3873_v5  ;;  %v3937_v5 = vcombine.low %v199_v57, %v203_v0  ;;  %v251_v0 = vld [vmem:[%s5936_s0 + $0x768] sm:$0xff] }
 0x1ba   :  { %3082 = vmatmul.mubr.bf16.gmra.mrb[60].mxu0 %v3877_v6  ;;  %2511 = vmatprep.mubr.bf16.mxu1 %v3882_v7  ;;  %v3941_v6 = vcombine.low %v201_v58, %v205_v59  ;;  %v3946_v7 = vcombine.high %v207_v1, %v211_v2  ;;  %v249_v58 = vld [vmem:[%s5936_s0 + $0x758] sm:$0xff] }
 0x1bb   :  { %3089 = vmatprep.mubr.bf16.mxu0 %v3886_v8  ;;  %v3950_v8 = vcombine.high %v209_v3, %v213_v4  ;;  %v253_v59 = vld [vmem:[%s5936_s0 + $0x778] sm:$0xff] }
 0x1c1   :  { %2512 = vmatmul.mubr.bf16.gmra.mrb[64].mxu1 %v3881_v13  ;;  %v3945_v13 = vcombine.low %v207_v1, %v211_v2 }
 0x1c2   :  { %3090 = vmatmul.mubr.bf16.gmra.mrb[64].mxu0 %v3885_v14  ;;  %2519 = vmatprep.mubr.bf16.mxu1 %v3890_v15  ;;  %v3949_v14 = vcombine.low %v209_v3, %v213_v4  ;;  %v3954_v15 = vcombine.high %v215_v9, %v219_v10 }
 0x1c3   :  { %3097 = vmatprep.mubr.bf16.mxu0 %v3894_v16  ;;  %v3958_v16 = vcombine.high %v217_v11, %v221_v12 }
 0x1c9   :  { %2520 = vmatmul.mubr.bf16.gmra.mrb[68].mxu1 %v3889_v21  ;;  %v3953_v21 = vcombine.low %v215_v9, %v219_v10 }
 0x1ca   :  { %3098 = vmatmul.mubr.bf16.gmra.mrb[68].mxu0 %v3893_v22  ;;  %2527 = vmatprep.mubr.bf16.mxu1 %v3898_v23  ;;  %v3957_v22 = vcombine.low %v217_v11, %v221_v12  ;;  %v3962_v23 = vcombine.high %v223_v17, %v227_v18 }
 0x1cb   :  { %3105 = vmatprep.mubr.bf16.mxu0 %v3902_v24  ;;  %v3966_v24 = vcombine.high %v225_v19, %v229_v20 }
 0x1d1   :  { %2528 = vmatmul.mubr.bf16.gmra.mrb[72].mxu1 %v3897_v29  ;;  %v3961_v29 = vcombine.low %v223_v17, %v227_v18 }
 0x1d2   :  { %3106 = vmatmul.mubr.bf16.gmra.mrb[72].mxu0 %v3901_v30  ;;  %2535 = vmatprep.mubr.bf16.mxu1 %v3906_v31  ;;  %v3965_v30 = vcombine.low %v225_v19, %v229_v20  ;;  %v3970_v31 = vcombine.high %v231_v25, %v235_v26  ;;  %v259_v19 = vld [vmem:[%s5936_s0 + $0x7a8] sm:$0xff]  ;;  %v257_v20 = vld [vmem:[%s5936_s0 + $0x798] sm:$0xff] }
 0x1d3   :  { %3113 = vmatprep.mubr.bf16.mxu0 %v3910_v32  ;;  %v3974_v32 = vcombine.high %v233_v27, %v237_v28  ;;  %v3989_v28 = vcombine.low %v249_v58, %v253_v59 }
 0x1d9   :  { %2536 = vmatmul.mubr.bf16.gmra.mrb[76].mxu1 %v3905_v37  ;;  %v245_v37 = vld [vmem:[%s5936_s0 + $0x738] sm:$0xff] }
 0x1da   :  { %3114 = vmatmul.mubr.bf16.gmra.mrb[76].mxu0 %v3909_v38  ;;  %2543 = vmatprep.mubr.bf16.mxu1 %v3914_v39  ;;  %v3981_v3 = vcombine.low %v241_v36, %v245_v37 }
 0x1db   :  { %3121 = vmatprep.mubr.bf16.mxu0 %v3918_v40  ;;  %v3969_v40 = vcombine.low %v231_v25, %v235_v26 }
 0x1e1   :  { %2544 = vmatmul.mubr.bf16.gmra.mrb[80].mxu1 %v3913_v45  ;;  %v3978_v45 = vcombine.high %v239_v33, %v243_v34 }
 0x1e2   :  { %3122 = vmatmul.mubr.bf16.gmra.mrb[80].mxu0 %v3917_v46  ;;  %2551 = vmatprep.mubr.bf16.mxu1 %v3922_v47 }
 0x1e3   :  { %3129 = vmatprep.mubr.bf16.mxu0 %v3926_v48  ;;  %v3982_v48 = vcombine.high %v241_v36, %v245_v37 }
 0x1e9   :  { %2552 = vmatmul.mubr.bf16.gmra.mrb[84].mxu1 %v3921_v53 }
 0x1ea   :  { %3130 = vmatmul.mubr.bf16.gmra.mrb[84].mxu0 %v3925_v54  ;;  %2559 = vmatprep.mubr.bf16.mxu1 %v3930_v55  ;;  %v247_v55 = vld [vmem:[%s5936_s0 + $0x748] sm:$0xff] }
 0x1eb   :  { %3137 = vmatprep.mubr.bf16.mxu0 %v3934_v56 }
 0x1f1   :  { %2560 = vmatmul.mubr.bf16.gmra.mrb[88].mxu1 %v3929_v60 }
 0x1f2   :  { %3138 = vmatmul.mubr.bf16.gmra.mrb[88].mxu0 %v3933_v61  ;;  %2567 = vmatprep.mubr.bf16.mxu1 %v3938_v62  ;;  %v3977_v62 = vcombine.low %v239_v33, %v243_v34 }
 0x1f3   :  { %3145 = vmatprep.mubr.bf16.mxu0 %v3942_v63 }
 0x1f9   :  { %2568 = vmatmul.mubr.bf16.gmra.mrb[92].mxu1 %v3937_v5 }
 0x1fa   :  { %3146 = vmatmul.mubr.bf16.gmra.mrb[92].mxu0 %v3941_v6  ;;  %2575 = vmatprep.mubr.bf16.mxu1 %v3946_v7  ;;  %v3986_v6 = vcombine.high %v247_v55, %v251_v0  ;;  %v3990_v7 = vcombine.high %v249_v58, %v253_v59 }
 0x1fb   :  { %3153 = vmatprep.mubr.bf16.mxu0 %v3950_v8 }
 0x201   :  { %2576 = vmatmul.mubr.bf16.gmra.mrb[96].mxu1 %v3945_v13 }
 0x202   :  { %3154 = vmatmul.mubr.bf16.gmra.mrb[96].mxu0 %v3949_v14  ;;  %2583 = vmatprep.mubr.bf16.mxu1 %v3954_v15 }
 0x203   :  { %3161 = vmatprep.mubr.bf16.mxu0 %v3958_v16  ;;  %v255_v16 = vld [vmem:[%s5936_s0 + $0x788] sm:$0xff] }
 0x209   :  { %2584 = vmatmul.mubr.bf16.gmra.mrb[100].mxu1 %v3953_v21  ;;  %v261_v21 = vld [vmem:[%s5936_s0 + $0x7b8] sm:$0xff] }
 0x20a   :  { %3162 = vmatmul.mubr.bf16.gmra.mrb[100].mxu0 %v3957_v22  ;;  %2591 = vmatprep.mubr.bf16.mxu1 %v3962_v23 }
 0x20b   :  { %3169 = vmatprep.mubr.bf16.mxu0 %v3966_v24  ;;  %v3985_v24 = vcombine.low %v247_v55, %v251_v0 }
 0x211   :  { %2592 = vmatmul.mubr.bf16.gmra.mrb[104].mxu1 %v3961_v29 }
 0x212   :  { %3170 = vmatmul.mubr.bf16.gmra.mrb[104].mxu0 %v3965_v30  ;;  %2599 = vmatprep.mubr.bf16.mxu1 %v3970_v31  ;;  %v3994_v31 = vcombine.high %v255_v16, %v259_v19 }
 0x213   :  { %3177 = vmatprep.mubr.bf16.mxu0 %v3974_v32  ;;  %v3998_v32 = vcombine.high %v257_v20, %v261_v21 }
 0x214   :  { %v2385_v35 = vpop.f32.mrb[0].mxu1 }
 0x215   :  { %v2963_v38 = vpop.f32.mrb[0].mxu0  ;;  %v2387_v39 = vpop.f32.mrb[1].mxu1 }
 0x216   :  { %v4390_v41 = vadd.f32 %v2963_v38, %v2385_v35  ;;  %v2965_v42 = vpop.f32.mrb[1].mxu0  ;;  %v2388_v43 = vpop.f32.mrb[2].mxu1 }
 0x217   :  { %v2966_v46 = vpop.f32.mrb[2].mxu0  ;;  %v2390_v47 = vpop.f32.mrb[3].mxu1 }
 0x218   :  { %v4391_v49 = vadd.f32 %v2966_v46, %v2388_v43  ;;  %v2968_v50 = vpop.f32.mrb[3].mxu0  ;;  %v3287_v51 = vmul.f32 %v4390_v41, %v4390_v41  ;;  %v269_v46 = vld [vmem:[%s5936_s0 + $0x7f8] sm:$0xff] }
 0x219   :  { %2600 = vmatmul.mubr.bf16.gmra.mrb[108].mxu1 %v3969_v40 }
 0x21a   :  { %v3218_v52 = vadd.f32 %v4391_v49, %v4390_v41  ;;  %v3288_v53 = vmul.f32 %v4391_v49, %v4391_v49  ;;  %v4202_v54 = vpack.c.bf16 %v4391_v49, %v4390_v41  ;;  %3178 = vmatmul.mubr.bf16.gmra.mrb[108].mxu0 %v3973_v44  ;;  %2607 = vmatprep.mubr.bf16.mxu1 %v3978_v45  ;;  %v263_v41 = vld [vmem:[%s5936_s0 + $0x7c8] sm:$0xff]  ;;  %v265_v45 = vld [vmem:[%s5936_s0 + $0x7d8] sm:$0xff] }
 0x21b   :  { %3185 = vmatprep.mubr.bf16.mxu0 %v3982_v48  ;;  %v267_v44 = vld [vmem:[%s5936_s0 + $0x7e8] sm:$0xff]  ;;  %v3993_v49 = vcombine.low %v255_v16, %v259_v19 }
 0x21c   :  { %v3351_v56 = vadd.f32 %v3288_v53, %v3287_v51  ;;  %4203 = vst [vmem:[%s5937_s2] sm:$0xff] %v4202_v54   ;;  %v2393_v57 = vpop.f32.mrb[4].mxu1  ;;  %v3997_v53 = vcombine.low %v257_v20, %v261_v21 }
 0x21d   :  { %v2971_v60 = vpop.f32.mrb[4].mxu0  ;;  %v2395_v61 = vpop.f32.mrb[5].mxu1 }
 0x21e   :  { %v4392_v63 = vadd.f32 %v2971_v60, %v2393_v57  ;;  %v2973_v1 = vpop.f32.mrb[5].mxu0  ;;  %v2396_v2 = vpop.f32.mrb[6].mxu1  ;;  %v4006_v57 = vcombine.high %v265_v45, %v269_v46 }
 0x21f   :  { %v2974_v4 = vpop.f32.mrb[6].mxu0  ;;  %v2398_v5 = vpop.f32.mrb[7].mxu1 }
 0x220   :  { %v3219_v8 = vadd.f32 %v4392_v63, %v3218_v52  ;;  %v3289_v9 = vmul.f32 %v4392_v63, %v4392_v63  ;;  %v4393_v10 = vadd.f32 %v2974_v4, %v2396_v2  ;;  %v2976_v11 = vpop.f32.mrb[7].mxu0 }
 0x221   :  { %2608 = vmatmul.mubr.bf16.gmra.mrb[112].mxu1 %v3977_v62 }
 0x222   :  { %v3352_v12 = vadd.f32 %v3351_v56, %v3289_v9  ;;  %v3220_v13 = vadd.f32 %v4393_v10, %v3219_v8  ;;  %v3290_v14 = vmul.f32 %v4393_v10, %v4393_v10  ;;  %v4207_v15 = vpack.c.bf16 %v4393_v10, %v4392_v63  ;;  %3186 = vmatmul.mubr.bf16.gmra.mrb[112].mxu0 %v3981_v3 }
 0x223   :  { %2615 = vmatprep.mubr.bf16.mxu1 %v3986_v6  ;;  %3193 = vmatprep.mubr.bf16.mxu0 %v3990_v7  ;;  %v4002_v56 = vcombine.high %v263_v41, %v267_v44  ;;  %v4001_v6 = vcombine.low %v263_v41, %v267_v44  ;;  %v4005_v10 = vcombine.low %v265_v45, %v269_v46 }
 0x224   :  { %v3353_v17 = vadd.f32 %v3352_v12, %v3290_v14  ;;  %4359 = vst [vmem:[%s5937_s2 + $0x8] sm:$0xff] %v4207_v15   ;;  %v2401_v18 = vpop.f32.mrb[8].mxu1 }
 0x225   :  { %v2979_v22 = vpop.f32.mrb[8].mxu0  ;;  %v2403_v23 = vpop.f32.mrb[9].mxu1 }
 0x226   :  { %v4394_v25 = vadd.f32 %v2979_v22, %v2401_v18  ;;  %v2981_v26 = vpop.f32.mrb[9].mxu0  ;;  %v2404_v27 = vpop.f32.mrb[10].mxu1 }
 0x227   :  { %v2982_v29 = vpop.f32.mrb[10].mxu0  ;;  %v2406_v30 = vpop.f32.mrb[11].mxu1 }
 0x228   :  { %v3221_v33 = vadd.f32 %v4394_v25, %v3220_v13  ;;  %v3291_v34 = vmul.f32 %v4394_v25, %v4394_v25  ;;  %v4395_v35 = vadd.f32 %v2982_v29, %v2404_v27  ;;  %v2984_v36 = vpop.f32.mrb[11].mxu0 }
 0x229   :  { %2616 = vmatmul.mubr.bf16.gmra.mrb[116].mxu1 %v3985_v24 }
 0x22a   :  { %v3354_v37 = vadd.f32 %v3353_v17, %v3291_v34  ;;  %v3222_v38 = vadd.f32 %v4395_v35, %v3221_v33  ;;  %v3292_v39 = vmul.f32 %v4395_v35, %v4395_v35  ;;  %v4212_v40 = vpack.c.bf16 %v4395_v35, %v4394_v25  ;;  %3194 = vmatmul.mubr.bf16.gmra.mrb[116].mxu0 %v3989_v28 }
 0x22b   :  { %2623 = vmatprep.mubr.bf16.mxu1 %v3994_v31  ;;  %3201 = vmatprep.mubr.bf16.mxu0 %v3998_v32 }
 0x22c   :  { %v3355_v42 = vadd.f32 %v3354_v37, %v3292_v39  ;;  %4360 = vst [vmem:[%s5937_s2 + $0x10] sm:$0xff] %v4212_v40   ;;  %v2409_v43 = vpop.f32.mrb[12].mxu1 }
 0x22d   :  { %v2987_v47 = vpop.f32.mrb[12].mxu0  ;;  %v2411_v48 = vpop.f32.mrb[13].mxu1 }
 0x22e   :  { %v4396_v50 = vadd.f32 %v2987_v47, %v2409_v43  ;;  %v2989_v51 = vpop.f32.mrb[13].mxu0  ;;  %v2412_v52 = vpop.f32.mrb[14].mxu1 }
 0x22f   :  { %v2990_v54 = vpop.f32.mrb[14].mxu0  ;;  %v2414_v55 = vpop.f32.mrb[15].mxu1 }
 0x230   :  { %v3223_v0 = vadd.f32 %v4396_v50, %v3222_v38  ;;  %v3293_v58 = vmul.f32 %v4396_v50, %v4396_v50  ;;  %v4397_v59 = vadd.f32 %v2990_v54, %v2412_v52  ;;  %v2992_v60 = vpop.f32.mrb[15].mxu0 }
 0x231   :  { %2624 = vmatmul.mubr.bf16.gmra.mrb[120].mxu1 %v3993_v49 }
 0x232   :  { %v3356_v61 = vadd.f32 %v3355_v42, %v3293_v58  ;;  %v3224_v62 = vadd.f32 %v4397_v59, %v3223_v0  ;;  %v3294_v63 = vmul.f32 %v4397_v59, %v4397_v59  ;;  %v4217_v1 = vpack.c.bf16 %v4397_v59, %v4396_v50  ;;  %3202 = vmatmul.mubr.bf16.gmra.mrb[120].mxu0 %v3997_v53 }
 0x233   :  { %2631 = vmatprep.mubr.bf16.mxu1 %v4002_v56  ;;  %3209 = vmatprep.mubr.bf16.mxu0 %v4006_v57 }
 0x234   :  { %v3357_v2 = vadd.f32 %v3356_v61, %v3294_v63  ;;  %4361 = vst [vmem:[%s5937_s2 + $0x18] sm:$0xff] %v4217_v1   ;;  %v2417_v3 = vpop.f32.mrb[16].mxu1 }
 0x235   :  { %v2995_v4 = vpop.f32.mrb[16].mxu0  ;;  %v2419_v5 = vpop.f32.mrb[17].mxu1 }
 0x236   :  { %v4398_v7 = vadd.f32 %v2995_v4, %v2417_v3  ;;  %v2997_v8 = vpop.f32.mrb[17].mxu0  ;;  %v2420_v9 = vpop.f32.mrb[18].mxu1 }
 0x237   :  { %v2998_v11 = vpop.f32.mrb[18].mxu0  ;;  %v2422_v12 = vpop.f32.mrb[19].mxu1 }
 0x238   :  { %v3225_v13 = vadd.f32 %v4398_v7, %v3224_v62  ;;  %v3295_v14 = vmul.f32 %v4398_v7, %v4398_v7  ;;  %v4399_v15 = vadd.f32 %v2998_v11, %v2420_v9  ;;  %v3000_v16 = vpop.f32.mrb[19].mxu0 }
 0x239   :  { %2632 = vmatmul.mubr.bf16.gmra.mrb[124].mxu1 %v4001_v6 }
 0x23a   :  { %v3358_v17 = vadd.f32 %v3357_v2, %v3295_v14  ;;  %v3226_v18 = vadd.f32 %v4399_v15, %v3225_v13  ;;  %v3296_v19 = vmul.f32 %v4399_v15, %v4399_v15  ;;  %v4222_v20 = vpack.c.bf16 %v4399_v15, %v4398_v7  ;;  %3210 = vmatmul.mubr.bf16.gmra.mrb[124].mxu0 %v4005_v10 }
 0x23c   :  { %v3359_v21 = vadd.f32 %v3358_v17, %v3296_v19  ;;  %4362 = vst [vmem:[%s5937_s2 + $0x20] sm:$0xff] %v4222_v20   ;;  %v2425_v22 = vpop.f32.mrb[20].mxu1 }
 0x23d   :  { %v3003_v23 = vpop.f32.mrb[20].mxu0  ;;  %v2427_v24 = vpop.f32.mrb[21].mxu1 }
 0x23e   :  { %v4400_v25 = vadd.f32 %v3003_v23, %v2425_v22  ;;  %v3005_v26 = vpop.f32.mrb[21].mxu0  ;;  %v2428_v27 = vpop.f32.mrb[22].mxu1 }
 0x23f   :  { %v3006_v28 = vpop.f32.mrb[22].mxu0  ;;  %v2430_v29 = vpop.f32.mrb[23].mxu1 }
 0x240   :  { %v3227_v30 = vadd.f32 %v4400_v25, %v3226_v18  ;;  %v3297_v31 = vmul.f32 %v4400_v25, %v4400_v25  ;;  %v4401_v32 = vadd.f32 %v3006_v28, %v2428_v27  ;;  %v3008_v33 = vpop.f32.mrb[23].mxu0 }
 0x242   :  { %v3360_v34 = vadd.f32 %v3359_v21, %v3297_v31  ;;  %v3228_v35 = vadd.f32 %v4401_v32, %v3227_v30  ;;  %v3298_v36 = vmul.f32 %v4401_v32, %v4401_v32  ;;  %v4227_v37 = vpack.c.bf16 %v4401_v32, %v4400_v25 }
 0x244   :  { %v3361_v38 = vadd.f32 %v3360_v34, %v3298_v36  ;;  %4363 = vst [vmem:[%s5937_s2 + $0x28] sm:$0xff] %v4227_v37   ;;  %v2433_v39 = vpop.f32.mrb[24].mxu1 }
 0x245   :  { %v3011_v40 = vpop.f32.mrb[24].mxu0  ;;  %v2435_v41 = vpop.f32.mrb[25].mxu1 }
 0x246   :  { %v4402_v42 = vadd.f32 %v3011_v40, %v2433_v39  ;;  %v3013_v43 = vpop.f32.mrb[25].mxu0  ;;  %v2436_v44 = vpop.f32.mrb[26].mxu1 }
 0x247   :  { %v3014_v45 = vpop.f32.mrb[26].mxu0  ;;  %v2438_v46 = vpop.f32.mrb[27].mxu1 }
 0x248   :  { %v3229_v47 = vadd.f32 %v4402_v42, %v3228_v35  ;;  %v3299_v48 = vmul.f32 %v4402_v42, %v4402_v42  ;;  %v4403_v49 = vadd.f32 %v3014_v45, %v2436_v44  ;;  %v3016_v50 = vpop.f32.mrb[27].mxu0 }
 0x24a   :  { %v3362_v51 = vadd.f32 %v3361_v38, %v3299_v48  ;;  %v3230_v52 = vadd.f32 %v4403_v49, %v3229_v47  ;;  %v3300_v53 = vmul.f32 %v4403_v49, %v4403_v49  ;;  %v4232_v54 = vpack.c.bf16 %v4403_v49, %v4402_v42 }
 0x24c   :  { %v3363_v55 = vadd.f32 %v3362_v51, %v3300_v53  ;;  %4364 = vst [vmem:[%s5937_s2 + $0x30] sm:$0xff] %v4232_v54   ;;  %v2441_v56 = vpop.f32.mrb[28].mxu1 }
 0x24d   :  { %v3019_v57 = vpop.f32.mrb[28].mxu0  ;;  %v2443_v0 = vpop.f32.mrb[29].mxu1 }
 0x24e   :  { %v4404_v58 = vadd.f32 %v3019_v57, %v2441_v56  ;;  %v3021_v59 = vpop.f32.mrb[29].mxu0  ;;  %v2444_v60 = vpop.f32.mrb[30].mxu1 }
 0x24f   :  { %v3022_v61 = vpop.f32.mrb[30].mxu0  ;;  %v2446_v62 = vpop.f32.mrb[31].mxu1 }
 0x250   :  { %v3231_v63 = vadd.f32 %v4404_v58, %v3230_v52  ;;  %v3301_v1 = vmul.f32 %v4404_v58, %v4404_v58  ;;  %v4405_v2 = vadd.f32 %v3022_v61, %v2444_v60  ;;  %v3024_v3 = vpop.f32.mrb[31].mxu0 }
 0x252   :  { %v3364_v4 = vadd.f32 %v3363_v55, %v3301_v1  ;;  %v3232_v5 = vadd.f32 %v4405_v2, %v3231_v63  ;;  %v3302_v6 = vmul.f32 %v4405_v2, %v4405_v2  ;;  %v4237_v7 = vpack.c.bf16 %v4405_v2, %v4404_v58 }
 0x254   :  { %v3365_v8 = vadd.f32 %v3364_v4, %v3302_v6  ;;  %4365 = vst [vmem:[%s5937_s2 + $0x38] sm:$0xff] %v4237_v7   ;;  %v2449_v9 = vpop.f32.mrb[32].mxu1 }
 0x255   :  { %v3027_v10 = vpop.f32.mrb[32].mxu0  ;;  %v2451_v11 = vpop.f32.mrb[33].mxu1 }
 0x256   :  { %v4406_v12 = vadd.f32 %v3027_v10, %v2449_v9  ;;  %v3029_v13 = vpop.f32.mrb[33].mxu0  ;;  %v2452_v14 = vpop.f32.mrb[34].mxu1 }
 0x257   :  { %v3030_v15 = vpop.f32.mrb[34].mxu0  ;;  %v2454_v16 = vpop.f32.mrb[35].mxu1 }
 0x258   :  { %v3233_v17 = vadd.f32 %v4406_v12, %v3232_v5  ;;  %v3303_v18 = vmul.f32 %v4406_v12, %v4406_v12  ;;  %v4407_v19 = vadd.f32 %v3030_v15, %v2452_v14  ;;  %v3032_v20 = vpop.f32.mrb[35].mxu0 }
 0x25a   :  { %v3366_v21 = vadd.f32 %v3365_v8, %v3303_v18  ;;  %v3234_v22 = vadd.f32 %v4407_v19, %v3233_v17  ;;  %v3304_v23 = vmul.f32 %v4407_v19, %v4407_v19  ;;  %v4242_v24 = vpack.c.bf16 %v4407_v19, %v4406_v12 }
 0x25c   :  { %v3367_v25 = vadd.f32 %v3366_v21, %v3304_v23  ;;  %4366 = vst [vmem:[%s5937_s2 + $0x40] sm:$0xff] %v4242_v24   ;;  %v2457_v26 = vpop.f32.mrb[36].mxu1 }
 0x25d   :  { %v3035_v27 = vpop.f32.mrb[36].mxu0  ;;  %v2459_v28 = vpop.f32.mrb[37].mxu1 }
 0x25e   :  { %v4408_v29 = vadd.f32 %v3035_v27, %v2457_v26  ;;  %v3037_v30 = vpop.f32.mrb[37].mxu0  ;;  %v2460_v31 = vpop.f32.mrb[38].mxu1 }
 0x25f   :  { %v3038_v32 = vpop.f32.mrb[38].mxu0  ;;  %v2462_v33 = vpop.f32.mrb[39].mxu1 }
 0x260   :  { %v3235_v34 = vadd.f32 %v4408_v29, %v3234_v22  ;;  %v3305_v35 = vmul.f32 %v4408_v29, %v4408_v29  ;;  %v4409_v36 = vadd.f32 %v3038_v32, %v2460_v31  ;;  %v3040_v37 = vpop.f32.mrb[39].mxu0 }
 0x262   :  { %v3368_v38 = vadd.f32 %v3367_v25, %v3305_v35  ;;  %v3236_v39 = vadd.f32 %v4409_v36, %v3235_v34  ;;  %v3306_v40 = vmul.f32 %v4409_v36, %v4409_v36  ;;  %v4247_v41 = vpack.c.bf16 %v4409_v36, %v4408_v29 }
 0x264   :  { %v3369_v42 = vadd.f32 %v3368_v38, %v3306_v40  ;;  %4367 = vst [vmem:[%s5937_s2 + $0x48] sm:$0xff] %v4247_v41   ;;  %v2465_v43 = vpop.f32.mrb[40].mxu1 }
 0x265   :  { %v3043_v44 = vpop.f32.mrb[40].mxu0  ;;  %v2467_v45 = vpop.f32.mrb[41].mxu1 }
 0x266   :  { %v4410_v46 = vadd.f32 %v3043_v44, %v2465_v43  ;;  %v3045_v47 = vpop.f32.mrb[41].mxu0  ;;  %v2468_v48 = vpop.f32.mrb[42].mxu1 }
 0x267   :  { %v3046_v49 = vpop.f32.mrb[42].mxu0  ;;  %v2470_v50 = vpop.f32.mrb[43].mxu1 }
 0x268   :  { %v3237_v51 = vadd.f32 %v4410_v46, %v3236_v39  ;;  %v3307_v52 = vmul.f32 %v4410_v46, %v4410_v46  ;;  %v4411_v53 = vadd.f32 %v3046_v49, %v2468_v48  ;;  %v3048_v54 = vpop.f32.mrb[43].mxu0 }
 0x26a   :  { %v3370_v55 = vadd.f32 %v3369_v42, %v3307_v52  ;;  %v3238_v56 = vadd.f32 %v4411_v53, %v3237_v51  ;;  %v3308_v57 = vmul.f32 %v4411_v53, %v4411_v53  ;;  %v4252_v0 = vpack.c.bf16 %v4411_v53, %v4410_v46 }
 0x26c   :  { %v3371_v58 = vadd.f32 %v3370_v55, %v3308_v57  ;;  %4368 = vst [vmem:[%s5937_s2 + $0x50] sm:$0xff] %v4252_v0   ;;  %v2473_v59 = vpop.f32.mrb[44].mxu1 }
 0x26d   :  { %v3051_v60 = vpop.f32.mrb[44].mxu0  ;;  %v2475_v61 = vpop.f32.mrb[45].mxu1 }
 0x26e   :  { %v4412_v62 = vadd.f32 %v3051_v60, %v2473_v59  ;;  %v3053_v63 = vpop.f32.mrb[45].mxu0  ;;  %v2476_v1 = vpop.f32.mrb[46].mxu1 }
 0x26f   :  { %v3054_v2 = vpop.f32.mrb[46].mxu0  ;;  %v2478_v3 = vpop.f32.mrb[47].mxu1 }
 0x270   :  { %v3239_v4 = vadd.f32 %v4412_v62, %v3238_v56  ;;  %v3309_v5 = vmul.f32 %v4412_v62, %v4412_v62  ;;  %v4413_v6 = vadd.f32 %v3054_v2, %v2476_v1  ;;  %v3056_v7 = vpop.f32.mrb[47].mxu0 }
 0x272   :  { %v3372_v8 = vadd.f32 %v3371_v58, %v3309_v5  ;;  %v3240_v9 = vadd.f32 %v4413_v6, %v3239_v4  ;;  %v3310_v10 = vmul.f32 %v4413_v6, %v4413_v6  ;;  %v4257_v11 = vpack.c.bf16 %v4413_v6, %v4412_v62 }
 0x274   :  { %v3373_v12 = vadd.f32 %v3372_v8, %v3310_v10  ;;  %4369 = vst [vmem:[%s5937_s2 + $0x58] sm:$0xff] %v4257_v11   ;;  %v2481_v13 = vpop.f32.mrb[48].mxu1 }
 0x275   :  { %v3059_v14 = vpop.f32.mrb[48].mxu0  ;;  %v2483_v15 = vpop.f32.mrb[49].mxu1 }
 0x276   :  { %v4414_v16 = vadd.f32 %v3059_v14, %v2481_v13  ;;  %v3061_v17 = vpop.f32.mrb[49].mxu0  ;;  %v2484_v18 = vpop.f32.mrb[50].mxu1 }
 0x277   :  { %v3062_v19 = vpop.f32.mrb[50].mxu0  ;;  %v2486_v20 = vpop.f32.mrb[51].mxu1 }
 0x278   :  { %v3241_v21 = vadd.f32 %v4414_v16, %v3240_v9  ;;  %v3311_v22 = vmul.f32 %v4414_v16, %v4414_v16  ;;  %v4415_v23 = vadd.f32 %v3062_v19, %v2484_v18  ;;  %v3064_v24 = vpop.f32.mrb[51].mxu0 }
 0x27a   :  { %v3374_v25 = vadd.f32 %v3373_v12, %v3311_v22  ;;  %v3242_v26 = vadd.f32 %v4415_v23, %v3241_v21  ;;  %v3312_v27 = vmul.f32 %v4415_v23, %v4415_v23  ;;  %v4262_v28 = vpack.c.bf16 %v4415_v23, %v4414_v16 }
 0x27c   :  { %v3375_v29 = vadd.f32 %v3374_v25, %v3312_v27  ;;  %4370 = vst [vmem:[%s5937_s2 + $0x60] sm:$0xff] %v4262_v28   ;;  %v2489_v30 = vpop.f32.mrb[52].mxu1 }
 0x27d   :  { %v3067_v31 = vpop.f32.mrb[52].mxu0  ;;  %v2491_v32 = vpop.f32.mrb[53].mxu1 }
 0x27e   :  { %v4416_v33 = vadd.f32 %v3067_v31, %v2489_v30  ;;  %v3069_v34 = vpop.f32.mrb[53].mxu0  ;;  %v2492_v35 = vpop.f32.mrb[54].mxu1 }
 0x27f   :  { %v3070_v36 = vpop.f32.mrb[54].mxu0  ;;  %v2494_v37 = vpop.f32.mrb[55].mxu1 }
 0x280   :  { %v3243_v38 = vadd.f32 %v4416_v33, %v3242_v26  ;;  %v3313_v39 = vmul.f32 %v4416_v33, %v4416_v33  ;;  %v4417_v40 = vadd.f32 %v3070_v36, %v2492_v35  ;;  %v3072_v41 = vpop.f32.mrb[55].mxu0 }
 0x282   :  { %v3376_v42 = vadd.f32 %v3375_v29, %v3313_v39  ;;  %v3244_v43 = vadd.f32 %v4417_v40, %v3243_v38  ;;  %v3314_v44 = vmul.f32 %v4417_v40, %v4417_v40  ;;  %v4267_v45 = vpack.c.bf16 %v4417_v40, %v4416_v33 }
 0x284   :  { %v3377_v46 = vadd.f32 %v3376_v42, %v3314_v44  ;;  %4371 = vst [vmem:[%s5937_s2 + $0x68] sm:$0xff] %v4267_v45   ;;  %v2497_v47 = vpop.f32.mrb[56].mxu1 }
 0x285   :  { %v3075_v48 = vpop.f32.mrb[56].mxu0  ;;  %v2499_v49 = vpop.f32.mrb[57].mxu1 }
 0x286   :  { %v4418_v50 = vadd.f32 %v3075_v48, %v2497_v47  ;;  %v3077_v51 = vpop.f32.mrb[57].mxu0  ;;  %v2500_v52 = vpop.f32.mrb[58].mxu1 }
 0x287   :  { %v3078_v53 = vpop.f32.mrb[58].mxu0  ;;  %v2502_v54 = vpop.f32.mrb[59].mxu1 }
 0x288   :  { %v3245_v55 = vadd.f32 %v4418_v50, %v3244_v43  ;;  %v3315_v56 = vmul.f32 %v4418_v50, %v4418_v50  ;;  %v4419_v57 = vadd.f32 %v3078_v53, %v2500_v52  ;;  %v3080_v0 = vpop.f32.mrb[59].mxu0 }
 0x28a   :  { %v3378_v58 = vadd.f32 %v3377_v46, %v3315_v56  ;;  %v3246_v59 = vadd.f32 %v4419_v57, %v3245_v55  ;;  %v3316_v60 = vmul.f32 %v4419_v57, %v4419_v57  ;;  %v4272_v61 = vpack.c.bf16 %v4419_v57, %v4418_v50 }
 0x28c   :  { %v3379_v62 = vadd.f32 %v3378_v58, %v3316_v60  ;;  %4372 = vst [vmem:[%s5937_s2 + $0x70] sm:$0xff] %v4272_v61   ;;  %v2505_v63 = vpop.f32.mrb[60].mxu1 }
 0x28d   :  { %v3083_v1 = vpop.f32.mrb[60].mxu0  ;;  %v2507_v2 = vpop.f32.mrb[61].mxu1 }
 0x28e   :  { %v4420_v3 = vadd.f32 %v3083_v1, %v2505_v63  ;;  %v3085_v4 = vpop.f32.mrb[61].mxu0  ;;  %v2508_v5 = vpop.f32.mrb[62].mxu1 }
 0x28f   :  { %v3086_v6 = vpop.f32.mrb[62].mxu0  ;;  %v2510_v7 = vpop.f32.mrb[63].mxu1 }
 0x290   :  { %v3247_v8 = vadd.f32 %v4420_v3, %v3246_v59  ;;  %v3317_v9 = vmul.f32 %v4420_v3, %v4420_v3  ;;  %v4421_v10 = vadd.f32 %v3086_v6, %v2508_v5  ;;  %v3088_v11 = vpop.f32.mrb[63].mxu0 }
 0x292   :  { %v3380_v12 = vadd.f32 %v3379_v62, %v3317_v9  ;;  %v3248_v13 = vadd.f32 %v4421_v10, %v3247_v8  ;;  %v3318_v14 = vmul.f32 %v4421_v10, %v4421_v10  ;;  %v4277_v15 = vpack.c.bf16 %v4421_v10, %v4420_v3 }
 0x294   :  { %v3381_v16 = vadd.f32 %v3380_v12, %v3318_v14  ;;  %4373 = vst [vmem:[%s5937_s2 + $0x78] sm:$0xff] %v4277_v15   ;;  %v2513_v17 = vpop.f32.mrb[64].mxu1 }
 0x295   :  { %v3091_v18 = vpop.f32.mrb[64].mxu0  ;;  %v2515_v19 = vpop.f32.mrb[65].mxu1 }
 0x296   :  { %v4422_v20 = vadd.f32 %v3091_v18, %v2513_v17  ;;  %v3093_v21 = vpop.f32.mrb[65].mxu0  ;;  %v2516_v22 = vpop.f32.mrb[66].mxu1 }
 0x297   :  { %v3094_v23 = vpop.f32.mrb[66].mxu0  ;;  %v2518_v24 = vpop.f32.mrb[67].mxu1 }
 0x298   :  { %v3249_v25 = vadd.f32 %v4422_v20, %v3248_v13  ;;  %v3319_v26 = vmul.f32 %v4422_v20, %v4422_v20  ;;  %v4423_v27 = vadd.f32 %v3094_v23, %v2516_v22  ;;  %v3096_v28 = vpop.f32.mrb[67].mxu0 }
 0x29a   :  { %v3382_v29 = vadd.f32 %v3381_v16, %v3319_v26  ;;  %v3250_v30 = vadd.f32 %v4423_v27, %v3249_v25  ;;  %v3320_v31 = vmul.f32 %v4423_v27, %v4423_v27  ;;  %v4282_v32 = vpack.c.bf16 %v4423_v27, %v4422_v20 }
 0x29c   :  { %v3383_v33 = vadd.f32 %v3382_v29, %v3320_v31  ;;  %4374 = vst [vmem:[%s5937_s2 + $0x80] sm:$0xff] %v4282_v32   ;;  %v2521_v34 = vpop.f32.mrb[68].mxu1 }
 0x29d   :  { %v3099_v35 = vpop.f32.mrb[68].mxu0  ;;  %v2523_v36 = vpop.f32.mrb[69].mxu1 }
 0x29e   :  { %v4424_v37 = vadd.f32 %v3099_v35, %v2521_v34  ;;  %v3101_v38 = vpop.f32.mrb[69].mxu0  ;;  %v2524_v39 = vpop.f32.mrb[70].mxu1 }
 0x29f   :  { %v3102_v40 = vpop.f32.mrb[70].mxu0  ;;  %v2526_v41 = vpop.f32.mrb[71].mxu1 }
 0x2a0   :  { %v3251_v42 = vadd.f32 %v4424_v37, %v3250_v30  ;;  %v3321_v43 = vmul.f32 %v4424_v37, %v4424_v37  ;;  %v4425_v44 = vadd.f32 %v3102_v40, %v2524_v39  ;;  %v3104_v45 = vpop.f32.mrb[71].mxu0 }
 0x2a2   :  { %v3384_v46 = vadd.f32 %v3383_v33, %v3321_v43  ;;  %v3252_v47 = vadd.f32 %v4425_v44, %v3251_v42  ;;  %v3322_v48 = vmul.f32 %v4425_v44, %v4425_v44  ;;  %v4287_v49 = vpack.c.bf16 %v4425_v44, %v4424_v37 }
 0x2a4   :  { %v3385_v50 = vadd.f32 %v3384_v46, %v3322_v48  ;;  %4375 = vst [vmem:[%s5937_s2 + $0x88] sm:$0xff] %v4287_v49   ;;  %v2529_v51 = vpop.f32.mrb[72].mxu1 }
 0x2a5   :  { %v3107_v52 = vpop.f32.mrb[72].mxu0  ;;  %v2531_v53 = vpop.f32.mrb[73].mxu1 }
 0x2a6   :  { %v4426_v54 = vadd.f32 %v3107_v52, %v2529_v51  ;;  %v3109_v55 = vpop.f32.mrb[73].mxu0  ;;  %v2532_v56 = vpop.f32.mrb[74].mxu1 }
 0x2a7   :  { %v3110_v57 = vpop.f32.mrb[74].mxu0  ;;  %v2534_v0 = vpop.f32.mrb[75].mxu1 }
 0x2a8   :  { %v3253_v58 = vadd.f32 %v4426_v54, %v3252_v47  ;;  %v3323_v59 = vmul.f32 %v4426_v54, %v4426_v54  ;;  %v4427_v60 = vadd.f32 %v3110_v57, %v2532_v56  ;;  %v3112_v61 = vpop.f32.mrb[75].mxu0 }
 0x2aa   :  { %v3386_v62 = vadd.f32 %v3385_v50, %v3323_v59  ;;  %v3254_v63 = vadd.f32 %v4427_v60, %v3253_v58  ;;  %v3324_v1 = vmul.f32 %v4427_v60, %v4427_v60  ;;  %v4292_v2 = vpack.c.bf16 %v4427_v60, %v4426_v54 }
 0x2ac   :  { %v3387_v3 = vadd.f32 %v3386_v62, %v3324_v1  ;;  %4376 = vst [vmem:[%s5937_s2 + $0x90] sm:$0xff] %v4292_v2   ;;  %v2537_v4 = vpop.f32.mrb[76].mxu1 }
 0x2ad   :  { %v3115_v5 = vpop.f32.mrb[76].mxu0  ;;  %v2539_v6 = vpop.f32.mrb[77].mxu1 }
 0x2ae   :  { %v4428_v7 = vadd.f32 %v3115_v5, %v2537_v4  ;;  %v3117_v8 = vpop.f32.mrb[77].mxu0  ;;  %v2540_v9 = vpop.f32.mrb[78].mxu1 }
 0x2af   :  { %v3118_v10 = vpop.f32.mrb[78].mxu0  ;;  %v2542_v11 = vpop.f32.mrb[79].mxu1 }
 0x2b0   :  { %v3255_v12 = vadd.f32 %v4428_v7, %v3254_v63  ;;  %v3325_v13 = vmul.f32 %v4428_v7, %v4428_v7  ;;  %v4429_v14 = vadd.f32 %v3118_v10, %v2540_v9  ;;  %v3120_v15 = vpop.f32.mrb[79].mxu0 }
 0x2b2   :  { %v3388_v16 = vadd.f32 %v3387_v3, %v3325_v13  ;;  %v3256_v17 = vadd.f32 %v4429_v14, %v3255_v12  ;;  %v3326_v18 = vmul.f32 %v4429_v14, %v4429_v14  ;;  %v4297_v19 = vpack.c.bf16 %v4429_v14, %v4428_v7 }
 0x2b4   :  { %v3389_v20 = vadd.f32 %v3388_v16, %v3326_v18  ;;  %4377 = vst [vmem:[%s5937_s2 + $0x98] sm:$0xff] %v4297_v19   ;;  %v2545_v21 = vpop.f32.mrb[80].mxu1 }
 0x2b5   :  { %v3123_v22 = vpop.f32.mrb[80].mxu0  ;;  %v2547_v23 = vpop.f32.mrb[81].mxu1 }
 0x2b6   :  { %v4430_v24 = vadd.f32 %v3123_v22, %v2545_v21  ;;  %v3125_v25 = vpop.f32.mrb[81].mxu0  ;;  %v2548_v26 = vpop.f32.mrb[82].mxu1 }
 0x2b7   :  { %v3126_v27 = vpop.f32.mrb[82].mxu0  ;;  %v2550_v28 = vpop.f32.mrb[83].mxu1 }
 0x2b8   :  { %v3257_v29 = vadd.f32 %v4430_v24, %v3256_v17  ;;  %v3327_v30 = vmul.f32 %v4430_v24, %v4430_v24  ;;  %v4431_v31 = vadd.f32 %v3126_v27, %v2548_v26  ;;  %v3128_v32 = vpop.f32.mrb[83].mxu0 }
 0x2ba   :  { %v3390_v33 = vadd.f32 %v3389_v20, %v3327_v30  ;;  %v3258_v34 = vadd.f32 %v4431_v31, %v3257_v29  ;;  %v3328_v35 = vmul.f32 %v4431_v31, %v4431_v31  ;;  %v4302_v36 = vpack.c.bf16 %v4431_v31, %v4430_v24 }
 0x2bc   :  { %v3391_v37 = vadd.f32 %v3390_v33, %v3328_v35  ;;  %4378 = vst [vmem:[%s5937_s2 + $0xa0] sm:$0xff] %v4302_v36   ;;  %v2553_v38 = vpop.f32.mrb[84].mxu1 }
 0x2bd   :  { %v3131_v39 = vpop.f32.mrb[84].mxu0  ;;  %v2555_v40 = vpop.f32.mrb[85].mxu1 }
 0x2be   :  { %v4432_v41 = vadd.f32 %v3131_v39, %v2553_v38  ;;  %v3133_v42 = vpop.f32.mrb[85].mxu0  ;;  %v2556_v43 = vpop.f32.mrb[86].mxu1 }
 0x2bf   :  { %v3134_v44 = vpop.f32.mrb[86].mxu0  ;;  %v2558_v45 = vpop.f32.mrb[87].mxu1 }
 0x2c0   :  { %v3259_v46 = vadd.f32 %v4432_v41, %v3258_v34  ;;  %v3329_v47 = vmul.f32 %v4432_v41, %v4432_v41  ;;  %v4433_v48 = vadd.f32 %v3134_v44, %v2556_v43  ;;  %v3136_v49 = vpop.f32.mrb[87].mxu0 }
 0x2c2   :  { %v3392_v50 = vadd.f32 %v3391_v37, %v3329_v47  ;;  %v3260_v51 = vadd.f32 %v4433_v48, %v3259_v46  ;;  %v3330_v52 = vmul.f32 %v4433_v48, %v4433_v48  ;;  %v4307_v53 = vpack.c.bf16 %v4433_v48, %v4432_v41 }
 0x2c4   :  { %v3393_v54 = vadd.f32 %v3392_v50, %v3330_v52  ;;  %4379 = vst [vmem:[%s5937_s2 + $0xa8] sm:$0xff] %v4307_v53   ;;  %v2561_v55 = vpop.f32.mrb[88].mxu1 }
 0x2c5   :  { %v3139_v56 = vpop.f32.mrb[88].mxu0  ;;  %v2563_v57 = vpop.f32.mrb[89].mxu1 }
 0x2c6   :  { %v4434_v0 = vadd.f32 %v3139_v56, %v2561_v55  ;;  %v3141_v58 = vpop.f32.mrb[89].mxu0  ;;  %v2564_v59 = vpop.f32.mrb[90].mxu1 }
 0x2c7   :  { %v3142_v60 = vpop.f32.mrb[90].mxu0  ;;  %v2566_v61 = vpop.f32.mrb[91].mxu1 }
 0x2c8   :  { %v3261_v62 = vadd.f32 %v4434_v0, %v3260_v51  ;;  %v3331_v63 = vmul.f32 %v4434_v0, %v4434_v0  ;;  %v4435_v1 = vadd.f32 %v3142_v60, %v2564_v59  ;;  %v3144_v2 = vpop.f32.mrb[91].mxu0 }
 0x2ca   :  { %v3394_v3 = vadd.f32 %v3393_v54, %v3331_v63  ;;  %v3262_v4 = vadd.f32 %v4435_v1, %v3261_v62  ;;  %v3332_v5 = vmul.f32 %v4435_v1, %v4435_v1  ;;  %v4312_v6 = vpack.c.bf16 %v4435_v1, %v4434_v0 }
 0x2cc   :  { %v3395_v7 = vadd.f32 %v3394_v3, %v3332_v5  ;;  %4380 = vst [vmem:[%s5937_s2 + $0xb0] sm:$0xff] %v4312_v6   ;;  %v2569_v8 = vpop.f32.mrb[92].mxu1 }
 0x2cd   :  { %v3147_v9 = vpop.f32.mrb[92].mxu0  ;;  %v2571_v10 = vpop.f32.mrb[93].mxu1 }
 0x2ce   :  { %v4436_v11 = vadd.f32 %v3147_v9, %v2569_v8  ;;  %v3149_v12 = vpop.f32.mrb[93].mxu0  ;;  %v2572_v13 = vpop.f32.mrb[94].mxu1 }
 0x2cf   :  { %v3150_v14 = vpop.f32.mrb[94].mxu0  ;;  %v2574_v15 = vpop.f32.mrb[95].mxu1 }
 0x2d0   :  { %v3263_v16 = vadd.f32 %v4436_v11, %v3262_v4  ;;  %v3333_v17 = vmul.f32 %v4436_v11, %v4436_v11  ;;  %v4437_v18 = vadd.f32 %v3150_v14, %v2572_v13  ;;  %v3152_v19 = vpop.f32.mrb[95].mxu0 }
 0x2d2   :  { %v3396_v20 = vadd.f32 %v3395_v7, %v3333_v17  ;;  %v3264_v21 = vadd.f32 %v4437_v18, %v3263_v16  ;;  %v3334_v22 = vmul.f32 %v4437_v18, %v4437_v18  ;;  %v4317_v23 = vpack.c.bf16 %v4437_v18, %v4436_v11 }
 0x2d4   :  { %v3397_v24 = vadd.f32 %v3396_v20, %v3334_v22  ;;  %4381 = vst [vmem:[%s5937_s2 + $0xb8] sm:$0xff] %v4317_v23   ;;  %v2577_v25 = vpop.f32.mrb[96].mxu1 }
 0x2d5   :  { %v3155_v26 = vpop.f32.mrb[96].mxu0  ;;  %v2579_v27 = vpop.f32.mrb[97].mxu1 }
 0x2d6   :  { %v4438_v28 = vadd.f32 %v3155_v26, %v2577_v25  ;;  %v3157_v29 = vpop.f32.mrb[97].mxu0  ;;  %v2580_v30 = vpop.f32.mrb[98].mxu1 }
 0x2d7   :  { %v3158_v31 = vpop.f32.mrb[98].mxu0  ;;  %v2582_v32 = vpop.f32.mrb[99].mxu1 }
 0x2d8   :  { %v3265_v33 = vadd.f32 %v4438_v28, %v3264_v21  ;;  %v3335_v34 = vmul.f32 %v4438_v28, %v4438_v28  ;;  %v4439_v35 = vadd.f32 %v3158_v31, %v2580_v30  ;;  %v3160_v36 = vpop.f32.mrb[99].mxu0 }
 0x2da   :  { %v3398_v37 = vadd.f32 %v3397_v24, %v3335_v34  ;;  %v3266_v38 = vadd.f32 %v4439_v35, %v3265_v33  ;;  %v3336_v39 = vmul.f32 %v4439_v35, %v4439_v35  ;;  %v4322_v40 = vpack.c.bf16 %v4439_v35, %v4438_v28 }
 0x2dc   :  { %v3399_v41 = vadd.f32 %v3398_v37, %v3336_v39  ;;  %4382 = vst [vmem:[%s5937_s2 + $0xc0] sm:$0xff] %v4322_v40   ;;  %v2585_v42 = vpop.f32.mrb[100].mxu1 }
 0x2dd   :  { %v3163_v43 = vpop.f32.mrb[100].mxu0  ;;  %v2587_v44 = vpop.f32.mrb[101].mxu1 }
 0x2de   :  { %v4440_v45 = vadd.f32 %v3163_v43, %v2585_v42  ;;  %v3165_v46 = vpop.f32.mrb[101].mxu0  ;;  %v2588_v47 = vpop.f32.mrb[102].mxu1 }
 0x2df   :  { %v3166_v48 = vpop.f32.mrb[102].mxu0  ;;  %v2590_v49 = vpop.f32.mrb[103].mxu1 }
 0x2e0   :  { %v3267_v50 = vadd.f32 %v4440_v45, %v3266_v38  ;;  %v3337_v51 = vmul.f32 %v4440_v45, %v4440_v45  ;;  %v4441_v52 = vadd.f32 %v3166_v48, %v2588_v47  ;;  %v3168_v53 = vpop.f32.mrb[103].mxu0 }
 0x2e2   :  { %v3400_v54 = vadd.f32 %v3399_v41, %v3337_v51  ;;  %v3268_v55 = vadd.f32 %v4441_v52, %v3267_v50  ;;  %v3338_v56 = vmul.f32 %v4441_v52, %v4441_v52  ;;  %v4327_v57 = vpack.c.bf16 %v4441_v52, %v4440_v45 }
 0x2e4   :  { %v3401_v0 = vadd.f32 %v3400_v54, %v3338_v56  ;;  %4383 = vst [vmem:[%s5937_s2 + $0xc8] sm:$0xff] %v4327_v57   ;;  %v2593_v58 = vpop.f32.mrb[104].mxu1 }
 0x2e5   :  { %v3171_v59 = vpop.f32.mrb[104].mxu0  ;;  %v2595_v60 = vpop.f32.mrb[105].mxu1 }
 0x2e6   :  { %v4442_v61 = vadd.f32 %v3171_v59, %v2593_v58  ;;  %v3173_v62 = vpop.f32.mrb[105].mxu0  ;;  %v2596_v63 = vpop.f32.mrb[106].mxu1 }
 0x2e7   :  { %v3174_v1 = vpop.f32.mrb[106].mxu0  ;;  %v2598_v2 = vpop.f32.mrb[107].mxu1 }
 0x2e8   :  { %v3269_v3 = vadd.f32 %v4442_v61, %v3268_v55  ;;  %v3339_v4 = vmul.f32 %v4442_v61, %v4442_v61  ;;  %v4443_v5 = vadd.f32 %v3174_v1, %v2596_v63  ;;  %v3176_v6 = vpop.f32.mrb[107].mxu0 }
 0x2ea   :  { %v3402_v7 = vadd.f32 %v3401_v0, %v3339_v4  ;;  %v3270_v8 = vadd.f32 %v4443_v5, %v3269_v3  ;;  %v3340_v9 = vmul.f32 %v4443_v5, %v4443_v5  ;;  %v4332_v10 = vpack.c.bf16 %v4443_v5, %v4442_v61 }
 0x2ec   :  { %v3403_v11 = vadd.f32 %v3402_v7, %v3340_v9  ;;  %4384 = vst [vmem:[%s5937_s2 + $0xd0] sm:$0xff] %v4332_v10   ;;  %v2601_v12 = vpop.f32.mrb[108].mxu1 }
 0x2ed   :  { %v3179_v13 = vpop.f32.mrb[108].mxu0  ;;  %v2603_v14 = vpop.f32.mrb[109].mxu1 }
 0x2ee   :  { %v4444_v15 = vadd.f32 %v3179_v13, %v2601_v12  ;;  %v3181_v16 = vpop.f32.mrb[109].mxu0  ;;  %v2604_v17 = vpop.f32.mrb[110].mxu1 }
 0x2ef   :  { %v3182_v18 = vpop.f32.mrb[110].mxu0  ;;  %v2606_v19 = vpop.f32.mrb[111].mxu1 }
 0x2f0   :  { %v3271_v20 = vadd.f32 %v4444_v15, %v3270_v8  ;;  %v3341_v21 = vmul.f32 %v4444_v15, %v4444_v15  ;;  %v4445_v22 = vadd.f32 %v3182_v18, %v2604_v17  ;;  %v3184_v23 = vpop.f32.mrb[111].mxu0 }
 0x2f2   :  { %v3404_v24 = vadd.f32 %v3403_v11, %v3341_v21  ;;  %v3272_v25 = vadd.f32 %v4445_v22, %v3271_v20  ;;  %v3342_v26 = vmul.f32 %v4445_v22, %v4445_v22  ;;  %v4337_v27 = vpack.c.bf16 %v4445_v22, %v4444_v15 }
 0x2f4   :  { %v3405_v28 = vadd.f32 %v3404_v24, %v3342_v26  ;;  %4385 = vst [vmem:[%s5937_s2 + $0xd8] sm:$0xff] %v4337_v27   ;;  %v2609_v29 = vpop.f32.mrb[112].mxu1 }
 0x2f5   :  { %v3187_v30 = vpop.f32.mrb[112].mxu0  ;;  %v2611_v31 = vpop.f32.mrb[113].mxu1 }
 0x2f6   :  { %v4446_v32 = vadd.f32 %v3187_v30, %v2609_v29  ;;  %v3189_v33 = vpop.f32.mrb[113].mxu0  ;;  %v2612_v34 = vpop.f32.mrb[114].mxu1 }
 0x2f7   :  { %v3190_v35 = vpop.f32.mrb[114].mxu0  ;;  %v2614_v36 = vpop.f32.mrb[115].mxu1 }
 0x2f8   :  { %v3273_v37 = vadd.f32 %v4446_v32, %v3272_v25  ;;  %v3343_v38 = vmul.f32 %v4446_v32, %v4446_v32  ;;  %v4447_v39 = vadd.f32 %v3190_v35, %v2612_v34  ;;  %v3192_v40 = vpop.f32.mrb[115].mxu0 }
 0x2fa   :  { %v3406_v41 = vadd.f32 %v3405_v28, %v3343_v38  ;;  %v3274_v42 = vadd.f32 %v4447_v39, %v3273_v37  ;;  %v3344_v43 = vmul.f32 %v4447_v39, %v4447_v39  ;;  %v4342_v44 = vpack.c.bf16 %v4447_v39, %v4446_v32 }
 0x2fc   :  { %v3407_v45 = vadd.f32 %v3406_v41, %v3344_v43  ;;  %4386 = vst [vmem:[%s5937_s2 + $0xe0] sm:$0xff] %v4342_v44   ;;  %v2617_v46 = vpop.f32.mrb[116].mxu1 }
 0x2fd   :  { %v3195_v47 = vpop.f32.mrb[116].mxu0  ;;  %v2619_v48 = vpop.f32.mrb[117].mxu1 }
 0x2fe   :  { %v4448_v49 = vadd.f32 %v3195_v47, %v2617_v46  ;;  %v3197_v50 = vpop.f32.mrb[117].mxu0  ;;  %v2620_v51 = vpop.f32.mrb[118].mxu1 }
 0x2ff   :  { %v3198_v52 = vpop.f32.mrb[118].mxu0  ;;  %v2622_v53 = vpop.f32.mrb[119].mxu1 }
 0x300   :  { %v3275_v54 = vadd.f32 %v4448_v49, %v3274_v42  ;;  %v3345_v55 = vmul.f32 %v4448_v49, %v4448_v49  ;;  %v4449_v56 = vadd.f32 %v3198_v52, %v2620_v51  ;;  %v3200_v57 = vpop.f32.mrb[119].mxu0 }
 0x302   :  { %v3408_v0 = vadd.f32 %v3407_v45, %v3345_v55  ;;  %v3276_v58 = vadd.f32 %v4449_v56, %v3275_v54  ;;  %v3346_v59 = vmul.f32 %v4449_v56, %v4449_v56  ;;  %v4347_v60 = vpack.c.bf16 %v4449_v56, %v4448_v49 }
 0x304   :  { %v3409_v61 = vadd.f32 %v3408_v0, %v3346_v59  ;;  %4387 = vst [vmem:[%s5937_s2 + $0xe8] sm:$0xff] %v4347_v60   ;;  %v2625_v62 = vpop.f32.mrb[120].mxu1 }
 0x305   :  { %v3203_v63 = vpop.f32.mrb[120].mxu0  ;;  %v2627_v1 = vpop.f32.mrb[121].mxu1 }
 0x306   :  { %v4450_v2 = vadd.f32 %v3203_v63, %v2625_v62  ;;  %v3205_v3 = vpop.f32.mrb[121].mxu0  ;;  %v2628_v4 = vpop.f32.mrb[122].mxu1 }
 0x307   :  { %v3206_v5 = vpop.f32.mrb[122].mxu0  ;;  %v2630_v6 = vpop.f32.mrb[123].mxu1 }
 0x308   :  { %v3277_v7 = vadd.f32 %v4450_v2, %v3276_v58  ;;  %v3347_v8 = vmul.f32 %v4450_v2, %v4450_v2  ;;  %v4451_v9 = vadd.f32 %v3206_v5, %v2628_v4  ;;  %v3208_v10 = vpop.f32.mrb[123].mxu0 }
 0x30a   :  { %v3410_v11 = vadd.f32 %v3409_v61, %v3347_v8  ;;  %v3278_v12 = vadd.f32 %v4451_v9, %v3277_v7  ;;  %v3348_v13 = vmul.f32 %v4451_v9, %v4451_v9  ;;  %v4352_v14 = vpack.c.bf16 %v4451_v9, %v4450_v2 }
 0x30c   :  { %v3411_v15 = vadd.f32 %v3410_v11, %v3348_v13  ;;  %4388 = vst [vmem:[%s5937_s2 + $0xf0] sm:$0xff] %v4352_v14   ;;  %v2633_v16 = vpop.f32.mrb[124].mxu1 }
 0x30d   :  { %v3211_v17 = vpop.f32.mrb[124].mxu0  ;;  %v2635_v18 = vpop.f32.mrb[125].mxu1 }
 0x30e   :  { %v4452_v19 = vadd.f32 %v3211_v17, %v2633_v16  ;;  %v3213_v20 = vpop.f32.mrb[125].mxu0  ;;  %v2636_v21 = vpop.f32.mrb[126].mxu1 }
 0x30f   :  { %v3214_v22 = vpop.f32.mrb[126].mxu0  ;;  %v2638_v23 = vpop.f32.mrb[127].mxu1 }
 0x310   :  { %v3279_v24 = vadd.f32 %v4452_v19, %v3278_v12  ;;  %v3349_v25 = vmul.f32 %v4452_v19, %v4452_v19  ;;  %v4453_v26 = vadd.f32 %v3214_v22, %v2636_v21  ;;  %v3216_v27 = vpop.f32.mrb[127].mxu0 }
 0x312   :  { %v3412_v28 = vadd.f32 %v3411_v15, %v3349_v25  ;;  %v3280_v29 = vadd.f32 %v4453_v26, %v3279_v24  ;;  %v3350_v30 = vmul.f32 %v4453_v26, %v4453_v26  ;;  %v4357_v31 = vpack.c.bf16 %v4453_v26, %v4452_v19 }
 0x314   :  { %v3281_v32 = vrot.slane %v3280_v29, 4  ;;  %v3413_v33 = vadd.f32 %v3412_v28, %v3350_v30  ;;  %4389 = vst [vmem:[%s5937_s2 + $0xf8] sm:$0xff] %v4357_v31  }
 0x316   :  { %v3282_v34 = vadd.f32 %v3281_v32, %v3280_v29  ;;  %v3414_v35 = vrot.slane %v3413_v33, 4 }
 0x318   :  { %v3283_v36 = vrot.slane %v3282_v34, 2  ;;  %v3415_v37 = vadd.f32 %v3414_v35, %v3413_v33 }
 0x31a   :  { %v3284_v38 = vadd.f32 %v3283_v36, %v3282_v34  ;;  %v3416_v39 = vrot.slane %v3415_v37, 2 }
 0x31c   :  { %v3285_v40 = vrot.slane %v3284_v38, 1  ;;  %v3417_v41 = vadd.f32 %v3416_v39, %v3415_v37 }
 0x31e   :  { %v3418_v42 = vrot.slane %v3417_v41, 1  ;;  %v3286_v43 = vadd.f32 %v3285_v40, %v3284_v38 }
 0x320   :  { %v3419_v44 = vadd.f32 %v3418_v42, %v3417_v41 }
 0x322   :  { %v3421_v45 = vsel %vm3420_vm0, %v3286_v43, %v3419_v44 }
 0x323   :  { %3422 = vst [vmem:[%s5938_s3] sm:$0x3] %v3421_v45 }

// kernel: netD_forward.7
= control target key start
LH: loop header
LB: loop body
LE: loop exit
PB: predicated region body
PF: predicated region fallthrough
CT: control target
= control target key end

     0   :  { %s3142_s12 = smov 0   ;;  %s3144_s13 = smov 0   ;;  %s3669_s0 = inlined_call_operand.vmem [shape: bf16[128,2048], index: 0, kind: input, shape index: {}]   ;;  %s3670_s1 = inlined_call_operand.vmem [shape: bf16[2048,256], index: 1, kind: input, shape index: {}]   ;;  %s3671_s2 = inlined_call_operand.vmem [shape: bf16[128,256], index: 2, kind: output, shape index: {0}]   ;;  %s3672_s3 = inlined_call_operand.vmem [shape: f32[1,2,256], index: 3, kind: output, shape index: {1}]  }
   0x1   :  { %s3146_s14 = smov 0   ;;  %s3148_s15 = smov 0  }
   0x2   :  { %s3150_s16 = smov 0  }
   0x3 LB: > { %s23_s17 = sadd.s32 1, %s3115_s15  ;;  %p42_p1 = scmp.ne.s32.totalorder %s3107_s13, %s3103_s12  ;;  %s3119_s16 = sphi %s3150_s16, %s14_s16   ;;  %s3115_s15 = sphi %s3148_s15, %s3676_s15   ;;  %s3111_s14 = sphi %s3146_s14, %s3675_s14   ;;  %s3107_s13 = sphi %s3144_s13, %s3674_s13   ;;  %s3103_s12 = sphi %s3142_s12, %s3673_s12  }
   0x4   : > { %p24_p0 = scmp.ge.s32.totalorder %s23_s17, 2  ;;  %p43_p2 = scmp.eq.s32.totalorder %s3119_s16, 0 }
   0x5   : > { %s35_s19 = sadd.s32 1, %s3107_s13  ;;  %p2509_p5 = scmp.ge.s32.totalorder %s3119_s16, 2 }
   0x6   : > { %s3678_s17 = smov (%p24_p0, %s23_s17), 0  ;;  %p44_p3 = por %p43_p2, %p42_p1 }
   0x7   : > { %s31_s18 = ssub.s32 %s3115_s15, %s3678_s17  ;;  %146 = sbr.rel (%p2509_p5) target bundleno = 50 (0x32), region = 16 }
   0x8   : > { %p33_p4 = scmp.eq.s32.totalorder %s31_s18, 0 }
   0xa   : > { %s3177_s20 = scalar_select %p33_p4, %s3107_s13, %s35_s19  }
   0xe   : > { %149 = sbr.rel (!%p44_p3) target bundleno = 50 (0x32), region = 20  ;;  %s151_s21 = sand.u32 (%p44_p3), 1, %s3107_s13  }
   0xf   : > { %s2734_s22 = sshll.u32 (%p44_p3), %s3115_s15, 5  ;;  %s2510_s23 = sshll.u32 (%p44_p3), %s151_s21, 9 }
  0x10   : > { %s3185_s26 = scalar_lea.vmem (%p44_p3), %s3669_s0, %s2734_s22  ;;  %s3190_s27 = scalar_lea.vmem (%p44_p3), [#allocation3], %s2510_s23 }
  0x11   : > { %v172_v0 = vld [vmem:[%s3185_s26] sm:$0xff] (%p44_p3)  ;;  %v174_v1 = vld [vmem:[%s3185_s26 + $0x8] sm:$0xff] (%p44_p3)  ;;  %v176_v2 = vld [vmem:[%s3185_s26 + $0x10] sm:$0xff] (%p44_p3) }
  0x12   : > { %173 = vst [vmem:[%s3190_s27] sm:$0xff] (%p44_p3), %v172_v0  ;;  %175 = vst [vmem:[%s3190_s27 + $0x8] sm:$0xff] (%p44_p3), %v174_v1  ;;  %v178_v3 = vld [vmem:[%s3185_s26 + $0x18] sm:$0xff] (%p44_p3)  ;;  %v180_v4 = vld [vmem:[%s3185_s26 + $0x40] sm:$0xff] (%p44_p3) }
  0x13   : > { %177 = vst [vmem:[%s3190_s27 + $0x10] sm:$0xff] (%p44_p3), %v176_v2  ;;  %v182_v5 = vld [vmem:[%s3185_s26 + $0x48] sm:$0xff] (%p44_p3)  ;;  %179 = vst [vmem:[%s3190_s27 + $0x18] sm:$0xff] (%p44_p3), %v178_v3  ;;  %v184_v6 = vld [vmem:[%s3185_s26 + $0x50] sm:$0xff] (%p44_p3) }
  0x14   : > { %181 = vst [vmem:[%s3190_s27 + $0x20] sm:$0xff] (%p44_p3), %v180_v4  ;;  %183 = vst [vmem:[%s3190_s27 + $0x28] sm:$0xff] (%p44_p3), %v182_v5  ;;  %v186_v7 = vld [vmem:[%s3185_s26 + $0x58] sm:$0xff] (%p44_p3)  ;;  %v188_v8 = vld [vmem:[%s3185_s26 + $0x80] sm:$0xff] (%p44_p3) }
  0x15   : > { %185 = vst [vmem:[%s3190_s27 + $0x30] sm:$0xff] %v184_v6  ;;  %187 = vst [vmem:[%s3190_s27 + $0x38] sm:$0xff] %v186_v7  ;;  %v190_v9 = vld [vmem:[%s3185_s26 + $0x88] sm:$0xff]  ;;  %v192_v10 = vld [vmem:[%s3185_s26 + $0x90] sm:$0xff] }
  0x16   : > { %189 = vst [vmem:[%s3190_s27 + $0x40] sm:$0xff] %v188_v8  ;;  %v194_v11 = vld [vmem:[%s3185_s26 + $0x98] sm:$0xff]  ;;  %191 = vst [vmem:[%s3190_s27 + $0x48] sm:$0xff] %v190_v9  ;;  %v196_v12 = vld [vmem:[%s3185_s26 + $0xc0] sm:$0xff] }
  0x17   : > { %193 = vst [vmem:[%s3190_s27 + $0x50] sm:$0xff] %v192_v10  ;;  %195 = vst [vmem:[%s3190_s27 + $0x58] sm:$0xff] %v194_v11  ;;  %v198_v13 = vld [vmem:[%s3185_s26 + $0xc8] sm:$0xff]  ;;  %v200_v14 = vld [vmem:[%s3185_s26 + $0xd0] sm:$0xff] }
  0x18   : > { %197 = vst [vmem:[%s3190_s27 + $0x60] sm:$0xff] %v196_v12  ;;  %199 = vst [vmem:[%s3190_s27 + $0x68] sm:$0xff] %v198_v13  ;;  %v202_v15 = vld [vmem:[%s3185_s26 + $0xd8] sm:$0xff]  ;;  %v204_v16 = vld [vmem:[%s3185_s26 + $0x100] sm:$0xff] }
  0x19   : > { %201 = vst [vmem:[%s3190_s27 + $0x70] sm:$0xff] %v200_v14  ;;  %v206_v17 = vld [vmem:[%s3185_s26 + $0x108] sm:$0xff]  ;;  %203 = vst [vmem:[%s3190_s27 + $0x78] sm:$0xff] %v202_v15  ;;  %v208_v18 = vld [vmem:[%s3185_s26 + $0x110] sm:$0xff] }
  0x1a   : > { %205 = vst [vmem:[%s3190_s27 + $0x80] sm:$0xff] %v204_v16  ;;  %207 = vst [vmem:[%s3190_s27 + $0x88] sm:$0xff] %v206_v17  ;;  %v210_v19 = vld [vmem:[%s3185_s26 + $0x118] sm:$0xff]  ;;  %v212_v20 = vld [vmem:[%s3185_s26 + $0x140] sm:$0xff] }
  0x1b   : > { %209 = vst [vmem:[%s3190_s27 + $0x90] sm:$0xff] %v208_v18  ;;  %211 = vst [vmem:[%s3190_s27 + $0x98] sm:$0xff] %v210_v19  ;;  %v214_v21 = vld [vmem:[%s3185_s26 + $0x148] sm:$0xff]  ;;  %v216_v22 = vld [vmem:[%s3185_s26 + $0x150] sm:$0xff] }
  0x1c   : > { %213 = vst [vmem:[%s3190_s27 + $0xa0] sm:$0xff] %v212_v20  ;;  %v218_v23 = vld [vmem:[%s3185_s26 + $0x158] sm:$0xff]  ;;  %215 = vst [vmem:[%s3190_s27 + $0xa8] sm:$0xff] %v214_v21  ;;  %v220_v24 = vld [vmem:[%s3185_s26 + $0x180] sm:$0xff] }
  0x1d   : > { %217 = vst [vmem:[%s3190_s27 + $0xb0] sm:$0xff] %v216_v22  ;;  %219 = vst [vmem:[%s3190_s27 + $0xb8] sm:$0xff] %v218_v23  ;;  %v222_v25 = vld [vmem:[%s3185_s26 + $0x188] sm:$0xff]  ;;  %v224_v26 = vld [vmem:[%s3185_s26 + $0x190] sm:$0xff] }
  0x1e   : > { %221 = vst [vmem:[%s3190_s27 + $0xc0] sm:$0xff] %v220_v24  ;;  %223 = vst [vmem:[%s3190_s27 + $0xc8] sm:$0xff] %v222_v25  ;;  %v226_v27 = vld [vmem:[%s3185_s26 + $0x198] sm:$0xff]  ;;  %v228_v28 = vld [vmem:[%s3185_s26 + $0x1c0] sm:$0xff] }
  0x1f   : > { %225 = vst [vmem:[%s3190_s27 + $0xd0] sm:$0xff] %v224_v26  ;;  %v230_v29 = vld [vmem:[%s3185_s26 + $0x1c8] sm:$0xff]  ;;  %227 = vst [vmem:[%s3190_s27 + $0xd8] sm:$0xff] %v226_v27  ;;  %v232_v30 = vld [vmem:[%s3185_s26 + $0x1d0] sm:$0xff] }
  0x20   : > { %229 = vst [vmem:[%s3190_s27 + $0xe0] sm:$0xff] %v228_v28  ;;  %231 = vst [vmem:[%s3190_s27 + $0xe8] sm:$0xff] %v230_v29  ;;  %v234_v31 = vld [vmem:[%s3185_s26 + $0x1d8] sm:$0xff]  ;;  %v236_v32 = vld [vmem:[%s3185_s26 + $0x200] sm:$0xff] }
  0x21   : > { %233 = vst [vmem:[%s3190_s27 + $0xf0] sm:$0xff] %v232_v30  ;;  %235 = vst [vmem:[%s3190_s27 + $0xf8] sm:$0xff] %v234_v31  ;;  %v238_v33 = vld [vmem:[%s3185_s26 + $0x208] sm:$0xff]  ;;  %v240_v34 = vld [vmem:[%s3185_s26 + $0x210] sm:$0xff] }
  0x22   : > { %237 = vst [vmem:[%s3190_s27 + $0x100] sm:$0xff] %v236_v32  ;;  %v242_v35 = vld [vmem:[%s3185_s26 + $0x218] sm:$0xff]  ;;  %239 = vst [vmem:[%s3190_s27 + $0x108] sm:$0xff] %v238_v33  ;;  %v244_v36 = vld [vmem:[%s3185_s26 + $0x240] sm:$0xff] }
  0x23   : > { %241 = vst [vmem:[%s3190_s27 + $0x110] sm:$0xff] %v240_v34  ;;  %243 = vst [vmem:[%s3190_s27 + $0x118] sm:$0xff] %v242_v35  ;;  %v246_v37 = vld [vmem:[%s3185_s26 + $0x248] sm:$0xff]  ;;  %v248_v38 = vld [vmem:[%s3185_s26 + $0x250] sm:$0xff] }
  0x24   : > { %245 = vst [vmem:[%s3190_s27 + $0x120] sm:$0xff] %v244_v36  ;;  %247 = vst [vmem:[%s3190_s27 + $0x128] sm:$0xff] %v246_v37  ;;  %v250_v39 = vld [vmem:[%s3185_s26 + $0x258] sm:$0xff]  ;;  %v252_v40 = vld [vmem:[%s3185_s26 + $0x280] sm:$0xff] }
  0x25   : > { %249 = vst [vmem:[%s3190_s27 + $0x130] sm:$0xff] %v248_v38  ;;  %v254_v41 = vld [vmem:[%s3185_s26 + $0x288] sm:$0xff]  ;;  %251 = vst [vmem:[%s3190_s27 + $0x138] sm:$0xff] %v250_v39  ;;  %v256_v42 = vld [vmem:[%s3185_s26 + $0x290] sm:$0xff] }
  0x26   : > { %253 = vst [vmem:[%s3190_s27 + $0x140] sm:$0xff] %v252_v40  ;;  %255 = vst [vmem:[%s3190_s27 + $0x148] sm:$0xff] %v254_v41  ;;  %v258_v43 = vld [vmem:[%s3185_s26 + $0x298] sm:$0xff]  ;;  %v260_v44 = vld [vmem:[%s3185_s26 + $0x2c0] sm:$0xff] }
  0x27   : > { %257 = vst [vmem:[%s3190_s27 + $0x150] sm:$0xff] %v256_v42  ;;  %259 = vst [vmem:[%s3190_s27 + $0x158] sm:$0xff] %v258_v43  ;;  %v262_v45 = vld [vmem:[%s3185_s26 + $0x2c8] sm:$0xff]  ;;  %v264_v46 = vld [vmem:[%s3185_s26 + $0x2d0] sm:$0xff] }
  0x28   : > { %261 = vst [vmem:[%s3190_s27 + $0x160] sm:$0xff] %v260_v44  ;;  %v266_v47 = vld [vmem:[%s3185_s26 + $0x2d8] sm:$0xff]  ;;  %263 = vst [vmem:[%s3190_s27 + $0x168] sm:$0xff] %v262_v45  ;;  %v268_v48 = vld [vmem:[%s3185_s26 + $0x300] sm:$0xff] }
  0x29   : > { %265 = vst [vmem:[%s3190_s27 + $0x170] sm:$0xff] %v264_v46  ;;  %267 = vst [vmem:[%s3190_s27 + $0x178] sm:$0xff] %v266_v47  ;;  %v270_v49 = vld [vmem:[%s3185_s26 + $0x308] sm:$0xff]  ;;  %v272_v50 = vld [vmem:[%s3185_s26 + $0x310] sm:$0xff] }
  0x2a   : > { %269 = vst [vmem:[%s3190_s27 + $0x180] sm:$0xff] %v268_v48  ;;  %271 = vst [vmem:[%s3190_s27 + $0x188] sm:$0xff] %v270_v49  ;;  %v274_v51 = vld [vmem:[%s3185_s26 + $0x318] sm:$0xff]  ;;  %v276_v52 = vld [vmem:[%s3185_s26 + $0x340] sm:$0xff] }
  0x2b   : > { %273 = vst [vmem:[%s3190_s27 + $0x190] sm:$0xff] %v272_v50  ;;  %v278_v53 = vld [vmem:[%s3185_s26 + $0x348] sm:$0xff]  ;;  %275 = vst [vmem:[%s3190_s27 + $0x198] sm:$0xff] %v274_v51  ;;  %v280_v54 = vld [vmem:[%s3185_s26 + $0x350] sm:$0xff] }
  0x2c   : > { %277 = vst [vmem:[%s3190_s27 + $0x1a0] sm:$0xff] %v276_v52  ;;  %279 = vst [vmem:[%s3190_s27 + $0x1a8] sm:$0xff] %v278_v53  ;;  %v282_v55 = vld [vmem:[%s3185_s26 + $0x358] sm:$0xff]  ;;  %v284_v56 = vld [vmem:[%s3185_s26 + $0x380] sm:$0xff] }
  0x2d   : > { %281 = vst [vmem:[%s3190_s27 + $0x1b0] sm:$0xff] %v280_v54  ;;  %283 = vst [vmem:[%s3190_s27 + $0x1b8] sm:$0xff] %v282_v55  ;;  %v286_v57 = vld [vmem:[%s3185_s26 + $0x388] sm:$0xff]  ;;  %v288_v58 = vld [vmem:[%s3185_s26 + $0x390] sm:$0xff] }
  0x2e   : > { %285 = vst [vmem:[%s3190_s27 + $0x1c0] sm:$0xff] %v284_v56  ;;  %v290_v59 = vld [vmem:[%s3185_s26 + $0x398] sm:$0xff]  ;;  %287 = vst [vmem:[%s3190_s27 + $0x1c8] sm:$0xff] %v286_v57  ;;  %v292_v60 = vld [vmem:[%s3185_s26 + $0x3c0] sm:$0xff] }
  0x2f   : > { %289 = vst [vmem:[%s3190_s27 + $0x1d0] sm:$0xff] %v288_v58  ;;  %291 = vst [vmem:[%s3190_s27 + $0x1d8] sm:$0xff] %v290_v59  ;;  %v294_v61 = vld [vmem:[%s3185_s26 + $0x3c8] sm:$0xff]  ;;  %v296_v62 = vld [vmem:[%s3185_s26 + $0x3d0] sm:$0xff] }
  0x30   : > { %293 = vst [vmem:[%s3190_s27 + $0x1e0] sm:$0xff] %v292_v60  ;;  %295 = vst [vmem:[%s3190_s27 + $0x1e8] sm:$0xff] %v294_v61  ;;  %v298_v63 = vld [vmem:[%s3185_s26 + $0x3d8] sm:$0xff] }
  0x31   : > { %297 = vst [vmem:[%s3190_s27 + $0x1f0] sm:$0xff] %v296_v62  ;;  %299 = vst [vmem:[%s3190_s27 + $0x1f8] sm:$0xff] %v298_v63 }
  0x32 PF: > { %p2513_p6 = scmp.ge.s32.totalorder %s3119_s16, 1  ;;  %p314_p7 = scmp.lt.s32.totalorder %s3119_s16, 3 }
  0x34   : > { %p315_p8 = pnand %p2513_p6, %p314_p7 }
  0x35   : > { %s321_s28 = sand.u32 (!%p315_p8), 1, %s3103_s12   ;;  %s2515_s29 = sshll.u32 (!%p315_p8), %s3111_s14, 7 }
  0x36   : > { %318 = sbr.rel (%p315_p8) target bundleno = 526 (0x20e), region = 47  ;;  %s2514_s30 = sshll.u32 (!%p315_p8), %s321_s28, 9 }
  0x37   : > { %p359_p9 = scmp.lt.s32.totalorder (!%p315_p8), %s2515_s29, 255  ;;  %s3326_s8 = scalar_lea.vmem (!%p315_p8), [#allocation3], %s2514_s30 }
  0x38   : > { %p2518_p10 = scmp.ne.s32.totalorder (!%p315_p8), %s3111_s14, 0 }
  0x3d   : > { %s3680_s29 = smov (!%p359_p9, %s2515_s29), 255  ;;  %380 = sbr.rel (%p2518_p10) target bundleno = 79 (0x4f), region = 55 }
  0x3e   : > { %s2735_s4 = sshll.u32 %s3680_s29, 3  ;;  %v3121_v0 = vmov (!%p2518_p10), 0.0  }
  0x3f   : > { %s3324_s7 = scalar_lea.vmem %s3670_s1, %s2735_s4  ;;  %381 = vst [vmem:[#allocation2] sm:$0xff] (!%p2518_p10), %v3121_v0  ;;  %382 = vst [vmem:[#allocation2 + $0x8] sm:$0xff] (!%p2518_p10), %v3121_v0 }
  0x40   : > { %383 = vst [vmem:[#allocation2 + $0x10] sm:$0xff] (!%p2518_p10), %v3121_v0  ;;  %384 = vst [vmem:[#allocation2 + $0x18] sm:$0xff] (!%p2518_p10), %v3121_v0 }
  0x41   : > { %385 = vst [vmem:[#allocation2 + $0x20] sm:$0xff] (!%p2518_p10), %v3121_v0  ;;  %386 = vst [vmem:[#allocation2 + $0x28] sm:$0xff] (!%p2518_p10), %v3121_v0 }
  0x42   : > { %387 = vst [vmem:[#allocation2 + $0x30] sm:$0xff] (!%p2518_p10), %v3121_v0  ;;  %388 = vst [vmem:[#allocation2 + $0x38] sm:$0xff] (!%p2518_p10), %v3121_v0 }
  0x43   : > { %389 = vst [vmem:[#allocation2 + $0x40] sm:$0xff] (!%p2518_p10), %v3121_v0  ;;  %390 = vst [vmem:[#allocation2 + $0x48] sm:$0xff] (!%p2518_p10), %v3121_v0 }
  0x44   : > { %391 = vst [vmem:[#allocation2 + $0x50] sm:$0xff] %v3121_v0  ;;  %392 = vst [vmem:[#allocation2 + $0x58] sm:$0xff] %v3121_v0 }
  0x45   : > { %393 = vst [vmem:[#allocation2 + $0x60] sm:$0xff] %v3121_v0  ;;  %394 = vst [vmem:[#allocation2 + $0x68] sm:$0xff] %v3121_v0 }
  0x46   : > { %395 = vst [vmem:[#allocation2 + $0x70] sm:$0xff] %v3121_v0  ;;  %396 = vst [vmem:[#allocation2 + $0x78] sm:$0xff] %v3121_v0 }
  0x47   : > { %397 = vst [vmem:[#allocation2 + $0x80] sm:$0xff] %v3121_v0  ;;  %398 = vst [vmem:[#allocation2 + $0x88] sm:$0xff] %v3121_v0 }
  0x48   : > { %399 = vst [vmem:[#allocation2 + $0x90] sm:$0xff] %v3121_v0  ;;  %400 = vst [vmem:[#allocation2 + $0x98] sm:$0xff] %v3121_v0 }
  0x49   : > { %401 = vst [vmem:[#allocation2 + $0xa0] sm:$0xff] %v3121_v0  ;;  %402 = vst [vmem:[#allocation2 + $0xa8] sm:$0xff] %v3121_v0 }
  0x4a   : > { %403 = vst [vmem:[#allocation2 + $0xb0] sm:$0xff] %v3121_v0  ;;  %404 = vst [vmem:[#allocation2 + $0xb8] sm:$0xff] %v3121_v0 }
  0x4b   : > { %405 = vst [vmem:[#allocation2 + $0xc0] sm:$0xff] %v3121_v0  ;;  %406 = vst [vmem:[#allocation2 + $0xc8] sm:$0xff] %v3121_v0 }
  0x4c   : > { %407 = vst [vmem:[#allocation2 + $0xd0] sm:$0xff] %v3121_v0  ;;  %408 = vst [vmem:[#allocation2 + $0xd8] sm:$0xff] %v3121_v0 }
  0x4d   : > { %409 = vst [vmem:[#allocation2 + $0xe0] sm:$0xff] %v3121_v0  ;;  %410 = vst [vmem:[#allocation2 + $0xe8] sm:$0xff] %v3121_v0 }
  0x4e   : > { %411 = vst [vmem:[#allocation2 + $0xf0] sm:$0xff] %v3121_v0  ;;  %412 = vst [vmem:[#allocation2 + $0xf8] sm:$0xff] %v3121_v0 }
  0x4f PF: > { %v2889_v1 = vld [vmem:[%s3324_s7 + $0x4] ss:$8 sps:$4 sm:$0xff]   ;;  %v2893_v3 = vld [vmem:[%s3324_s7] ss:$8 sps:$4 sm:$0xff]   ;;  %v2895_v5 = vld [vmem:[%s3324_s7 + $0x14] ss:$8 sps:$4 sm:$0xff]  }
  0x50   : > { %v2891_v2 = vld [vmem:[%s3324_s7 + $0x204] ss:$8 sps:$4 sm:$0xff]   ;;  %1597 = vmatprep.subr.bf16.mxu1 %v2889_v1  ;;  %v2894_v4 = vld [vmem:[%s3324_s7 + $0x200] ss:$8 sps:$4 sm:$0xff]   ;;  %v2897_v6 = vld [vmem:[%s3324_s7 + $0x214] ss:$8 sps:$4 sm:$0xff]  }
  0x51   : > { %1823 = vmatprep.subr.bf16.mxu0 %v2891_v2  ;;  %1598 = vmatpush1.bf16.msra.mxu1 %v2893_v3  ;;  %v2899_v7 = vld [vmem:[%s3324_s7 + $0x10] ss:$8 sps:$4 sm:$0xff]   ;;  %v2901_v9 = vld [vmem:[%s3324_s7 + $0x24] ss:$8 sps:$4 sm:$0xff]   ;;  %v2905_v11 = vld [vmem:[%s3324_s7 + $0x20] ss:$8 sps:$4 sm:$0xff]  }
  0x52   : > { %1824 = vmatpush1.bf16.msra.mxu0 %v2894_v4  ;;  %1599 = vmatprep.subr.bf16.mxu1 %v2895_v5  ;;  %v2900_v8 = vld [vmem:[%s3324_s7 + $0x210] ss:$8 sps:$4 sm:$0xff]   ;;  %v2903_v10 = vld [vmem:[%s3324_s7 + $0x224] ss:$8 sps:$4 sm:$0xff]   ;;  %v2906_v12 = vld [vmem:[%s3324_s7 + $0x220] ss:$8 sps:$4 sm:$0xff]  }
  0x53   : > { %1825 = vmatprep.subr.bf16.mxu0 %v2897_v6  ;;  %v2907_v13 = vld [vmem:[%s3324_s7 + $0x34] ss:$8 sps:$4 sm:$0xff]   ;;  %v2911_v15 = vld [vmem:[%s3324_s7 + $0x30] ss:$8 sps:$4 sm:$0xff]   ;;  %v2913_v17 = vld [vmem:[%s3324_s7 + $0x44] ss:$8 sps:$4 sm:$0xff]  }
  0x54   : > { %v2909_v14 = vld [vmem:[%s3324_s7 + $0x234] ss:$8 sps:$4 sm:$0xff]   ;;  %v2912_v16 = vld [vmem:[%s3324_s7 + $0x230] ss:$8 sps:$4 sm:$0xff]   ;;  %v2915_v18 = vld [vmem:[%s3324_s7 + $0x244] ss:$8 sps:$4 sm:$0xff]  }
  0x55   : > { %1600 = vmatpush1.bf16.msra.mxu1 %v2899_v7  ;;  %v2917_v19 = vld [vmem:[%s3324_s7 + $0x40] ss:$8 sps:$4 sm:$0xff]   ;;  %v2919_v21 = vld [vmem:[%s3324_s7 + $0x54] ss:$8 sps:$4 sm:$0xff]   ;;  %v2923_v23 = vld [vmem:[%s3324_s7 + $0x50] ss:$8 sps:$4 sm:$0xff]  }
  0x56   : > { %1826 = vmatpush1.bf16.msra.mxu0 %v2900_v8  ;;  %1601 = vmatprep.subr.bf16.mxu1 %v2901_v9  ;;  %v2918_v20 = vld [vmem:[%s3324_s7 + $0x240] ss:$8 sps:$4 sm:$0xff]   ;;  %v2921_v22 = vld [vmem:[%s3324_s7 + $0x254] ss:$8 sps:$4 sm:$0xff]   ;;  %v2924_v24 = vld [vmem:[%s3324_s7 + $0x250] ss:$8 sps:$4 sm:$0xff]  }
  0x57   : > { %1827 = vmatprep.subr.bf16.mxu0 %v2903_v10  ;;  %v2925_v25 = vld [vmem:[%s3324_s7 + $0x64] ss:$8 sps:$4 sm:$0xff]   ;;  %v2929_v27 = vld [vmem:[%s3324_s7 + $0x60] ss:$8 sps:$4 sm:$0xff]   ;;  %v2931_v29 = vld [vmem:[%s3324_s7 + $0x74] ss:$8 sps:$4 sm:$0xff]  }
  0x58   : > { %v2927_v26 = vld [vmem:[%s3324_s7 + $0x264] ss:$8 sps:$4 sm:$0xff]   ;;  %v2930_v28 = vld [vmem:[%s3324_s7 + $0x260] ss:$8 sps:$4 sm:$0xff]   ;;  %v2933_v30 = vld [vmem:[%s3324_s7 + $0x274] ss:$8 sps:$4 sm:$0xff]  }
  0x59   : > { %1602 = vmatpush1.bf16.msra.mxu1 %v2905_v11  ;;  %v2935_v31 = vld [vmem:[%s3324_s7 + $0x70] ss:$8 sps:$4 sm:$0xff]   ;;  %v2937_v33 = vld [vmem:[%s3324_s7 + $0x84] ss:$8 sps:$4 sm:$0xff]   ;;  %v2941_v35 = vld [vmem:[%s3324_s7 + $0x80] ss:$8 sps:$4 sm:$0xff]  }
  0x5a   : > { %1828 = vmatpush1.bf16.msra.mxu0 %v2906_v12  ;;  %1603 = vmatprep.subr.bf16.mxu1 %v2907_v13  ;;  %v2936_v32 = vld [vmem:[%s3324_s7 + $0x270] ss:$8 sps:$4 sm:$0xff]   ;;  %v2939_v34 = vld [vmem:[%s3324_s7 + $0x284] ss:$8 sps:$4 sm:$0xff]   ;;  %v2942_v36 = vld [vmem:[%s3324_s7 + $0x280] ss:$8 sps:$4 sm:$0xff]  }
  0x5b   : > { %1829 = vmatprep.subr.bf16.mxu0 %v2909_v14  ;;  %v2943_v37 = vld [vmem:[%s3324_s7 + $0x94] ss:$8 sps:$4 sm:$0xff]   ;;  %v2947_v39 = vld [vmem:[%s3324_s7 + $0x90] ss:$8 sps:$4 sm:$0xff]   ;;  %v2949_v41 = vld [vmem:[%s3324_s7 + $0xa4] ss:$8 sps:$4 sm:$0xff]  }
  0x5c   : > { %v2945_v38 = vld [vmem:[%s3324_s7 + $0x294] ss:$8 sps:$4 sm:$0xff]   ;;  %v2948_v40 = vld [vmem:[%s3324_s7 + $0x290] ss:$8 sps:$4 sm:$0xff]   ;;  %v2951_v42 = vld [vmem:[%s3324_s7 + $0x2a4] ss:$8 sps:$4 sm:$0xff]  }
  0x5d   : > { %1604 = vmatpush1.bf16.msra.mxu1 %v2911_v15  ;;  %v2953_v43 = vld [vmem:[%s3324_s7 + $0xa0] ss:$8 sps:$4 sm:$0xff]   ;;  %v2955_v45 = vld [vmem:[%s3324_s7 + $0xb4] ss:$8 sps:$4 sm:$0xff]   ;;  %v2959_v47 = vld [vmem:[%s3324_s7 + $0xb0] ss:$8 sps:$4 sm:$0xff]  }
  0x5e   : > { %1830 = vmatpush1.bf16.msra.mxu0 %v2912_v16  ;;  %1605 = vmatprep.subr.bf16.mxu1 %v2913_v17  ;;  %v2954_v44 = vld [vmem:[%s3324_s7 + $0x2a0] ss:$8 sps:$4 sm:$0xff]   ;;  %v2957_v46 = vld [vmem:[%s3324_s7 + $0x2b4] ss:$8 sps:$4 sm:$0xff]   ;;  %v2960_v48 = vld [vmem:[%s3324_s7 + $0x2b0] ss:$8 sps:$4 sm:$0xff]  }
  0x5f   : > { %1831 = vmatprep.subr.bf16.mxu0 %v2915_v18  ;;  %v445_v49 = vld [vmem:[%s3326_s8] sm:$0xff]  ;;  %v447_v51 = vld [vmem:[%s3326_s8 + $0x10] sm:$0xff]  ;;  %p2711_p11 = scmp.ne.s32.totalorder %s3111_s14, 1 }
  0x60   : > { %v449_v50 = vld [vmem:[%s3326_s8 + $0x20] sm:$0xff]  ;;  %v451_v52 = vld [vmem:[%s3326_s8 + $0x30] sm:$0xff]  ;;  %vm2265_vm0 = vcmask (!%p2711_p11), 1040384  }
  0x61   : > { %1606 = vmatpush1.bf16.msra.mxu1 %v2917_v19  ;;  %v2961_v53 = vld [vmem:[%s3324_s7 + $0xc4] ss:$8 sps:$4 sm:$0xff]   ;;  %v2520_v54 = vcombine.high %v445_v49, %v449_v50  ;;  %v2524_v56 = vcombine.high %v447_v51, %v451_v52  ;;  %v2965_v57 = vld [vmem:[%s3324_s7 + $0xc0] ss:$8 sps:$4 sm:$0xff]   ;;  %v2967_v59 = vld [vmem:[%s3324_s7 + $0xd4] ss:$8 sps:$4 sm:$0xff]   ;;  %v2519_v12 = vcombine.low %v445_v49, %v449_v50  ;;  %v2523_v13 = vcombine.low %v447_v51, %v451_v52 }
  0x62   : > { %1832 = vmatpush1.bf16.msra.mxu0 %v2918_v20  ;;  %1607 = vmatprep.subr.bf16.mxu1 %v2919_v21  ;;  %v2963_v55 = vld [vmem:[%s3324_s7 + $0x2c4] ss:$8 sps:$4 sm:$0xff]   ;;  %v2966_v58 = vld [vmem:[%s3324_s7 + $0x2c0] ss:$8 sps:$4 sm:$0xff]   ;;  %v2969_v60 = vld [vmem:[%s3324_s7 + $0x2d4] ss:$8 sps:$4 sm:$0xff]  }
  0x63   : > { %1833 = vmatprep.subr.bf16.mxu0 %v2921_v22  ;;  %1629 = vmatprep.mubr.bf16.mxu1 %v2520_v54  ;;  %v2971_v61 = vld [vmem:[%s3324_s7 + $0xd0] ss:$8 sps:$4 sm:$0xff]   ;;  %v2973_v63 = vld [vmem:[%s3324_s7 + $0xe4] ss:$8 sps:$4 sm:$0xff]   ;;  %v2977_v1 = vld [vmem:[%s3324_s7 + $0xe0] ss:$8 sps:$4 sm:$0xff]  }
  0x64   : > { %1855 = vmatprep.mubr.bf16.mxu0 %v2524_v56  ;;  %v2972_v62 = vld [vmem:[%s3324_s7 + $0x2d0] ss:$8 sps:$4 sm:$0xff]   ;;  %v2975_v0 = vld [vmem:[%s3324_s7 + $0x2e4] ss:$8 sps:$4 sm:$0xff]   ;;  %v2978_v2 = vld [vmem:[%s3324_s7 + $0x2e0] ss:$8 sps:$4 sm:$0xff]  }
  0x65   : > { %1608 = vmatpush1.bf16.msra.mxu1 %v2923_v23  ;;  %v2979_v3 = vld [vmem:[%s3324_s7 + $0xf4] ss:$8 sps:$4 sm:$0xff]   ;;  %v2983_v5 = vld [vmem:[%s3324_s7 + $0xf0] ss:$8 sps:$4 sm:$0xff]   ;;  %v2987_v7 = vld [vmem:[%s3324_s7 + $0x104] ss:$8 sps:$4 sm:$0xff]  }
  0x66   : > { %1834 = vmatpush1.bf16.msra.mxu0 %v2924_v24  ;;  %1609 = vmatprep.subr.bf16.mxu1 %v2925_v25  ;;  %v2981_v4 = vld [vmem:[%s3324_s7 + $0x2f4] ss:$8 sps:$4 sm:$0xff]   ;;  %v2984_v6 = vld [vmem:[%s3324_s7 + $0x2f0] ss:$8 sps:$4 sm:$0xff]   ;;  %v2990_v8 = vld [vmem:[%s3324_s7 + $0x304] ss:$8 sps:$4 sm:$0xff]  }
  0x67   : > { %1835 = vmatprep.subr.bf16.mxu0 %v2927_v26  ;;  %v2985_v9 = vld [vmem:[%s3324_s7 + $0x100] ss:$8 sps:$4 sm:$0xff]   ;;  %v455_v15 = vld [vmem:[%s3326_s8 + $0x50] sm:$0xff]  ;;  %v2999_v23 = vld [vmem:[%s3324_s7 + $0x124] ss:$8 sps:$4 sm:$0xff]  }
  0x68   : > { %v2988_v10 = vld [vmem:[%s3324_s7 + $0x300] ss:$8 sps:$4 sm:$0xff]   ;;  %v459_v16 = vld [vmem:[%s3326_s8 + $0x70] sm:$0xff]  ;;  %v3002_v24 = vld [vmem:[%s3324_s7 + $0x324] ss:$8 sps:$4 sm:$0xff]  }
  0x69   : > { %1610 = vmatpush1.bf16.msra.mxu1 %v2929_v27  ;;  %v453_v11 = vld [vmem:[%s3326_s8 + $0x40] sm:$0xff]  ;;  %v2993_v17 = vld [vmem:[%s3324_s7 + $0x114] ss:$8 sps:$4 sm:$0xff]   ;;  %v2532_v20 = vcombine.high %v455_v15, %v459_v16  ;;  %v2991_v21 = vld [vmem:[%s3324_s7 + $0x110] ss:$8 sps:$4 sm:$0xff]  }
  0x6a   : > { %1836 = vmatpush1.bf16.msra.mxu0 %v2930_v28  ;;  %1611 = vmatprep.subr.bf16.mxu1 %v2931_v29  ;;  %v457_v14 = vld [vmem:[%s3326_s8 + $0x60] sm:$0xff]  ;;  %v2996_v18 = vld [vmem:[%s3324_s7 + $0x314] ss:$8 sps:$4 sm:$0xff]   ;;  %v2994_v22 = vld [vmem:[%s3324_s7 + $0x310] ss:$8 sps:$4 sm:$0xff]  }
  0x6b   : > { %1837 = vmatprep.subr.bf16.mxu0 %v2933_v30  ;;  %v2528_v19 = vcombine.high %v453_v11, %v457_v14  ;;  %v2997_v25 = vld [vmem:[%s3324_s7 + $0x120] ss:$8 sps:$4 sm:$0xff]   ;;  %v2527_v29 = vcombine.low %v453_v11, %v457_v14  ;;  %v2531_v30 = vcombine.low %v455_v15, %v459_v16  ;;  %v3017_v49 = vld [vmem:[%s3324_s7 + $0x154] ss:$8 sps:$4 sm:$0xff]   ;;  %v3018_v54 = vld [vmem:[%s3324_s7 + $0x350] ss:$8 sps:$4 sm:$0xff]  }
  0x6c   : > { %v3000_v26 = vld [vmem:[%s3324_s7 + $0x320] ss:$8 sps:$4 sm:$0xff]   ;;  %v3020_v50 = vld [vmem:[%s3324_s7 + $0x354] ss:$8 sps:$4 sm:$0xff]   ;;  %v3026_v56 = vld [vmem:[%s3324_s7 + $0x364] ss:$8 sps:$4 sm:$0xff]  }
  0x6d   : > { %1612 = vmatpush1.bf16.msra.mxu1 %v2935_v31  ;;  %v461_v27 = vld [vmem:[%s3326_s8 + $0x80] sm:$0xff]  ;;  %v463_v31 = vld [vmem:[%s3326_s8 + $0x90] sm:$0xff] }
  0x6e   : > { %1838 = vmatpush1.bf16.msra.mxu0 %v2936_v32  ;;  %1613 = vmatprep.subr.bf16.mxu1 %v2937_v33  ;;  %v465_v28 = vld [vmem:[%s3326_s8 + $0xa0] sm:$0xff]  ;;  %v467_v32 = vld [vmem:[%s3326_s8 + $0xb0] sm:$0xff] }
  0x6f   : > { %1839 = vmatprep.subr.bf16.mxu0 %v2939_v34  ;;  %v3005_v33 = vld [vmem:[%s3324_s7 + $0x134] ss:$8 sps:$4 sm:$0xff]   ;;  %v3033_v15 = vld [vmem:[%s3324_s7 + $0x180] ss:$8 sps:$4 sm:$0xff]  }
  0x70   : > { %v3008_v34 = vld [vmem:[%s3324_s7 + $0x334] ss:$8 sps:$4 sm:$0xff]   ;;  %v3036_v16 = vld [vmem:[%s3324_s7 + $0x380] ss:$8 sps:$4 sm:$0xff]  }
  0x71   : > { %1614 = vmatpush1.bf16.msra.mxu1 %v2941_v35  ;;  %v2536_v35 = vcombine.high %v461_v27, %v465_v28  ;;  %v491_v14 = vld [vmem:[%s3326_s8 + $0x170] sm:$0xff] }
  0x72   : > { %1840 = vmatpush1.bf16.msra.mxu0 %v2942_v36  ;;  %1615 = vmatprep.subr.bf16.mxu1 %v2943_v37  ;;  %v2540_v36 = vcombine.high %v463_v31, %v467_v32  ;;  %v3003_v37 = vld [vmem:[%s3324_s7 + $0x130] ss:$8 sps:$4 sm:$0xff]  }
  0x73   : > { %1841 = vmatprep.subr.bf16.mxu0 %v2945_v38  ;;  %v3006_v38 = vld [vmem:[%s3324_s7 + $0x330] ss:$8 sps:$4 sm:$0xff]  }
  0x75   : > { %1616 = vmatpush1.bf16.msra.mxu1 %v2947_v39  ;;  %v3011_v39 = vld [vmem:[%s3324_s7 + $0x144] ss:$8 sps:$4 sm:$0xff]  }
  0x76   : > { %1842 = vmatpush1.bf16.msra.mxu0 %v2948_v40  ;;  %1617 = vmatprep.subr.bf16.mxu1 %v2949_v41  ;;  %v3014_v40 = vld [vmem:[%s3324_s7 + $0x344] ss:$8 sps:$4 sm:$0xff]   ;;  %v3009_v41 = vld [vmem:[%s3324_s7 + $0x140] ss:$8 sps:$4 sm:$0xff]  }
  0x77   : > { %1843 = vmatprep.subr.bf16.mxu0 %v2951_v42  ;;  %v3012_v42 = vld [vmem:[%s3324_s7 + $0x340] ss:$8 sps:$4 sm:$0xff]  }
  0x79   : > { %1618 = vmatpush1.bf16.msra.mxu1 %v2953_v43  ;;  %v469_v43 = vld [vmem:[%s3326_s8 + $0xc0] sm:$0xff] }
  0x7a   : > { %1844 = vmatpush1.bf16.msra.mxu0 %v2954_v44  ;;  %1619 = vmatprep.subr.bf16.mxu1 %v2955_v45  ;;  %v473_v44 = vld [vmem:[%s3326_s8 + $0xe0] sm:$0xff]  ;;  %v2535_v45 = vcombine.low %v461_v27, %v465_v28 }
  0x7b   : > { %1845 = vmatprep.subr.bf16.mxu0 %v2957_v46  ;;  %v2539_v46 = vcombine.low %v463_v31, %v467_v32  ;;  %v2544_v51 = vcombine.high %v469_v43, %v473_v44  ;;  %v497_v28 = vld [vmem:[%s3326_s8 + $0x1a0] sm:$0xff] }
  0x7c   : > { %v3045_v31 = vld [vmem:[%s3324_s7 + $0x1a0] ss:$8 sps:$4 sm:$0xff]  }
  0x7d   : > { %1620 = vmatpush1.bf16.msra.mxu1 %v2959_v47  ;;  %v471_v47 = vld [vmem:[%s3326_s8 + $0xd0] sm:$0xff]  ;;  %v3048_v32 = vld [vmem:[%s3324_s7 + $0x3a0] ss:$8 sps:$4 sm:$0xff]  }
  0x7e   : > { %1846 = vmatpush1.bf16.msra.mxu0 %v2960_v48  ;;  %1621 = vmatprep.subr.bf16.mxu1 %v2961_v53  ;;  %v475_v48 = vld [vmem:[%s3326_s8 + $0xf0] sm:$0xff] }
  0x7f   : > { %1847 = vmatprep.subr.bf16.mxu0 %v2963_v55  ;;  %v2548_v52 = vcombine.high %v471_v47, %v475_v48  ;;  %v3015_v53 = vld [vmem:[%s3324_s7 + $0x150] ss:$8 sps:$4 sm:$0xff]   ;;  %v3023_v55 = vld [vmem:[%s3324_s7 + $0x164] ss:$8 sps:$4 sm:$0xff]  }
  0x81   : > { %1622 = vmatpush1.bf16.msra.mxu1 %v2965_v57  ;;  %v3021_v57 = vld [vmem:[%s3324_s7 + $0x160] ss:$8 sps:$4 sm:$0xff]  }
  0x82   : > { %1848 = vmatpush1.bf16.msra.mxu0 %v2966_v58  ;;  %1623 = vmatprep.subr.bf16.mxu1 %v2967_v59  ;;  %v477_v58 = vld [vmem:[%s3326_s8 + $0x100] sm:$0xff] }
  0x83   : > { %1849 = vmatprep.subr.bf16.mxu0 %v2969_v60  ;;  %v481_v59 = vld [vmem:[%s3326_s8 + $0x120] sm:$0xff]  ;;  %v2543_v60 = vcombine.low %v469_v43, %v473_v44 }
  0x84   : > { %v2551_v11 = vcombine.low %v477_v58, %v481_v59  ;;  %v505_v44 = vld [vmem:[%s3326_s8 + $0x1e0] sm:$0xff] }
  0x85   : > { %1624 = vmatpush1.bf16.msra.mxu1 %v2971_v61  ;;  %v2547_v61 = vcombine.low %v471_v47, %v475_v48  ;;  %v3057_v47 = vld [vmem:[%s3324_s7 + $0x1c0] ss:$8 sps:$4 sm:$0xff]  }
  0x86   : > { %1850 = vmatpush1.bf16.msra.mxu0 %v2972_v62  ;;  %1625 = vmatprep.subr.bf16.mxu1 %v2973_v63  ;;  %v479_v62 = vld [vmem:[%s3326_s8 + $0x110] sm:$0xff]  ;;  %v3060_v48 = vld [vmem:[%s3324_s7 + $0x3c0] ss:$8 sps:$4 sm:$0xff]  }
  0x87   : > { %1851 = vmatprep.subr.bf16.mxu0 %v2975_v0  ;;  %v483_v63 = vld [vmem:[%s3326_s8 + $0x130] sm:$0xff]  ;;  %v3024_v0 = vld [vmem:[%s3324_s7 + $0x360] ss:$8 sps:$4 sm:$0xff]  }
  0x89   : > { %1626 = vmatpush1.bf16.msra.mxu1 %v2977_v1  ;;  %v3029_v1 = vld [vmem:[%s3324_s7 + $0x174] ss:$8 sps:$4 sm:$0xff]  }
  0x8a   : > { %1852 = vmatpush1.bf16.msra.mxu0 %v2978_v2  ;;  %1627 = vmatprep.subr.bf16.mxu1 %v2979_v3  ;;  %v3032_v2 = vld [vmem:[%s3324_s7 + $0x374] ss:$8 sps:$4 sm:$0xff]   ;;  %v2552_v3 = vcombine.high %v477_v58, %v481_v59 }
  0x8b   : > { %1853 = vmatprep.subr.bf16.mxu0 %v2981_v4  ;;  %v2556_v4 = vcombine.high %v479_v62, %v483_v63 }
  0x8d   : > { %1628 = vmatpush1.bf16.msra.mxu1 %v2983_v5  ;;  %v3027_v5 = vld [vmem:[%s3324_s7 + $0x170] ss:$8 sps:$4 sm:$0xff]  }
  0x8e   : > { %1854 = vmatpush1.bf16.msra.mxu0 %v2984_v6  ;;  %1710 = vmatprep.subr.bf16.mxu1 %v2987_v7  ;;  %v3030_v6 = vld [vmem:[%s3324_s7 + $0x370] ss:$8 sps:$4 sm:$0xff]   ;;  %v3035_v7 = vld [vmem:[%s3324_s7 + $0x184] ss:$8 sps:$4 sm:$0xff]  }
  0x8f   : > { %1936 = vmatprep.subr.bf16.mxu0 %v2990_v8  ;;  %v3038_v8 = vld [vmem:[%s3324_s7 + $0x384] ss:$8 sps:$4 sm:$0xff]  }
  0x90   : > { %1630 = vmatmul.mubr.bf16.vlgmr.msra.gmra.mrb[0].mxu1 %v2519_v12  ;;  %v2555_v12 = vcombine.low %v479_v62, %v483_v63  ;;  %v452_v62 = vld [vmem:[%s3326_s8 + $0x38] sm:$0xff]  ;;  %v3069_v63 = vld [vmem:[%s3324_s7 + $0x1e0] ss:$8 sps:$4 sm:$0xff]  }
  0x91   : > { %1856 = vmatmul.mubr.bf16.vlgmr.msra.gmra.mrb[0].mxu0 %v2523_v13  ;;  %1711 = vmatpush1.bf16.msra.mxu1 %v2985_v9  ;;  %v485_v9 = vld [vmem:[%s3326_s8 + $0x140] sm:$0xff]  ;;  %v487_v13 = vld [vmem:[%s3326_s8 + $0x150] sm:$0xff] }
  0x92   : > { %1937 = vmatpush1.bf16.msra.mxu0 %v2988_v10  ;;  %1712 = vmatprep.subr.bf16.mxu1 %v2993_v17  ;;  %v489_v10 = vld [vmem:[%s3326_s8 + $0x160] sm:$0xff]  ;;  %v3041_v17 = vld [vmem:[%s3324_s7 + $0x194] ss:$8 sps:$4 sm:$0xff]   ;;  %v2563_v27 = vcombine.low %v487_v13, %v491_v14 }
  0x93   : > { %1938 = vmatprep.subr.bf16.mxu0 %v2996_v18  ;;  %1639 = vmatprep.mubr.bf16.mxu1 %v2528_v19  ;;  %v3044_v18 = vld [vmem:[%s3324_s7 + $0x394] ss:$8 sps:$4 sm:$0xff]   ;;  %v2560_v19 = vcombine.high %v485_v9, %v489_v10 }
  0x94   : > { %1865 = vmatprep.mubr.bf16.mxu0 %v2532_v20  ;;  %v2564_v20 = vcombine.high %v487_v13, %v491_v14 }
  0x95   : > { %1713 = vmatpush1.bf16.msra.mxu1 %v2991_v21  ;;  %v3039_v21 = vld [vmem:[%s3324_s7 + $0x190] ss:$8 sps:$4 sm:$0xff]  }
  0x96   : > { %1939 = vmatpush1.bf16.msra.mxu0 %v2994_v22  ;;  %1714 = vmatprep.subr.bf16.mxu1 %v2999_v23  ;;  %v3042_v22 = vld [vmem:[%s3324_s7 + $0x390] ss:$8 sps:$4 sm:$0xff]   ;;  %v3047_v23 = vld [vmem:[%s3324_s7 + $0x1a4] ss:$8 sps:$4 sm:$0xff]  }
  0x97   : > { %1940 = vmatprep.subr.bf16.mxu0 %v3002_v24  ;;  %v3050_v24 = vld [vmem:[%s3324_s7 + $0x3a4] ss:$8 sps:$4 sm:$0xff]  }
  0x98   : > { %1640 = vmatmul.mubr.bf16.gmra.mrb[4].mxu1 %v2527_v29  ;;  %v495_v29 = vld [vmem:[%s3326_s8 + $0x190] sm:$0xff] }
  0x99   : > { %1866 = vmatmul.mubr.bf16.gmra.mrb[4].mxu0 %v2531_v30  ;;  %1715 = vmatpush1.bf16.msra.mxu1 %v2997_v25  ;;  %v493_v25 = vld [vmem:[%s3326_s8 + $0x180] sm:$0xff]  ;;  %v499_v30 = vld [vmem:[%s3326_s8 + $0x1b0] sm:$0xff] }
  0x9a   : > { %1941 = vmatpush1.bf16.msra.mxu0 %v3000_v26  ;;  %1716 = vmatprep.subr.bf16.mxu1 %v3005_v33  ;;  %v2559_v26 = vcombine.low %v485_v9, %v489_v10  ;;  %v3053_v33 = vld [vmem:[%s3324_s7 + $0x1b4] ss:$8 sps:$4 sm:$0xff]   ;;  %v2571_v43 = vcombine.low %v495_v29, %v499_v30 }
  0x9b   : > { %1942 = vmatprep.subr.bf16.mxu0 %v3008_v34  ;;  %1649 = vmatprep.mubr.bf16.mxu1 %v2536_v35  ;;  %v3056_v34 = vld [vmem:[%s3324_s7 + $0x3b4] ss:$8 sps:$4 sm:$0xff]   ;;  %v2568_v35 = vcombine.high %v493_v25, %v497_v28 }
  0x9c   : > { %1875 = vmatprep.mubr.bf16.mxu0 %v2540_v36  ;;  %v2572_v36 = vcombine.high %v495_v29, %v499_v30  ;;  %v456_v9 = vld [vmem:[%s3326_s8 + $0x58] sm:$0xff] }
  0x9d   : > { %1717 = vmatpush1.bf16.msra.mxu1 %v3003_v37  ;;  %v3051_v37 = vld [vmem:[%s3324_s7 + $0x1b0] ss:$8 sps:$4 sm:$0xff]  }
  0x9e   : > { %1943 = vmatpush1.bf16.msra.mxu0 %v3006_v38  ;;  %1718 = vmatprep.subr.bf16.mxu1 %v3011_v39  ;;  %v3054_v38 = vld [vmem:[%s3324_s7 + $0x3b0] ss:$8 sps:$4 sm:$0xff]   ;;  %v3059_v39 = vld [vmem:[%s3324_s7 + $0x1c4] ss:$8 sps:$4 sm:$0xff]  }
  0x9f   : > { %1944 = vmatprep.subr.bf16.mxu0 %v3014_v40  ;;  %v3062_v40 = vld [vmem:[%s3324_s7 + $0x3c4] ss:$8 sps:$4 sm:$0xff]   ;;  %v460_v10 = vld [vmem:[%s3326_s8 + $0x78] sm:$0xff] }
  0xa0   : > { %1650 = vmatmul.mubr.bf16.gmra.mrb[8].mxu1 %v2535_v45  ;;  %v503_v45 = vld [vmem:[%s3326_s8 + $0x1d0] sm:$0xff]  ;;  %v2534_v14 = vcombine.high %v456_v9, %v460_v10 }
  0xa1   : > { %1876 = vmatmul.mubr.bf16.gmra.mrb[8].mxu0 %v2539_v46  ;;  %1719 = vmatpush1.bf16.msra.mxu1 %v3009_v41  ;;  %v501_v41 = vld [vmem:[%s3326_s8 + $0x1c0] sm:$0xff]  ;;  %v507_v46 = vld [vmem:[%s3326_s8 + $0x1f0] sm:$0xff] }
  0xa2   : > { %1945 = vmatpush1.bf16.msra.mxu0 %v3012_v42  ;;  %1720 = vmatprep.subr.bf16.mxu1 %v3017_v49  ;;  %v2567_v42 = vcombine.low %v493_v25, %v497_v28  ;;  %v3065_v49 = vld [vmem:[%s3324_s7 + $0x1d4] ss:$8 sps:$4 sm:$0xff]   ;;  %v2575_v58 = vcombine.low %v501_v41, %v505_v44  ;;  %v2579_v59 = vcombine.low %v503_v45, %v507_v46 }
  0xa3   : > { %1946 = vmatprep.subr.bf16.mxu0 %v3020_v50  ;;  %1659 = vmatprep.mubr.bf16.mxu1 %v2544_v51  ;;  %v3068_v50 = vld [vmem:[%s3324_s7 + $0x3d4] ss:$8 sps:$4 sm:$0xff]   ;;  %v2576_v51 = vcombine.high %v501_v41, %v505_v44 }
  0xa4   : > { %1885 = vmatprep.mubr.bf16.mxu0 %v2548_v52  ;;  %v2580_v52 = vcombine.high %v503_v45, %v507_v46  ;;  %v472_v25 = vld [vmem:[%s3326_s8 + $0xd8] sm:$0xff] }
  0xa5   : > { %1721 = vmatpush1.bf16.msra.mxu1 %v3015_v53  ;;  %v3063_v53 = vld [vmem:[%s3324_s7 + $0x1d0] ss:$8 sps:$4 sm:$0xff]  }
  0xa6   : > { %1947 = vmatpush1.bf16.msra.mxu0 %v3018_v54  ;;  %1722 = vmatprep.subr.bf16.mxu1 %v3023_v55  ;;  %v3066_v54 = vld [vmem:[%s3324_s7 + $0x3d0] ss:$8 sps:$4 sm:$0xff]   ;;  %v3071_v55 = vld [vmem:[%s3324_s7 + $0x1e4] ss:$8 sps:$4 sm:$0xff]  }
  0xa7   : > { %1948 = vmatprep.subr.bf16.mxu0 %v3026_v56  ;;  %v3074_v56 = vld [vmem:[%s3324_s7 + $0x3e4] ss:$8 sps:$4 sm:$0xff]   ;;  %v488_v41 = vld [vmem:[%s3326_s8 + $0x158] sm:$0xff] }
  0xa8   : > { %1660 = vmatmul.mubr.bf16.gmra.mrb[12].mxu1 %v2543_v60  ;;  %v450_v60 = vld [vmem:[%s3326_s8 + $0x28] sm:$0xff] }
  0xa9   : > { %1886 = vmatmul.mubr.bf16.gmra.mrb[12].mxu0 %v2547_v61  ;;  %1723 = vmatpush1.bf16.msra.mxu1 %v3021_v57  ;;  %v446_v57 = vld [vmem:[%s3326_s8 + $0x8] sm:$0xff]  ;;  %v448_v61 = vld [vmem:[%s3326_s8 + $0x18] sm:$0xff] }
  0xaa   : > { %1949 = vmatpush1.bf16.msra.mxu0 %v3024_v0  ;;  %1724 = vmatprep.subr.bf16.mxu1 %v3029_v1  ;;  %v3072_v0 = vld [vmem:[%s3324_s7 + $0x3e0] ss:$8 sps:$4 sm:$0xff]   ;;  %v3077_v1 = vld [vmem:[%s3324_s7 + $0x1f4] ss:$8 sps:$4 sm:$0xff]  }
  0xab   : > { %1950 = vmatprep.subr.bf16.mxu0 %v3032_v2  ;;  %1669 = vmatprep.mubr.bf16.mxu1 %v2552_v3  ;;  %v3080_v2 = vld [vmem:[%s3324_s7 + $0x3f4] ss:$8 sps:$4 sm:$0xff]   ;;  %v2522_v3 = vcombine.high %v446_v57, %v450_v60 }
  0xac   : > { %1895 = vmatprep.mubr.bf16.mxu0 %v2556_v4  ;;  %v2526_v4 = vcombine.high %v448_v61, %v452_v62 }
  0xad   : > { %1725 = vmatpush1.bf16.msra.mxu1 %v3027_v5  ;;  %v3075_v5 = vld [vmem:[%s3324_s7 + $0x1f0] ss:$8 sps:$4 sm:$0xff]  }
  0xae   : > { %1951 = vmatpush1.bf16.msra.mxu0 %v3030_v6  ;;  %1726 = vmatprep.subr.bf16.mxu1 %v3035_v7  ;;  %v3078_v6 = vld [vmem:[%s3324_s7 + $0x3f0] ss:$8 sps:$4 sm:$0xff]   ;;  %v454_v7 = vld [vmem:[%s3326_s8 + $0x48] sm:$0xff] }
  0xaf   : > { %1952 = vmatprep.subr.bf16.mxu0 %v3038_v8  ;;  %v458_v8 = vld [vmem:[%s3326_s8 + $0x68] sm:$0xff] }
  0xb0   : > { %1670 = vmatmul.mubr.bf16.gmra.mrb[16].mxu1 %v2551_v11  ;;  %v2521_v11 = vcombine.low %v446_v57, %v450_v60  ;;  %v2530_v13 = vcombine.high %v454_v7, %v458_v8  ;;  %v504_v57 = vld [vmem:[%s3326_s8 + $0x1d8] sm:$0xff] }
  0xb1   : > { %1896 = vmatmul.mubr.bf16.gmra.mrb[16].mxu0 %v2555_v12  ;;  %1727 = vmatpush1.bf16.msra.mxu1 %v3033_v15  ;;  %v2525_v12 = vcombine.low %v448_v61, %v452_v62  ;;  %v462_v15 = vld [vmem:[%s3326_s8 + $0x88] sm:$0xff] }
  0xb2   : > { %1953 = vmatpush1.bf16.msra.mxu0 %v3036_v16  ;;  %1728 = vmatprep.subr.bf16.mxu1 %v3041_v17  ;;  %v466_v16 = vld [vmem:[%s3326_s8 + $0xa8] sm:$0xff]  ;;  %v464_v17 = vld [vmem:[%s3326_s8 + $0x98] sm:$0xff] }
  0xb3   : > { %1954 = vmatprep.subr.bf16.mxu0 %v3044_v18  ;;  %1679 = vmatprep.mubr.bf16.mxu1 %v2560_v19  ;;  %v468_v18 = vld [vmem:[%s3326_s8 + $0xb8] sm:$0xff]  ;;  %v2529_v19 = vcombine.low %v454_v7, %v458_v8 }
  0xb4   : > { %1905 = vmatprep.mubr.bf16.mxu0 %v2564_v20  ;;  %v2533_v20 = vcombine.low %v456_v9, %v460_v10  ;;  %v2541_v28 = vcombine.low %v464_v17, %v468_v18  ;;  %v415_v10 = vld [vmem:[#allocation2 + $0x10] sm:$0xff] }
  0xb5   : > { %1729 = vmatpush1.bf16.msra.mxu1 %v3039_v21  ;;  %v2538_v21 = vcombine.high %v462_v15, %v466_v16 }
  0xb6   : > { %1955 = vmatpush1.bf16.msra.mxu0 %v3042_v22  ;;  %1730 = vmatprep.subr.bf16.mxu1 %v3047_v23  ;;  %v2542_v22 = vcombine.high %v464_v17, %v468_v18  ;;  %v470_v23 = vld [vmem:[%s3326_s8 + $0xc8] sm:$0xff] }
  0xb7   : > { %1956 = vmatprep.subr.bf16.mxu0 %v3050_v24  ;;  %v474_v24 = vld [vmem:[%s3326_s8 + $0xe8] sm:$0xff] }
  0xb8   : > { %1680 = vmatmul.mubr.bf16.gmra.mrb[20].mxu1 %v2559_v26  ;;  %v476_v26 = vld [vmem:[%s3326_s8 + $0xf8] sm:$0xff]  ;;  %v2546_v29 = vcombine.high %v470_v23, %v474_v24 }
  0xb9   : > { %1906 = vmatmul.mubr.bf16.gmra.mrb[20].mxu0 %v2563_v27  ;;  %1731 = vmatpush1.bf16.msra.mxu1 %v3045_v31  ;;  %v2537_v27 = vcombine.low %v462_v15, %v466_v16  ;;  %v2550_v30 = vcombine.high %v472_v25, %v476_v26  ;;  %v478_v31 = vld [vmem:[%s3326_s8 + $0x108] sm:$0xff]  ;;  %v416_v15 = vld [vmem:[#allocation2 + $0x18] sm:$0xff] }
  0xba   : > { %1957 = vmatpush1.bf16.msra.mxu0 %v3048_v32  ;;  %1732 = vmatprep.subr.bf16.mxu1 %v3053_v33  ;;  %v482_v32 = vld [vmem:[%s3326_s8 + $0x128] sm:$0xff]  ;;  %v480_v33 = vld [vmem:[%s3326_s8 + $0x118] sm:$0xff] }
  0xbb   : > { %1958 = vmatprep.subr.bf16.mxu0 %v3056_v34  ;;  %1689 = vmatprep.mubr.bf16.mxu1 %v2568_v35  ;;  %v484_v34 = vld [vmem:[%s3326_s8 + $0x138] sm:$0xff]  ;;  %v2545_v35 = vcombine.low %v470_v23, %v474_v24 }
  0xbc   : > { %1915 = vmatprep.mubr.bf16.mxu0 %v2572_v36  ;;  %v2549_v36 = vcombine.low %v472_v25, %v476_v26  ;;  %v2557_v44 = vcombine.low %v480_v33, %v484_v34  ;;  %v418_v26 = vld [vmem:[#allocation2 + $0x28] sm:$0xff] }
  0xbd   : > { %1733 = vmatpush1.bf16.msra.mxu1 %v3051_v37  ;;  %v2554_v37 = vcombine.high %v478_v31, %v482_v32 }
  0xbe   : > { %1959 = vmatpush1.bf16.msra.mxu0 %v3054_v38  ;;  %1734 = vmatprep.subr.bf16.mxu1 %v3059_v39  ;;  %v2558_v38 = vcombine.high %v480_v33, %v484_v34  ;;  %v486_v39 = vld [vmem:[%s3326_s8 + $0x148] sm:$0xff] }
  0xbf   : > { %1960 = vmatprep.subr.bf16.mxu0 %v3062_v40  ;;  %v490_v40 = vld [vmem:[%s3326_s8 + $0x168] sm:$0xff] }
  0xc0   : > { %1690 = vmatmul.mubr.bf16.gmra.mrb[24].mxu1 %v2567_v42  ;;  %v492_v42 = vld [vmem:[%s3326_s8 + $0x178] sm:$0xff]  ;;  %v2562_v45 = vcombine.high %v486_v39, %v490_v40 }
  0xc1   : > { %1916 = vmatmul.mubr.bf16.gmra.mrb[24].mxu0 %v2571_v43  ;;  %1735 = vmatpush1.bf16.msra.mxu1 %v3057_v47  ;;  %v2553_v43 = vcombine.low %v478_v31, %v482_v32  ;;  %v2566_v46 = vcombine.high %v488_v41, %v492_v42  ;;  %v494_v47 = vld [vmem:[%s3326_s8 + $0x188] sm:$0xff] }
  0xc2   : > { %1961 = vmatpush1.bf16.msra.mxu0 %v3060_v48  ;;  %1736 = vmatprep.subr.bf16.mxu1 %v3065_v49  ;;  %v498_v48 = vld [vmem:[%s3326_s8 + $0x1a8] sm:$0xff]  ;;  %v496_v49 = vld [vmem:[%s3326_s8 + $0x198] sm:$0xff] }
  0xc3   : > { %1962 = vmatprep.subr.bf16.mxu0 %v3068_v50  ;;  %1699 = vmatprep.mubr.bf16.mxu1 %v2576_v51  ;;  %v500_v50 = vld [vmem:[%s3326_s8 + $0x1b8] sm:$0xff]  ;;  %v2561_v51 = vcombine.low %v486_v39, %v490_v40 }
  0xc4   : > { %1925 = vmatprep.mubr.bf16.mxu0 %v2580_v52  ;;  %v2565_v52 = vcombine.low %v488_v41, %v492_v42  ;;  %v2573_v60 = vcombine.low %v496_v49, %v500_v50  ;;  %v421_v42 = vld [vmem:[#allocation2 + $0x40] sm:$0xff] }
  0xc5   : > { %1737 = vmatpush1.bf16.msra.mxu1 %v3063_v53  ;;  %v2570_v53 = vcombine.high %v494_v47, %v498_v48 }
  0xc6   : > { %1963 = vmatpush1.bf16.msra.mxu0 %v3066_v54  ;;  %1738 = vmatprep.subr.bf16.mxu1 %v3071_v55  ;;  %v2574_v54 = vcombine.high %v496_v49, %v500_v50  ;;  %v502_v55 = vld [vmem:[%s3326_s8 + $0x1c8] sm:$0xff]  ;;  %v423_v50 = vld [vmem:[#allocation2 + $0x50] sm:$0xff] }
  0xc7   : > { %1964 = vmatprep.subr.bf16.mxu0 %v3074_v56  ;;  %v506_v56 = vld [vmem:[%s3326_s8 + $0x1e8] sm:$0xff] }
  0xc8   : > { %1700 = vmatmul.mubr.bf16.gmra.mrb[28].mxu1 %v2575_v58  ;;  %v508_v58 = vld [vmem:[%s3326_s8 + $0x1f8] sm:$0xff]  ;;  %v2578_v61 = vcombine.high %v502_v55, %v506_v56 }
  0xc9   : > { %1926 = vmatmul.mubr.bf16.gmra.mrb[28].mxu0 %v2579_v59  ;;  %1739 = vmatpush1.bf16.msra.mxu1 %v3069_v63  ;;  %v2569_v59 = vcombine.low %v494_v47, %v498_v48  ;;  %v2582_v62 = vcombine.high %v504_v57, %v508_v58  ;;  %v2577_v63 = vcombine.low %v502_v55, %v506_v56  ;;  %v424_v55 = vld [vmem:[#allocation2 + $0x58] sm:$0xff] }
  0xca   : > { %1965 = vmatpush1.bf16.msra.mxu0 %v3072_v0  ;;  %1740 = vmatprep.subr.bf16.mxu1 %v3077_v1  ;;  %v2581_v0 = vcombine.low %v504_v57, %v508_v58 }
  0xcb   : > { %1966 = vmatprep.subr.bf16.mxu0 %v3080_v2  ;;  %1742 = vmatprep.mubr.bf16.mxu1 %v2522_v3  ;;  %v413_v2 = vld [vmem:[#allocation2] sm:$0xff] }
  0xcc   : > { %1968 = vmatprep.mubr.bf16.mxu0 %v2526_v4 }
  0xcd   : > { %1741 = vmatpush1.bf16.msra.mxu1 %v3075_v5 }
  0xce   : > { %1967 = vmatpush1.bf16.msra.mxu0 %v3078_v6  ;;  %v414_v6 = vld [vmem:[#allocation2 + $0x8] sm:$0xff] }
  0xd0   : > { %1743 = vmatmul.mubr.bf16.vlgmr.msra.gmra.mrb[0].mxu1 %v2521_v11 }
  0xd1   : > { %1969 = vmatmul.mubr.bf16.vlgmr.msra.gmra.mrb[0].mxu0 %v2525_v12  ;;  %1752 = vmatprep.mubr.bf16.mxu1 %v2530_v13 }
  0xd2   : > { %1978 = vmatprep.mubr.bf16.mxu0 %v2534_v14 }
  0xd8   : > { %1753 = vmatmul.mubr.bf16.gmra.mrb[4].mxu1 %v2529_v19 }
  0xd9   : > { %1979 = vmatmul.mubr.bf16.gmra.mrb[4].mxu0 %v2533_v20  ;;  %1762 = vmatprep.mubr.bf16.mxu1 %v2538_v21 }
  0xda   : > { %1988 = vmatprep.mubr.bf16.mxu0 %v2542_v22  ;;  %v417_v22 = vld [vmem:[#allocation2 + $0x20] sm:$0xff] }
  0xe0   : > { %1763 = vmatmul.mubr.bf16.gmra.mrb[8].mxu1 %v2537_v27 }
  0xe1   : > { %1989 = vmatmul.mubr.bf16.gmra.mrb[8].mxu0 %v2541_v28  ;;  %1772 = vmatprep.mubr.bf16.mxu1 %v2546_v29 }
  0xe2   : > { %1998 = vmatprep.mubr.bf16.mxu0 %v2550_v30  ;;  %v419_v30 = vld [vmem:[#allocation2 + $0x30] sm:$0xff] }
  0xe8   : > { %1773 = vmatmul.mubr.bf16.gmra.mrb[12].mxu1 %v2545_v35  ;;  %v420_v35 = vld [vmem:[#allocation2 + $0x38] sm:$0xff] }
  0xe9   : > { %1999 = vmatmul.mubr.bf16.gmra.mrb[12].mxu0 %v2549_v36  ;;  %1782 = vmatprep.mubr.bf16.mxu1 %v2554_v37 }
  0xea   : > { %2008 = vmatprep.mubr.bf16.mxu0 %v2558_v38 }
  0xf0   : > { %1783 = vmatmul.mubr.bf16.gmra.mrb[16].mxu1 %v2553_v43 }
  0xf1   : > { %2009 = vmatmul.mubr.bf16.gmra.mrb[16].mxu0 %v2557_v44  ;;  %1792 = vmatprep.mubr.bf16.mxu1 %v2562_v45 }
  0xf2   : > { %2018 = vmatprep.mubr.bf16.mxu0 %v2566_v46  ;;  %v422_v46 = vld [vmem:[#allocation2 + $0x48] sm:$0xff] }
  0xf8   : > { %1793 = vmatmul.mubr.bf16.gmra.mrb[20].mxu1 %v2561_v51 }
  0xf9   : > { %2019 = vmatmul.mubr.bf16.gmra.mrb[20].mxu0 %v2565_v52  ;;  %1802 = vmatprep.mubr.bf16.mxu1 %v2570_v53 }
  0xfa   : > { %2028 = vmatprep.mubr.bf16.mxu0 %v2574_v54 }
 0x100   : > { %1803 = vmatmul.mubr.bf16.gmra.mrb[24].mxu1 %v2569_v59 }
 0x101   : > { %2029 = vmatmul.mubr.bf16.gmra.mrb[24].mxu0 %v2573_v60  ;;  %1812 = vmatprep.mubr.bf16.mxu1 %v2578_v61 }
 0x102   : > { %2038 = vmatprep.mubr.bf16.mxu0 %v2582_v62  ;;  %v425_v62 = vld [vmem:[#allocation2 + $0x60] sm:$0xff] }
 0x108   : > { %1813 = vmatmul.mubr.bf16.gmra.mrb[28].mxu1 %v2577_v63 }
 0x109   : > { %2039 = vmatmul.mubr.bf16.gmra.mrb[28].mxu0 %v2581_v0 }
 0x1a3   : > { %v1744_v1 = vpop.f32.mrb[0].mxu1 }
 0x1a4   : > { %v1970_v3 = vpop.f32.mrb[0].mxu0  ;;  %v1746_v5 = vpop.f32.mrb[1].mxu1 }
 0x1a5   : > { %v2752_v4 = vadd.f32 %v1970_v3, %v1744_v1  ;;  %v1972_v7 = vpop.f32.mrb[1].mxu0  ;;  %v1748_v9 = vpop.f32.mrb[2].mxu1 }
 0x1a6   : > { %v2753_v8 = vadd.f32 %v1972_v7, %v1746_v5  ;;  %v1974_v11 = vpop.f32.mrb[2].mxu0  ;;  %v1750_v14 = vpop.f32.mrb[3].mxu1 }
 0x1a7   : > { %v2049_v12 = vadd.f32 %v2752_v4, %v413_v2  ;;  %v2754_v13 = vadd.f32 %v1974_v11, %v1748_v9  ;;  %v1976_v16 = vpop.f32.mrb[3].mxu0  ;;  %v426_v2 = vld [vmem:[#allocation2 + $0x68] sm:$0xff]  ;;  %v428_v11 = vld [vmem:[#allocation2 + $0x78] sm:$0xff] }
 0x1a8   : > { %v2050_v17 = vadd.f32 %v2753_v8, %v414_v6  ;;  %v2755_v18 = vadd.f32 %v1976_v16, %v1750_v14  ;;  %v427_v6 = vld [vmem:[#allocation2 + $0x70] sm:$0xff] }
 0x1a9   : > { %2081 = vst [vmem:[#allocation2] sm:$0xff] %v2049_v12  ;;  %v2051_v19 = vadd.f32 %v2754_v13, %v415_v10 }
 0x1aa   : > { %2082 = vst [vmem:[#allocation2 + $0x8] sm:$0xff] %v2050_v17  ;;  %v2052_v20 = vadd.f32 %v2755_v18, %v416_v15  ;;  %v429_v18 = vld [vmem:[#allocation2 + $0x80] sm:$0xff] }
 0x1ab   : > { %2083 = vst [vmem:[#allocation2 + $0x10] sm:$0xff] %v2051_v19  ;;  %v1754_v21 = vpop.f32.mrb[4].mxu1 }
 0x1ac   : > { %2084 = vst [vmem:[#allocation2 + $0x18] sm:$0xff] %v2052_v20  ;;  %v1980_v23 = vpop.f32.mrb[4].mxu0  ;;  %v1756_v25 = vpop.f32.mrb[5].mxu1 }
 0x1ad   : > { %v2756_v24 = vadd.f32 %v1980_v23, %v1754_v21  ;;  %v1982_v27 = vpop.f32.mrb[5].mxu0  ;;  %v1758_v29 = vpop.f32.mrb[6].mxu1 }
 0x1ae   : > { %v2757_v28 = vadd.f32 %v1982_v27, %v1756_v25  ;;  %v1984_v31 = vpop.f32.mrb[6].mxu0  ;;  %v1760_v34 = vpop.f32.mrb[7].mxu1 }
 0x1af   : > { %v2053_v32 = vadd.f32 %v2756_v24, %v417_v22  ;;  %v2758_v33 = vadd.f32 %v1984_v31, %v1758_v29  ;;  %v1986_v36 = vpop.f32.mrb[7].mxu0  ;;  %v430_v22 = vld [vmem:[#allocation2 + $0x88] sm:$0xff]  ;;  %v432_v31 = vld [vmem:[#allocation2 + $0x98] sm:$0xff] }
 0x1b0   : > { %v2054_v37 = vadd.f32 %v2757_v28, %v418_v26  ;;  %v2759_v38 = vadd.f32 %v1986_v36, %v1760_v34  ;;  %v431_v26 = vld [vmem:[#allocation2 + $0x90] sm:$0xff] }
 0x1b1   : > { %2085 = vst [vmem:[#allocation2 + $0x20] sm:$0xff] %v2053_v32  ;;  %v2055_v39 = vadd.f32 %v2758_v33, %v419_v30 }
 0x1b2   : > { %2086 = vst [vmem:[#allocation2 + $0x28] sm:$0xff] %v2054_v37  ;;  %v2056_v40 = vadd.f32 %v2759_v38, %v420_v35  ;;  %v433_v38 = vld [vmem:[#allocation2 + $0xa0] sm:$0xff] }
 0x1b3   : > { %2087 = vst [vmem:[#allocation2 + $0x30] sm:$0xff] %v2055_v39  ;;  %v1764_v41 = vpop.f32.mrb[8].mxu1 }
 0x1b4   : > { %2088 = vst [vmem:[#allocation2 + $0x38] sm:$0xff] %v2056_v40  ;;  %v1990_v43 = vpop.f32.mrb[8].mxu0  ;;  %v1766_v45 = vpop.f32.mrb[9].mxu1 }
 0x1b5   : > { %v2760_v44 = vadd.f32 %v1990_v43, %v1764_v41  ;;  %v1992_v47 = vpop.f32.mrb[9].mxu0  ;;  %v1768_v49 = vpop.f32.mrb[10].mxu1 }
 0x1b6   : > { %v2761_v48 = vadd.f32 %v1992_v47, %v1766_v45  ;;  %v1994_v51 = vpop.f32.mrb[10].mxu0  ;;  %v1770_v54 = vpop.f32.mrb[11].mxu1 }
 0x1b7   : > { %v2057_v52 = vadd.f32 %v2760_v44, %v421_v42  ;;  %v2762_v53 = vadd.f32 %v1994_v51, %v1768_v49  ;;  %v1996_v56 = vpop.f32.mrb[11].mxu0  ;;  %v434_v42 = vld [vmem:[#allocation2 + $0xa8] sm:$0xff]  ;;  %v436_v51 = vld [vmem:[#allocation2 + $0xb8] sm:$0xff] }
 0x1b8   : > { %v2058_v57 = vadd.f32 %v2761_v48, %v422_v46  ;;  %v2763_v58 = vadd.f32 %v1996_v56, %v1770_v54  ;;  %v435_v46 = vld [vmem:[#allocation2 + $0xb0] sm:$0xff] }
 0x1b9   : > { %2089 = vst [vmem:[#allocation2 + $0x40] sm:$0xff] %v2057_v52  ;;  %v2059_v59 = vadd.f32 %v2762_v53, %v423_v50 }
 0x1ba   : > { %2090 = vst [vmem:[#allocation2 + $0x48] sm:$0xff] %v2058_v57  ;;  %v2060_v60 = vadd.f32 %v2763_v58, %v424_v55  ;;  %v437_v58 = vld [vmem:[#allocation2 + $0xc0] sm:$0xff] }
 0x1bb   : > { %2091 = vst [vmem:[#allocation2 + $0x50] sm:$0xff] %v2059_v59  ;;  %v1774_v61 = vpop.f32.mrb[12].mxu1 }
 0x1bc   : > { %2092 = vst [vmem:[#allocation2 + $0x58] sm:$0xff] %v2060_v60  ;;  %v2000_v63 = vpop.f32.mrb[12].mxu0  ;;  %v1776_v1 = vpop.f32.mrb[13].mxu1 }
 0x1bd   : > { %v2764_v0 = vadd.f32 %v2000_v63, %v1774_v61  ;;  %v2002_v3 = vpop.f32.mrb[13].mxu0  ;;  %v1778_v5 = vpop.f32.mrb[14].mxu1 }
 0x1be   : > { %v2765_v4 = vadd.f32 %v2002_v3, %v1776_v1  ;;  %v2004_v7 = vpop.f32.mrb[14].mxu0  ;;  %v1780_v10 = vpop.f32.mrb[15].mxu1 }
 0x1bf   : > { %v2061_v8 = vadd.f32 %v2764_v0, %v425_v62  ;;  %v2766_v9 = vadd.f32 %v2004_v7, %v1778_v5  ;;  %v2006_v12 = vpop.f32.mrb[15].mxu0  ;;  %v438_v62 = vld [vmem:[#allocation2 + $0xc8] sm:$0xff]  ;;  %v440_v7 = vld [vmem:[#allocation2 + $0xd8] sm:$0xff] }
 0x1c0   : > { %v2062_v13 = vadd.f32 %v2765_v4, %v426_v2  ;;  %v2767_v14 = vadd.f32 %v2006_v12, %v1780_v10  ;;  %v439_v2 = vld [vmem:[#allocation2 + $0xd0] sm:$0xff] }
 0x1c1   : > { %2093 = vst [vmem:[#allocation2 + $0x60] sm:$0xff] %v2061_v8  ;;  %v2063_v15 = vadd.f32 %v2766_v9, %v427_v6 }
 0x1c2   : > { %2094 = vst [vmem:[#allocation2 + $0x68] sm:$0xff] %v2062_v13  ;;  %v2064_v16 = vadd.f32 %v2767_v14, %v428_v11  ;;  %v441_v14 = vld [vmem:[#allocation2 + $0xe0] sm:$0xff] }
 0x1c3   : > { %2095 = vst [vmem:[#allocation2 + $0x70] sm:$0xff] %v2063_v15  ;;  %v1784_v17 = vpop.f32.mrb[16].mxu1 }
 0x1c4   : > { %2096 = vst [vmem:[#allocation2 + $0x78] sm:$0xff] %v2064_v16  ;;  %v2010_v19 = vpop.f32.mrb[16].mxu0  ;;  %v1786_v21 = vpop.f32.mrb[17].mxu1 }
 0x1c5   : > { %v2768_v20 = vadd.f32 %v2010_v19, %v1784_v17  ;;  %v2012_v23 = vpop.f32.mrb[17].mxu0  ;;  %v1788_v25 = vpop.f32.mrb[18].mxu1 }
 0x1c6   : > { %v2769_v24 = vadd.f32 %v2012_v23, %v1786_v21  ;;  %v2014_v27 = vpop.f32.mrb[18].mxu0  ;;  %v1790_v30 = vpop.f32.mrb[19].mxu1 }
 0x1c7   : > { %v2065_v28 = vadd.f32 %v2768_v20, %v429_v18  ;;  %v2770_v29 = vadd.f32 %v2014_v27, %v1788_v25  ;;  %v2016_v32 = vpop.f32.mrb[19].mxu0  ;;  %v442_v18 = vld [vmem:[#allocation2 + $0xe8] sm:$0xff]  ;;  %v444_v27 = vld [vmem:[#allocation2 + $0xf8] sm:$0xff] }
 0x1c8   : > { %v2066_v33 = vadd.f32 %v2769_v24, %v430_v22  ;;  %v2771_v34 = vadd.f32 %v2016_v32, %v1790_v30  ;;  %v443_v22 = vld [vmem:[#allocation2 + $0xf0] sm:$0xff] }
 0x1c9   : > { %2097 = vst [vmem:[#allocation2 + $0x80] sm:$0xff] %v2065_v28  ;;  %v2067_v35 = vadd.f32 %v2770_v29, %v431_v26 }
 0x1ca   : > { %2098 = vst [vmem:[#allocation2 + $0x88] sm:$0xff] %v2066_v33  ;;  %v2068_v36 = vadd.f32 %v2771_v34, %v432_v31  ;;  %v2117_v33 = vld [vmem:[#allocation2] sm:$0xff] (!%p2711_p11)  ;;  %v2119_v34 = vld [vmem:[#allocation2 + $0x10] sm:$0xff] (!%p2711_p11) }
 0x1cb   : > { %2099 = vst [vmem:[#allocation2 + $0x90] sm:$0xff] %v2067_v35  ;;  %v1794_v37 = vpop.f32.mrb[20].mxu1  ;;  %v2118_v35 = vld [vmem:[#allocation2 + $0x8] sm:$0xff] (!%p2711_p11) }
 0x1cc   : > { %2100 = vst [vmem:[#allocation2 + $0x98] sm:$0xff] %v2068_v36  ;;  %v2020_v39 = vpop.f32.mrb[20].mxu0  ;;  %v1796_v41 = vpop.f32.mrb[21].mxu1  ;;  %v2120_v36 = vld [vmem:[#allocation2 + $0x18] sm:$0xff] (!%p2711_p11) }
 0x1cd   : > { %v2772_v40 = vadd.f32 %v2020_v39, %v1794_v37  ;;  %v2022_v43 = vpop.f32.mrb[21].mxu0  ;;  %v1798_v45 = vpop.f32.mrb[22].mxu1  ;;  %v2149_v37 = vadd.f32 (!%p2711_p11), %v2119_v34, %v2117_v33  ;;  %v2170_v39 = vadd.f32 (!%p2711_p11), %v2120_v36, %v2118_v35 }
 0x1ce   : > { %v2773_v44 = vadd.f32 %v2022_v43, %v1796_v41  ;;  %v2024_v47 = vpop.f32.mrb[22].mxu0  ;;  %v1800_v50 = vpop.f32.mrb[23].mxu1 }
 0x1cf   : > { %v2069_v48 = vadd.f32 %v2772_v40, %v433_v38  ;;  %v2774_v49 = vadd.f32 %v2024_v47, %v1798_v45  ;;  %v2026_v52 = vpop.f32.mrb[23].mxu0  ;;  %v2121_v38 = vld [vmem:[#allocation2 + $0x20] sm:$0xff] (!%p2711_p11)  ;;  %v2122_v40 = vld [vmem:[#allocation2 + $0x28] sm:$0xff] (!%p2711_p11) }
 0x1d0   : > { %v2070_v53 = vadd.f32 %v2773_v44, %v434_v42  ;;  %v2775_v54 = vadd.f32 %v2026_v52, %v1800_v50  ;;  %v2150_v41 = vadd.f32 (!%p2711_p11), %v2149_v37, %v2121_v38  ;;  %v2123_v42 = vld [vmem:[#allocation2 + $0x30] sm:$0xff] (!%p2711_p11)  ;;  %v2171_v43 = vadd.f32 (!%p2711_p11), %v2170_v39, %v2122_v40  ;;  %v2124_v44 = vld [vmem:[#allocation2 + $0x38] sm:$0xff] (!%p2711_p11)  ;;  %v2126_v47 = vld [vmem:[#allocation2 + $0x48] sm:$0xff] (!%p2711_p11) }
 0x1d1   : > { %2101 = vst [vmem:[#allocation2 + $0xa0] sm:$0xff] %v2069_v48  ;;  %v2071_v55 = vadd.f32 %v2774_v49, %v435_v46  ;;  %v2125_v46 = vld [vmem:[#allocation2 + $0x40] sm:$0xff] (!%p2711_p11)  ;;  %v2191_v49 = vmul.f32 (!%p2711_p11), %v2117_v33, %v2117_v33  ;;  %v2127_v50 = vld [vmem:[#allocation2 + $0x50] sm:$0xff] (!%p2711_p11) }
 0x1d2   : > { %2102 = vst [vmem:[#allocation2 + $0xa8] sm:$0xff] %v2070_v53  ;;  %v2072_v56 = vadd.f32 %v2775_v54, %v436_v51  ;;  %v2151_v45 = vadd.f32 (!%p2711_p11), %v2150_v41, %v2123_v42  ;;  %v2172_v48 = vadd.f32 (!%p2711_p11), %v2171_v43, %v2124_v44  ;;  %v2128_v51 = vld [vmem:[#allocation2 + $0x58] sm:$0xff] (!%p2711_p11)  ;;  %v3522_v52 = vld [vmem:[#allocation2 + $0x60] sm:$0xff] (!%p2711_p11)  ;;  %v2192_v54 = vmul.f32 (!%p2711_p11), %v2118_v35, %v2118_v35 }
 0x1d3   : > { %2103 = vst [vmem:[#allocation2 + $0xb0] sm:$0xff] %v2071_v55  ;;  %v1804_v57 = vpop.f32.mrb[24].mxu1  ;;  %v2193_v55 = vmul.f32 (!%p2711_p11), %v2119_v34, %v2119_v34 }
 0x1d4   : > { %2104 = vst [vmem:[#allocation2 + $0xb8] sm:$0xff] %v2072_v56  ;;  %v2030_v59 = vpop.f32.mrb[24].mxu0  ;;  %v1806_v61 = vpop.f32.mrb[25].mxu1  ;;  %v2152_v53 = vadd.f32 (!%p2711_p11), %v2151_v45, %v2125_v46  ;;  %v2194_v56 = vmul.f32 (!%p2711_p11), %v2120_v36, %v2120_v36 }
 0x1d5   : > { %v2776_v60 = vadd.f32 %v2030_v59, %v1804_v57  ;;  %v2032_v63 = vpop.f32.mrb[25].mxu0  ;;  %v1808_v1 = vpop.f32.mrb[26].mxu1  ;;  %v2130_v57 = vld [vmem:[#allocation2 + $0x68] sm:$0xff] (!%p2711_p11)  ;;  %v2173_v59 = vadd.f32 (!%p2711_p11), %v2172_v48, %v2126_v47 }
 0x1d6   : > { %v2777_v0 = vadd.f32 %v2032_v63, %v1806_v61  ;;  %v2034_v3 = vpop.f32.mrb[26].mxu0  ;;  %v1810_v6 = vpop.f32.mrb[27].mxu1  ;;  %v2196_v61 = vmul.f32 (!%p2711_p11), %v2122_v40, %v2122_v40  ;;  %v2153_v63 = vadd.f32 (!%p2711_p11), %v2152_v53, %v2127_v50 }
 0x1d7   : > { %v2073_v4 = vadd.f32 %v2776_v60, %v437_v58  ;;  %v2778_v5 = vadd.f32 %v2034_v3, %v1808_v1  ;;  %v2036_v8 = vpop.f32.mrb[27].mxu0  ;;  %v2131_v58 = vld [vmem:[#allocation2 + $0x70] sm:$0xff] (!%p2711_p11)  ;;  %v2195_v60 = vmul.f32 (!%p2711_p11), %v2121_v38, %v2121_v38  ;;  %v2199_v1 = vmul.f32 (!%p2711_p11), %v2125_v46, %v2125_v46 }
 0x1d8   : > { %v2074_v9 = vadd.f32 %v2777_v0, %v438_v62  ;;  %v2779_v10 = vadd.f32 %v2036_v8, %v1810_v6  ;;  %v2197_v62 = vmul.f32 (!%p2711_p11), %v2123_v42, %v2123_v42  ;;  %v2198_v0 = vmul.f32 (!%p2711_p11), %v2124_v44, %v2124_v44 }
 0x1d9   : > { %2105 = vst [vmem:[#allocation2 + $0xc0] sm:$0xff] %v2073_v4  ;;  %v2075_v11 = vadd.f32 %v2778_v5, %v439_v2  ;;  %v2200_v2 = vmul.f32 (!%p2711_p11), %v2126_v47, %v2126_v47  ;;  %v2174_v3 = vadd.f32 (!%p2711_p11), %v2173_v59, %v2128_v51  ;;  %v3524_v4 = vmul.f32 (!%p2711_p11), %v2127_v50, %v2127_v50 }
 0x1da   : > { %2106 = vst [vmem:[#allocation2 + $0xc8] sm:$0xff] %v2074_v9  ;;  %v2076_v12 = vadd.f32 %v2779_v10, %v440_v7  ;;  %v3526_v5 = vmul.f32 (!%p2711_p11), %v2128_v51, %v2128_v51  ;;  %v3530_v6 = vmul.f32 (!%p2711_p11), %v3522_v52, %v3522_v52  ;;  %v2154_v7 = vadd.f32 (!%p2711_p11), %v2153_v63, %v3522_v52 }
 0x1db   : > { %2107 = vst [vmem:[#allocation2 + $0xd0] sm:$0xff] %v2075_v11  ;;  %v1814_v13 = vpop.f32.mrb[28].mxu1  ;;  %v3533_v8 = vmul.f32 (!%p2711_p11), %v2130_v57, %v2130_v57  ;;  %v3535_v9 = vmul.f32 (!%p2711_p11), %v2131_v58, %v2131_v58  ;;  %v2223_v10 = vadd.f32 (!%p2711_p11), %v2193_v55, %v2191_v49  ;;  %v2175_v11 = vadd.f32 (!%p2711_p11), %v2174_v3, %v2130_v57 }
 0x1dc   : > { %2108 = vst [vmem:[#allocation2 + $0xd8] sm:$0xff] %v2076_v12  ;;  %v2040_v15 = vpop.f32.mrb[28].mxu0  ;;  %v1816_v17 = vpop.f32.mrb[29].mxu1  ;;  %v2244_v12 = vadd.f32 (!%p2711_p11), %v2194_v56, %v2192_v54 }
 0x1dd   : > { %v2780_v16 = vadd.f32 %v2040_v15, %v1814_v13  ;;  %v2042_v19 = vpop.f32.mrb[29].mxu0  ;;  %v1818_v21 = vpop.f32.mrb[30].mxu1  ;;  %v2736_v13 = vpack.c.bf16 (!%p2711_p11), %v2118_v35, %v2117_v33  ;;  %v2132_v15 = vld [vmem:[#allocation2 + $0x78] sm:$0xff] (!%p2711_p11)  ;;  %v2742_v33 = vpack.c.bf16 (!%p2711_p11), %v2130_v57, %v3522_v52 }
 0x1de   : > { %v2781_v20 = vadd.f32 %v2042_v19, %v1816_v17  ;;  %v2044_v23 = vpop.f32.mrb[30].mxu0  ;;  %v1820_v26 = vpop.f32.mrb[31].mxu1  ;;  %2116 = sbr.rel (%p2711_p11) target bundleno = 526 (0x20e), region = 59  ;;  %v2155_v17 = vadd.f32 (!%p2711_p11), %v2154_v7, %v2131_v58  ;;  %v2738_v19 = vpack.c.bf16 (!%p2711_p11), %v2122_v40, %v2121_v38  ;;  %v2140_v35 = vld [vmem:[#allocation2 + $0xb8] sm:$0xff] (!%p2711_p11) }
 0x1df   : > { %v2077_v24 = vadd.f32 %v2780_v16, %v441_v14  ;;  %v2782_v25 = vadd.f32 %v2044_v23, %v1818_v21  ;;  %v2046_v28 = vpop.f32.mrb[31].mxu0  ;;  %v2737_v14 = vpack.c.bf16 (!%p2711_p11), %v2120_v36, %v2119_v34  ;;  %v2133_v16 = vld [vmem:[#allocation2 + $0x80] sm:$0xff] (!%p2711_p11)  ;;  %v2134_v21 = vld [vmem:[#allocation2 + $0x88] sm:$0xff] (!%p2711_p11)  ;;  %v3539_v23 = vld [vmem:[#allocation2 + $0x98] sm:$0xff] (!%p2711_p11)  ;;  %2376 = vst [vmem:[%s3671_s2] sm:$0xff] (!%p2711_p11), %v2736_v13  ;;  %v2743_v34 = vpack.c.bf16 (!%p2711_p11), %v2132_v15, %v2131_v58 }
 0x1e0   : > { %v2078_v29 = vadd.f32 %v2781_v20, %v442_v18  ;;  %v2783_v30 = vadd.f32 %v2046_v28, %v1820_v26  ;;  %v2224_v18 = vadd.f32 (!%p2711_p11), %v2223_v10, %v2195_v60  ;;  %v2739_v20 = vpack.c.bf16 (!%p2711_p11), %v2124_v44, %v2123_v42  ;;  %v2137_v28 = vld [vmem:[#allocation2 + $0xa0] sm:$0xff] (!%p2711_p11)  ;;  %2378 = vst [vmem:[%s3671_s2 + $0x10] sm:$0xff] (!%p2711_p11), %v2738_v19 }
 0x1e1   : > { %2109 = vst [vmem:[#allocation2 + $0xe0] sm:$0xff] %v2077_v24  ;;  %v2079_v31 = vadd.f32 %v2782_v25, %v443_v22  ;;  %v3537_v22 = vld [vmem:[#allocation2 + $0x90] sm:$0xff] (!%p2711_p11)  ;;  %v2176_v24 = vadd.f32 (!%p2711_p11), %v2175_v11, %v2132_v15  ;;  %v2245_v25 = vadd.f32 (!%p2711_p11), %v2244_v12, %v2196_v61  ;;  %2377 = vst [vmem:[%s3671_s2 + $0x8] sm:$0xff] (!%p2711_p11), %v2737_v14  ;;  %v3558_v36 = vld [vmem:[#allocation2 + $0xc0] sm:$0xff] (!%p2711_p11) }
 0x1e2   : > { %2110 = vst [vmem:[#allocation2 + $0xe8] sm:$0xff] %v2078_v29  ;;  %v2080_v32 = vadd.f32 %v2783_v30, %v444_v27  ;;  %v2740_v26 = vpack.c.bf16 (!%p2711_p11), %v2126_v47, %v2125_v46  ;;  %v2741_v27 = vpack.c.bf16 (!%p2711_p11), %v2128_v51, %v2127_v50  ;;  %v3547_v29 = vld [vmem:[#allocation2 + $0xa8] sm:$0xff] (!%p2711_p11)  ;;  %v3549_v30 = vld [vmem:[#allocation2 + $0xb0] sm:$0xff] (!%p2711_p11)  ;;  %2379 = vst [vmem:[%s3671_s2 + $0x18] sm:$0xff] (!%p2711_p11), %v2739_v20 }
 0x1e3   : > { %2111 = vst [vmem:[#allocation2 + $0xf0] sm:$0xff] %v2079_v31  ;;  %v2156_v31 = vadd.f32 (!%p2711_p11), %v2155_v17, %v2133_v16  ;;  %v3560_v37 = vld [vmem:[#allocation2 + $0xc8] sm:$0xff] (!%p2711_p11)  ;;  %v2177_v38 = vadd.f32 (!%p2711_p11), %v2176_v24, %v2134_v21  ;;  %v2246_v39 = vadd.f32 (!%p2711_p11), %v2245_v25, %v2198_v0  ;;  %v2744_v40 = vpack.c.bf16 (!%p2711_p11), %v2134_v21, %v2133_v16  ;;  %v2143_v42 = vld [vmem:[#allocation2 + $0xd0] sm:$0xff] (!%p2711_p11)  ;;  %v3570_v43 = vld [vmem:[#allocation2 + $0xd8] sm:$0xff] (!%p2711_p11) }
 0x1e4   : > { %2112 = vst [vmem:[#allocation2 + $0xf8] sm:$0xff] %v2080_v32  ;;  %v2225_v32 = vadd.f32 (!%p2711_p11), %v2224_v18, %v2197_v62  ;;  %2380 = vst [vmem:[%s3671_s2 + $0x20] sm:$0xff] (!%p2711_p11), %v2740_v26  ;;  %v2745_v41 = vpack.c.bf16 (!%p2711_p11), %v3539_v23, %v3537_v22  ;;  %v2746_v47 = vpack.c.bf16 (!%p2711_p11), %v3547_v29, %v2137_v28 }
 0x1e5   : > { %2381 = vst [vmem:[%s3671_s2 + $0x28] sm:$0xff] %v2741_v27  ;;  %v2157_v45 = vadd.f32 %v2156_v31, %v3537_v22  ;;  %2382 = vst [vmem:[%s3671_s2 + $0x30] sm:$0xff] %v2742_v33  ;;  %v2747_v48 = vpack.c.bf16 %v2140_v35, %v3549_v30  ;;  %v2178_v52 = vadd.f32 %v2177_v38, %v3539_v23 }
 0x1e6   : > { %v2226_v46 = vadd.f32 %v2225_v32, %v2199_v1  ;;  %2383 = vst [vmem:[%s3671_s2 + $0x38] sm:$0xff] %v2743_v34  ;;  %v2247_v53 = vadd.f32 %v2246_v39, %v2200_v2  ;;  %2384 = vst [vmem:[%s3671_s2 + $0x40] sm:$0xff] %v2744_v40  ;;  %v2748_v54 = vpack.c.bf16 %v3560_v37, %v3558_v36 }
 0x1e7   : > { %2385 = vst [vmem:[%s3671_s2 + $0x48] sm:$0xff] %v2745_v41  ;;  %v2749_v55 = vpack.c.bf16 %v3570_v43, %v2143_v42  ;;  %v2158_v56 = vadd.f32 %v2157_v45, %v2137_v28  ;;  %2386 = vst [vmem:[%s3671_s2 + $0x50] sm:$0xff] %v2746_v47  ;;  %v2179_v60 = vadd.f32 %v2178_v52, %v3547_v29 }
 0x1e8   : > { %v3572_v44 = vld [vmem:[#allocation2 + $0xe0] sm:$0xff]  ;;  %v2227_v57 = vadd.f32 %v2226_v46, %v3524_v4  ;;  %2387 = vst [vmem:[%s3671_s2 + $0x58] sm:$0xff] %v2747_v48  ;;  %v2206_v61 = vmul.f32 %v2132_v15, %v2132_v15  ;;  %v2248_v62 = vadd.f32 %v2247_v53, %v3526_v5  ;;  %2388 = vst [vmem:[%s3671_s2 + $0x60] sm:$0xff] %v2748_v54 }
 0x1e9   : > { %v2146_v49 = vld [vmem:[#allocation2 + $0xe8] sm:$0xff]  ;;  %2389 = vst [vmem:[%s3671_s2 + $0x68] sm:$0xff] %v2749_v55  ;;  %v2159_v63 = vadd.f32 %v2158_v56, %v3549_v30  ;;  %v2207_v0 = vmul.f32 %v2133_v16, %v2133_v16  ;;  %v2180_v2 = vadd.f32 %v2179_v60, %v2140_v35  ;;  %v2208_v3 = vmul.f32 %v2134_v21, %v2134_v21 }
 0x1ea   : > { %v3583_v50 = vld [vmem:[#allocation2 + $0xf0] sm:$0xff]  ;;  %v2750_v58 = vpack.c.bf16 %v2146_v49, %v3572_v44  ;;  %v2228_v1 = vadd.f32 %v2227_v57, %v3530_v6  ;;  %v2249_v4 = vadd.f32 %v2248_v62, %v3533_v8  ;;  %v2209_v7 = vmul.f32 %v3537_v22, %v3537_v22 }
 0x1eb   : > { %v3585_v51 = vld [vmem:[#allocation2 + $0xf8] sm:$0xff]  ;;  %v2160_v5 = vadd.f32 %v2159_v63, %v3558_v36  ;;  %v2181_v6 = vadd.f32 %v2180_v2, %v3560_v37  ;;  %v2210_v11 = vmul.f32 %v3539_v23, %v3539_v23  ;;  %v2211_v14 = vmul.f32 %v2137_v28, %v2137_v28 }
 0x1ec   : > { %v2751_v59 = vpack.c.bf16 %v3585_v51, %v3583_v50  ;;  %2390 = vst [vmem:[%s3671_s2 + $0x70] sm:$0xff] %v2750_v58  ;;  %v2229_v10 = vadd.f32 %v2228_v1, %v3535_v9  ;;  %v2250_v12 = vadd.f32 %v2249_v4, %v2206_v61  ;;  %v2212_v8 = vmul.f32 %v3547_v29, %v3547_v29 }
 0x1ed   : > { %v2161_v13 = vadd.f32 %v2160_v5, %v2143_v42  ;;  %v2182_v16 = vadd.f32 %v2181_v6, %v3570_v43  ;;  %v2213_v9 = vmul.f32 %v3549_v30, %v3549_v30  ;;  %v2214_v21 = vmul.f32 %v2140_v35, %v2140_v35 }
 0x1ee   : > { %2391 = vst [vmem:[%s3671_s2 + $0x78] sm:$0xff] %v2751_v59  ;;  %v2230_v15 = vadd.f32 %v2229_v10, %v2207_v0  ;;  %v2251_v17 = vadd.f32 %v2250_v12, %v2208_v3  ;;  %v2215_v24 = vmul.f32 %v3558_v36, %v3558_v36  ;;  %v2216_v27 = vmul.f32 %v3560_v37, %v3560_v37 }
 0x1ef   : > { %v2162_v18 = vadd.f32 %v2161_v13, %v3572_v44  ;;  %v2183_v20 = vadd.f32 %v2182_v16, %v2146_v49  ;;  %v2217_v31 = vmul.f32 %v2143_v42, %v2143_v42  ;;  %v2218_v33 = vmul.f32 %v3570_v43, %v3570_v43 }
 0x1f0   : > { %v2231_v19 = vadd.f32 %v2230_v15, %v2209_v7  ;;  %v2252_v22 = vadd.f32 %v2251_v17, %v2210_v11  ;;  %v2219_v38 = vmul.f32 %v3572_v44, %v3572_v44  ;;  %v2220_v40 = vmul.f32 %v2146_v49, %v2146_v49 }
 0x1f1   : > { %v2163_v23 = vadd.f32 %v2162_v18, %v3583_v50  ;;  %v2184_v26 = vadd.f32 %v2183_v20, %v3585_v51  ;;  %v2221_v37 = vmul.f32 %v3583_v50, %v3583_v50  ;;  %v2222_v42 = vmul.f32 %v3585_v51, %v3585_v51 }
 0x1f2   : > { %v2232_v25 = vadd.f32 %v2231_v19, %v2211_v14  ;;  %v2253_v28 = vadd.f32 %v2252_v22, %v2212_v8 }
 0x1f3   : > { %v2164_v29 = vrot.slane %v2163_v23, 4  ;;  %v2185_v30 = vrot.slane %v2184_v26, 4 }
 0x1f4   : > { %v2233_v32 = vadd.f32 %v2232_v25, %v2213_v9  ;;  %v2254_v34 = vadd.f32 %v2253_v28, %v2214_v21 }
 0x1f5   : > { %v2165_v35 = vadd.f32 %v2164_v29, %v2163_v23  ;;  %v2186_v39 = vadd.f32 %v2185_v30, %v2184_v26 }
 0x1f6   : > { %v2234_v36 = vadd.f32 %v2233_v32, %v2215_v24  ;;  %v2255_v41 = vadd.f32 %v2254_v34, %v2216_v27 }
 0x1f7   : > { %v2166_v47 = vrot.slane %v2165_v35, 2  ;;  %v2187_v43 = vrot.slane %v2186_v39, 2 }
 0x1f8   : > { %v2235_v45 = vadd.f32 %v2234_v36, %v2217_v31  ;;  %v2256_v46 = vadd.f32 %v2255_v41, %v2218_v33 }
 0x1f9   : > { %v2167_v55 = vadd.f32 %v2166_v47, %v2165_v35  ;;  %v2188_v56 = vadd.f32 %v2187_v43, %v2186_v39 }
 0x1fa   : > { %v2236_v48 = vadd.f32 %v2235_v45, %v2219_v38  ;;  %v2257_v52 = vadd.f32 %v2256_v46, %v2220_v40 }
 0x1fb   : > { %v2168_v59 = vrot.slane %v2167_v55, 1  ;;  %v2189_v50 = vrot.slane %v2188_v56, 1 }
 0x1fc   : > { %v2237_v53 = vadd.f32 %v2236_v48, %v2221_v37  ;;  %v2258_v54 = vadd.f32 %v2257_v52, %v2222_v42 }
 0x1fd   : > { %v2169_v51 = vadd.f32 %v2168_v59, %v2167_v55  ;;  %v2190_v1 = vadd.f32 %v2189_v50, %v2188_v56 }
 0x1fe   : > { %v2238_v44 = vrot.slane %v2237_v53, 4  ;;  %v2259_v57 = vrot.slane %v2258_v54, 4 }
 0x200   : > { %v2239_v49 = vadd.f32 %v2238_v44, %v2237_v53  ;;  %v2260_v58 = vadd.f32 %v2259_v57, %v2258_v54 }
 0x202   : > { %v2240_v60 = vrot.slane %v2239_v49, 2  ;;  %v2261_v61 = vrot.slane %v2260_v58, 2 }
 0x204   : > { %v2241_v62 = vadd.f32 %v2240_v60, %v2239_v49  ;;  %v2262_v63 = vadd.f32 %v2261_v61, %v2260_v58 }
 0x206   : > { %v2242_v0 = vrot.slane %v2241_v62, 1  ;;  %v2263_v2 = vrot.slane %v2262_v63, 1 }
 0x208   : > { %v2243_v3 = vadd.f32 %v2242_v0, %v2241_v62  ;;  %v2264_v4 = vadd.f32 %v2263_v2, %v2262_v63 }
 0x20a   : > { %v2266_v5 = vsel %vm2265_vm0, %v2169_v51, %v2243_v3  ;;  %v2267_v7 = vsel %vm2265_vm0, %v2190_v1, %v2264_v4 }
 0x20b   : > { %v2270_v10 = vcombine.low %v2266_v5, %v2267_v7 }
 0x20d   : > { %2712 = vst.sshfl [vmem:[%s3672_s3] sm:$0x33 pattern:$0x76325410] %v2270_v10 }
 0x20e PF: > { %s14_s16 = sadd.s32 1, %s3119_s16   ;;  %s3673_s12 = smov %s3107_s13 }
 0x20f   : > { %p11_p12 = scmp.ge.s32.totalorder %s14_s16, 4   ;;  %s3674_s13 = smov %s3177_s20 }
 0x210   : > { %s3675_s14 = smov %s3115_s15  ;;  %s3676_s15 = smov %s3678_s17 }
 0x211   :  { %13 = sbr.rel (!%p11_p12) target bundleno = 3 (0x3), region = 109 }

// kernel: netD_forward.8
= control target key start
LH: loop header
LB: loop body
LE: loop exit
PB: predicated region body
PF: predicated region fallthrough
CT: control target
= control target key end

     0   :  { %s3556_s12 = smov 0   ;;  %s3558_s13 = smov 0   ;;  %s4071_s0 = inlined_call_operand.vmem [shape: bf16[32,4096], index: 0, kind: input, shape index: {}]   ;;  %s4072_s1 = inlined_call_operand.vmem [shape: bf16[4096,512], index: 1, kind: input, shape index: {}]   ;;  %s4073_s2 = inlined_call_operand.vmem [shape: bf16[32,512], index: 2, kind: output, shape index: {0}]   ;;  %s4074_s3 = inlined_call_operand.vmem [shape: f32[1,2,512], index: 3, kind: output, shape index: {1}]  }
   0x1   :  { %s3560_s14 = smov 0   ;;  %s3562_s15 = smov 0  }
   0x2   :  { %s3564_s16 = smov 0  }
   0x3 LB: > { %s23_s17 = sadd.s32 1, %s3528_s15  ;;  %p42_p1 = scmp.ne.s32.totalorder %s3520_s13, %s3516_s12  ;;  %s3532_s16 = sphi %s3564_s16, %s14_s16   ;;  %s3528_s15 = sphi %s3562_s15, %s4078_s15   ;;  %s3524_s14 = sphi %s3560_s14, %s4077_s14   ;;  %s3520_s13 = sphi %s3558_s13, %s4076_s13   ;;  %s3516_s12 = sphi %s3556_s12, %s4075_s12  }
   0x4   : > { %p24_p0 = scmp.ge.s32.totalorder %s23_s17, 4  ;;  %p43_p2 = scmp.eq.s32.totalorder %s3532_s16, 0 }
   0x5   : > { %s35_s19 = sadd.s32 1, %s3520_s13  ;;  %p2714_p5 = scmp.ge.s32.totalorder %s3532_s16, 4 }
   0x6   : > { %s4080_s17 = smov (%p24_p0, %s23_s17), 0  ;;  %p44_p3 = por %p43_p2, %p42_p1 }
   0x7   : > { %s31_s18 = ssub.s32 %s3528_s15, %s4080_s17  ;;  %146 = sbr.rel (%p2714_p5) target bundleno = 26 (0x1a), region = 16 }
   0x8   : > { %p33_p4 = scmp.eq.s32.totalorder %s31_s18, 0 }
   0xa   : > { %s3591_s20 = scalar_select %p33_p4, %s3520_s13, %s35_s19  }
   0xe   : > { %149 = sbr.rel (!%p44_p3) target bundleno = 26 (0x1a), region = 20  ;;  %s151_s21 = sand.u32 (%p44_p3), 1, %s3520_s13  }
   0xf   : > { %s3010_s22 = sshll.u32 (%p44_p3), %s3528_s15, 5  ;;  %s2715_s23 = sshll.u32 (%p44_p3), %s151_s21, 7 }
  0x10   : > { %s3599_s26 = scalar_lea.vmem (%p44_p3), %s4071_s0, %s3010_s22  ;;  %s153_s27 = scalar_lea.vmem (%p44_p3), [#allocation3], %s2715_s23 }
  0x11   : > { %v172_v0 = vld [vmem:[%s3599_s26] sm:$0xff] (%p44_p3)  ;;  %v174_v1 = vld [vmem:[%s3599_s26 + $0x8] sm:$0xff] (%p44_p3)  ;;  %v176_v2 = vld [vmem:[%s3599_s26 + $0x10] sm:$0xff] (%p44_p3) }
  0x12   : > { %173 = vst [vmem:[%s153_s27] sm:$0xff] (%p44_p3), %v172_v0  ;;  %175 = vst [vmem:[%s153_s27 + $0x8] sm:$0xff] (%p44_p3), %v174_v1  ;;  %v178_v3 = vld [vmem:[%s3599_s26 + $0x18] sm:$0xff] (%p44_p3)  ;;  %v180_v4 = vld [vmem:[%s3599_s26 + $0x80] sm:$0xff] (%p44_p3) }
  0x13   : > { %177 = vst [vmem:[%s153_s27 + $0x10] sm:$0xff] (%p44_p3), %v176_v2  ;;  %v182_v5 = vld [vmem:[%s3599_s26 + $0x88] sm:$0xff] (%p44_p3)  ;;  %179 = vst [vmem:[%s153_s27 + $0x18] sm:$0xff] (%p44_p3), %v178_v3  ;;  %v184_v6 = vld [vmem:[%s3599_s26 + $0x90] sm:$0xff] (%p44_p3) }
  0x14   : > { %181 = vst [vmem:[%s153_s27 + $0x20] sm:$0xff] (%p44_p3), %v180_v4  ;;  %183 = vst [vmem:[%s153_s27 + $0x28] sm:$0xff] (%p44_p3), %v182_v5  ;;  %v186_v7 = vld [vmem:[%s3599_s26 + $0x98] sm:$0xff] (%p44_p3)  ;;  %v188_v8 = vld [vmem:[%s3599_s26 + $0x100] sm:$0xff] (%p44_p3) }
  0x15   : > { %185 = vst [vmem:[%s153_s27 + $0x30] sm:$0xff] %v184_v6  ;;  %187 = vst [vmem:[%s153_s27 + $0x38] sm:$0xff] %v186_v7  ;;  %v190_v9 = vld [vmem:[%s3599_s26 + $0x108] sm:$0xff]  ;;  %v192_v10 = vld [vmem:[%s3599_s26 + $0x110] sm:$0xff] }
  0x16   : > { %189 = vst [vmem:[%s153_s27 + $0x40] sm:$0xff] %v188_v8  ;;  %v194_v11 = vld [vmem:[%s3599_s26 + $0x118] sm:$0xff]  ;;  %191 = vst [vmem:[%s153_s27 + $0x48] sm:$0xff] %v190_v9  ;;  %v196_v12 = vld [vmem:[%s3599_s26 + $0x180] sm:$0xff] }
  0x17   : > { %193 = vst [vmem:[%s153_s27 + $0x50] sm:$0xff] %v192_v10  ;;  %195 = vst [vmem:[%s153_s27 + $0x58] sm:$0xff] %v194_v11  ;;  %v198_v13 = vld [vmem:[%s3599_s26 + $0x188] sm:$0xff]  ;;  %v200_v14 = vld [vmem:[%s3599_s26 + $0x190] sm:$0xff] }
  0x18   : > { %197 = vst [vmem:[%s153_s27 + $0x60] sm:$0xff] %v196_v12  ;;  %199 = vst [vmem:[%s153_s27 + $0x68] sm:$0xff] %v198_v13  ;;  %v202_v15 = vld [vmem:[%s3599_s26 + $0x198] sm:$0xff] }
  0x19   : > { %201 = vst [vmem:[%s153_s27 + $0x70] sm:$0xff] %v200_v14  ;;  %203 = vst [vmem:[%s153_s27 + $0x78] sm:$0xff] %v202_v15 }
  0x1a PF: > { %p2718_p6 = scmp.ge.s32.totalorder %s3532_s16, 1  ;;  %p218_p7 = scmp.lt.s32.totalorder %s3532_s16, 5 }
  0x1c   : > { %p219_p8 = pnand %p2718_p6, %p218_p7 }
  0x1d   : > { %s225_s28 = sand.u32 (!%p219_p8), 1, %s3516_s12   ;;  %s2720_s29 = sshll.u32 (!%p219_p8), %s3524_s14, 7 }
  0x1e   : > { %222 = sbr.rel (%p219_p8) target bundleno = 565 (0x235), region = 47  ;;  %s2719_s30 = sshll.u32 (!%p219_p8), %s225_s28, 7 }
  0x1f   : > { %p263_p9 = scmp.lt.s32.totalorder (!%p219_p8), %s2720_s29, 511  ;;  %s3626_s8 = scalar_lea.vmem (!%p219_p8), [#allocation3], %s2719_s30 }
  0x20   : > { %p2723_p10 = scmp.ne.s32.totalorder (!%p219_p8), %s3524_s14, 0 }
  0x25   : > { %s4082_s29 = smov (!%p263_p9, %s2720_s29), 511  ;;  %284 = sbr.rel (%p2723_p10) target bundleno = 47 (0x2f), region = 55 }
  0x26   : > { %s3011_s4 = sshll.u32 %s4082_s29, 4  ;;  %v3534_v16 = vmov (!%p2723_p10), 0.0  }
  0x27   : > { %s3624_s7 = scalar_lea.vmem %s4072_s1, %s3011_s4  ;;  %285 = vst [vmem:[#allocation2] sm:$0xff] (!%p2723_p10), %v3534_v16  ;;  %286 = vst [vmem:[#allocation2 + $0x8] sm:$0xff] (!%p2723_p10), %v3534_v16 }
  0x28   : > { %287 = vst [vmem:[#allocation2 + $0x10] sm:$0xff] (!%p2723_p10), %v3534_v16  ;;  %288 = vst [vmem:[#allocation2 + $0x18] sm:$0xff] (!%p2723_p10), %v3534_v16 }
  0x29   : > { %289 = vst [vmem:[#allocation2 + $0x20] sm:$0xff] (!%p2723_p10), %v3534_v16  ;;  %290 = vst [vmem:[#allocation2 + $0x28] sm:$0xff] (!%p2723_p10), %v3534_v16 }
  0x2a   : > { %291 = vst [vmem:[#allocation2 + $0x30] sm:$0xff] (!%p2723_p10), %v3534_v16  ;;  %292 = vst [vmem:[#allocation2 + $0x38] sm:$0xff] (!%p2723_p10), %v3534_v16 }
  0x2b   : > { %293 = vst [vmem:[#allocation2 + $0x40] sm:$0xff] (!%p2723_p10), %v3534_v16  ;;  %294 = vst [vmem:[#allocation2 + $0x48] sm:$0xff] (!%p2723_p10), %v3534_v16 }
  0x2c   : > { %295 = vst [vmem:[#allocation2 + $0x50] sm:$0xff] %v3534_v16  ;;  %296 = vst [vmem:[#allocation2 + $0x58] sm:$0xff] %v3534_v16 }
  0x2d   : > { %297 = vst [vmem:[#allocation2 + $0x60] sm:$0xff] %v3534_v16  ;;  %298 = vst [vmem:[#allocation2 + $0x68] sm:$0xff] %v3534_v16 }
  0x2e   : > { %299 = vst [vmem:[#allocation2 + $0x70] sm:$0xff] %v3534_v16  ;;  %300 = vst [vmem:[#allocation2 + $0x78] sm:$0xff] %v3534_v16 }
  0x2f PF: > { %v3110_v17 = vld [vmem:[%s3624_s7 + $0x4] ss:$16 sps:$4 sm:$0xff]   ;;  %v3112_v18 = vld [vmem:[%s3624_s7 + $0xc] ss:$16 sps:$4 sm:$0xff]   ;;  %v3114_v19 = vld [vmem:[%s3624_s7] ss:$16 sps:$4 sm:$0xff]  }
  0x30   : > { %1949 = vmatprep.subr.bf16.mxu0 %v3110_v17  ;;  %v3115_v20 = vld [vmem:[%s3624_s7 + $0x8] ss:$16 sps:$4 sm:$0xff]   ;;  %2161 = vmatprep.subr.bf16.mxu1 %v3112_v18  ;;  %v3116_v21 = vld [vmem:[%s3624_s7 + $0x24] ss:$16 sps:$4 sm:$0xff]   ;;  %v3118_v22 = vld [vmem:[%s3624_s7 + $0x2c] ss:$16 sps:$4 sm:$0xff]  }
  0x31   : > { %1950 = vmatpush1.bf16.msra.mxu0 %v3114_v19  ;;  %2162 = vmatpush1.bf16.msra.mxu1 %v3115_v20  ;;  %v3120_v23 = vld [vmem:[%s3624_s7 + $0x20] ss:$16 sps:$4 sm:$0xff]   ;;  %v3121_v24 = vld [vmem:[%s3624_s7 + $0x28] ss:$16 sps:$4 sm:$0xff]   ;;  %v3122_v25 = vld [vmem:[%s3624_s7 + $0x44] ss:$16 sps:$4 sm:$0xff]  }
  0x32   : > { %1951 = vmatprep.subr.bf16.mxu0 %v3116_v21  ;;  %2163 = vmatprep.subr.bf16.mxu1 %v3118_v22  ;;  %v3124_v26 = vld [vmem:[%s3624_s7 + $0x4c] ss:$16 sps:$4 sm:$0xff]   ;;  %v3126_v27 = vld [vmem:[%s3624_s7 + $0x40] ss:$16 sps:$4 sm:$0xff]   ;;  %v3127_v28 = vld [vmem:[%s3624_s7 + $0x48] ss:$16 sps:$4 sm:$0xff]  }
  0x33   : > { %v3128_v29 = vld [vmem:[%s3624_s7 + $0x64] ss:$16 sps:$4 sm:$0xff]   ;;  %v3130_v30 = vld [vmem:[%s3624_s7 + $0x6c] ss:$16 sps:$4 sm:$0xff]   ;;  %v3132_v31 = vld [vmem:[%s3624_s7 + $0x60] ss:$16 sps:$4 sm:$0xff]  }
  0x34   : > { %v3133_v32 = vld [vmem:[%s3624_s7 + $0x68] ss:$16 sps:$4 sm:$0xff]   ;;  %v3134_v33 = vld [vmem:[%s3624_s7 + $0x84] ss:$16 sps:$4 sm:$0xff]   ;;  %v3136_v34 = vld [vmem:[%s3624_s7 + $0x8c] ss:$16 sps:$4 sm:$0xff]  }
  0x35   : > { %1952 = vmatpush1.bf16.msra.mxu0 %v3120_v23  ;;  %2164 = vmatpush1.bf16.msra.mxu1 %v3121_v24  ;;  %v3138_v35 = vld [vmem:[%s3624_s7 + $0x80] ss:$16 sps:$4 sm:$0xff]   ;;  %v3139_v36 = vld [vmem:[%s3624_s7 + $0x88] ss:$16 sps:$4 sm:$0xff]   ;;  %v3140_v37 = vld [vmem:[%s3624_s7 + $0xa4] ss:$16 sps:$4 sm:$0xff]  }
  0x36   : > { %1953 = vmatprep.subr.bf16.mxu0 %v3122_v25  ;;  %2165 = vmatprep.subr.bf16.mxu1 %v3124_v26  ;;  %v3142_v38 = vld [vmem:[%s3624_s7 + $0xac] ss:$16 sps:$4 sm:$0xff]   ;;  %v3144_v39 = vld [vmem:[%s3624_s7 + $0xa0] ss:$16 sps:$4 sm:$0xff]   ;;  %v3145_v40 = vld [vmem:[%s3624_s7 + $0xa8] ss:$16 sps:$4 sm:$0xff]  }
  0x37   : > { %v3146_v41 = vld [vmem:[%s3624_s7 + $0xc4] ss:$16 sps:$4 sm:$0xff]   ;;  %v3148_v42 = vld [vmem:[%s3624_s7 + $0xcc] ss:$16 sps:$4 sm:$0xff]   ;;  %v3150_v43 = vld [vmem:[%s3624_s7 + $0xc0] ss:$16 sps:$4 sm:$0xff]  }
  0x38   : > { %v3151_v44 = vld [vmem:[%s3624_s7 + $0xc8] ss:$16 sps:$4 sm:$0xff]   ;;  %v3152_v45 = vld [vmem:[%s3624_s7 + $0xe4] ss:$16 sps:$4 sm:$0xff]   ;;  %v3154_v46 = vld [vmem:[%s3624_s7 + $0xec] ss:$16 sps:$4 sm:$0xff]  }
  0x39   : > { %1954 = vmatpush1.bf16.msra.mxu0 %v3126_v27  ;;  %2166 = vmatpush1.bf16.msra.mxu1 %v3127_v28  ;;  %v3156_v47 = vld [vmem:[%s3624_s7 + $0xe0] ss:$16 sps:$4 sm:$0xff]   ;;  %v3157_v48 = vld [vmem:[%s3624_s7 + $0xe8] ss:$16 sps:$4 sm:$0xff]   ;;  %v3158_v49 = vld [vmem:[%s3624_s7 + $0x104] ss:$16 sps:$4 sm:$0xff]  }
  0x3a   : > { %1955 = vmatprep.subr.bf16.mxu0 %v3128_v29  ;;  %2167 = vmatprep.subr.bf16.mxu1 %v3130_v30  ;;  %v3160_v50 = vld [vmem:[%s3624_s7 + $0x10c] ss:$16 sps:$4 sm:$0xff]   ;;  %v3162_v51 = vld [vmem:[%s3624_s7 + $0x100] ss:$16 sps:$4 sm:$0xff]   ;;  %v3163_v52 = vld [vmem:[%s3624_s7 + $0x108] ss:$16 sps:$4 sm:$0xff]  }
  0x3b   : > { %v3164_v53 = vld [vmem:[%s3624_s7 + $0x124] ss:$16 sps:$4 sm:$0xff]   ;;  %v3166_v54 = vld [vmem:[%s3624_s7 + $0x12c] ss:$16 sps:$4 sm:$0xff]   ;;  %v3168_v55 = vld [vmem:[%s3624_s7 + $0x120] ss:$16 sps:$4 sm:$0xff]  }
  0x3c   : > { %v3169_v56 = vld [vmem:[%s3624_s7 + $0x128] ss:$16 sps:$4 sm:$0xff]   ;;  %v3170_v57 = vld [vmem:[%s3624_s7 + $0x144] ss:$16 sps:$4 sm:$0xff]   ;;  %v3172_v58 = vld [vmem:[%s3624_s7 + $0x14c] ss:$16 sps:$4 sm:$0xff]  }
  0x3d   : > { %1956 = vmatpush1.bf16.msra.mxu0 %v3132_v31  ;;  %2168 = vmatpush1.bf16.msra.mxu1 %v3133_v32  ;;  %v3174_v59 = vld [vmem:[%s3624_s7 + $0x140] ss:$16 sps:$4 sm:$0xff]   ;;  %v3175_v60 = vld [vmem:[%s3624_s7 + $0x148] ss:$16 sps:$4 sm:$0xff]   ;;  %v3176_v61 = vld [vmem:[%s3624_s7 + $0x164] ss:$16 sps:$4 sm:$0xff]  }
  0x3e   : > { %1957 = vmatprep.subr.bf16.mxu0 %v3134_v33  ;;  %2169 = vmatprep.subr.bf16.mxu1 %v3136_v34  ;;  %v3178_v62 = vld [vmem:[%s3624_s7 + $0x16c] ss:$16 sps:$4 sm:$0xff]   ;;  %v317_v63 = vld [vmem:[%s3626_s8] sm:$0xff]  ;;  %v3181_v2 = vld [vmem:[%s3624_s7 + $0x168] ss:$16 sps:$4 sm:$0xff]   ;;  %p2996_p11 = scmp.ne.s32.totalorder %s3524_s14, 3 }
  0x3f   : > { %v321_v0 = vld [vmem:[%s3626_s8 + $0x20] sm:$0xff]  ;;  %v3184_v5 = vld [vmem:[%s3624_s7 + $0x18c] ss:$16 sps:$4 sm:$0xff]   ;;  %v3187_v7 = vld [vmem:[%s3624_s7 + $0x188] ss:$16 sps:$4 sm:$0xff]   ;;  %vm2513_vm0 = vcmask (!%p2996_p11), 1040384  }
  0x40   : > { %v3180_v1 = vld [vmem:[%s3624_s7 + $0x160] ss:$16 sps:$4 sm:$0xff]   ;;  %v2725_v3 = vcombine.high %v317_v63, %v321_v0  ;;  %v3182_v4 = vld [vmem:[%s3624_s7 + $0x184] ss:$16 sps:$4 sm:$0xff]   ;;  %v3190_v9 = vld [vmem:[%s3624_s7 + $0x1ac] ss:$16 sps:$4 sm:$0xff]   ;;  %v2724_v22 = vcombine.low %v317_v63, %v321_v0 }
  0x41   : > { %1958 = vmatpush1.bf16.msra.mxu0 %v3138_v35  ;;  %2170 = vmatpush1.bf16.msra.mxu1 %v3139_v36  ;;  %v3186_v6 = vld [vmem:[%s3624_s7 + $0x180] ss:$16 sps:$4 sm:$0xff]   ;;  %v3188_v8 = vld [vmem:[%s3624_s7 + $0x1a4] ss:$16 sps:$4 sm:$0xff]   ;;  %v3193_v11 = vld [vmem:[%s3624_s7 + $0x1a8] ss:$16 sps:$4 sm:$0xff]  }
  0x42   : > { %1959 = vmatprep.subr.bf16.mxu0 %v3140_v37  ;;  %2171 = vmatprep.subr.bf16.mxu1 %v3142_v38  ;;  %v3192_v10 = vld [vmem:[%s3624_s7 + $0x1a0] ss:$16 sps:$4 sm:$0xff]   ;;  %v3194_v12 = vld [vmem:[%s3624_s7 + $0x1c4] ss:$16 sps:$4 sm:$0xff]   ;;  %v3196_v13 = vld [vmem:[%s3624_s7 + $0x1cc] ss:$16 sps:$4 sm:$0xff]  }
  0x43   : > { %1981 = vmatprep.mubr.bf16.mxu0 %v2725_v3  ;;  %2193 = vmatprep.mubr.bf16.mxu1 %v2725_v3  ;;  %v3198_v14 = vld [vmem:[%s3624_s7 + $0x1c0] ss:$16 sps:$4 sm:$0xff]   ;;  %v3199_v15 = vld [vmem:[%s3624_s7 + $0x1c8] ss:$16 sps:$4 sm:$0xff]   ;;  %v3200_v16 = vld [vmem:[%s3624_s7 + $0x1e4] ss:$16 sps:$4 sm:$0xff]  }
  0x44   : > { %v3202_v17 = vld [vmem:[%s3624_s7 + $0x1ec] ss:$16 sps:$4 sm:$0xff]   ;;  %v3204_v18 = vld [vmem:[%s3624_s7 + $0x1e0] ss:$16 sps:$4 sm:$0xff]   ;;  %v3205_v19 = vld [vmem:[%s3624_s7 + $0x1e8] ss:$16 sps:$4 sm:$0xff]  }
  0x45   : > { %1960 = vmatpush1.bf16.msra.mxu0 %v3144_v39  ;;  %2172 = vmatpush1.bf16.msra.mxu1 %v3145_v40  ;;  %v3208_v20 = vld [vmem:[%s3624_s7 + $0x204] ss:$16 sps:$4 sm:$0xff]   ;;  %v3211_v21 = vld [vmem:[%s3624_s7 + $0x20c] ss:$16 sps:$4 sm:$0xff]   ;;  %v3206_v23 = vld [vmem:[%s3624_s7 + $0x200] ss:$16 sps:$4 sm:$0xff]  }
  0x46   : > { %1961 = vmatprep.subr.bf16.mxu0 %v3146_v41  ;;  %2173 = vmatprep.subr.bf16.mxu1 %v3148_v42  ;;  %v3209_v24 = vld [vmem:[%s3624_s7 + $0x208] ss:$16 sps:$4 sm:$0xff]   ;;  %v3214_v25 = vld [vmem:[%s3624_s7 + $0x224] ss:$16 sps:$4 sm:$0xff]   ;;  %v3217_v26 = vld [vmem:[%s3624_s7 + $0x22c] ss:$16 sps:$4 sm:$0xff]  }
  0x47   : > { %v3212_v27 = vld [vmem:[%s3624_s7 + $0x220] ss:$16 sps:$4 sm:$0xff]   ;;  %v3215_v28 = vld [vmem:[%s3624_s7 + $0x228] ss:$16 sps:$4 sm:$0xff]   ;;  %v3220_v29 = vld [vmem:[%s3624_s7 + $0x244] ss:$16 sps:$4 sm:$0xff]  }
  0x48   : > { %v3223_v30 = vld [vmem:[%s3624_s7 + $0x24c] ss:$16 sps:$4 sm:$0xff]   ;;  %v3218_v31 = vld [vmem:[%s3624_s7 + $0x240] ss:$16 sps:$4 sm:$0xff]   ;;  %v3221_v32 = vld [vmem:[%s3624_s7 + $0x248] ss:$16 sps:$4 sm:$0xff]  }
  0x49   : > { %1962 = vmatpush1.bf16.msra.mxu0 %v3150_v43  ;;  %2174 = vmatpush1.bf16.msra.mxu1 %v3151_v44  ;;  %v3226_v33 = vld [vmem:[%s3624_s7 + $0x264] ss:$16 sps:$4 sm:$0xff]   ;;  %v3229_v34 = vld [vmem:[%s3624_s7 + $0x26c] ss:$16 sps:$4 sm:$0xff]   ;;  %v3224_v35 = vld [vmem:[%s3624_s7 + $0x260] ss:$16 sps:$4 sm:$0xff]  }
  0x4a   : > { %1963 = vmatprep.subr.bf16.mxu0 %v3152_v45  ;;  %2175 = vmatprep.subr.bf16.mxu1 %v3154_v46  ;;  %v3227_v36 = vld [vmem:[%s3624_s7 + $0x268] ss:$16 sps:$4 sm:$0xff]   ;;  %v3232_v37 = vld [vmem:[%s3624_s7 + $0x284] ss:$16 sps:$4 sm:$0xff]   ;;  %v3235_v38 = vld [vmem:[%s3624_s7 + $0x28c] ss:$16 sps:$4 sm:$0xff]  }
  0x4b   : > { %v3230_v39 = vld [vmem:[%s3624_s7 + $0x280] ss:$16 sps:$4 sm:$0xff]   ;;  %v3233_v40 = vld [vmem:[%s3624_s7 + $0x288] ss:$16 sps:$4 sm:$0xff]   ;;  %v3238_v41 = vld [vmem:[%s3624_s7 + $0x2a4] ss:$16 sps:$4 sm:$0xff]  }
  0x4c   : > { %v3241_v42 = vld [vmem:[%s3624_s7 + $0x2ac] ss:$16 sps:$4 sm:$0xff]   ;;  %v325_v43 = vld [vmem:[%s3626_s8 + $0x40] sm:$0xff]  ;;  %v3257_v63 = vld [vmem:[%s3624_s7 + $0x308] ss:$16 sps:$4 sm:$0xff]  }
  0x4d   : > { %1964 = vmatpush1.bf16.msra.mxu0 %v3156_v47  ;;  %2176 = vmatpush1.bf16.msra.mxu1 %v3157_v48  ;;  %v329_v44 = vld [vmem:[%s3626_s8 + $0x60] sm:$0xff]  ;;  %v3239_v47 = vld [vmem:[%s3624_s7 + $0x2a8] ss:$16 sps:$4 sm:$0xff]  }
  0x4e   : > { %1965 = vmatprep.subr.bf16.mxu0 %v3158_v49  ;;  %2177 = vmatprep.subr.bf16.mxu1 %v3160_v50  ;;  %v2733_v45 = vcombine.high %v325_v43, %v329_v44  ;;  %v3236_v46 = vld [vmem:[%s3624_s7 + $0x2a0] ss:$16 sps:$4 sm:$0xff]   ;;  %v2732_v48 = vcombine.low %v325_v43, %v329_v44  ;;  %v3244_v49 = vld [vmem:[%s3624_s7 + $0x2c4] ss:$16 sps:$4 sm:$0xff]   ;;  %v3247_v50 = vld [vmem:[%s3624_s7 + $0x2cc] ss:$16 sps:$4 sm:$0xff]  }
  0x4f   : > { %v3262_v0 = vld [vmem:[%s3624_s7 + $0x324] ss:$16 sps:$4 sm:$0xff]   ;;  %v3263_v3 = vld [vmem:[%s3624_s7 + $0x328] ss:$16 sps:$4 sm:$0xff]  }
  0x50   : > { %v3787_v44 = vld [vmem:[%s3626_s8 + $0x30] sm:$0xff] }
  0x51   : > { %1966 = vmatpush1.bf16.msra.mxu0 %v3162_v51  ;;  %2178 = vmatpush1.bf16.msra.mxu1 %v3163_v52  ;;  %v3724_v51 = vld [vmem:[%s3626_s8 + $0x8] sm:$0xff] }
  0x52   : > { %1967 = vmatprep.subr.bf16.mxu0 %v3164_v53  ;;  %2179 = vmatprep.subr.bf16.mxu1 %v3166_v54  ;;  %v3727_v52 = vld [vmem:[%s3626_s8 + $0x28] sm:$0xff]  ;;  %v3242_v53 = vld [vmem:[%s3624_s7 + $0x2c0] ss:$16 sps:$4 sm:$0xff]  }
  0x53   : > { %v3245_v54 = vld [vmem:[%s3624_s7 + $0x2c8] ss:$16 sps:$4 sm:$0xff]  }
  0x55   : > { %1968 = vmatpush1.bf16.msra.mxu0 %v3168_v55  ;;  %2180 = vmatpush1.bf16.msra.mxu1 %v3169_v56  ;;  %v2727_v55 = vcombine.high %v3724_v51, %v3727_v52  ;;  %v3250_v56 = vld [vmem:[%s3624_s7 + $0x2e4] ss:$16 sps:$4 sm:$0xff]  }
  0x56   : > { %1969 = vmatprep.subr.bf16.mxu0 %v3170_v57  ;;  %2181 = vmatprep.subr.bf16.mxu1 %v3172_v58  ;;  %v3253_v57 = vld [vmem:[%s3624_s7 + $0x2ec] ss:$16 sps:$4 sm:$0xff]   ;;  %v3248_v58 = vld [vmem:[%s3624_s7 + $0x2e0] ss:$16 sps:$4 sm:$0xff]  }
  0x59   : > { %1970 = vmatpush1.bf16.msra.mxu0 %v3174_v59  ;;  %2182 = vmatpush1.bf16.msra.mxu1 %v3175_v60  ;;  %v3251_v59 = vld [vmem:[%s3624_s7 + $0x2e8] ss:$16 sps:$4 sm:$0xff]   ;;  %v3256_v60 = vld [vmem:[%s3624_s7 + $0x304] ss:$16 sps:$4 sm:$0xff]  }
  0x5a   : > { %1971 = vmatprep.subr.bf16.mxu0 %v3176_v61  ;;  %2183 = vmatprep.subr.bf16.mxu1 %v3178_v62  ;;  %v3259_v61 = vld [vmem:[%s3624_s7 + $0x30c] ss:$16 sps:$4 sm:$0xff]   ;;  %v3254_v62 = vld [vmem:[%s3624_s7 + $0x300] ss:$16 sps:$4 sm:$0xff]  }
  0x5d   : > { %1972 = vmatpush1.bf16.msra.mxu0 %v3180_v1  ;;  %2184 = vmatpush1.bf16.msra.mxu1 %v3181_v2  ;;  %v3265_v1 = vld [vmem:[%s3624_s7 + $0x32c] ss:$16 sps:$4 sm:$0xff]   ;;  %v3260_v2 = vld [vmem:[%s3624_s7 + $0x320] ss:$16 sps:$4 sm:$0xff]  }
  0x5e   : > { %1973 = vmatprep.subr.bf16.mxu0 %v3182_v4  ;;  %2185 = vmatprep.subr.bf16.mxu1 %v3184_v5  ;;  %v3268_v4 = vld [vmem:[%s3624_s7 + $0x344] ss:$16 sps:$4 sm:$0xff]   ;;  %v3271_v5 = vld [vmem:[%s3624_s7 + $0x34c] ss:$16 sps:$4 sm:$0xff]  }
  0x61   : > { %1974 = vmatpush1.bf16.msra.mxu0 %v3186_v6  ;;  %2186 = vmatpush1.bf16.msra.mxu1 %v3187_v7  ;;  %v3266_v6 = vld [vmem:[%s3624_s7 + $0x340] ss:$16 sps:$4 sm:$0xff]   ;;  %v3269_v7 = vld [vmem:[%s3624_s7 + $0x348] ss:$16 sps:$4 sm:$0xff]  }
  0x62   : > { %1975 = vmatprep.subr.bf16.mxu0 %v3188_v8  ;;  %2187 = vmatprep.subr.bf16.mxu1 %v3190_v9  ;;  %v3274_v8 = vld [vmem:[%s3624_s7 + $0x364] ss:$16 sps:$4 sm:$0xff]   ;;  %v3277_v9 = vld [vmem:[%s3624_s7 + $0x36c] ss:$16 sps:$4 sm:$0xff]  }
  0x65   : > { %1976 = vmatpush1.bf16.msra.mxu0 %v3192_v10  ;;  %2188 = vmatpush1.bf16.msra.mxu1 %v3193_v11  ;;  %v3272_v10 = vld [vmem:[%s3624_s7 + $0x360] ss:$16 sps:$4 sm:$0xff]   ;;  %v3275_v11 = vld [vmem:[%s3624_s7 + $0x368] ss:$16 sps:$4 sm:$0xff]  }
  0x66   : > { %1977 = vmatprep.subr.bf16.mxu0 %v3194_v12  ;;  %2189 = vmatprep.subr.bf16.mxu1 %v3196_v13  ;;  %v3280_v12 = vld [vmem:[%s3624_s7 + $0x384] ss:$16 sps:$4 sm:$0xff]   ;;  %v3283_v13 = vld [vmem:[%s3624_s7 + $0x38c] ss:$16 sps:$4 sm:$0xff]  }
  0x69   : > { %1978 = vmatpush1.bf16.msra.mxu0 %v3198_v14  ;;  %2190 = vmatpush1.bf16.msra.mxu1 %v3199_v15  ;;  %v3278_v14 = vld [vmem:[%s3624_s7 + $0x380] ss:$16 sps:$4 sm:$0xff]   ;;  %v3281_v15 = vld [vmem:[%s3624_s7 + $0x388] ss:$16 sps:$4 sm:$0xff]  }
  0x6a   : > { %1979 = vmatprep.subr.bf16.mxu0 %v3200_v16  ;;  %2191 = vmatprep.subr.bf16.mxu1 %v3202_v17  ;;  %v3286_v16 = vld [vmem:[%s3624_s7 + $0x3a4] ss:$16 sps:$4 sm:$0xff]   ;;  %v3289_v17 = vld [vmem:[%s3624_s7 + $0x3ac] ss:$16 sps:$4 sm:$0xff]  }
  0x6d   : > { %1980 = vmatpush1.bf16.msra.mxu0 %v3204_v18  ;;  %2192 = vmatpush1.bf16.msra.mxu1 %v3205_v19  ;;  %v3284_v18 = vld [vmem:[%s3624_s7 + $0x3a0] ss:$16 sps:$4 sm:$0xff]   ;;  %v3287_v19 = vld [vmem:[%s3624_s7 + $0x3a8] ss:$16 sps:$4 sm:$0xff]  }
  0x6e   : > { %2002 = vmatprep.subr.bf16.mxu0 %v3208_v20  ;;  %2214 = vmatprep.subr.bf16.mxu1 %v3211_v21  ;;  %v3292_v20 = vld [vmem:[%s3624_s7 + $0x3c4] ss:$16 sps:$4 sm:$0xff]   ;;  %v3295_v21 = vld [vmem:[%s3624_s7 + $0x3cc] ss:$16 sps:$4 sm:$0xff]  }
  0x70   : > { %1982 = vmatmul.mubr.bf16.vlgmr.msra.gmra.mrb[0].mxu0 %v2724_v22  ;;  %2194 = vmatmul.mubr.bf16.vlgmr.msra.gmra.mrb[0].mxu1 %v2724_v22  ;;  %v3290_v22 = vld [vmem:[%s3624_s7 + $0x3c0] ss:$16 sps:$4 sm:$0xff]  }
  0x71   : > { %2003 = vmatpush1.bf16.msra.mxu0 %v3206_v23  ;;  %2215 = vmatpush1.bf16.msra.mxu1 %v3209_v24  ;;  %v3293_v23 = vld [vmem:[%s3624_s7 + $0x3c8] ss:$16 sps:$4 sm:$0xff]   ;;  %v3298_v24 = vld [vmem:[%s3624_s7 + $0x3e4] ss:$16 sps:$4 sm:$0xff]  }
  0x72   : > { %2004 = vmatprep.subr.bf16.mxu0 %v3214_v25  ;;  %2216 = vmatprep.subr.bf16.mxu1 %v3217_v26  ;;  %v3301_v25 = vld [vmem:[%s3624_s7 + $0x3ec] ss:$16 sps:$4 sm:$0xff]   ;;  %v3296_v26 = vld [vmem:[%s3624_s7 + $0x3e0] ss:$16 sps:$4 sm:$0xff]  }
  0x73   : > { %1991 = vmatprep.mubr.bf16.mxu0 %v2733_v45  ;;  %2203 = vmatprep.mubr.bf16.mxu1 %v2733_v45  ;;  %v3314_v45 = vld [vmem:[%s3624_s7 + $0x440] ss:$16 sps:$4 sm:$0xff]  }
  0x75   : > { %2005 = vmatpush1.bf16.msra.mxu0 %v3212_v27  ;;  %2217 = vmatpush1.bf16.msra.mxu1 %v3215_v28  ;;  %v3299_v27 = vld [vmem:[%s3624_s7 + $0x3e8] ss:$16 sps:$4 sm:$0xff]   ;;  %v3304_v28 = vld [vmem:[%s3624_s7 + $0x404] ss:$16 sps:$4 sm:$0xff]  }
  0x76   : > { %2006 = vmatprep.subr.bf16.mxu0 %v3220_v29  ;;  %2218 = vmatprep.subr.bf16.mxu1 %v3223_v30  ;;  %v3307_v29 = vld [vmem:[%s3624_s7 + $0x40c] ss:$16 sps:$4 sm:$0xff]   ;;  %v3302_v30 = vld [vmem:[%s3624_s7 + $0x400] ss:$16 sps:$4 sm:$0xff]  }
  0x78   : > { %1992 = vmatmul.mubr.bf16.gmra.mrb[4].mxu0 %v2732_v48  ;;  %2204 = vmatmul.mubr.bf16.gmra.mrb[4].mxu1 %v2732_v48  ;;  %v3325_v48 = vld [vmem:[%s3624_s7 + $0x46c] ss:$16 sps:$4 sm:$0xff]  }
  0x79   : > { %2007 = vmatpush1.bf16.msra.mxu0 %v3218_v31  ;;  %2219 = vmatpush1.bf16.msra.mxu1 %v3221_v32  ;;  %v3305_v31 = vld [vmem:[%s3624_s7 + $0x408] ss:$16 sps:$4 sm:$0xff]   ;;  %v2726_v32 = vcombine.low %v3724_v51, %v3727_v52  ;;  %v3328_v52 = vld [vmem:[%s3624_s7 + $0x484] ss:$16 sps:$4 sm:$0xff]  }
  0x7a   : > { %2008 = vmatprep.subr.bf16.mxu0 %v3226_v33  ;;  %2220 = vmatprep.subr.bf16.mxu1 %v3229_v34  ;;  %v326_v33 = vld [vmem:[%s3626_s8 + $0x48] sm:$0xff] }
  0x7b   : > { %2034 = vmatprep.mubr.bf16.mxu0 %v2727_v55  ;;  %2246 = vmatprep.mubr.bf16.mxu1 %v2727_v55  ;;  %v330_v34 = vld [vmem:[%s3626_s8 + $0x68] sm:$0xff] }
  0x7c   : > { %v2734_v43 = vcombine.low %v326_v33, %v330_v34  ;;  %v3323_v51 = vld [vmem:[%s3624_s7 + $0x468] ss:$16 sps:$4 sm:$0xff]  }
  0x7d   : > { %2009 = vmatpush1.bf16.msra.mxu0 %v3224_v35  ;;  %2221 = vmatpush1.bf16.msra.mxu1 %v3227_v36  ;;  %v3310_v35 = vld [vmem:[%s3624_s7 + $0x424] ss:$16 sps:$4 sm:$0xff]   ;;  %v3313_v36 = vld [vmem:[%s3624_s7 + $0x42c] ss:$16 sps:$4 sm:$0xff]   ;;  %v3329_v55 = vld [vmem:[%s3624_s7 + $0x488] ss:$16 sps:$4 sm:$0xff]  }
  0x7e   : > { %2010 = vmatprep.subr.bf16.mxu0 %v3232_v37  ;;  %2222 = vmatprep.subr.bf16.mxu1 %v3235_v38  ;;  %v2735_v37 = vcombine.high %v326_v33, %v330_v34  ;;  %v3308_v38 = vld [vmem:[%s3624_s7 + $0x420] ss:$16 sps:$4 sm:$0xff]   ;;  %v3397_v33 = vld [vmem:[%s3624_s7 + $0x5ec] ss:$16 sps:$4 sm:$0xff]  }
  0x7f   : > { %v3392_v34 = vld [vmem:[%s3624_s7 + $0x5e0] ss:$16 sps:$4 sm:$0xff]  }
  0x81   : > { %2011 = vmatpush1.bf16.msra.mxu0 %v3230_v39  ;;  %2223 = vmatpush1.bf16.msra.mxu1 %v3233_v40  ;;  %v3311_v39 = vld [vmem:[%s3624_s7 + $0x428] ss:$16 sps:$4 sm:$0xff]   ;;  %v3316_v40 = vld [vmem:[%s3624_s7 + $0x444] ss:$16 sps:$4 sm:$0xff]  }
  0x82   : > { %2012 = vmatprep.subr.bf16.mxu0 %v3238_v41  ;;  %2224 = vmatprep.subr.bf16.mxu1 %v3241_v42  ;;  %v3319_v41 = vld [vmem:[%s3624_s7 + $0x44c] ss:$16 sps:$4 sm:$0xff]   ;;  %v3784_v42 = vld [vmem:[%s3626_s8 + $0x10] sm:$0xff] }
  0x85   : > { %2013 = vmatpush1.bf16.msra.mxu0 %v3236_v46  ;;  %2225 = vmatpush1.bf16.msra.mxu1 %v3239_v47  ;;  %v3317_v46 = vld [vmem:[%s3624_s7 + $0x448] ss:$16 sps:$4 sm:$0xff]   ;;  %v3322_v47 = vld [vmem:[%s3624_s7 + $0x464] ss:$16 sps:$4 sm:$0xff]  }
  0x86   : > { %2014 = vmatprep.subr.bf16.mxu0 %v3244_v49  ;;  %2226 = vmatprep.subr.bf16.mxu1 %v3247_v50  ;;  %v2729_v49 = vcombine.high %v3784_v42, %v3787_v44  ;;  %v3320_v50 = vld [vmem:[%s3624_s7 + $0x460] ss:$16 sps:$4 sm:$0xff]  }
  0x89   : > { %2015 = vmatpush1.bf16.msra.mxu0 %v3242_v53  ;;  %2227 = vmatpush1.bf16.msra.mxu1 %v3245_v54  ;;  %v3331_v53 = vld [vmem:[%s3624_s7 + $0x48c] ss:$16 sps:$4 sm:$0xff]   ;;  %v3326_v54 = vld [vmem:[%s3624_s7 + $0x480] ss:$16 sps:$4 sm:$0xff]  }
  0x8a   : > { %2016 = vmatprep.subr.bf16.mxu0 %v3250_v56  ;;  %2228 = vmatprep.subr.bf16.mxu1 %v3253_v57  ;;  %v3334_v56 = vld [vmem:[%s3624_s7 + $0x4a4] ss:$16 sps:$4 sm:$0xff]   ;;  %v3337_v57 = vld [vmem:[%s3624_s7 + $0x4ac] ss:$16 sps:$4 sm:$0xff]  }
  0x8d   : > { %2017 = vmatpush1.bf16.msra.mxu0 %v3248_v58  ;;  %2229 = vmatpush1.bf16.msra.mxu1 %v3251_v59  ;;  %v3332_v58 = vld [vmem:[%s3624_s7 + $0x4a0] ss:$16 sps:$4 sm:$0xff]   ;;  %v3335_v59 = vld [vmem:[%s3624_s7 + $0x4a8] ss:$16 sps:$4 sm:$0xff]  }
  0x8e   : > { %2018 = vmatprep.subr.bf16.mxu0 %v3256_v60  ;;  %2230 = vmatprep.subr.bf16.mxu1 %v3259_v61  ;;  %v3340_v60 = vld [vmem:[%s3624_s7 + $0x4c4] ss:$16 sps:$4 sm:$0xff]   ;;  %v3343_v61 = vld [vmem:[%s3624_s7 + $0x4cc] ss:$16 sps:$4 sm:$0xff]  }
  0x91   : > { %2019 = vmatpush1.bf16.msra.mxu0 %v3254_v62  ;;  %2231 = vmatpush1.bf16.msra.mxu1 %v3257_v63  ;;  %v3338_v62 = vld [vmem:[%s3624_s7 + $0x4c0] ss:$16 sps:$4 sm:$0xff]   ;;  %v3341_v63 = vld [vmem:[%s3624_s7 + $0x4c8] ss:$16 sps:$4 sm:$0xff]  }
  0x92   : > { %2020 = vmatprep.subr.bf16.mxu0 %v3262_v0  ;;  %2232 = vmatprep.subr.bf16.mxu1 %v3265_v1  ;;  %v3346_v0 = vld [vmem:[%s3624_s7 + $0x4e4] ss:$16 sps:$4 sm:$0xff]   ;;  %v3349_v1 = vld [vmem:[%s3624_s7 + $0x4ec] ss:$16 sps:$4 sm:$0xff]  }
  0x95   : > { %2021 = vmatpush1.bf16.msra.mxu0 %v3260_v2  ;;  %2233 = vmatpush1.bf16.msra.mxu1 %v3263_v3  ;;  %v3344_v2 = vld [vmem:[%s3624_s7 + $0x4e0] ss:$16 sps:$4 sm:$0xff]   ;;  %v3347_v3 = vld [vmem:[%s3624_s7 + $0x4e8] ss:$16 sps:$4 sm:$0xff]  }
  0x96   : > { %2022 = vmatprep.subr.bf16.mxu0 %v3268_v4  ;;  %2234 = vmatprep.subr.bf16.mxu1 %v3271_v5  ;;  %v3352_v4 = vld [vmem:[%s3624_s7 + $0x504] ss:$16 sps:$4 sm:$0xff]   ;;  %v3355_v5 = vld [vmem:[%s3624_s7 + $0x50c] ss:$16 sps:$4 sm:$0xff]  }
  0x99   : > { %2023 = vmatpush1.bf16.msra.mxu0 %v3266_v6  ;;  %2235 = vmatpush1.bf16.msra.mxu1 %v3269_v7  ;;  %v3350_v6 = vld [vmem:[%s3624_s7 + $0x500] ss:$16 sps:$4 sm:$0xff]   ;;  %v3353_v7 = vld [vmem:[%s3624_s7 + $0x508] ss:$16 sps:$4 sm:$0xff]  }
  0x9a   : > { %2024 = vmatprep.subr.bf16.mxu0 %v3274_v8  ;;  %2236 = vmatprep.subr.bf16.mxu1 %v3277_v9  ;;  %v3358_v8 = vld [vmem:[%s3624_s7 + $0x524] ss:$16 sps:$4 sm:$0xff]   ;;  %v3361_v9 = vld [vmem:[%s3624_s7 + $0x52c] ss:$16 sps:$4 sm:$0xff]  }
  0x9d   : > { %2025 = vmatpush1.bf16.msra.mxu0 %v3272_v10  ;;  %2237 = vmatpush1.bf16.msra.mxu1 %v3275_v11  ;;  %v3356_v10 = vld [vmem:[%s3624_s7 + $0x520] ss:$16 sps:$4 sm:$0xff]   ;;  %v3359_v11 = vld [vmem:[%s3624_s7 + $0x528] ss:$16 sps:$4 sm:$0xff]  }
  0x9e   : > { %2026 = vmatprep.subr.bf16.mxu0 %v3280_v12  ;;  %2238 = vmatprep.subr.bf16.mxu1 %v3283_v13  ;;  %v3364_v12 = vld [vmem:[%s3624_s7 + $0x544] ss:$16 sps:$4 sm:$0xff]   ;;  %v3367_v13 = vld [vmem:[%s3624_s7 + $0x54c] ss:$16 sps:$4 sm:$0xff]  }
  0xa1   : > { %2027 = vmatpush1.bf16.msra.mxu0 %v3278_v14  ;;  %2239 = vmatpush1.bf16.msra.mxu1 %v3281_v15  ;;  %v3362_v14 = vld [vmem:[%s3624_s7 + $0x540] ss:$16 sps:$4 sm:$0xff]   ;;  %v3365_v15 = vld [vmem:[%s3624_s7 + $0x548] ss:$16 sps:$4 sm:$0xff]  }
  0xa2   : > { %2028 = vmatprep.subr.bf16.mxu0 %v3286_v16  ;;  %2240 = vmatprep.subr.bf16.mxu1 %v3289_v17  ;;  %v3370_v16 = vld [vmem:[%s3624_s7 + $0x564] ss:$16 sps:$4 sm:$0xff]   ;;  %v3373_v17 = vld [vmem:[%s3624_s7 + $0x56c] ss:$16 sps:$4 sm:$0xff]  }
  0xa5   : > { %2029 = vmatpush1.bf16.msra.mxu0 %v3284_v18  ;;  %2241 = vmatpush1.bf16.msra.mxu1 %v3287_v19  ;;  %v3368_v18 = vld [vmem:[%s3624_s7 + $0x560] ss:$16 sps:$4 sm:$0xff]   ;;  %v3371_v19 = vld [vmem:[%s3624_s7 + $0x568] ss:$16 sps:$4 sm:$0xff]  }
  0xa6   : > { %2030 = vmatprep.subr.bf16.mxu0 %v3292_v20  ;;  %2242 = vmatprep.subr.bf16.mxu1 %v3295_v21  ;;  %v3376_v20 = vld [vmem:[%s3624_s7 + $0x584] ss:$16 sps:$4 sm:$0xff]   ;;  %v3379_v21 = vld [vmem:[%s3624_s7 + $0x58c] ss:$16 sps:$4 sm:$0xff]  }
  0xa9   : > { %2031 = vmatpush1.bf16.msra.mxu0 %v3290_v22  ;;  %2243 = vmatpush1.bf16.msra.mxu1 %v3293_v23  ;;  %v3374_v22 = vld [vmem:[%s3624_s7 + $0x580] ss:$16 sps:$4 sm:$0xff]   ;;  %v3377_v23 = vld [vmem:[%s3624_s7 + $0x588] ss:$16 sps:$4 sm:$0xff]  }
  0xaa   : > { %2032 = vmatprep.subr.bf16.mxu0 %v3298_v24  ;;  %2244 = vmatprep.subr.bf16.mxu1 %v3301_v25  ;;  %v3382_v24 = vld [vmem:[%s3624_s7 + $0x5a4] ss:$16 sps:$4 sm:$0xff]   ;;  %v3385_v25 = vld [vmem:[%s3624_s7 + $0x5ac] ss:$16 sps:$4 sm:$0xff]  }
  0xad   : > { %2033 = vmatpush1.bf16.msra.mxu0 %v3296_v26  ;;  %2245 = vmatpush1.bf16.msra.mxu1 %v3299_v27  ;;  %v3380_v26 = vld [vmem:[%s3624_s7 + $0x5a0] ss:$16 sps:$4 sm:$0xff]   ;;  %v3383_v27 = vld [vmem:[%s3624_s7 + $0x5a8] ss:$16 sps:$4 sm:$0xff]  }
  0xae   : > { %2055 = vmatprep.subr.bf16.mxu0 %v3304_v28  ;;  %2267 = vmatprep.subr.bf16.mxu1 %v3307_v29  ;;  %v3388_v28 = vld [vmem:[%s3624_s7 + $0x5c4] ss:$16 sps:$4 sm:$0xff]   ;;  %v3391_v29 = vld [vmem:[%s3624_s7 + $0x5cc] ss:$16 sps:$4 sm:$0xff]  }
  0xb0   : > { %2035 = vmatmul.mubr.bf16.vlgmr.msra.gmra.mrb[0].mxu0 %v2726_v32  ;;  %2247 = vmatmul.mubr.bf16.vlgmr.msra.gmra.mrb[0].mxu1 %v2726_v32  ;;  %v3394_v32 = vld [vmem:[%s3624_s7 + $0x5e4] ss:$16 sps:$4 sm:$0xff]  }
  0xb1   : > { %2056 = vmatpush1.bf16.msra.mxu0 %v3302_v30  ;;  %2268 = vmatpush1.bf16.msra.mxu1 %v3305_v31  ;;  %v3386_v30 = vld [vmem:[%s3624_s7 + $0x5c0] ss:$16 sps:$4 sm:$0xff]   ;;  %v3389_v31 = vld [vmem:[%s3624_s7 + $0x5c8] ss:$16 sps:$4 sm:$0xff]  }
  0xb2   : > { %2057 = vmatprep.subr.bf16.mxu0 %v3310_v35  ;;  %2269 = vmatprep.subr.bf16.mxu1 %v3313_v36  ;;  %v3395_v35 = vld [vmem:[%s3624_s7 + $0x5e8] ss:$16 sps:$4 sm:$0xff]   ;;  %v3400_v36 = vld [vmem:[%s3624_s7 + $0x604] ss:$16 sps:$4 sm:$0xff]  }
  0xb3   : > { %2044 = vmatprep.mubr.bf16.mxu0 %v2735_v37  ;;  %2256 = vmatprep.mubr.bf16.mxu1 %v2735_v37  ;;  %v3403_v37 = vld [vmem:[%s3624_s7 + $0x60c] ss:$16 sps:$4 sm:$0xff]  }
  0xb5   : > { %2058 = vmatpush1.bf16.msra.mxu0 %v3308_v38  ;;  %2270 = vmatpush1.bf16.msra.mxu1 %v3311_v39  ;;  %v2728_v38 = vcombine.low %v3784_v42, %v3787_v44  ;;  %v327_v39 = vld [vmem:[%s3626_s8 + $0x50] sm:$0xff]  ;;  %v3407_v44 = vld [vmem:[%s3624_s7 + $0x628] ss:$16 sps:$4 sm:$0xff]  }
  0xb6   : > { %2059 = vmatprep.subr.bf16.mxu0 %v3316_v40  ;;  %2271 = vmatprep.subr.bf16.mxu1 %v3319_v41  ;;  %v331_v40 = vld [vmem:[%s3626_s8 + $0x70] sm:$0xff] }
  0xb7   : > { %v3398_v41 = vld [vmem:[%s3624_s7 + $0x600] ss:$16 sps:$4 sm:$0xff]  }
  0xb8   : > { %2045 = vmatmul.mubr.bf16.gmra.mrb[4].mxu0 %v2734_v43  ;;  %2257 = vmatmul.mubr.bf16.gmra.mrb[4].mxu1 %v2734_v43  ;;  %v3401_v43 = vld [vmem:[%s3624_s7 + $0x608] ss:$16 sps:$4 sm:$0xff]   ;;  %v3404_v42 = vld [vmem:[%s3624_s7 + $0x620] ss:$16 sps:$4 sm:$0xff]  }
  0xb9   : > { %2060 = vmatpush1.bf16.msra.mxu0 %v3314_v45  ;;  %2272 = vmatpush1.bf16.msra.mxu1 %v3317_v46  ;;  %v3406_v45 = vld [vmem:[%s3624_s7 + $0x624] ss:$16 sps:$4 sm:$0xff]   ;;  %v3409_v46 = vld [vmem:[%s3624_s7 + $0x62c] ss:$16 sps:$4 sm:$0xff]  }
  0xba   : > { %2061 = vmatprep.subr.bf16.mxu0 %v3322_v47  ;;  %2273 = vmatprep.subr.bf16.mxu1 %v3325_v48  ;;  %v2737_v47 = vcombine.high %v327_v39, %v331_v40  ;;  %v3412_v48 = vld [vmem:[%s3624_s7 + $0x644] ss:$16 sps:$4 sm:$0xff]  }
  0xbb   : > { %2087 = vmatprep.mubr.bf16.mxu0 %v2729_v49  ;;  %2299 = vmatprep.mubr.bf16.mxu1 %v2729_v49  ;;  %v3415_v49 = vld [vmem:[%s3624_s7 + $0x64c] ss:$16 sps:$4 sm:$0xff]  }
  0xbd   : > { %2062 = vmatpush1.bf16.msra.mxu0 %v3320_v50  ;;  %2274 = vmatpush1.bf16.msra.mxu1 %v3323_v51  ;;  %v2736_v50 = vcombine.low %v327_v39, %v331_v40  ;;  %v3860_v51 = vld [vmem:[%s3626_s8 + $0x18] sm:$0xff]  ;;  %v3490_v40 = vld [vmem:[%s3624_s7 + $0x7e4] ss:$16 sps:$4 sm:$0xff]  }
  0xbe   : > { %2063 = vmatprep.subr.bf16.mxu0 %v3328_v52  ;;  %2275 = vmatprep.subr.bf16.mxu1 %v3331_v53  ;;  %v3863_v52 = vld [vmem:[%s3626_s8 + $0x38] sm:$0xff]  ;;  %v3410_v53 = vld [vmem:[%s3624_s7 + $0x640] ss:$16 sps:$4 sm:$0xff]  }
  0xbf   : > { %v3485_v39 = vld [vmem:[%s3624_s7 + $0x7c8] ss:$16 sps:$4 sm:$0xff]  }
  0xc1   : > { %2064 = vmatpush1.bf16.msra.mxu0 %v3326_v54  ;;  %2276 = vmatpush1.bf16.msra.mxu1 %v3329_v55  ;;  %v3413_v54 = vld [vmem:[%s3624_s7 + $0x648] ss:$16 sps:$4 sm:$0xff]   ;;  %v3418_v55 = vld [vmem:[%s3624_s7 + $0x664] ss:$16 sps:$4 sm:$0xff]  }
  0xc2   : > { %2065 = vmatprep.subr.bf16.mxu0 %v3334_v56  ;;  %2277 = vmatprep.subr.bf16.mxu1 %v3337_v57  ;;  %v3421_v56 = vld [vmem:[%s3624_s7 + $0x66c] ss:$16 sps:$4 sm:$0xff]   ;;  %v2731_v57 = vcombine.high %v3860_v51, %v3863_v52 }
  0xc5   : > { %2066 = vmatpush1.bf16.msra.mxu0 %v3332_v58  ;;  %2278 = vmatpush1.bf16.msra.mxu1 %v3335_v59  ;;  %v3416_v58 = vld [vmem:[%s3624_s7 + $0x660] ss:$16 sps:$4 sm:$0xff]   ;;  %v3419_v59 = vld [vmem:[%s3624_s7 + $0x668] ss:$16 sps:$4 sm:$0xff]  }
  0xc6   : > { %2067 = vmatprep.subr.bf16.mxu0 %v3340_v60  ;;  %2279 = vmatprep.subr.bf16.mxu1 %v3343_v61  ;;  %v3424_v60 = vld [vmem:[%s3624_s7 + $0x684] ss:$16 sps:$4 sm:$0xff]   ;;  %v3427_v61 = vld [vmem:[%s3624_s7 + $0x68c] ss:$16 sps:$4 sm:$0xff]  }
  0xc9   : > { %2068 = vmatpush1.bf16.msra.mxu0 %v3338_v62  ;;  %2280 = vmatpush1.bf16.msra.mxu1 %v3341_v63  ;;  %v3422_v62 = vld [vmem:[%s3624_s7 + $0x680] ss:$16 sps:$4 sm:$0xff]   ;;  %v3425_v63 = vld [vmem:[%s3624_s7 + $0x688] ss:$16 sps:$4 sm:$0xff]  }
  0xca   : > { %2069 = vmatprep.subr.bf16.mxu0 %v3346_v0  ;;  %2281 = vmatprep.subr.bf16.mxu1 %v3349_v1  ;;  %v3430_v0 = vld [vmem:[%s3624_s7 + $0x6a4] ss:$16 sps:$4 sm:$0xff]   ;;  %v3433_v1 = vld [vmem:[%s3624_s7 + $0x6ac] ss:$16 sps:$4 sm:$0xff]  }
  0xcd   : > { %2070 = vmatpush1.bf16.msra.mxu0 %v3344_v2  ;;  %2282 = vmatpush1.bf16.msra.mxu1 %v3347_v3  ;;  %v3428_v2 = vld [vmem:[%s3624_s7 + $0x6a0] ss:$16 sps:$4 sm:$0xff]   ;;  %v3431_v3 = vld [vmem:[%s3624_s7 + $0x6a8] ss:$16 sps:$4 sm:$0xff]  }
  0xce   : > { %2071 = vmatprep.subr.bf16.mxu0 %v3352_v4  ;;  %2283 = vmatprep.subr.bf16.mxu1 %v3355_v5  ;;  %v3436_v4 = vld [vmem:[%s3624_s7 + $0x6c4] ss:$16 sps:$4 sm:$0xff]   ;;  %v3439_v5 = vld [vmem:[%s3624_s7 + $0x6cc] ss:$16 sps:$4 sm:$0xff]  }
  0xd1   : > { %2072 = vmatpush1.bf16.msra.mxu0 %v3350_v6  ;;  %2284 = vmatpush1.bf16.msra.mxu1 %v3353_v7  ;;  %v3434_v6 = vld [vmem:[%s3624_s7 + $0x6c0] ss:$16 sps:$4 sm:$0xff]   ;;  %v3437_v7 = vld [vmem:[%s3624_s7 + $0x6c8] ss:$16 sps:$4 sm:$0xff]  }
  0xd2   : > { %2073 = vmatprep.subr.bf16.mxu0 %v3358_v8  ;;  %2285 = vmatprep.subr.bf16.mxu1 %v3361_v9  ;;  %v3442_v8 = vld [vmem:[%s3624_s7 + $0x6e4] ss:$16 sps:$4 sm:$0xff]   ;;  %v3445_v9 = vld [vmem:[%s3624_s7 + $0x6ec] ss:$16 sps:$4 sm:$0xff]  }
  0xd5   : > { %2074 = vmatpush1.bf16.msra.mxu0 %v3356_v10  ;;  %2286 = vmatpush1.bf16.msra.mxu1 %v3359_v11  ;;  %v3440_v10 = vld [vmem:[%s3624_s7 + $0x6e0] ss:$16 sps:$4 sm:$0xff]   ;;  %v3443_v11 = vld [vmem:[%s3624_s7 + $0x6e8] ss:$16 sps:$4 sm:$0xff]  }
  0xd6   : > { %2075 = vmatprep.subr.bf16.mxu0 %v3364_v12  ;;  %2287 = vmatprep.subr.bf16.mxu1 %v3367_v13  ;;  %v3448_v12 = vld [vmem:[%s3624_s7 + $0x704] ss:$16 sps:$4 sm:$0xff]   ;;  %v3451_v13 = vld [vmem:[%s3624_s7 + $0x70c] ss:$16 sps:$4 sm:$0xff]  }
  0xd9   : > { %2076 = vmatpush1.bf16.msra.mxu0 %v3362_v14  ;;  %2288 = vmatpush1.bf16.msra.mxu1 %v3365_v15  ;;  %v3446_v14 = vld [vmem:[%s3624_s7 + $0x700] ss:$16 sps:$4 sm:$0xff]   ;;  %v3449_v15 = vld [vmem:[%s3624_s7 + $0x708] ss:$16 sps:$4 sm:$0xff]  }
  0xda   : > { %2077 = vmatprep.subr.bf16.mxu0 %v3370_v16  ;;  %2289 = vmatprep.subr.bf16.mxu1 %v3373_v17  ;;  %v3454_v16 = vld [vmem:[%s3624_s7 + $0x724] ss:$16 sps:$4 sm:$0xff]   ;;  %v3457_v17 = vld [vmem:[%s3624_s7 + $0x72c] ss:$16 sps:$4 sm:$0xff]  }
  0xdd   : > { %2078 = vmatpush1.bf16.msra.mxu0 %v3368_v18  ;;  %2290 = vmatpush1.bf16.msra.mxu1 %v3371_v19  ;;  %v3452_v18 = vld [vmem:[%s3624_s7 + $0x720] ss:$16 sps:$4 sm:$0xff]   ;;  %v3455_v19 = vld [vmem:[%s3624_s7 + $0x728] ss:$16 sps:$4 sm:$0xff]  }
  0xde   : > { %2079 = vmatprep.subr.bf16.mxu0 %v3376_v20  ;;  %2291 = vmatprep.subr.bf16.mxu1 %v3379_v21  ;;  %v3460_v20 = vld [vmem:[%s3624_s7 + $0x744] ss:$16 sps:$4 sm:$0xff]   ;;  %v3463_v21 = vld [vmem:[%s3624_s7 + $0x74c] ss:$16 sps:$4 sm:$0xff]  }
  0xe1   : > { %2080 = vmatpush1.bf16.msra.mxu0 %v3374_v22  ;;  %2292 = vmatpush1.bf16.msra.mxu1 %v3377_v23  ;;  %v3458_v22 = vld [vmem:[%s3624_s7 + $0x740] ss:$16 sps:$4 sm:$0xff]   ;;  %v3461_v23 = vld [vmem:[%s3624_s7 + $0x748] ss:$16 sps:$4 sm:$0xff]  }
  0xe2   : > { %2081 = vmatprep.subr.bf16.mxu0 %v3382_v24  ;;  %2293 = vmatprep.subr.bf16.mxu1 %v3385_v25  ;;  %v3466_v24 = vld [vmem:[%s3624_s7 + $0x764] ss:$16 sps:$4 sm:$0xff]   ;;  %v3469_v25 = vld [vmem:[%s3624_s7 + $0x76c] ss:$16 sps:$4 sm:$0xff]  }
  0xe5   : > { %2082 = vmatpush1.bf16.msra.mxu0 %v3380_v26  ;;  %2294 = vmatpush1.bf16.msra.mxu1 %v3383_v27  ;;  %v3464_v26 = vld [vmem:[%s3624_s7 + $0x760] ss:$16 sps:$4 sm:$0xff]   ;;  %v3467_v27 = vld [vmem:[%s3624_s7 + $0x768] ss:$16 sps:$4 sm:$0xff]  }
  0xe6   : > { %2083 = vmatprep.subr.bf16.mxu0 %v3388_v28  ;;  %2295 = vmatprep.subr.bf16.mxu1 %v3391_v29  ;;  %v3472_v28 = vld [vmem:[%s3624_s7 + $0x784] ss:$16 sps:$4 sm:$0xff]   ;;  %v3475_v29 = vld [vmem:[%s3624_s7 + $0x78c] ss:$16 sps:$4 sm:$0xff]  }
  0xe9   : > { %2084 = vmatpush1.bf16.msra.mxu0 %v3386_v30  ;;  %2296 = vmatpush1.bf16.msra.mxu1 %v3389_v31  ;;  %v3470_v30 = vld [vmem:[%s3624_s7 + $0x780] ss:$16 sps:$4 sm:$0xff]   ;;  %v3473_v31 = vld [vmem:[%s3624_s7 + $0x788] ss:$16 sps:$4 sm:$0xff]  }
  0xea   : > { %2085 = vmatprep.subr.bf16.mxu0 %v3394_v32  ;;  %2297 = vmatprep.subr.bf16.mxu1 %v3397_v33  ;;  %v3478_v32 = vld [vmem:[%s3624_s7 + $0x7a4] ss:$16 sps:$4 sm:$0xff]   ;;  %v3481_v33 = vld [vmem:[%s3624_s7 + $0x7ac] ss:$16 sps:$4 sm:$0xff]  }
  0xed   : > { %2086 = vmatpush1.bf16.msra.mxu0 %v3392_v34  ;;  %2298 = vmatpush1.bf16.msra.mxu1 %v3395_v35  ;;  %v3476_v34 = vld [vmem:[%s3624_s7 + $0x7a0] ss:$16 sps:$4 sm:$0xff]   ;;  %v3479_v35 = vld [vmem:[%s3624_s7 + $0x7a8] ss:$16 sps:$4 sm:$0xff]  }
  0xee   : > { %2108 = vmatprep.subr.bf16.mxu0 %v3400_v36  ;;  %2320 = vmatprep.subr.bf16.mxu1 %v3403_v37  ;;  %v3484_v36 = vld [vmem:[%s3624_s7 + $0x7c4] ss:$16 sps:$4 sm:$0xff]   ;;  %v3487_v37 = vld [vmem:[%s3624_s7 + $0x7cc] ss:$16 sps:$4 sm:$0xff]  }
  0xf0   : > { %2088 = vmatmul.mubr.bf16.vlgmr.msra.gmra.mrb[0].mxu0 %v2728_v38  ;;  %2300 = vmatmul.mubr.bf16.vlgmr.msra.gmra.mrb[0].mxu1 %v2728_v38  ;;  %v3482_v38 = vld [vmem:[%s3624_s7 + $0x7c0] ss:$16 sps:$4 sm:$0xff]  }
  0xf1   : > { %2109 = vmatpush1.bf16.msra.mxu0 %v3398_v41  ;;  %2321 = vmatpush1.bf16.msra.mxu1 %v3401_v43  ;;  %v3493_v41 = vld [vmem:[%s3624_s7 + $0x7ec] ss:$16 sps:$4 sm:$0xff]   ;;  %v3488_v43 = vld [vmem:[%s3624_s7 + $0x7e0] ss:$16 sps:$4 sm:$0xff]  }
  0xf2   : > { %2110 = vmatprep.subr.bf16.mxu0 %v3406_v45  ;;  %2322 = vmatprep.subr.bf16.mxu1 %v3409_v46  ;;  %v3491_v45 = vld [vmem:[%s3624_s7 + $0x7e8] ss:$16 sps:$4 sm:$0xff]  }
  0xf3   : > { %2097 = vmatprep.mubr.bf16.mxu0 %v2737_v47  ;;  %2309 = vmatprep.mubr.bf16.mxu1 %v2737_v47  ;;  %v328_v46 = vld [vmem:[%s3626_s8 + $0x58] sm:$0xff] }
  0xf4   : > { %v332_v47 = vld [vmem:[%s3626_s8 + $0x78] sm:$0xff] }
  0xf5   : > { %2111 = vmatpush1.bf16.msra.mxu0 %v3404_v42  ;;  %2323 = vmatpush1.bf16.msra.mxu1 %v3407_v44  ;;  %v2730_v42 = vcombine.low %v3860_v51, %v3863_v52  ;;  %v2739_v44 = vcombine.high %v328_v46, %v332_v47 }
  0xf6   : > { %2112 = vmatprep.subr.bf16.mxu0 %v3412_v48  ;;  %2324 = vmatprep.subr.bf16.mxu1 %v3415_v49  ;;  %v2738_v48 = vcombine.low %v328_v46, %v332_v47  ;;  %v301_v49 = vld [vmem:[#allocation2] sm:$0xff] }
  0xf8   : > { %2098 = vmatmul.mubr.bf16.gmra.mrb[4].mxu0 %v2736_v50  ;;  %2310 = vmatmul.mubr.bf16.gmra.mrb[4].mxu1 %v2736_v50  ;;  %v303_v50 = vld [vmem:[#allocation2 + $0x10] sm:$0xff] }
  0xf9   : > { %2113 = vmatpush1.bf16.msra.mxu0 %v3410_v53  ;;  %2325 = vmatpush1.bf16.msra.mxu1 %v3413_v54  ;;  %v302_v53 = vld [vmem:[#allocation2 + $0x8] sm:$0xff]  ;;  %v304_v54 = vld [vmem:[#allocation2 + $0x18] sm:$0xff] }
  0xfa   : > { %2114 = vmatprep.subr.bf16.mxu0 %v3418_v55  ;;  %2326 = vmatprep.subr.bf16.mxu1 %v3421_v56 }
  0xfb   : > { %2140 = vmatprep.mubr.bf16.mxu0 %v2731_v57  ;;  %2352 = vmatprep.mubr.bf16.mxu1 %v2731_v57  ;;  %v305_v57 = vld [vmem:[#allocation2 + $0x20] sm:$0xff] }
  0xfd   : > { %2115 = vmatpush1.bf16.msra.mxu0 %v3416_v58  ;;  %2327 = vmatpush1.bf16.msra.mxu1 %v3419_v59  ;;  %v307_v58 = vld [vmem:[#allocation2 + $0x30] sm:$0xff] }
  0xfe   : > { %2116 = vmatprep.subr.bf16.mxu0 %v3424_v60  ;;  %2328 = vmatprep.subr.bf16.mxu1 %v3427_v61  ;;  %v306_v61 = vld [vmem:[#allocation2 + $0x28] sm:$0xff] }
 0x101   : > { %2117 = vmatpush1.bf16.msra.mxu0 %v3422_v62  ;;  %2329 = vmatpush1.bf16.msra.mxu1 %v3425_v63  ;;  %v308_v62 = vld [vmem:[#allocation2 + $0x38] sm:$0xff] }
 0x102   : > { %2118 = vmatprep.subr.bf16.mxu0 %v3430_v0  ;;  %2330 = vmatprep.subr.bf16.mxu1 %v3433_v1 }
 0x105   : > { %2119 = vmatpush1.bf16.msra.mxu0 %v3428_v2  ;;  %2331 = vmatpush1.bf16.msra.mxu1 %v3431_v3 }
 0x106   : > { %2120 = vmatprep.subr.bf16.mxu0 %v3436_v4  ;;  %2332 = vmatprep.subr.bf16.mxu1 %v3439_v5 }
 0x109   : > { %2121 = vmatpush1.bf16.msra.mxu0 %v3434_v6  ;;  %2333 = vmatpush1.bf16.msra.mxu1 %v3437_v7 }
 0x10a   : > { %2122 = vmatprep.subr.bf16.mxu0 %v3442_v8  ;;  %2334 = vmatprep.subr.bf16.mxu1 %v3445_v9  ;;  %v309_v9 = vld [vmem:[#allocation2 + $0x40] sm:$0xff] }
 0x10d   : > { %2123 = vmatpush1.bf16.msra.mxu0 %v3440_v10  ;;  %2335 = vmatpush1.bf16.msra.mxu1 %v3443_v11  ;;  %v311_v10 = vld [vmem:[#allocation2 + $0x50] sm:$0xff]  ;;  %v310_v11 = vld [vmem:[#allocation2 + $0x48] sm:$0xff] }
 0x10e   : > { %2124 = vmatprep.subr.bf16.mxu0 %v3448_v12  ;;  %2336 = vmatprep.subr.bf16.mxu1 %v3451_v13  ;;  %v312_v12 = vld [vmem:[#allocation2 + $0x58] sm:$0xff] }
 0x111   : > { %2125 = vmatpush1.bf16.msra.mxu0 %v3446_v14  ;;  %2337 = vmatpush1.bf16.msra.mxu1 %v3449_v15  ;;  %v313_v15 = vld [vmem:[#allocation2 + $0x60] sm:$0xff] }
 0x112   : > { %2126 = vmatprep.subr.bf16.mxu0 %v3454_v16  ;;  %2338 = vmatprep.subr.bf16.mxu1 %v3457_v17  ;;  %v315_v16 = vld [vmem:[#allocation2 + $0x70] sm:$0xff] }
 0x115   : > { %2127 = vmatpush1.bf16.msra.mxu0 %v3452_v18  ;;  %2339 = vmatpush1.bf16.msra.mxu1 %v3455_v19 }
 0x116   : > { %2128 = vmatprep.subr.bf16.mxu0 %v3460_v20  ;;  %2340 = vmatprep.subr.bf16.mxu1 %v3463_v21  ;;  %v314_v21 = vld [vmem:[#allocation2 + $0x68] sm:$0xff] }
 0x119   : > { %2129 = vmatpush1.bf16.msra.mxu0 %v3458_v22  ;;  %2341 = vmatpush1.bf16.msra.mxu1 %v3461_v23  ;;  %v316_v22 = vld [vmem:[#allocation2 + $0x78] sm:$0xff] }
 0x11a   : > { %2130 = vmatprep.subr.bf16.mxu0 %v3466_v24  ;;  %2342 = vmatprep.subr.bf16.mxu1 %v3469_v25 }
 0x11d   : > { %2131 = vmatpush1.bf16.msra.mxu0 %v3464_v26  ;;  %2343 = vmatpush1.bf16.msra.mxu1 %v3467_v27 }
 0x11e   : > { %2132 = vmatprep.subr.bf16.mxu0 %v3472_v28  ;;  %2344 = vmatprep.subr.bf16.mxu1 %v3475_v29 }
 0x121   : > { %2133 = vmatpush1.bf16.msra.mxu0 %v3470_v30  ;;  %2345 = vmatpush1.bf16.msra.mxu1 %v3473_v31 }
 0x122   : > { %2134 = vmatprep.subr.bf16.mxu0 %v3478_v32  ;;  %2346 = vmatprep.subr.bf16.mxu1 %v3481_v33 }
 0x125   : > { %2135 = vmatpush1.bf16.msra.mxu0 %v3476_v34  ;;  %2347 = vmatpush1.bf16.msra.mxu1 %v3479_v35 }
 0x126   : > { %2136 = vmatprep.subr.bf16.mxu0 %v3484_v36  ;;  %2348 = vmatprep.subr.bf16.mxu1 %v3487_v37 }
 0x129   : > { %2137 = vmatpush1.bf16.msra.mxu0 %v3482_v38  ;;  %2349 = vmatpush1.bf16.msra.mxu1 %v3485_v39 }
 0x12a   : > { %2138 = vmatprep.subr.bf16.mxu0 %v3490_v40  ;;  %2350 = vmatprep.subr.bf16.mxu1 %v3493_v41 }
 0x12d   : > { %2139 = vmatpush1.bf16.msra.mxu0 %v3488_v43  ;;  %2351 = vmatpush1.bf16.msra.mxu1 %v3491_v45  ;;  %v3535_v43 = vmov (!%p2996_p11), 1983009808  }
 0x12e   : > { %v3944_v45 = vunpack.c.l.s4 (!%p2996_p11), %v3535_v43 }
 0x130   : > { %2141 = vmatmul.mubr.bf16.vlgmr.msra.gmra.mrb[0].mxu0 %v2730_v42  ;;  %2353 = vmatmul.mubr.bf16.vlgmr.msra.gmra.mrb[0].mxu1 %v2730_v42 }
 0x131   : > { %2150 = vmatprep.mubr.bf16.mxu0 %v2739_v44  ;;  %2362 = vmatprep.mubr.bf16.mxu1 %v2739_v44 }
 0x138   : > { %2151 = vmatmul.mubr.bf16.gmra.mrb[4].mxu0 %v2738_v48  ;;  %2363 = vmatmul.mubr.bf16.gmra.mrb[4].mxu1 %v2738_v48 }
 0x203   : > { %v2142_v55 = vpop.f32.mrb[0].mxu0  ;;  %v2354_v56 = vpop.f32.mrb[0].mxu1 }
 0x204   : > { %v2373_v59 = vadd.f32 %v2142_v55, %v301_v49  ;;  %v2375_v51 = vadd.f32 %v2354_v56, %v303_v50  ;;  %v2144_v52 = vpop.f32.mrb[1].mxu0  ;;  %v2356_v60 = vpop.f32.mrb[1].mxu1 }
 0x205   : > { %v2374_v63 = vadd.f32 %v2144_v52, %v302_v53  ;;  %v2376_v0 = vadd.f32 %v2356_v60, %v304_v54  ;;  %v2146_v1 = vpop.f32.mrb[2].mxu0  ;;  %v2358_v2 = vpop.f32.mrb[2].mxu1 }
 0x206   : > { %2389 = vst [vmem:[#allocation2] sm:$0xff] %v2373_v59  ;;  %2391 = vst [vmem:[#allocation2 + $0x10] sm:$0xff] %v2375_v51  ;;  %v2377_v3 = vadd.f32 %v2146_v1, %v305_v57  ;;  %v2379_v4 = vadd.f32 %v2358_v2, %v307_v58  ;;  %v2148_v5 = vpop.f32.mrb[3].mxu0  ;;  %v2360_v6 = vpop.f32.mrb[3].mxu1 }
 0x207   : > { %2390 = vst [vmem:[#allocation2 + $0x8] sm:$0xff] %v2374_v63  ;;  %2392 = vst [vmem:[#allocation2 + $0x18] sm:$0xff] %v2376_v0  ;;  %v2378_v7 = vadd.f32 %v2148_v5, %v306_v61  ;;  %v2380_v8 = vadd.f32 %v2360_v6, %v308_v62 }
 0x208   : > { %2393 = vst [vmem:[#allocation2 + $0x20] sm:$0xff] %v2377_v3  ;;  %2395 = vst [vmem:[#allocation2 + $0x30] sm:$0xff] %v2379_v4 }
 0x209   : > { %2394 = vst [vmem:[#allocation2 + $0x28] sm:$0xff] %v2378_v7  ;;  %2396 = vst [vmem:[#allocation2 + $0x38] sm:$0xff] %v2380_v8 }
 0x20b   : > { %v2152_v13 = vpop.f32.mrb[4].mxu0  ;;  %v2364_v14 = vpop.f32.mrb[4].mxu1  ;;  %2408 = sbr.rel (%p2996_p11) target bundleno = 565 (0x235), region = 59 }
 0x20c   : > { %v2381_v17 = vadd.f32 %v2152_v13, %v309_v9  ;;  %v2383_v18 = vadd.f32 %v2364_v14, %v311_v10  ;;  %v2154_v19 = vpop.f32.mrb[5].mxu0  ;;  %v2366_v20 = vpop.f32.mrb[5].mxu1 }
 0x20d   : > { %v2382_v23 = vadd.f32 %v2154_v19, %v310_v11  ;;  %v2384_v24 = vadd.f32 %v2366_v20, %v312_v12  ;;  %v2156_v25 = vpop.f32.mrb[6].mxu0  ;;  %v2368_v26 = vpop.f32.mrb[6].mxu1  ;;  %v3926_v33 = vld [vmem:[#allocation2] sm:$0xff] (!%p2996_p11)  ;;  %v3930_v35 = vld [vmem:[#allocation2 + $0x10] sm:$0xff] (!%p2996_p11) }
 0x20e   : > { %2397 = vst [vmem:[#allocation2 + $0x40] sm:$0xff] %v2381_v17  ;;  %2399 = vst [vmem:[#allocation2 + $0x50] sm:$0xff] %v2383_v18  ;;  %v2385_v27 = vadd.f32 %v2156_v25, %v313_v15  ;;  %v2387_v28 = vadd.f32 %v2368_v26, %v315_v16  ;;  %v2158_v29 = vpop.f32.mrb[7].mxu0  ;;  %v2370_v30 = vpop.f32.mrb[7].mxu1  ;;  %v3928_v34 = vld [vmem:[#allocation2 + $0x8] sm:$0xff] (!%p2996_p11)  ;;  %v3932_v36 = vld [vmem:[#allocation2 + $0x18] sm:$0xff] (!%p2996_p11)  ;;  %v2461_v39 = vmul.f32 (!%p2996_p11), %v3926_v33, %v3926_v33 }
 0x20f   : > { %2398 = vst [vmem:[#allocation2 + $0x48] sm:$0xff] %v2382_v23  ;;  %2400 = vst [vmem:[#allocation2 + $0x58] sm:$0xff] %v2384_v24  ;;  %v2386_v31 = vadd.f32 %v2158_v29, %v314_v21  ;;  %v2388_v32 = vadd.f32 %v2370_v30, %v316_v22  ;;  %v3934_v37 = vld [vmem:[#allocation2 + $0x20] sm:$0xff] (!%p2996_p11)  ;;  %v2462_v40 = vmul.f32 (!%p2996_p11), %v3928_v34, %v3928_v34  ;;  %v3946_v46 = vld [vmem:[#allocation2 + $0x30] sm:$0xff] (!%p2996_p11) }
 0x210   : > { %2401 = vst [vmem:[#allocation2 + $0x60] sm:$0xff] %v2385_v27  ;;  %2403 = vst [vmem:[#allocation2 + $0x70] sm:$0xff] %v2387_v28  ;;  %v3936_v38 = vld [vmem:[#allocation2 + $0x28] sm:$0xff] (!%p2996_p11)  ;;  %v2463_v41 = vmul.f32 (!%p2996_p11), %v3930_v35, %v3930_v35  ;;  %v3948_v47 = vld [vmem:[#allocation2 + $0x38] sm:$0xff] (!%p2996_p11)  ;;  %v2425_v44 = vadd.f32 (!%p2996_p11), %v3934_v37, %v3926_v33  ;;  %v2464_v49 = vmul.f32 (!%p2996_p11), %v3932_v36, %v3932_v36 }
 0x211   : > { %2402 = vst [vmem:[#allocation2 + $0x68] sm:$0xff] %v2386_v31  ;;  %2404 = vst [vmem:[#allocation2 + $0x78] sm:$0xff] %v2388_v32  ;;  %v2434_v48 = vadd.f32 (!%p2996_p11), %v3936_v38, %v3928_v34  ;;  %v2465_v50 = vmul.f32 (!%p2996_p11), %v3934_v37, %v3934_v37  ;;  %v2443_v56 = vadd.f32 (!%p2996_p11), %v3946_v46, %v3930_v35 }
 0x212   : > { %v2452_v57 = vadd.f32 %v3948_v47, %v3932_v36  ;;  %v2466_v58 = vmul.f32 %v3936_v38, %v3936_v38  ;;  %v2467_v59 = vmul.f32 %v3946_v46, %v3946_v46  ;;  %v2468_v63 = vmul.f32 %v3948_v47, %v3948_v47 }
 0x213   : > { %v2477_v17 = vadd.f32 %v2465_v50, %v2461_v39 }
 0x214   : > { %v2486_v20 = vadd.f32 %v2466_v58, %v2462_v40  ;;  %v2495_v21 = vadd.f32 %v2467_v59, %v2463_v41  ;;  %v2504_v25 = vadd.f32 %v2468_v63, %v2464_v49 }
 0x215   : > { %v3950_v42 = vld [vmem:[#allocation2 + $0x40] sm:$0xff]  ;;  %v3962_v54 = vld [vmem:[#allocation2 + $0x50] sm:$0xff] }
 0x216   : > { %v3960_v53 = vld [vmem:[#allocation2 + $0x48] sm:$0xff]  ;;  %v3964_v55 = vld [vmem:[#allocation2 + $0x58] sm:$0xff]  ;;  %v2426_v61 = vadd.f32 %v2425_v44, %v3950_v42  ;;  %v2469_v0 = vmul.f32 %v3950_v42, %v3950_v42  ;;  %v2444_v2 = vadd.f32 %v2443_v56, %v3962_v54  ;;  %v2471_v5 = vmul.f32 %v3962_v54, %v3962_v54 }
 0x217   : > { %v3974_v51 = vld [vmem:[#allocation2 + $0x60] sm:$0xff]  ;;  %v3978_v60 = vld [vmem:[#allocation2 + $0x70] sm:$0xff]  ;;  %v2435_v62 = vadd.f32 %v2434_v48, %v3960_v53  ;;  %v2453_v3 = vadd.f32 %v2452_v57, %v3964_v55  ;;  %v2470_v4 = vmul.f32 %v3960_v53, %v3960_v53  ;;  %v2472_v8 = vmul.f32 %v3964_v55, %v3964_v55 }
 0x218   : > { %v3976_v52 = vld [vmem:[#allocation2 + $0x68] sm:$0xff]  ;;  %v3986_v1 = vld [vmem:[#allocation2 + $0x78] sm:$0xff]  ;;  %v2427_v6 = vadd.f32 %v2426_v61, %v3974_v51  ;;  %v2473_v9 = vmul.f32 %v3974_v51, %v3974_v51  ;;  %v2445_v10 = vadd.f32 %v2444_v2, %v3978_v60  ;;  %v2475_v13 = vmul.f32 %v3978_v60, %v3978_v60 }
 0x219   : > { %v2436_v7 = vadd.f32 %v2435_v62, %v3976_v52  ;;  %v2454_v11 = vadd.f32 %v2453_v3, %v3986_v1  ;;  %v2474_v12 = vmul.f32 %v3976_v52, %v3976_v52  ;;  %v2476_v16 = vmul.f32 %v3986_v1, %v3986_v1 }
 0x21a   : > { %v2428_v14 = vrot.slane %v2427_v6, 4  ;;  %v2446_v18 = vrot.slane %v2445_v10, 4  ;;  %v2478_v24 = vadd.f32 %v2477_v17, %v2469_v0  ;;  %v2487_v28 = vadd.f32 %v2486_v20, %v2470_v4 }
 0x21b   : > { %v2437_v15 = vrot.slane %v2436_v7, 4  ;;  %v2455_v19 = vrot.slane %v2454_v11, 4  ;;  %v2496_v29 = vadd.f32 %v2495_v21, %v2471_v5  ;;  %v2505_v43 = vadd.f32 %v2504_v25, %v2472_v8 }
 0x21c   : > { %v2429_v22 = vadd.f32 %v2428_v14, %v2427_v6  ;;  %v2447_v26 = vadd.f32 %v2446_v18, %v2445_v10  ;;  %v2479_v32 = vadd.f32 %v2478_v24, %v2473_v9  ;;  %v2488_v56 = vadd.f32 %v2487_v28, %v2474_v12 }
 0x21d   : > { %v2438_v23 = vadd.f32 %v2437_v15, %v2436_v7  ;;  %v2456_v27 = vadd.f32 %v2455_v19, %v2454_v11  ;;  %v2497_v39 = vadd.f32 %v2496_v29, %v2475_v13  ;;  %v2506_v41 = vadd.f32 %v2505_v43, %v2476_v16 }
 0x21e   : > { %v2430_v30 = vrot.slane %v2429_v22, 2  ;;  %v2448_v44 = vrot.slane %v2447_v26, 2  ;;  %v2480_v40 = vrot.slane %v2479_v32, 4  ;;  %v2489_v61 = vrot.slane %v2488_v56, 4 }
 0x21f   : > { %v2439_v31 = vrot.slane %v2438_v23, 2  ;;  %v2457_v48 = vrot.slane %v2456_v27, 2  ;;  %v2498_v49 = vrot.slane %v2497_v39, 4  ;;  %v2507_v2 = vrot.slane %v2506_v41, 4 }
 0x220   : > { %v2431_v50 = vadd.f32 %v2430_v30, %v2429_v22  ;;  %v2449_v58 = vadd.f32 %v2448_v44, %v2447_v26  ;;  %v2481_v0 = vadd.f32 %v2480_v40, %v2479_v32  ;;  %v2490_v5 = vadd.f32 %v2489_v61, %v2488_v56 }
 0x221   : > { %v2440_v57 = vadd.f32 %v2439_v31, %v2438_v23  ;;  %v2458_v59 = vadd.f32 %v2457_v48, %v2456_v27  ;;  %v2499_v6 = vadd.f32 %v2498_v49, %v2497_v39  ;;  %v2508_v9 = vadd.f32 %v2507_v2, %v2506_v41 }
 0x222   : > { %v2432_v62 = vrot.slane %v2431_v50, 1  ;;  %v2450_v3 = vrot.slane %v2449_v58, 1  ;;  %v2482_v8 = vrot.slane %v2481_v0, 2  ;;  %v2527_v10 = vlaneseq }
 0x223   : > { %v2441_v63 = vrot.slane %v2440_v57, 1  ;;  %v2459_v4 = vrot.slane %v2458_v59, 1  ;;  %v2491_v13 = vrot.slane %v2490_v5, 2  ;;  %v2500_v14 = vrot.slane %v2499_v6, 2 }
 0x224   : > { %v2433_v7 = vadd.f32 %v2432_v62, %v2431_v50  ;;  %v2451_v12 = vadd.f32 %v2450_v3, %v2449_v58  ;;  %v2483_v16 = vadd.f32 %v2482_v8, %v2481_v0  ;;  %v2509_v17 = vrot.slane %v2508_v9, 2 }
 0x225   : > { %v2442_v11 = vadd.f32 %v2441_v63, %v2440_v57  ;;  %v2460_v15 = vadd.f32 %v2459_v4, %v2458_v59  ;;  %v2526_v18 = vunpack.c.0.s8 %v3944_v45  ;;  %v2492_v19 = vadd.f32 %v2491_v13, %v2490_v5 }
 0x226   : > { %v2501_v20 = vadd.f32 %v2500_v14, %v2499_v6  ;;  %v3012_v21 = vpack.c.bf16 %v3928_v34, %v3926_v33  ;;  %v3013_v22 = vpack.c.bf16 %v3932_v36, %v3930_v35  ;;  %v2484_v23 = vrot.slane %v2483_v16, 1 }
 0x227   : > { %v2510_v24 = vadd.f32 %v2509_v17, %v2508_v9  ;;  %v2528_v25 = vshrl.u32 %v2527_v10, 7  ;;  %v3014_v26 = vpack.c.bf16 %v3936_v38, %v3934_v37  ;;  %v2493_v27 = vrot.slane %v2492_v19, 1 }
 0x228   : > { %v2502_v28 = vrot.slane %v2501_v20, 1  ;;  %2589 = vst [vmem:[%s4073_s2] sm:$0xff] %v3012_v21  ;;  %2590 = vst [vmem:[%s4073_s2 + $0x8] sm:$0xff] %v3013_v22  ;;  %v3015_v33 = vpack.c.bf16 %v3948_v47, %v3946_v46  ;;  %v3016_v34 = vpack.c.bf16 %v3960_v53, %v3950_v42  ;;  %v2485_v35 = vadd.f32 %v2484_v23, %v2483_v16 }
 0x229   : > { %v2511_v36 = vrot.slane %v2510_v24, 1  ;;  %2591 = vst [vmem:[%s4073_s2 + $0x10] sm:$0xff] %v3014_v26  ;;  %v3017_v37 = vpack.c.bf16 %v3964_v55, %v3962_v54  ;;  %v3018_v38 = vpack.c.bf16 %v3976_v52, %v3974_v51  ;;  %v2494_v45 = vadd.f32 %v2493_v27, %v2492_v19 }
 0x22a   : > { %v2503_v29 = vadd.f32 %v2502_v28, %v2501_v20  ;;  %2592 = vst [vmem:[%s4073_s2 + $0x18] sm:$0xff] %v3015_v33  ;;  %2593 = vst [vmem:[%s4073_s2 + $0x20] sm:$0xff] %v3016_v34  ;;  %v3019_v46 = vpack.c.bf16 %v3986_v1, %v3978_v60  ;;  %v2514_v42 = vsel %vm2513_vm0, %v2433_v7, %v2485_v35 }
 0x22b   : > { %v2512_v47 = vadd.f32 %v2511_v36, %v2510_v24  ;;  %v2529_v53 = vsub.s32 %v2526_v18, %v2528_v25  ;;  %2594 = vst [vmem:[%s4073_s2 + $0x28] sm:$0xff] %v3017_v37  ;;  %2595 = vst [vmem:[%s4073_s2 + $0x30] sm:$0xff] %v3018_v38  ;;  %v2515_v54 = vsel %vm2513_vm0, %v2442_v11, %v2494_v45 }
 0x22c   : > { %v2516_v55 = vsel %vm2513_vm0, %v2451_v12, %v2503_v29  ;;  %2596 = vst [vmem:[%s4073_s2 + $0x38] sm:$0xff] %v3019_v46  ;;  %v2522_v52 = vcombine.low %v2514_v42, %v2515_v54 }
 0x22d   : > { %v2517_v51 = vsel %vm2513_vm0, %v2460_v15, %v2512_v47 }
 0x22e   : > { %v2523_v60 = vcombine.low %v2516_v55, %v2517_v51  ;;  %v2530_v1 = vrot.slane %v2522_v52, %v2529_v53 }
 0x230   : > { %v2537_v30 = vrot.slane %v2523_v60, %v2529_v53 }
 0x232   : > { %v2538_v31 = vcombine.low %v2530_v1, %v2537_v30 }
 0x234   : > { %2540 = vst [vmem:[%s4074_s3] sm:$0xff] %v2538_v31 }
 0x235 PF: > { %s14_s16 = sadd.s32 1, %s3532_s16   ;;  %s4075_s12 = smov %s3520_s13 }
 0x236   : > { %p11_p12 = scmp.ge.s32.totalorder %s14_s16, 6   ;;  %s4076_s13 = smov %s3591_s20 }
 0x237   : > { %s4077_s14 = smov %s3528_s15  ;;  %s4078_s15 = smov %s4080_s17 }
 0x238   :  { %13 = sbr.rel (!%p11_p12) target bundleno = 3 (0x3), region = 109 }

// kernel: netD_forward.9
= control target key start
LH: loop header
LB: loop body
LE: loop exit
PB: predicated region body
PF: predicated region fallthrough
CT: control target
= control target key end

     0   :  { %v75_v0 = vlaneseq  ;;  %v1521_v10 = vmov 1983009808   ;;  %vm1371_vm0 = vcmask 1041408   ;;  %vm1510_vm2 = vcmask 1024   ;;  %s2502_s1 = inlined_call_operand.vmem [shape: bf16[1,8192], index: 1, kind: input, shape index: {}]   ;;  %s2503_s0 = inlined_call_operand.vmem [shape: bf16[2,8192], index: 0, kind: input, shape index: {}]   ;;  %s2504_s2 = inlined_call_operand.vmem [shape: f32[2,1], index: 2, kind: output, shape index: {}]  }
   0x1   :  { %v39_v1 = vld [vmem:[%s2502_s1 + $0x20] sm:$0xff]  ;;  %v40_v2 = vld [vmem:[%s2502_s1 + $0x28] sm:$0xff]  ;;  %v41_v4 = vld [vmem:[%s2502_s1 + $0x30] sm:$0xff]  ;;  %v1559_v11 = vunpack.c.l.s4 %v1521_v10 }
   0x2   :  { %v1543_v3 = vshrl.u32 %v75_v0, 7  ;;  %v42_v5 = vld [vmem:[%s2502_s1 + $0x38] sm:$0xff]  ;;  %v1551_v6 = vunpack.c.l.bf16 %v39_v1  ;;  %v1553_v7 = vunpack.c.h.bf16 %v39_v1  ;;  %v1555_v8 = vunpack.c.l.bf16 %v40_v2  ;;  %v1640_v48 = vld [vmem:[%s2503_s0] sm:$0xff]  ;;  %v1645_v49 = vld [vmem:[%s2503_s0 + $0x8] sm:$0xff] }
   0x3   :  { %v1557_v9 = vunpack.c.h.bf16 %v40_v2  ;;  %v1573_v16 = vunpack.c.l.bf16 %v41_v4  ;;  %v1575_v17 = vunpack.c.h.bf16 %v41_v4  ;;  %v1577_v18 = vunpack.c.l.bf16 %v42_v5  ;;  %2525 = vst [vmem:[#allocation4_spill] sm:$0xff] %v1640_v48  ;;  %2526 = vst [vmem:[#allocation5_spill] sm:$0xff] %v1645_v49  ;;  %v1658_v54 = vld [vmem:[%s2503_s0 + $0x20] sm:$0xff]  ;;  %v1666_v56 = vld [vmem:[%s2503_s0 + $0x28] sm:$0xff] }
   0x4   :  { %v1562_v12 = vsub.s32 0, %v1543_v3  ;;  %v1565_v13 = vsub.s32 2, %v1543_v3  ;;  %v1568_v14 = vsub.s32 4, %v1543_v3  ;;  %v1571_v15 = vsub.s32 6, %v1543_v3  ;;  %v35_v55 = vld [vmem:[%s2502_s1] sm:$0xff]  ;;  %v1671_v57 = vld [vmem:[%s2503_s0 + $0x30] sm:$0xff] }
   0x5   :  { %v1579_v19 = vunpack.c.h.bf16 %v42_v5  ;;  %2527 = vst [vmem:[#allocation6_spill] sm:$0xff] %v1671_v57  ;;  %v1676_v58 = vld [vmem:[%s2503_s0 + $0x38] sm:$0xff]  ;;  %v36_v0 = vld [vmem:[%s2502_s1 + $0x8] sm:$0xff]  ;;  %v37_v1 = vld [vmem:[%s2502_s1 + $0x10] sm:$0xff]  ;;  %v1689_v2 = vunpack.c.l.bf16 %v35_v55  ;;  %v719_v4 = vunpack.c.0.s8 %v1559_v11  ;;  %v1704_v11 = vunpack.c.h.bf16 %v35_v55 }
   0x6   :  { %2523 = vst [vmem:[#allocation2_spill] sm:$0xff] %v1565_v13  ;;  %2524 = vst [vmem:[#allocation3_spill] sm:$0xff] %v1568_v14  ;;  %v206_v20 = vrot.slane %v1551_v6, %v1562_v12  ;;  %v210_v21 = vrot.slane %v1551_v6, %v1565_v13  ;;  %v214_v22 = vrot.slane %v1551_v6, %v1568_v14  ;;  %v1699_v60 = vld [vmem:[%s2502_s1 + $0x18] sm:$0xff]  ;;  %v1706_v5 = vunpack.c.l.bf16 %v36_v0 }
   0x7   :  { %v218_v23 = vrot.slane %v1551_v6, %v1571_v15  ;;  %v222_v24 = vrot.slane %v1553_v7, %v1562_v12  ;;  %v226_v25 = vrot.slane %v1553_v7, %v1565_v13  ;;  %v230_v26 = vrot.slane %v1553_v7, %v1568_v14  ;;  %2528 = vst [vmem:[#allocation7_spill] sm:$0xff] %v1676_v58 }
   0x8   :  { %v234_v27 = vrot.slane %v1553_v7, %v1571_v15  ;;  %v238_v28 = vrot.slane %v1555_v8, %v1562_v12  ;;  %v242_v29 = vrot.slane %v1555_v8, %v1565_v13  ;;  %v246_v30 = vrot.slane %v1555_v8, %v1568_v14  ;;  %2529 = vst [vmem:[#allocation8_spill] sm:$0xff] %v1699_v60 }
   0x9   :  { %v250_v31 = vrot.slane %v1555_v8, %v1571_v15  ;;  %v254_v32 = vrot.slane %v1557_v9, %v1562_v12  ;;  %v258_v33 = vrot.slane %v1557_v9, %v1565_v13  ;;  %v262_v34 = vrot.slane %v1557_v9, %v1568_v14 }
   0xa   :  { %v266_v35 = vrot.slane %v1557_v9, %v1571_v15  ;;  %v270_v36 = vrot.slane %v1573_v16, %v1562_v12  ;;  %v274_v37 = vrot.slane %v1573_v16, %v1565_v13  ;;  %v278_v38 = vrot.slane %v1573_v16, %v1568_v14 }
   0xb   :  { %v282_v39 = vrot.slane %v1573_v16, %v1571_v15  ;;  %v286_v40 = vrot.slane %v1575_v17, %v1562_v12  ;;  %v290_v41 = vrot.slane %v1575_v17, %v1565_v13  ;;  %v294_v42 = vrot.slane %v1575_v17, %v1568_v14 }
   0xc   :  { %v298_v43 = vrot.slane %v1575_v17, %v1571_v15  ;;  %v302_v44 = vrot.slane %v1577_v18, %v1562_v12  ;;  %v306_v45 = vrot.slane %v1577_v18, %v1565_v13  ;;  %v310_v46 = vrot.slane %v1577_v18, %v1568_v14 }
   0xd   :  { %v314_v47 = vrot.slane %v1577_v18, %v1571_v15  ;;  %v318_v50 = vrot.slane %v1579_v19, %v1562_v12  ;;  %v322_v51 = vrot.slane %v1579_v19, %v1565_v13  ;;  %v1708_v10 = vunpack.c.h.bf16 %v36_v0 }
   0xe   :  { %v1710_v62 = vunpack.c.l.bf16 %v37_v1  ;;  %v1712_v61 = vunpack.c.h.bf16 %v37_v1  ;;  %v1715_v52 = vunpack.c.l.bf16 %v1699_v60  ;;  %v78_v59 = vrot.slane %v1689_v2, %v1562_v12 }
   0xf   :  { %v82_v63 = vrot.slane %v1689_v2, %v1565_v13  ;;  %v1722_v55 = vsub.s32 %v719_v4, %v1543_v3  ;;  %v1728_v0 = vrot.slane %v206_v20, %v1562_v12  ;;  %v1734_v1 = vrot.slane %v210_v21, %v1562_v12 }
  0x10   :  { %2530 = vst [vmem:[#allocation9_spill] sm:$0xff] %v1712_v61  ;;  %2531 = vst [vmem:[#allocation10_spill] sm:$0xff] %v1715_v52  ;;  %v1740_v53 = vrot.slane %v214_v22, %v1562_v12  ;;  %v1746_v3 = vrot.slane %v218_v23, %v1562_v12  ;;  %v1752_v20 = vrot.slane %v222_v24, %v1562_v12 }
  0x11   :  { %2532 = vst [vmem:[#allocation11_spill] sm:$0xff] %v1722_v55  ;;  %v1758_v21 = vrot.slane %v226_v25, %v1562_v12  ;;  %v1764_v22 = vrot.slane %v230_v26, %v1562_v12  ;;  %v1770_v6 = vrot.slane %v234_v27, %v1562_v12  ;;  %v1776_v23 = vrot.slane %v238_v28, %v1562_v12 }
  0x12   :  { %v1782_v24 = vrot.slane %v242_v29, %v1562_v12  ;;  %v1788_v25 = vrot.slane %v246_v30, %v1562_v12  ;;  %v1794_v7 = vrot.slane %v250_v31, %v1562_v12  ;;  %v1800_v26 = vrot.slane %v254_v32, %v1562_v12 }
  0x13   :  { %v1806_v27 = vrot.slane %v258_v33, %v1562_v12  ;;  %v1812_v28 = vrot.slane %v262_v34, %v1562_v12  ;;  %v1818_v8 = vrot.slane %v266_v35, %v1562_v12  ;;  %v1824_v29 = vrot.slane %v270_v36, %v1562_v12 }
  0x14   :  { %v1830_v30 = vrot.slane %v274_v37, %v1562_v12  ;;  %v1836_v31 = vrot.slane %v278_v38, %v1562_v12  ;;  %v1842_v9 = vrot.slane %v282_v39, %v1562_v12  ;;  %v1848_v32 = vrot.slane %v286_v40, %v1562_v12 }
  0x15   :  { %v1854_v33 = vrot.slane %v290_v41, %v1562_v12  ;;  %v1860_v34 = vrot.slane %v294_v42, %v1562_v12  ;;  %v1866_v16 = vrot.slane %v298_v43, %v1562_v12  ;;  %v1872_v35 = vrot.slane %v302_v44, %v1562_v12 }
  0x16   :  { %v1878_v36 = vrot.slane %v306_v45, %v1562_v12  ;;  %v1884_v37 = vrot.slane %v310_v46, %v1562_v12  ;;  %v1890_v17 = vrot.slane %v314_v47, %v1562_v12  ;;  %v1896_v38 = vrot.slane %v318_v50, %v1562_v12 }
  0x17   :  { %v1902_v39 = vrot.slane %v322_v51, %v1562_v12  ;;  %v2533_v40 = vrot.slane %v1579_v19, %v1568_v14  ;;  %v2534_v18 = vrot.slane %v1579_v19, %v1571_v15  ;;  %v86_v43 = vrot.slane %v1689_v2, %v1568_v14 }
  0x18   :  { %v90_v44 = vrot.slane %v1689_v2, %v1571_v15  ;;  %v94_v45 = vrot.slane %v1704_v11, %v1562_v12  ;;  %v98_v46 = vrot.slane %v1704_v11, %v1565_v13  ;;  %v102_v47 = vrot.slane %v1704_v11, %v1568_v14 }
  0x19   :  { %v1908_v41 = vrot.slane %v2533_v40, %v1562_v12  ;;  %v1914_v42 = vrot.slane %v2534_v18, %v1562_v12  ;;  %v106_v19 = vrot.slane %v1704_v11, %v1571_v15  ;;  %v110_v50 = vrot.slane %v1706_v5, %v1562_v12 }
  0x1a   :  { %v114_v51 = vrot.slane %v1706_v5, %v1565_v13  ;;  %v118_v2 = vrot.slane %v1706_v5, %v1568_v14  ;;  %v122_v4 = vrot.slane %v1706_v5, %v1571_v15  ;;  %v126_v40 = vrot.slane %v1708_v10, %v1562_v12 }
  0x1b   :  { %v130_v18 = vrot.slane %v1708_v10, %v1565_v13  ;;  %v134_v11 = vrot.slane %v1708_v10, %v1568_v14  ;;  %v138_v49 = vrot.slane %v1708_v10, %v1571_v15  ;;  %v142_v48 = vrot.slane %v1710_v62, %v1562_v12 }
  0x1c   :  { %v146_v60 = vrot.slane %v1710_v62, %v1565_v13  ;;  %v150_v5 = vrot.slane %v1710_v62, %v1568_v14  ;;  %v154_v52 = vrot.slane %v1710_v62, %v1571_v15  ;;  %v1953_v61 = vrot.slane %v78_v59, %v1562_v12 }
  0x1d   :  { %v1956_v58 = vrot.slane %v82_v63, %v1562_v12  ;;  %v1959_v10 = vrot.slane %v86_v43, %v1562_v12  ;;  %v1962_v57 = vrot.slane %v90_v44, %v1562_v12  ;;  %v1965_v13 = vrot.slane %v94_v45, %v1562_v12 }
  0x1e   :  { %v1968_v14 = vrot.slane %v98_v46, %v1562_v12  ;;  %v1971_v62 = vrot.slane %v102_v47, %v1562_v12  ;;  %v1974_v59 = vrot.slane %v106_v19, %v1562_v12  ;;  %v1977_v63 = vrot.slane %v110_v50, %v1562_v12 }
  0x1f   :  { %v1980_v43 = vrot.slane %v114_v51, %v1562_v12  ;;  %v1983_v44 = vrot.slane %v118_v2, %v1562_v12  ;;  %v1986_v45 = vrot.slane %v122_v4, %v1562_v12  ;;  %v1989_v46 = vrot.slane %v126_v40, %v1562_v12 }
  0x20   :  { %v1992_v47 = vrot.slane %v130_v18, %v1562_v12  ;;  %v1995_v19 = vrot.slane %v134_v11, %v1562_v12  ;;  %v1998_v50 = vrot.slane %v138_v49, %v1562_v12  ;;  %v2001_v51 = vrot.slane %v142_v48, %v1562_v12 }
  0x21   :  { %v851_v2 = vcombine.low %v1728_v0, %v1734_v1  ;;  %v2006_v4 = vrot.slane %v146_v60, %v1562_v12  ;;  %v2009_v40 = vrot.slane %v150_v5, %v1562_v12  ;;  %v2012_v18 = vrot.slane %v154_v52, %v1562_v12 }
  0x22   :  { %v852_v11 = vcombine.low %v1740_v53, %v1746_v3  ;;  %v715_v49 = vcombine.low %v1953_v61, %v1956_v58  ;;  %v868_v0 = vcombine.low %v1752_v20, %v1758_v21  ;;  %v869_v60 = vcombine.low %v1764_v22, %v1770_v6 }
  0x23   :  { %v859_v48 = vrot.slane %v851_v2, %v1722_v55  ;;  %v716_v1 = vcombine.low %v1959_v10, %v1962_v57  ;;  %v885_v5 = vcombine.low %v1776_v23, %v1782_v24  ;;  %v886_v53 = vcombine.low %v1788_v25, %v1794_v7 }
  0x24   :  { %v866_v52 = vrot.slane %v852_v11, %v1722_v55  ;;  %v876_v58 = vrot.slane %v868_v0, %v1722_v55  ;;  %v883_v61 = vrot.slane %v869_v60, %v1722_v55  ;;  %v902_v3 = vcombine.low %v1800_v26, %v1806_v27 }
  0x25   :  { %v903_v20 = vcombine.low %v1812_v28, %v1818_v8  ;;  %v893_v57 = vrot.slane %v885_v5, %v1722_v55  ;;  %v900_v22 = vrot.slane %v886_v53, %v1722_v55  ;;  %v919_v6 = vcombine.low %v1824_v29, %v1830_v30  ;;  %v2542_v5 = vld [vmem:[#allocation7_spill] sm:$0xff] }
  0x26   :  { %v867_v21 = vcombine.low %v859_v48, %v866_v52  ;;  %v884_v23 = vcombine.low %v876_v58, %v883_v61  ;;  %v910_v24 = vrot.slane %v902_v3, %v1722_v55  ;;  %v920_v7 = vcombine.low %v1836_v31, %v1842_v9 }
  0x27   :  { %v917_v25 = vrot.slane %v903_v20, %v1722_v55  ;;  %v901_v26 = vcombine.low %v893_v57, %v900_v22  ;;  %v927_v27 = vrot.slane %v919_v6, %v1722_v55  ;;  %v936_v28 = vcombine.low %v1848_v32, %v1854_v33  ;;  %v2546_v20 = vld [vmem:[#allocation2_spill] sm:$0xff]  ;;  %v2547_v6 = vld [vmem:[#allocation3_spill] sm:$0xff] }
  0x28   :  { %v937_v8 = vcombine.low %v1860_v34, %v1866_v16  ;;  %v934_v29 = vrot.slane %v920_v7, %v1722_v55  ;;  %v953_v30 = vcombine.low %v1872_v35, %v1878_v36  ;;  %v954_v2 = vcombine.low %v1884_v37, %v1890_v17 }
  0x29   :  { %v918_v10 = vcombine.low %v910_v24, %v917_v25  ;;  %v944_v31 = vrot.slane %v936_v28, %v1722_v55  ;;  %v970_v11 = vcombine.low %v1896_v38, %v1902_v39  ;;  %v971_v32 = vcombine.low %v1908_v41, %v1914_v42 }
  0x2a   :  { %v951_v9 = vrot.slane %v937_v8, %v1722_v55  ;;  %v732_v33 = vcombine.low %v1965_v13, %v1968_v14  ;;  %v935_v34 = vcombine.low %v927_v27, %v934_v29  ;;  %v961_v16 = vrot.slane %v953_v30, %v1722_v55  ;;  %v2127_v29 = vld [vmem:[%s2503_s0 + $0x10] sm:$0xff] }
  0x2b   :  { %v968_v35 = vrot.slane %v954_v2, %v1722_v55  ;;  %v733_v36 = vcombine.low %v1971_v62, %v1974_v59  ;;  %v978_v17 = vrot.slane %v970_v11, %v1722_v55  ;;  %v985_v48 = vrot.slane %v971_v32, %v1722_v55 }
  0x2c   :  { %v952_v37 = vcombine.low %v944_v31, %v951_v9  ;;  %v749_v38 = vcombine.low %v1977_v63, %v1980_v43  ;;  %v750_v39 = vcombine.low %v1983_v44, %v1986_v45  ;;  %v766_v13 = vcombine.low %v1989_v46, %v1992_v47 }
  0x2d   :  { %v969_v14 = vcombine.low %v961_v16, %v968_v35  ;;  %v723_v41 = vrot.slane %v715_v49, %v1722_v55  ;;  %v730_v42 = vrot.slane %v716_v1, %v1722_v55  ;;  %v767_v62 = vcombine.low %v1995_v19, %v1998_v50  ;;  %v2539_v49 = vld [vmem:[#allocation6_spill] sm:$0xff]  ;;  %v2549_v35 = vld [vmem:[#allocation8_spill] sm:$0xff] }
  0x2e   :  { %v986_v59 = vcombine.low %v978_v17, %v985_v48  ;;  %v2535_v0 = vunpack.c.l.bf16 %v1658_v54  ;;  %v2536_v63 = vunpack.c.h.bf16 %v1658_v54  ;;  %v2537_v44 = vunpack.c.l.bf16 %v1666_v56 }
  0x2f   :  { %v2538_v46 = vunpack.c.h.bf16 %v1666_v56  ;;  %v2540_v52 = vunpack.c.l.bf16 %v2539_v49  ;;  %v2541_v19 = vunpack.c.h.bf16 %v2539_v49  ;;  %v2543_v53 = vunpack.c.l.bf16 %v2542_v5  ;;  %v2545_v56 = vld [vmem:[#allocation9_spill] sm:$0xff] }
  0x30   :  { %v1011_v60 = vmul.f32 %v867_v21, %v2535_v0  ;;  %v1012_v43 = vmul.f32 %v884_v23, %v2536_v63  ;;  %v1013_v45 = vmul.f32 %v901_v26, %v2537_v44  ;;  %v2544_v54 = vunpack.c.h.bf16 %v2542_v5  ;;  %v2548_v26 = vld [vmem:[#allocation10_spill] sm:$0xff] }
  0x31   :  { %v2086_v47 = vmul.f32 %v918_v10, %v2538_v46  ;;  %v2090_v1 = vmul.f32 %v935_v34, %v2540_v52  ;;  %v2094_v50 = vmul.f32 %v952_v37, %v2541_v19  ;;  %v2098_v58 = vmul.f32 %v969_v14, %v2543_v53  ;;  %v2554_v19 = vld [vmem:[#allocation5_spill] sm:$0xff] }
  0x32   :  { %v2102_v61 = vmul.f32 %v986_v59, %v2544_v54  ;;  %v158_v3 = vrot.slane %v2545_v56, %v1562_v12  ;;  %v162_v21 = vrot.slane %v2545_v56, %v2546_v20  ;;  %v740_v57 = vrot.slane %v732_v33, %v1722_v55 }
  0x33   :  { %v747_v22 = vrot.slane %v733_v36, %v1722_v55  ;;  %v166_v23 = vrot.slane %v2545_v56, %v2547_v6  ;;  %v170_v24 = vrot.slane %v2545_v56, %v1571_v15  ;;  %v783_v25 = vcombine.low %v2001_v51, %v2006_v4 }
  0x34   :  { %v784_v7 = vcombine.low %v2009_v40, %v2012_v18  ;;  %v174_v27 = vrot.slane %v2548_v26, %v1562_v12  ;;  %v178_v28 = vrot.slane %v2548_v26, %v2546_v20  ;;  %v757_v8 = vrot.slane %v749_v38, %v1722_v55 }
  0x35   :  { %v764_v10 = vrot.slane %v750_v39, %v1722_v55  ;;  %v182_v51 = vrot.slane %v2548_v26, %v2547_v6  ;;  %v731_v4 = vcombine.low %v723_v41, %v730_v42  ;;  %v774_v40 = vrot.slane %v766_v13, %v1722_v55  ;;  %v2550_v13 = vld [vmem:[#allocation4_spill] sm:$0xff] }
  0x36   :  { %v781_v18 = vrot.slane %v767_v62, %v1722_v55  ;;  %v186_v30 = vrot.slane %v2548_v26, %v1571_v15  ;;  %v478_v2 = vrot.slane %v158_v3, %v1562_v12  ;;  %v482_v31 = vrot.slane %v162_v21, %v1562_v12 }
  0x37   :  { %v748_v9 = vcombine.low %v740_v57, %v747_v22  ;;  %v486_v11 = vrot.slane %v166_v23, %v1562_v12  ;;  %v490_v32 = vrot.slane %v170_v24, %v1562_v12  ;;  %v791_v33 = vrot.slane %v783_v25, %v1722_v55 }
  0x38   :  { %v798_v34 = vrot.slane %v784_v7, %v1722_v55  ;;  %v23_v16 = vunpack.c.l.bf16 %v2127_v29  ;;  %v2143_v36 = vunpack.c.h.bf16 %v2549_v35  ;;  %v2146_v37 = vrot.slane %v174_v27, %v1562_v12 }
  0x39   :  { %v765_v17 = vcombine.low %v757_v8, %v764_v10  ;;  %v2149_v48 = vrot.slane %v178_v28, %v1562_v12  ;;  %v2152_v38 = vrot.slane %v182_v51, %v1562_v12  ;;  %v782_v39 = vcombine.low %v774_v40, %v781_v18 }
  0x3a   :  { %v2551_v14 = vunpack.c.l.bf16 %v2550_v13  ;;  %v2157_v42 = vrot.slane %v186_v30, %v1562_v12  ;;  %v800_v62 = vcombine.low %v478_v2, %v482_v31  ;;  %v2552_v59 = vunpack.c.h.bf16 %v2550_v13 }
  0x3b   :  { %v1171_v63 = vcombine.high %v1011_v60, %v1011_v60  ;;  %v799_v44 = vcombine.low %v791_v33, %v798_v34  ;;  %v801_v46 = vcombine.low %v486_v11, %v490_v32  ;;  %v2162_v52 = vrot.slane %v1011_v60, %v1722_v55 }
  0x3c   :  { %v1003_v41 = vmul.f32 %v731_v4, %v2551_v14  ;;  %v1004_v0 = vmul.f32 %v748_v9, %v2552_v59  ;;  %v2555_v5 = vunpack.c.l.bf16 %v2554_v19  ;;  %v1188_v56 = vcombine.high %v1012_v43, %v1012_v43 }
  0x3d   :  { %2553 = vst [vmem:[#allocation6_spill] sm:$0xff] %v2162_v52  ;;  %v2167_v54 = vrot.slane %v1171_v63, %v1722_v55  ;;  %v2170_v3 = vrot.slane %v1012_v43, %v1722_v55  ;;  %v2556_v21 = vunpack.c.h.bf16 %v2554_v19  ;;  %v1205_v23 = vcombine.high %v1013_v45, %v1013_v45 }
  0x3e   :  { %v1035_v49 = vcombine.high %v1003_v41, %v1003_v41  ;;  %v1005_v53 = vmul.f32 %v765_v17, %v2555_v5  ;;  %v1042_v22 = vrot.slane %v1003_v41, %v1722_v55  ;;  %v2176_v24 = vrot.slane %v1013_v45, %v1722_v55 }
  0x3f   :  { %v1006_v57 = vmul.f32 %v782_v39, %v2556_v21  ;;  %v1052_v60 = vcombine.high %v1004_v0, %v1004_v0  ;;  %v1059_v25 = vrot.slane %v1004_v0, %v1722_v55  ;;  %v2180_v7 = vrot.slane %v1188_v56, %v1722_v55 }
  0x40   :  { %v1222_v26 = vcombine.high %v2086_v47, %v2086_v47  ;;  %v1049_v43 = vrot.slane %v1035_v49, %v1722_v55  ;;  %v2186_v27 = vrot.slane %v1205_v23, %v1722_v55  ;;  %v2190_v28 = vrot.slane %v2086_v47, %v1722_v55 }
  0x41   :  { %v1239_v45 = vcombine.high %v2090_v1, %v2090_v1  ;;  %v1069_v8 = vcombine.high %v1005_v53, %v1005_v53  ;;  %v2199_v51 = vrot.slane %v2090_v1, %v1722_v55  ;;  %v1256_v4 = vcombine.high %v2094_v50, %v2094_v50 }
  0x42   :  { %v2195_v10 = vrot.slane %v1222_v26, %v1722_v55  ;;  %v1050_v40 = vcombine.high %v1042_v22, %v1042_v22  ;;  %v1076_v18 = vrot.slane %v1005_v53, %v1722_v55  ;;  %v2209_v30 = vrot.slane %v2094_v50, %v1722_v55 }
  0x43   :  { %v2205_v47 = vrot.slane %v1239_v45, %v1722_v55  ;;  %v1086_v2 = vcombine.high %v1006_v57, %v1006_v57  ;;  %v2212_v31 = vrot.slane %v1006_v57, %v1722_v55  ;;  %v2215_v1 = vrot.slane %v1256_v4, %v1722_v55 }
  0x44   :  { %v1273_v9 = vcombine.high %v2098_v58, %v2098_v58  ;;  %v1051_v11 = vcombine.high %v1049_v43, %v1049_v43  ;;  %v1066_v32 = vrot.slane %v1052_v60, %v1722_v55  ;;  %v2222_v33 = vrot.slane %v2098_v58, %v1722_v55 }
  0x45   :  { %v1290_v50 = vcombine.high %v2102_v61, %v2102_v61  ;;  %v1083_v34 = vrot.slane %v1069_v8, %v1722_v55  ;;  %v2232_v17 = vrot.slane %v2102_v61, %v1722_v55  ;;  %v1372_v39 = vsel %vm1371_vm0, %v1042_v22, 0.0 }
  0x46   :  { %v2228_v35 = vrot.slane %v1273_v9, %v1722_v55  ;;  %v2236_v13 = vrot.slane %v800_v62, %v1722_v55  ;;  %v1373_v14 = vsel %vm1371_vm0, %v1050_v40, 0.0  ;;  %v1375_v41 = vsel %vm1371_vm0, %v1049_v43, 0.0 }
  0x47   :  { %v2239_v58 = vrot.slane %v1290_v50, %v1722_v55  ;;  %v2244_v59 = vrot.slane %v801_v46, %v1722_v55  ;;  %v2246_v0 = vmul.f32 %v799_v44, %v23_v16  ;;  %v1067_v63 = vcombine.high %v1059_v25, %v1059_v25 }
  0x48   :  { %v1374_v61 = vadd.f32 %v1373_v14, %v1372_v39  ;;  %v1084_v49 = vcombine.high %v1076_v18, %v1076_v18  ;;  %v2249_v19 = vrot.slane %v1086_v2, %v1722_v55  ;;  %v1377_v5 = vsel %vm1371_vm0, %v1051_v11, 0.0 }
  0x49   :  { %v1068_v53 = vcombine.high %v1066_v32, %v1066_v32  ;;  %v1085_v56 = vcombine.high %v1083_v34, %v1083_v34  ;;  %v1186_v21 = vcombine.high %v2162_v52, %v2162_v52  ;;  %v1187_v16 = vcombine.high %v2167_v54, %v2167_v54 }
  0x4a   :  { %v1376_v46 = vadd.f32 %v1375_v41, %v1374_v61  ;;  %v1203_v44 = vcombine.high %v2170_v3, %v2170_v3  ;;  %v1220_v57 = vcombine.high %v2176_v24, %v2176_v24  ;;  %v1379_v22 = vsel %vm1371_vm0, %v1059_v25, 0.0 }
  0x4b   :  { %v1204_v23 = vcombine.high %v2180_v7, %v2180_v7  ;;  %v1221_v60 = vcombine.high %v2186_v27, %v2186_v27  ;;  %v1237_v26 = vcombine.high %v2190_v28, %v2190_v28  ;;  %v1238_v45 = vcombine.high %v2195_v10, %v2195_v10 }
  0x4c   :  { %v1378_v43 = vadd.f32 %v1377_v5, %v1376_v46  ;;  %v1254_v8 = vcombine.high %v2199_v51, %v2199_v51  ;;  %v1255_v4 = vcombine.high %v2205_v47, %v2205_v47  ;;  %v1381_v25 = vsel %vm1371_vm0, %v1067_v63, 0.0 }
  0x4d   :  { %v1271_v40 = vcombine.high %v2209_v30, %v2209_v30  ;;  %v1272_v2 = vcombine.high %v2215_v1, %v2215_v1  ;;  %v1288_v9 = vcombine.high %v2222_v33, %v2222_v33  ;;  %v1289_v50 = vcombine.high %v2228_v35, %v2228_v35 }
  0x4e   :  { %v1380_v11 = vadd.f32 %v1379_v22, %v1378_v43  ;;  %v1305_v39 = vcombine.high %v2232_v17, %v2232_v17  ;;  %v1306_v14 = vcombine.high %v2239_v58, %v2239_v58  ;;  %v1383_v41 = vsel %vm1371_vm0, %v1066_v32, 0.0 }
  0x4f   :  { %v1385_v61 = vsel %vm1371_vm0, %v1068_v53, 0.0  ;;  %v1387_v5 = vsel %vm1371_vm0, %v1076_v18, 0.0  ;;  %v1389_v46 = vsel %vm1371_vm0, %v1084_v49, 0.0  ;;  %v1391_v22 = vsel %vm1371_vm0, %v1083_v34, 0.0 }
  0x50   :  { %v1382_v63 = vadd.f32 %v1381_v25, %v1380_v11  ;;  %v1393_v43 = vsel %vm1371_vm0, %v1085_v56, 0.0  ;;  %v2295_v62 = vsel %vm1371_vm0, %v1186_v21, 0.0  ;;  %v2299_v52 = vsel %vm1371_vm0, %v2167_v54, 0.0 }
  0x51   :  { %v2302_v32 = vsel %vm1371_vm0, %v1187_v16, 0.0  ;;  %v2306_v18 = vsel %vm1371_vm0, %v2170_v3, 0.0  ;;  %v2309_v49 = vsel %vm1371_vm0, %v1203_v44, 0.0  ;;  %v2313_v34 = vsel %vm1371_vm0, %v2180_v7, 0.0 }
  0x52   :  { %v1384_v55 = vadd.f32 %v1383_v41, %v1382_v63  ;;  %v2316_v53 = vsel %vm1371_vm0, %v1204_v23, 0.0  ;;  %v2320_v54 = vsel %vm1371_vm0, %v2176_v24, 0.0  ;;  %v2323_v56 = vsel %vm1371_vm0, %v1220_v57, 0.0 }
  0x53   :  { %v2327_v3 = vsel %vm1371_vm0, %v2186_v27, 0.0  ;;  %v2330_v16 = vsel %vm1371_vm0, %v1221_v60, 0.0  ;;  %v2334_v7 = vsel %vm1371_vm0, %v2190_v28, 0.0  ;;  %v2337_v44 = vsel %vm1371_vm0, %v1237_v26, 0.0 }
  0x54   :  { %v1386_v21 = vadd.f32 %v1385_v61, %v1384_v55  ;;  %v2341_v24 = vsel %vm1371_vm0, %v2195_v10, 0.0  ;;  %v2344_v55 = vsel %vm1371_vm0, %v1238_v45, 0.0  ;;  %v2348_v27 = vsel %vm1371_vm0, %v2199_v51, 0.0 }
  0x55   :  { %v2351_v23 = vsel %vm1371_vm0, %v1254_v8, 0.0  ;;  %v2355_v28 = vsel %vm1371_vm0, %v2205_v47, 0.0  ;;  %v2358_v60 = vsel %vm1371_vm0, %v1255_v4, 0.0  ;;  %v2362_v10 = vsel %vm1371_vm0, %v2209_v30, 0.0 }
  0x56   :  { %v1388_v57 = vadd.f32 %v1387_v5, %v1386_v21  ;;  %v2365_v26 = vsel %vm1371_vm0, %v1271_v40, 0.0  ;;  %v2369_v51 = vsel %vm1371_vm0, %v2215_v1, 0.0  ;;  %v2372_v45 = vsel %vm1371_vm0, %v1272_v2, 0.0  ;;  %v14_v5 = vld [vmem:[%s2503_s0 + $0x18] sm:$0xff] }
  0x57   :  { %v2376_v47 = vsel %vm1371_vm0, %v2222_v33, 0.0  ;;  %v2379_v4 = vsel %vm1371_vm0, %v1288_v9, 0.0  ;;  %v2383_v30 = vsel %vm1371_vm0, %v2228_v35, 0.0  ;;  %v2386_v25 = vsel %vm1371_vm0, %v1289_v50, 0.0 }
  0x58   :  { %v1390_v8 = vadd.f32 %v1389_v46, %v1388_v57  ;;  %v2390_v1 = vsel %vm1371_vm0, %v2232_v17, 0.0  ;;  %v2393_v40 = vsel %vm1371_vm0, %v1305_v39, 0.0  ;;  %v2397_v33 = vsel %vm1371_vm0, %v2239_v58, 0.0 }
  0x59   :  { %v24_v2 = vunpack.c.h.bf16 %v2127_v29  ;;  %v190_v35 = vrot.slane %v2143_v36, %v1562_v12  ;;  %v2403_v11 = vsel %vm1371_vm0, %v1306_v14, 0.0  ;;  %v194_v17 = vrot.slane %v2143_v36, %v2546_v20 }
  0x5a   :  { %v1392_v9 = vadd.f32 %v1391_v22, %v1390_v8  ;;  %v198_v50 = vrot.slane %v2143_v36, %v2547_v6  ;;  %v202_v39 = vrot.slane %v2143_v36, %v1571_v15  ;;  %v1395_v58 = vsel %vm1371_vm0, %v2212_v31, 0.0  ;;  %v2557_v15 = vld [vmem:[#allocation11_spill] sm:$0xff] }
  0x5b   :  { %v816_v29 = vcombine.low %v2236_v13, %v2244_v59  ;;  %v817_v41 = vcombine.low %v2146_v37, %v2149_v48  ;;  %v818_v14 = vcombine.low %v2152_v38, %v2157_v42  ;;  %v1102_v20 = vcombine.high %v2249_v19, %v2249_v19 }
  0x5c   :  { %v1394_v63 = vadd.f32 %v1393_v43, %v1392_v9  ;;  %v1103_v6 = vcombine.high %v2246_v0, %v2246_v0  ;;  %v1110_v36 = vrot.slane %v2246_v0, %v2557_v15  ;;  %v2558_v61 = vcombine.high %v2212_v31, %v2212_v31 }
  0x5d   :  { %v510_v37 = vrot.slane %v190_v35, %v1562_v12  ;;  %v514_v48 = vrot.slane %v194_v17, %v1562_v12  ;;  %v518_v38 = vrot.slane %v198_v50, %v1562_v12  ;;  %v1399_v42 = vsel %vm1371_vm0, %v2249_v19, 0.0 }
  0x5e   :  { %v1397_v13 = vsel %vm1371_vm0, %v2558_v61, 0.0  ;;  %v1396_v59 = vadd.f32 %v1395_v58, %v1394_v63  ;;  %v522_v0 = vrot.slane %v202_v39, %v1562_v12  ;;  %v825_v31 = vrot.slane %v817_v41, %v2557_v15 }
  0x5f   :  { %v832_v46 = vrot.slane %v818_v14, %v2557_v15  ;;  %v1008_v43 = vmul.f32 %v816_v29, %v24_v2  ;;  %v1117_v21 = vrot.slane %v1103_v6, %v2557_v15  ;;  %v1118_v57 = vcombine.high %v1110_v36, %v1110_v36 }
  0x60   :  { %v1398_v22 = vadd.f32 %v1397_v13, %v1396_v59  ;;  %v1401_v8 = vsel %vm1371_vm0, %v1102_v20, 0.0  ;;  %v25_v9 = vunpack.c.l.bf16 %v14_v5  ;;  %v1403_v19 = vsel %vm1371_vm0, %v1110_v36, 0.0 }
  0x61   :  { %v833_v17 = vcombine.low %v825_v31, %v832_v46  ;;  %v834_v50 = vcombine.low %v510_v37, %v514_v48  ;;  %v835_v58 = vcombine.low %v518_v38, %v522_v0  ;;  %v1119_v12 = vcombine.high %v1117_v21, %v1117_v21 }
  0x62   :  { %v1400_v35 = vadd.f32 %v1399_v42, %v1398_v22  ;;  %v1120_v39 = vcombine.high %v1008_v43, %v1008_v43  ;;  %v1127_v41 = vrot.slane %v1008_v43, %v2557_v15  ;;  %v1405_v14 = vsel %vm1371_vm0, %v1118_v57, 0.0 }
  0x63   :  { %v1407_v29 = vsel %vm1371_vm0, %v1117_v21, 0.0  ;;  %v842_v6 = vrot.slane %v834_v50, %v2557_v15  ;;  %v849_v20 = vrot.slane %v835_v58, %v2557_v15  ;;  %v1009_v13 = vmul.f32 %v833_v17, %v25_v9 }
  0x64   :  { %v1402_v63 = vadd.f32 %v1401_v8, %v1400_v35  ;;  %v1134_v36 = vrot.slane %v1120_v39, %v2557_v15  ;;  %v1135_v59 = vcombine.high %v1127_v41, %v1127_v41  ;;  %v1409_v37 = vsel %vm1371_vm0, %v1119_v12, 0.0 }
  0x65   :  { %v1411_v38 = vsel %vm1371_vm0, %v1127_v41, 0.0  ;;  %v26_v42 = vunpack.c.h.bf16 %v14_v5  ;;  %v850_v0 = vcombine.low %v842_v6, %v849_v20  ;;  %v1137_v22 = vcombine.high %v1009_v13, %v1009_v13 }
  0x66   :  { %v1404_v2 = vadd.f32 %v1403_v19, %v1402_v63  ;;  %v1136_v46 = vcombine.high %v1134_v36, %v1134_v36  ;;  %v1144_v43 = vrot.slane %v1009_v13, %v2557_v15  ;;  %v1413_v21 = vsel %vm1371_vm0, %v1135_v59, 0.0 }
  0x67   :  { %v1415_v8 = vsel %vm1371_vm0, %v1134_v36, 0.0  ;;  %v1010_v9 = vmul.f32 %v850_v0, %v26_v42  ;;  %v1151_v19 = vrot.slane %v1137_v22, %v2557_v15 }
  0x68   :  { %v1406_v61 = vadd.f32 %v1405_v14, %v1404_v2  ;;  %v1152_v17 = vcombine.high %v1144_v43, %v1144_v43  ;;  %v1417_v50 = vsel %vm1371_vm0, %v1136_v46, 0.0  ;;  %v1419_v5 = vsel %vm1371_vm0, %v1144_v43, 0.0  ;;  %v2559_v43 = vld [vmem:[#allocation6_spill] sm:$0xff] }
  0x69   :  { %v1153_v12 = vcombine.high %v1151_v19, %v1151_v19  ;;  %v1154_v39 = vcombine.high %v1010_v9, %v1010_v9  ;;  %v1161_v41 = vrot.slane %v1010_v9, %v2557_v15 }
  0x6a   :  { %v1408_v48 = vadd.f32 %v1407_v29, %v1406_v61  ;;  %v1421_v14 = vsel %vm1371_vm0, %v1152_v17, 0.0  ;;  %v1423_v29 = vsel %vm1371_vm0, %v1151_v19, 0.0 }
  0x6b   :  { %v1168_v20 = vrot.slane %v1154_v39, %v2557_v15  ;;  %v1169_v61 = vcombine.high %v1161_v41, %v1161_v41  ;;  %v1425_v13 = vsel %vm1371_vm0, %v1153_v12, 0.0  ;;  %v1427_v59 = vsel %vm1371_vm0, %v1161_v41, 0.0 }
  0x6c   :  { %v1410_v31 = vadd.f32 %v1409_v37, %v1408_v48  ;;  %v1435_v15 = vsel %vm1371_vm0, %v2559_v43, 0.0 }
  0x6d   :  { %v1170_v48 = vcombine.high %v1168_v20, %v1168_v20  ;;  %v1431_v0 = vsel %vm1371_vm0, %v1168_v20, 0.0 }
  0x6e   :  { %v1412_v57 = vadd.f32 %v1411_v38, %v1410_v31  ;;  %v1429_v38 = vsel %vm1371_vm0, %v1169_v61, 0.0 }
  0x6f   :  { %v1433_v46 = vsel %vm1371_vm0, %v1170_v48, 0.0 }
  0x70   :  { %v1414_v35 = vadd.f32 %v1413_v21, %v1412_v57 }
  0x72   :  { %v1416_v58 = vadd.f32 %v1415_v8, %v1414_v35 }
  0x74   :  { %v1418_v63 = vadd.f32 %v1417_v50, %v1416_v58 }
  0x76   :  { %v1420_v2 = vadd.f32 %v1419_v5, %v1418_v63 }
  0x78   :  { %v1422_v6 = vadd.f32 %v1421_v14, %v1420_v2 }
  0x7a   :  { %v1424_v36 = vadd.f32 %v1423_v29, %v1422_v6 }
  0x7c   :  { %v1426_v37 = vadd.f32 %v1425_v13, %v1424_v36 }
  0x7e   :  { %v1428_v42 = vadd.f32 %v1427_v59, %v1426_v37 }
  0x80   :  { %v1430_v31 = vadd.f32 %v1429_v38, %v1428_v42 }
  0x82   :  { %v1432_v22 = vadd.f32 %v1431_v0, %v1430_v31 }
  0x84   :  { %v1434_v21 = vadd.f32 %v1433_v46, %v1432_v22 }
  0x86   :  { %v1436_v57 = vadd.f32 %v1435_v15, %v1434_v21 }
  0x88   :  { %v1438_v8 = vadd.f32 %v2295_v62, %v1436_v57 }
  0x8a   :  { %v1440_v35 = vadd.f32 %v2299_v52, %v1438_v8 }
  0x8c   :  { %v1442_v9 = vadd.f32 %v2302_v32, %v1440_v35 }
  0x8e   :  { %v1444_v19 = vadd.f32 %v2306_v18, %v1442_v9 }
  0x90   :  { %v1446_v17 = vadd.f32 %v2309_v49, %v1444_v19 }
  0x92   :  { %v1448_v50 = vadd.f32 %v2313_v34, %v1446_v17 }
  0x94   :  { %v1450_v58 = vadd.f32 %v2316_v53, %v1448_v50 }
  0x96   :  { %v1452_v5 = vadd.f32 %v2320_v54, %v1450_v58 }
  0x98   :  { %v1454_v63 = vadd.f32 %v2323_v56, %v1452_v5 }
  0x9a   :  { %v1456_v12 = vadd.f32 %v2327_v3, %v1454_v63 }
  0x9c   :  { %v1458_v62 = vadd.f32 %v2330_v16, %v1456_v12 }
  0x9e   :  { %v1460_v52 = vadd.f32 %v2334_v7, %v1458_v62 }
  0xa0   :  { %v1462_v32 = vadd.f32 %v2337_v44, %v1460_v52 }
  0xa2   :  { %v1464_v18 = vadd.f32 %v2341_v24, %v1462_v32 }
  0xa4   :  { %v1466_v49 = vadd.f32 %v2344_v55, %v1464_v18 }
  0xa6   :  { %v1468_v34 = vadd.f32 %v2348_v27, %v1466_v49 }
  0xa8   :  { %v1470_v53 = vadd.f32 %v2351_v23, %v1468_v34 }
  0xaa   :  { %v1472_v54 = vadd.f32 %v2355_v28, %v1470_v53 }
  0xac   :  { %v1474_v56 = vadd.f32 %v2358_v60, %v1472_v54 }
  0xae   :  { %v1476_v3 = vadd.f32 %v2362_v10, %v1474_v56 }
  0xb0   :  { %v1478_v16 = vadd.f32 %v2365_v26, %v1476_v3 }
  0xb2   :  { %v1480_v7 = vadd.f32 %v2369_v51, %v1478_v16 }
  0xb4   :  { %v1482_v44 = vadd.f32 %v2372_v45, %v1480_v7 }
  0xb6   :  { %v1484_v24 = vadd.f32 %v2376_v47, %v1482_v44 }
  0xb8   :  { %v1486_v55 = vadd.f32 %v2379_v4, %v1484_v24 }
  0xba   :  { %v1488_v27 = vadd.f32 %v2383_v30, %v1486_v55 }
  0xbc   :  { %v1490_v23 = vadd.f32 %v2386_v25, %v1488_v27 }
  0xbe   :  { %v1492_v28 = vadd.f32 %v2390_v1, %v1490_v23 }
  0xc0   :  { %v1494_v60 = vadd.f32 %v2393_v40, %v1492_v28 }
  0xc2   :  { %v1496_v10 = vadd.f32 %v2397_v33, %v1494_v60 }
  0xc4   :  { %v1498_v26 = vadd.f32 %v2403_v11, %v1496_v10 }
  0xc6   :  { %1499 = vadd.xlane.f32.xlu0 %v1498_v26 }
 0x153   :  { %v1500_v51 = vpop.xlane.xlu0 %1499 }
 0x154   :  { %v1501_v39 = vand.u32 2147483647, %v1500_v51  ;;  %vm1505_vm1 = vcmp.ge.f32.partialorder %v1500_v51, 0.0 }
 0x156   :  { %v1502_v45 = vsub.f32 0.0, %v1501_v39 }
 0x158   :  { %v1503_v41 = vmul.f32 1.442695, %v1502_v45 }
 0x15a   :  { %1517 = vpow2.f32 %v1503_v41 }
 0x164   :  { %v1518_v47 = vpop.eup %1517 }
 0x165   :  { %v1507_v4 = vadd.f32 1.0, %v1518_v47  ;;  %v1506_v25 = vsel %vm1505_vm1, 1.0, %v1518_v47 }
 0x167   :  { %1519 = vrcp.f32 %v1507_v4 }
 0x171   :  { %v1520_v30 = vpop.eup %1519 }
 0x172   :  { %v1509_v1 = vmul.f32 %v1520_v30, %v1506_v25 }
 0x174   :  { %1511 = vst.msk [vmem:[%s2504_s2] sm:$0x3] %vm1510_vm2, %v1509_v1 }

</bundles_post_ra>
